<compile_context>
chip_gen: v7x
topology: tpu7x:2x2x1
jax: 0.10.0
libtpu: 0.0.40
codegen_flags: <defaults>
</compile_context>

<pallas_src>
import math
import functools

import numpy as np
import jax
import jax.numpy as jnp
from jax.experimental import pallas as pl
from jax.experimental.pallas import tpu as pltpu

_PMAX = 3  # largest conv padding (the 7x7 conv)


# ----------------------------- trace-time constants -----------------------------

def _pool_out(n):
    # AvgPool2d(kernel=3, stride=2, padding=0, ceil_mode=True) output size.
    return (n - 3 + 1) // 2 + 1


def _avgpool_w_matrix(W, Wp):
    """(Wp, W): stride-2, size-3 average pooling along W; divisor clamped to the
    valid window size (PyTorch ceil_mode with padding=0 semantics)."""
    A = np.zeros((Wp, W), np.float32)
    for ow in range(Wp):
        j0 = 2 * ow
        j1 = min(j0 + 3, W)
        A[ow, j0:j1] = 1.0 / (j1 - j0)
    return A


def _bilinear_matrix(n_in, n_out):
    """(n_out, n_in): reproduces F.interpolate(scale_factor=2, mode='bilinear',
    align_corners=False) along one axis."""
    U = np.zeros((n_out, n_in), np.float32)
    scale = n_in / n_out
    for o in range(n_out):
        src = max((o + 0.5) * scale - 0.5, 0.0)
        i0 = min(int(np.floor(src)), n_in - 1)
        i1 = min(i0 + 1, n_in - 1)
        lam = src - i0
        U[o, i0] += 1.0 - lam
        U[o, i1] += lam
    return U


# ----------------------------------- kernel -----------------------------------

def _crn_kernel(x_ref, aw_ref, w3_ref, b3_ref, w5_ref, b5_ref, w7_ref, b7_ref,
                uh_ref, uwt_ref, o_ref, pflat_ref, *, H, Hp, Wp):
    Wpad = Wp + 2 * _PMAX
    F = Hp * Wpad  # flattened (row-major, padded-W) spatial extent of the conv output

    # ---- AvgPool2d(k=3, s=2, ceil_mode=True) -> flattened zero-padded map ----
    pflat_ref[...] = jnp.zeros_like(pflat_ref)
    aw = aw_ref[...]                                           # (Wp, W), holds 1/kw
    for oh in range(Hp):
        kh = min(3, H - 2 * oh)                                # valid rows in this window
        rowsum = x_ref[0, 2 * oh, :, :].astype(jnp.float32)    # (W, Cin)
        for d in range(1, kh):
            rowsum = rowsum + x_ref[0, 2 * oh + d, :, :].astype(jnp.float32)
        pooled = jnp.dot(aw, rowsum, preferred_element_type=jnp.float32) * (1.0 / kh)
        r0 = (oh + _PMAX) * Wpad + _PMAX
        pflat_ref[r0:r0 + Wp, :] = pooled                      # (Wp, Cin)

    # ---- three same-padding convs + ReLU, then acc_w (all-ones 1x1) = channel sum ----
    gsum = jnp.zeros((F, 1), jnp.float32)
    for w_ref, b_ref, K in ((w3_ref, b3_ref, 3), (w5_ref, b5_ref, 5), (w7_ref, b7_ref, 7)):
        P = (K - 1) // 2
        cout = w_ref.shape[-1]
        acc = jnp.zeros((F, cout), jnp.float32)
        for dy in range(K):
            for dx in range(K):
                base = (dy - P + _PMAX) * Wpad + (dx - P + _PMAX)
                taps = pflat_ref[base:base + F, :]             # (F, Cin) contiguous slice
                acc = acc + jnp.dot(taps, w_ref[dy * K + dx],
                                    preferred_element_type=jnp.float32)
        g = jnp.maximum(acc + b_ref[...], 0.0)                 # ReLU(conv + bias)
        gsum = gsum + jnp.sum(g, axis=1, keepdims=True)        # acc_w weight == 1

    wmap = jnp.maximum(gsum, 0.0)                              # acc_w bias == 0, then ReLU

    # ---- bilinear x2 upsample via two constant resampling matrices ----
    # UH / UWT also drop the padded / junk columns of the flattened layout.
    o = jnp.dot(uh_ref[...], wmap * uwt_ref[...], preferred_element_type=jnp.float32)
    o_ref[0, :, :] = o.astype(o_ref.dtype)


# ---------------------------------- wrapper ----------------------------------

def init_crn_params(key, dim):
    """Conv filters (xavier-normal, zero bias), matching CRNModule._initialize_weights.
    acc_w (weight=1, bias=0, frozen) is implemented as an in-kernel channel sum."""
    def xavier(k, kh, kw, cin, cout):
        std = math.sqrt(2.0 / (cin * kh * kw + cout * kh * kw))
        return std * jax.random.normal(k, (kh, kw, cin, cout), jnp.float32)  # HWIO
    k3, k5, k7 = jax.random.split(key, 3)
    return {
        "w3": xavier(k3, 3, 3, dim, 32), "b3": jnp.zeros((32,), jnp.float32),
        "w5": xavier(k5, 5, 5, dim, 32), "b5": jnp.zeros((32,), jnp.float32),
        "w7": xavier(k7, 7, 7, dim, 20), "b7": jnp.zeros((20,), jnp.float32),
    }


def crn_forward(x, params):
    """x: (N, C, H, W) -> mask: (N, 1, 2*Hp, 2*Wp), matching CRNModule.forward."""
    N, C, H, W = x.shape
    Hp, Wp = _pool_out(H), _pool_out(W)
    Wpad = Wp + 2 * _PMAX
    F = Hp * Wpad
    R = (Hp + 2 * _PMAX) * Wpad + 2 * _PMAX      # padded flattened rows (+ slop for max shift)
    Ho, Wo = 2 * Hp, 2 * Wp

    # trace-time constant matrices
    aw = jnp.asarray(_avgpool_w_matrix(W, Wp))                       # (Wp, W)
    uh = _bilinear_matrix(Hp, Ho)                                    # (Ho, Hp)
    uw = _bilinear_matrix(Wp, Wo)                                    # (Wo, Wp)
    hrow = np.arange(F) // Wpad
    wcol = np.arange(F) % Wpad
    UH = jnp.asarray(uh[:, hrow])                                    # (Ho, F)
    UWT = jnp.asarray(np.where((wcol < Wp)[:, None],
                               uw.T[np.minimum(wcol, Wp - 1)],
                               0.0).astype(np.float32))              # (F, Wo)

    # channel-last on chip: C maps to the lane axis of the conv matmuls.
    x_nhwc = jnp.transpose(x, (0, 2, 3, 1))
    w3 = params["w3"].reshape(9, C, 32)
    w5 = params["w5"].reshape(25, C, 32)
    w7 = params["w7"].reshape(49, C, 20)
    b3 = params["b3"].reshape(1, 32)
    b5 = params["b5"].reshape(1, 32)
    b7 = params["b7"].reshape(1, 20)

    kernel = functools.partial(_crn_kernel, H=H, Hp=Hp, Wp=Wp)

    def const_spec(*shape):
        return pl.BlockSpec(shape, lambda n: (0,) * len(shape))

    out = pl.pallas_call(
        kernel,
        out_shape=jax.ShapeDtypeStruct((N, Ho, Wo), jnp.float32),
        grid=(N,),
        in_specs=[
            pl.BlockSpec((1, H, W, C), lambda n: (n, 0, 0, 0)),
            const_spec(Wp, W),
            const_spec(9, C, 32), const_spec(1, 32),
            const_spec(25, C, 32), const_spec(1, 32),
            const_spec(49, C, 20), const_spec(1, 20),
            const_spec(Ho, F), const_spec(F, Wo),
        ],
        out_specs=pl.BlockSpec((1, Ho, Wo), lambda n: (n, 0, 0)),
        scratch_shapes=[pltpu.VMEM((R, C), jnp.float32)],
        compiler_params=pltpu.CompilerParams(dimension_semantics=("parallel",)),
    )(x_nhwc, aw, w3, b3, w5, b5, w7, b7, UH, UWT)

    return out.reshape(N, 1, Ho, Wo)


# ------------------------------ numpy reference ------------------------------

def _crn_reference(x, params):
    """Direct numpy re-implementation of CRNModule.forward (validation only)."""
    x = np.asarray(x, np.float64)
    N, C, H, W = x.shape
    Hp, Wp = _pool_out(H), _pool_out(W)

    # AvgPool2d(3, stride=2, padding=0, ceil_mode=True)
    xp = np.zeros((N, C, Hp, Wp))
    for oh in range(Hp):
        for ow in range(Wp):
            h1, w1 = min(2 * oh + 3, H), min(2 * ow + 3, W)
            xp[:, :, oh, ow] = x[:, :, 2 * oh:h1, 2 * ow:w1].mean(axis=(2, 3))

    def conv(w, b):
        w = np.asarray(w, np.float64)          # (K, K, Cin, Cout)
        K, cout = w.shape[0], w.shape[-1]
        P = (K - 1) // 2
        pad = np.zeros((N, C, Hp + 2 * P, Wp + 2 * P))
        pad[:, :, P:P + Hp, P:P + Wp] = xp
        out = np.zeros((N, cout, Hp, Wp))
        for dy in range(K):
            for dx in range(K):
                out += np.einsum('nchw,co->nohw',
                                 pad[:, :, dy:dy + Hp, dx:dx + Wp], w[dy, dx])
        return out + np.asarray(b, np.float64).reshape(1, cout, 1, 1)

    g = np.concatenate([conv(params["w3"], params["b3"]),
                        conv(params["w5"], params["b5"]),
                        conv(params["w7"], params["b7"])], axis=1)
    g = np.maximum(g, 0.0)
    wm = np.maximum(g.sum(axis=1, keepdims=True), 0.0)        # acc_w (weight=1) + ReLU

    Uh = _bilinear_matrix(Hp, 2 * Hp).astype(np.float64)
    Uw = _bilinear_matrix(Wp, 2 * Wp).astype(np.float64)
    return np.einsum('oh,nchw,pw->ncop', Uh, wm, Uw)


if __name__ == "__main__":
    key = jax.random.PRNGKey(0)
    kx, kp = jax.random.split(key)

    N, dim, H, W = 2, 4, 16, 16
    x = jax.random.normal(kx, (N, dim, H, W), dtype=jnp.float32)
    params = init_crn_params(kp, dim)

    mask = crn_forward(x, params)
    jax.block_until_ready(mask)

    assert mask.shape == (N, 1, 16, 16), mask.shape
    assert bool(jnp.all(jnp.isfinite(mask)))

    ref = _crn_reference(np.asarray(x), {k: np.asarray(v) for k, v in params.items()})
    err = float(np.max(np.abs(np.asarray(mask) - ref)))
    assert np.allclose(np.asarray(mask), ref, rtol=1e-3, atol=1e-3), err

    print("KERNEL_OK")
</pallas_src>

<mosaic_0001>
module attributes {stable_mosaic.version = 11 : i64} {
  func.func @_crn_kernel(%arg0: i32, %arg1: memref<1x16x16x4xf32, #tpu.memory_space<vmem>>, %arg2: memref<8x16xf32, #tpu.memory_space<vmem>>, %arg3: memref<9x4x32xf32, #tpu.memory_space<vmem>>, %arg4: memref<1x32xf32, #tpu.memory_space<vmem>>, %arg5: memref<25x4x32xf32, #tpu.memory_space<vmem>>, %arg6: memref<1x32xf32, #tpu.memory_space<vmem>>, %arg7: memref<49x4x20xf32, #tpu.memory_space<vmem>>, %arg8: memref<1x20xf32, #tpu.memory_space<vmem>>, %arg9: memref<16x112xf32, #tpu.memory_space<vmem>>, %arg10: memref<112x16xf32, #tpu.memory_space<vmem>>, %arg11: memref<1x16x16xf32, #tpu.memory_space<vmem>>, %arg12: memref<202x4xf32, #tpu.memory_space<vmem>>) attributes {dimension_semantics = [#tpu.dimension_semantics<parallel>], iteration_bounds = array<i64: 2>, scalar_prefetch = 0 : i64, scratch_operands = 1 : i64, tpu.core_type = #tpu.core_type<tc>, window_params = [{transform_indices = @transform_0, window_bounds = array<i64: 1, 16, 16, 4>}, {pipeline_mode = #tpu.pipeline_mode<synchronous>, transform_indices = @transform_1, window_bounds = array<i64: 8, 16>}, {pipeline_mode = #tpu.pipeline_mode<synchronous>, transform_indices = @transform_2, window_bounds = array<i64: 9, 4, 32>}, {pipeline_mode = #tpu.pipeline_mode<synchronous>, transform_indices = @transform_3, window_bounds = array<i64: 1, 32>}, {pipeline_mode = #tpu.pipeline_mode<synchronous>, transform_indices = @transform_4, window_bounds = array<i64: 25, 4, 32>}, {pipeline_mode = #tpu.pipeline_mode<synchronous>, transform_indices = @transform_5, window_bounds = array<i64: 1, 32>}, {pipeline_mode = #tpu.pipeline_mode<synchronous>, transform_indices = @transform_6, window_bounds = array<i64: 49, 4, 20>}, {pipeline_mode = #tpu.pipeline_mode<synchronous>, transform_indices = @transform_7, window_bounds = array<i64: 1, 20>}, {pipeline_mode = #tpu.pipeline_mode<synchronous>, transform_indices = @transform_8, window_bounds = array<i64: 16, 112>}, {pipeline_mode = #tpu.pipeline_mode<synchronous>, transform_indices = @transform_9, window_bounds = array<i64: 112, 16>}, {transform_indices = @transform_10, window_bounds = array<i64: 1, 16, 16>}]} {
    %cst = arith.constant 0.000000e+00 : f32
    %0 = vector.broadcast %cst : f32 to vector<202x4xf32>
    %c0 = arith.constant 0 : index
    %c0_0 = arith.constant 0 : index
    %1 = vector.load %arg12[%c0, %c0_0] : memref<202x4xf32, #tpu.memory_space<vmem>>, vector<202x4xf32>
    tpu.vector_store %arg12[%c0, %c0_0], %0 {strides = array<i32>} : memref<202x4xf32, #tpu.memory_space<vmem>>, vector<202x4xf32>,
    %c0_1 = arith.constant 0 : index
    %c0_2 = arith.constant 0 : index
    %2 = vector.load %arg2[%c0_1, %c0_2] : memref<8x16xf32, #tpu.memory_space<vmem>>, vector<8x16xf32>
    %c0_3 = arith.constant 0 : index
    %c0_4 = arith.constant 0 : index
    %c0_5 = arith.constant 0 : index
    %c0_6 = arith.constant 0 : index
    %3 = vector.load %arg1[%c0_3, %c0_4, %c0_5, %c0_6] : memref<1x16x16x4xf32, #tpu.memory_space<vmem>>, vector<1x1x16x4xf32>
    %4 = vector.shape_cast %3 : vector<1x1x16x4xf32> to vector<16x4xf32>
    %c0_7 = arith.constant 0 : index
    %c1 = arith.constant 1 : index
    %c0_8 = arith.constant 0 : index
    %c0_9 = arith.constant 0 : index
    %5 = vector.load %arg1[%c0_7, %c1, %c0_8, %c0_9] : memref<1x16x16x4xf32, #tpu.memory_space<vmem>>, vector<1x1x16x4xf32>
    %6 = vector.shape_cast %5 : vector<1x1x16x4xf32> to vector<16x4xf32>
    %7 = arith.addf %4, %6 : vector<16x4xf32>
    %c0_10 = arith.constant 0 : index
    %c2 = arith.constant 2 : index
    %c0_11 = arith.constant 0 : index
    %c0_12 = arith.constant 0 : index
    %8 = vector.load %arg1[%c0_10, %c2, %c0_11, %c0_12] : memref<1x16x16x4xf32, #tpu.memory_space<vmem>>, vector<1x1x16x4xf32>
    %9 = vector.shape_cast %8 : vector<1x1x16x4xf32> to vector<16x4xf32>
    %10 = arith.addf %7, %9 : vector<16x4xf32>
    %cst_13 = arith.constant dense<0.000000e+00> : vector<8x4xf32>
    %11 = tpu.matmul %2, %10, %cst_13 {dimension_numbers = #tpu.dot_dimension_numbers<[1], [0], [0], [1], [0, 0, 1, 1], [], []>} : vector<8x16xf32>, vector<16x4xf32>, vector<8x4xf32> -> vector<8x4xf32>
    %cst_14 = arith.constant 0.333333343 : f32
    %12 = vector.broadcast %cst_14 : f32 to vector<8x4xf32>
    %13 = arith.mulf %11, %12 : vector<8x4xf32>
    %c45 = arith.constant 45 : index
    %c0_15 = arith.constant 0 : index
    %14 = vector.load %arg12[%c45, %c0_15] : memref<202x4xf32, #tpu.memory_space<vmem>>, vector<8x4xf32>
    tpu.vector_store %arg12[%c45, %c0_15], %13 {strides = array<i32>} : memref<202x4xf32, #tpu.memory_space<vmem>>, vector<8x4xf32>,
    %c0_16 = arith.constant 0 : index
    %c2_17 = arith.constant 2 : index
    %c0_18 = arith.constant 0 : index
    %c0_19 = arith.constant 0 : index
    %15 = vector.load %arg1[%c0_16, %c2_17, %c0_18, %c0_19] : memref<1x16x16x4xf32, #tpu.memory_space<vmem>>, vector<1x1x16x4xf32>
    %16 = vector.shape_cast %15 : vector<1x1x16x4xf32> to vector<16x4xf32>
    %c0_20 = arith.constant 0 : index
    %c3 = arith.constant 3 : index
    %c0_21 = arith.constant 0 : index
    %c0_22 = arith.constant 0 : index
    %17 = vector.load %arg1[%c0_20, %c3, %c0_21, %c0_22] : memref<1x16x16x4xf32, #tpu.memory_space<vmem>>, vector<1x1x16x4xf32>
    %18 = vector.shape_cast %17 : vector<1x1x16x4xf32> to vector<16x4xf32>
    %19 = arith.addf %16, %18 : vector<16x4xf32>
    %c0_23 = arith.constant 0 : index
    %c4 = arith.constant 4 : index
    %c0_24 = arith.constant 0 : index
    %c0_25 = arith.constant 0 : index
    %20 = vector.load %arg1[%c0_23, %c4, %c0_24, %c0_25] : memref<1x16x16x4xf32, #tpu.memory_space<vmem>>, vector<1x1x16x4xf32>
    %21 = vector.shape_cast %20 : vector<1x1x16x4xf32> to vector<16x4xf32>
    %22 = arith.addf %19, %21 : vector<16x4xf32>
    %cst_26 = arith.constant dense<0.000000e+00> : vector<8x4xf32>
    %23 = tpu.matmul %2, %22, %cst_26 {dimension_numbers = #tpu.dot_dimension_numbers<[1], [0], [0], [1], [0, 0, 1, 1], [], []>} : vector<8x16xf32>, vector<16x4xf32>, vector<8x4xf32> -> vector<8x4xf32>
    %cst_27 = arith.constant 0.333333343 : f32
    %24 = vector.broadcast %cst_27 : f32 to vector<8x4xf32>
    %25 = arith.mulf %23, %24 : vector<8x4xf32>
    %c59 = arith.constant 59 : index
    %c0_28 = arith.constant 0 : index
    %26 = vector.load %arg12[%c59, %c0_28] : memref<202x4xf32, #tpu.memory_space<vmem>>, vector<8x4xf32>
    tpu.vector_store %arg12[%c59, %c0_28], %25 {strides = array<i32>} : memref<202x4xf32, #tpu.memory_space<vmem>>, vector<8x4xf32>,
    %c0_29 = arith.constant 0 : index
    %c4_30 = arith.constant 4 : index
    %c0_31 = arith.constant 0 : index
    %c0_32 = arith.constant 0 : index
    %27 = vector.load %arg1[%c0_29, %c4_30, %c0_31, %c0_32] : memref<1x16x16x4xf32, #tpu.memory_space<vmem>>, vector<1x1x16x4xf32>
    %28 = vector.shape_cast %27 : vector<1x1x16x4xf32> to vector<16x4xf32>
    %c0_33 = arith.constant 0 : index
    %c5 = arith.constant 5 : index
    %c0_34 = arith.constant 0 : index
    %c0_35 = arith.constant 0 : index
    %29 = vector.load %arg1[%c0_33, %c5, %c0_34, %c0_35] : memref<1x16x16x4xf32, #tpu.memory_space<vmem>>, vector<1x1x16x4xf32>
    %30 = vector.shape_cast %29 : vector<1x1x16x4xf32> to vector<16x4xf32>
    %31 = arith.addf %28, %30 : vector<16x4xf32>
    %c0_36 = arith.constant 0 : index
    %c6 = arith.constant 6 : index
    %c0_37 = arith.constant 0 : index
    %c0_38 = arith.constant 0 : index
    %32 = vector.load %arg1[%c0_36, %c6, %c0_37, %c0_38] : memref<1x16x16x4xf32, #tpu.memory_space<vmem>>, vector<1x1x16x4xf32>
    %33 = vector.shape_cast %32 : vector<1x1x16x4xf32> to vector<16x4xf32>
    %34 = arith.addf %31, %33 : vector<16x4xf32>
    %cst_39 = arith.constant dense<0.000000e+00> : vector<8x4xf32>
    %35 = tpu.matmul %2, %34, %cst_39 {dimension_numbers = #tpu.dot_dimension_numbers<[1], [0], [0], [1], [0, 0, 1, 1], [], []>} : vector<8x16xf32>, vector<16x4xf32>, vector<8x4xf32> -> vector<8x4xf32>
    %cst_40 = arith.constant 0.333333343 : f32
    %36 = vector.broadcast %cst_40 : f32 to vector<8x4xf32>
    %37 = arith.mulf %35, %36 : vector<8x4xf32>
    %c73 = arith.constant 73 : index
    %c0_41 = arith.constant 0 : index
    %38 = vector.load %arg12[%c73, %c0_41] : memref<202x4xf32, #tpu.memory_space<vmem>>, vector<8x4xf32>
    tpu.vector_store %arg12[%c73, %c0_41], %37 {strides = array<i32>} : memref<202x4xf32, #tpu.memory_space<vmem>>, vector<8x4xf32>,
    %c0_42 = arith.constant 0 : index
    %c6_43 = arith.constant 6 : index
    %c0_44 = arith.constant 0 : index
    %c0_45 = arith.constant 0 : index
    %39 = vector.load %arg1[%c0_42, %c6_43, %c0_44, %c0_45] : memref<1x16x16x4xf32, #tpu.memory_space<vmem>>, vector<1x1x16x4xf32>
    %40 = vector.shape_cast %39 : vector<1x1x16x4xf32> to vector<16x4xf32>
    %c0_46 = arith.constant 0 : index
    %c7 = arith.constant 7 : index
    %c0_47 = arith.constant 0 : index
    %c0_48 = arith.constant 0 : index
    %41 = vector.load %arg1[%c0_46, %c7, %c0_47, %c0_48] : memref<1x16x16x4xf32, #tpu.memory_space<vmem>>, vector<1x1x16x4xf32>
    %42 = vector.shape_cast %41 : vector<1x1x16x4xf32> to vector<16x4xf32>
    %43 = arith.addf %40, %42 : vector<16x4xf32>
    %c0_49 = arith.constant 0 : index
    %c8 = arith.constant 8 : index
    %c0_50 = arith.constant 0 : index
    %c0_51 = arith.constant 0 : index
    %44 = vector.load %arg1[%c0_49, %c8, %c0_50, %c0_51] : memref<1x16x16x4xf32, #tpu.memory_space<vmem>>, vector<1x1x16x4xf32>
    %45 = vector.shape_cast %44 : vector<1x1x16x4xf32> to vector<16x4xf32>
    %46 = arith.addf %43, %45 : vector<16x4xf32>
    %cst_52 = arith.constant dense<0.000000e+00> : vector<8x4xf32>
    %47 = tpu.matmul %2, %46, %cst_52 {dimension_numbers = #tpu.dot_dimension_numbers<[1], [0], [0], [1], [0, 0, 1, 1], [], []>} : vector<8x16xf32>, vector<16x4xf32>, vector<8x4xf32> -> vector<8x4xf32>
    %cst_53 = arith.constant 0.333333343 : f32
    %48 = vector.broadcast %cst_53 : f32 to vector<8x4xf32>
    %49 = arith.mulf %47, %48 : vector<8x4xf32>
    %c87 = arith.constant 87 : index
    %c0_54 = arith.constant 0 : index
    %50 = vector.load %arg12[%c87, %c0_54] : memref<202x4xf32, #tpu.memory_space<vmem>>, vector<8x4xf32>
    tpu.vector_store %arg12[%c87, %c0_54], %49 {strides = array<i32>} : memref<202x4xf32, #tpu.memory_space<vmem>>, vector<8x4xf32>,
    %c0_55 = arith.constant 0 : index
    %c8_56 = arith.constant 8 : index
    %c0_57 = arith.constant 0 : index
    %c0_58 = arith.constant 0 : index
    %51 = vector.load %arg1[%c0_55, %c8_56, %c0_57, %c0_58] : memref<1x16x16x4xf32, #tpu.memory_space<vmem>>, vector<1x1x16x4xf32>
    %52 = vector.shape_cast %51 : vector<1x1x16x4xf32> to vector<16x4xf32>
    %c0_59 = arith.constant 0 : index
    %c9 = arith.constant 9 : index
    %c0_60 = arith.constant 0 : index
    %c0_61 = arith.constant 0 : index
    %53 = vector.load %arg1[%c0_59, %c9, %c0_60, %c0_61] : memref<1x16x16x4xf32, #tpu.memory_space<vmem>>, vector<1x1x16x4xf32>
    %54 = vector.shape_cast %53 : vector<1x1x16x4xf32> to vector<16x4xf32>
    %55 = arith.addf %52, %54 : vector<16x4xf32>
    %c0_62 = arith.constant 0 : index
    %c10 = arith.constant 10 : index
    %c0_63 = arith.constant 0 : index
    %c0_64 = arith.constant 0 : index
    %56 = vector.load %arg1[%c0_62, %c10, %c0_63, %c0_64] : memref<1x16x16x4xf32, #tpu.memory_space<vmem>>, vector<1x1x16x4xf32>
    %57 = vector.shape_cast %56 : vector<1x1x16x4xf32> to vector<16x4xf32>
    %58 = arith.addf %55, %57 : vector<16x4xf32>
    %cst_65 = arith.constant dense<0.000000e+00> : vector<8x4xf32>
    %59 = tpu.matmul %2, %58, %cst_65 {dimension_numbers = #tpu.dot_dimension_numbers<[1], [0], [0], [1], [0, 0, 1, 1], [], []>} : vector<8x16xf32>, vector<16x4xf32>, vector<8x4xf32> -> vector<8x4xf32>
    %cst_66 = arith.constant 0.333333343 : f32
    %60 = vector.broadcast %cst_66 : f32 to vector<8x4xf32>
    %61 = arith.mulf %59, %60 : vector<8x4xf32>
    %c101 = arith.constant 101 : index
    %c0_67 = arith.constant 0 : index
    %62 = vector.load %arg12[%c101, %c0_67] : memref<202x4xf32, #tpu.memory_space<vmem>>, vector<8x4xf32>
    tpu.vector_store %arg12[%c101, %c0_67], %61 {strides = array<i32>} : memref<202x4xf32, #tpu.memory_space<vmem>>, vector<8x4xf32>,
    %c0_68 = arith.constant 0 : index
    %c10_69 = arith.constant 10 : index
    %c0_70 = arith.constant 0 : index
    %c0_71 = arith.constant 0 : index
    %63 = vector.load %arg1[%c0_68, %c10_69, %c0_70, %c0_71] : memref<1x16x16x4xf32, #tpu.memory_space<vmem>>, vector<1x1x16x4xf32>
    %64 = vector.shape_cast %63 : vector<1x1x16x4xf32> to vector<16x4xf32>
    %c0_72 = arith.constant 0 : index
    %c11 = arith.constant 11 : index
    %c0_73 = arith.constant 0 : index
    %c0_74 = arith.constant 0 : index
    %65 = vector.load %arg1[%c0_72, %c11, %c0_73, %c0_74] : memref<1x16x16x4xf32, #tpu.memory_space<vmem>>, vector<1x1x16x4xf32>
    %66 = vector.shape_cast %65 : vector<1x1x16x4xf32> to vector<16x4xf32>
    %67 = arith.addf %64, %66 : vector<16x4xf32>
    %c0_75 = arith.constant 0 : index
    %c12 = arith.constant 12 : index
    %c0_76 = arith.constant 0 : index
    %c0_77 = arith.constant 0 : index
    %68 = vector.load %arg1[%c0_75, %c12, %c0_76, %c0_77] : memref<1x16x16x4xf32, #tpu.memory_space<vmem>>, vector<1x1x16x4xf32>
    %69 = vector.shape_cast %68 : vector<1x1x16x4xf32> to vector<16x4xf32>
    %70 = arith.addf %67, %69 : vector<16x4xf32>
    %cst_78 = arith.constant dense<0.000000e+00> : vector<8x4xf32>
    %71 = tpu.matmul %2, %70, %cst_78 {dimension_numbers = #tpu.dot_dimension_numbers<[1], [0], [0], [1], [0, 0, 1, 1], [], []>} : vector<8x16xf32>, vector<16x4xf32>, vector<8x4xf32> -> vector<8x4xf32>
    %cst_79 = arith.constant 0.333333343 : f32
    %72 = vector.broadcast %cst_79 : f32 to vector<8x4xf32>
    %73 = arith.mulf %71, %72 : vector<8x4xf32>
    %c115 = arith.constant 115 : index
    %c0_80 = arith.constant 0 : index
    %74 = vector.load %arg12[%c115, %c0_80] : memref<202x4xf32, #tpu.memory_space<vmem>>, vector<8x4xf32>
    tpu.vector_store %arg12[%c115, %c0_80], %73 {strides = array<i32>} : memref<202x4xf32, #tpu.memory_space<vmem>>, vector<8x4xf32>,
    %c0_81 = arith.constant 0 : index
    %c12_82 = arith.constant 12 : index
    %c0_83 = arith.constant 0 : index
    %c0_84 = arith.constant 0 : index
    %75 = vector.load %arg1[%c0_81, %c12_82, %c0_83, %c0_84] : memref<1x16x16x4xf32, #tpu.memory_space<vmem>>, vector<1x1x16x4xf32>
    %76 = vector.shape_cast %75 : vector<1x1x16x4xf32> to vector<16x4xf32>
    %c0_85 = arith.constant 0 : index
    %c13 = arith.constant 13 : index
    %c0_86 = arith.constant 0 : index
    %c0_87 = arith.constant 0 : index
    %77 = vector.load %arg1[%c0_85, %c13, %c0_86, %c0_87] : memref<1x16x16x4xf32, #tpu.memory_space<vmem>>, vector<1x1x16x4xf32>
    %78 = vector.shape_cast %77 : vector<1x1x16x4xf32> to vector<16x4xf32>
    %79 = arith.addf %76, %78 : vector<16x4xf32>
    %c0_88 = arith.constant 0 : index
    %c14 = arith.constant 14 : index
    %c0_89 = arith.constant 0 : index
    %c0_90 = arith.constant 0 : index
    %80 = vector.load %arg1[%c0_88, %c14, %c0_89, %c0_90] : memref<1x16x16x4xf32, #tpu.memory_space<vmem>>, vector<1x1x16x4xf32>
    %81 = vector.shape_cast %80 : vector<1x1x16x4xf32> to vector<16x4xf32>
    %82 = arith.addf %79, %81 : vector<16x4xf32>
    %cst_91 = arith.constant dense<0.000000e+00> : vector<8x4xf32>
    %83 = tpu.matmul %2, %82, %cst_91 {dimension_numbers = #tpu.dot_dimension_numbers<[1], [0], [0], [1], [0, 0, 1, 1], [], []>} : vector<8x16xf32>, vector<16x4xf32>, vector<8x4xf32> -> vector<8x4xf32>
    %cst_92 = arith.constant 0.333333343 : f32
    %84 = vector.broadcast %cst_92 : f32 to vector<8x4xf32>
    %85 = arith.mulf %83, %84 : vector<8x4xf32>
    %c129 = arith.constant 129 : index
    %c0_93 = arith.constant 0 : index
    %86 = vector.load %arg12[%c129, %c0_93] : memref<202x4xf32, #tpu.memory_space<vmem>>, vector<8x4xf32>
    tpu.vector_store %arg12[%c129, %c0_93], %85 {strides = array<i32>} : memref<202x4xf32, #tpu.memory_space<vmem>>, vector<8x4xf32>,
    %c0_94 = arith.constant 0 : index
    %c14_95 = arith.constant 14 : index
    %c0_96 = arith.constant 0 : index
    %c0_97 = arith.constant 0 : index
    %87 = vector.load %arg1[%c0_94, %c14_95, %c0_96, %c0_97] : memref<1x16x16x4xf32, #tpu.memory_space<vmem>>, vector<1x1x16x4xf32>
    %88 = vector.shape_cast %87 : vector<1x1x16x4xf32> to vector<16x4xf32>
    %c0_98 = arith.constant 0 : index
    %c15 = arith.constant 15 : index
    %c0_99 = arith.constant 0 : index
    %c0_100 = arith.constant 0 : index
    %89 = vector.load %arg1[%c0_98, %c15, %c0_99, %c0_100] : memref<1x16x16x4xf32, #tpu.memory_space<vmem>>, vector<1x1x16x4xf32>
    %90 = vector.shape_cast %89 : vector<1x1x16x4xf32> to vector<16x4xf32>
    %91 = arith.addf %88, %90 : vector<16x4xf32>
    %cst_101 = arith.constant dense<0.000000e+00> : vector<8x4xf32>
    %92 = tpu.matmul %2, %91, %cst_101 {dimension_numbers = #tpu.dot_dimension_numbers<[1], [0], [0], [1], [0, 0, 1, 1], [], []>} : vector<8x16xf32>, vector<16x4xf32>, vector<8x4xf32> -> vector<8x4xf32>
    %cst_102 = arith.constant 5.000000e-01 : f32
    %93 = vector.broadcast %cst_102 : f32 to vector<8x4xf32>
    %94 = arith.mulf %92, %93 : vector<8x4xf32>
    %c143 = arith.constant 143 : index
    %c0_103 = arith.constant 0 : index
    %95 = vector.load %arg12[%c143, %c0_103] : memref<202x4xf32, #tpu.memory_space<vmem>>, vector<8x4xf32>
    tpu.vector_store %arg12[%c143, %c0_103], %94 {strides = array<i32>} : memref<202x4xf32, #tpu.memory_space<vmem>>, vector<8x4xf32>,
    %cst_104 = arith.constant 0.000000e+00 : f32
    %96 = vector.broadcast %cst_104 : f32 to vector<112x1xf32>
    %cst_105 = arith.constant 0.000000e+00 : f32
    %97 = vector.broadcast %cst_105 : f32 to vector<112x32xf32>
    %c30 = arith.constant 30 : index
    %c0_106 = arith.constant 0 : index
    %98 = vector.load %arg12[%c30, %c0_106] : memref<202x4xf32, #tpu.memory_space<vmem>>, vector<112x4xf32>
    %c0_107 = arith.constant 0 : index
    %c0_108 = arith.constant 0 : index
    %c0_109 = arith.constant 0 : index
    %99 = vector.load %arg3[%c0_107, %c0_108, %c0_109] : memref<9x4x32xf32, #tpu.memory_space<vmem>>, vector<1x4x32xf32>
    %100 = vector.shape_cast %99 : vector<1x4x32xf32> to vector<4x32xf32>
    %cst_110 = arith.constant dense<0.000000e+00> : vector<112x32xf32>
    %101 = tpu.matmul %98, %100, %cst_110 {dimension_numbers = #tpu.dot_dimension_numbers<[1], [0], [0], [1], [0, 0, 1, 1], [], []>} : vector<112x4xf32>, vector<4x32xf32>, vector<112x32xf32> -> vector<112x32xf32>
    %102 = arith.addf %97, %101 : vector<112x32xf32>
    %c31 = arith.constant 31 : index
    %c0_111 = arith.constant 0 : index
    %103 = vector.load %arg12[%c31, %c0_111] : memref<202x4xf32, #tpu.memory_space<vmem>>, vector<112x4xf32>
    %c1_112 = arith.constant 1 : index
    %c0_113 = arith.constant 0 : index
    %c0_114 = arith.constant 0 : index
    %104 = vector.load %arg3[%c1_112, %c0_113, %c0_114] : memref<9x4x32xf32, #tpu.memory_space<vmem>>, vector<1x4x32xf32>
    %105 = vector.shape_cast %104 : vector<1x4x32xf32> to vector<4x32xf32>
    %cst_115 = arith.constant dense<0.000000e+00> : vector<112x32xf32>
    %106 = tpu.matmul %103, %105, %cst_115 {dimension_numbers = #tpu.dot_dimension_numbers<[1], [0], [0], [1], [0, 0, 1, 1], [], []>} : vector<112x4xf32>, vector<4x32xf32>, vector<112x32xf32> -> vector<112x32xf32>
    %107 = arith.addf %102, %106 : vector<112x32xf32>
    %c32 = arith.constant 32 : index
    %c0_116 = arith.constant 0 : index
    %108 = vector.load %arg12[%c32, %c0_116] : memref<202x4xf32, #tpu.memory_space<vmem>>, vector<112x4xf32>
    %c2_117 = arith.constant 2 : index
    %c0_118 = arith.constant 0 : index
    %c0_119 = arith.constant 0 : index
    %109 = vector.load %arg3[%c2_117, %c0_118, %c0_119] : memref<9x4x32xf32, #tpu.memory_space<vmem>>, vector<1x4x32xf32>
    %110 = vector.shape_cast %109 : vector<1x4x32xf32> to vector<4x32xf32>
    %cst_120 = arith.constant dense<0.000000e+00> : vector<112x32xf32>
    %111 = tpu.matmul %108, %110, %cst_120 {dimension_numbers = #tpu.dot_dimension_numbers<[1], [0], [0], [1], [0, 0, 1, 1], [], []>} : vector<112x4xf32>, vector<4x32xf32>, vector<112x32xf32> -> vector<112x32xf32>
    %112 = arith.addf %107, %111 : vector<112x32xf32>
    %c44 = arith.constant 44 : index
    %c0_121 = arith.constant 0 : index
    %113 = vector.load %arg12[%c44, %c0_121] : memref<202x4xf32, #tpu.memory_space<vmem>>, vector<112x4xf32>
    %c3_122 = arith.constant 3 : index
    %c0_123 = arith.constant 0 : index
    %c0_124 = arith.constant 0 : index
    %114 = vector.load %arg3[%c3_122, %c0_123, %c0_124] : memref<9x4x32xf32, #tpu.memory_space<vmem>>, vector<1x4x32xf32>
    %115 = vector.shape_cast %114 : vector<1x4x32xf32> to vector<4x32xf32>
    %cst_125 = arith.constant dense<0.000000e+00> : vector<112x32xf32>
    %116 = tpu.matmul %113, %115, %cst_125 {dimension_numbers = #tpu.dot_dimension_numbers<[1], [0], [0], [1], [0, 0, 1, 1], [], []>} : vector<112x4xf32>, vector<4x32xf32>, vector<112x32xf32> -> vector<112x32xf32>
    %117 = arith.addf %112, %116 : vector<112x32xf32>
    %c45_126 = arith.constant 45 : index
    %c0_127 = arith.constant 0 : index
    %118 = vector.load %arg12[%c45_126, %c0_127] : memref<202x4xf32, #tpu.memory_space<vmem>>, vector<112x4xf32>
    %c4_128 = arith.constant 4 : index
    %c0_129 = arith.constant 0 : index
    %c0_130 = arith.constant 0 : index
    %119 = vector.load %arg3[%c4_128, %c0_129, %c0_130] : memref<9x4x32xf32, #tpu.memory_space<vmem>>, vector<1x4x32xf32>
    %120 = vector.shape_cast %119 : vector<1x4x32xf32> to vector<4x32xf32>
    %cst_131 = arith.constant dense<0.000000e+00> : vector<112x32xf32>
    %121 = tpu.matmul %118, %120, %cst_131 {dimension_numbers = #tpu.dot_dimension_numbers<[1], [0], [0], [1], [0, 0, 1, 1], [], []>} : vector<112x4xf32>, vector<4x32xf32>, vector<112x32xf32> -> vector<112x32xf32>
    %122 = arith.addf %117, %121 : vector<112x32xf32>
    %c46 = arith.constant 46 : index
    %c0_132 = arith.constant 0 : index
    %123 = vector.load %arg12[%c46, %c0_132] : memref<202x4xf32, #tpu.memory_space<vmem>>, vector<112x4xf32>
    %c5_133 = arith.constant 5 : index
    %c0_134 = arith.constant 0 : index
    %c0_135 = arith.constant 0 : index
    %124 = vector.load %arg3[%c5_133, %c0_134, %c0_135] : memref<9x4x32xf32, #tpu.memory_space<vmem>>, vector<1x4x32xf32>
    %125 = vector.shape_cast %124 : vector<1x4x32xf32> to vector<4x32xf32>
    %cst_136 = arith.constant dense<0.000000e+00> : vector<112x32xf32>
    %126 = tpu.matmul %123, %125, %cst_136 {dimension_numbers = #tpu.dot_dimension_numbers<[1], [0], [0], [1], [0, 0, 1, 1], [], []>} : vector<112x4xf32>, vector<4x32xf32>, vector<112x32xf32> -> vector<112x32xf32>
    %127 = arith.addf %122, %126 : vector<112x32xf32>
    %c58 = arith.constant 58 : index
    %c0_137 = arith.constant 0 : index
    %128 = vector.load %arg12[%c58, %c0_137] : memref<202x4xf32, #tpu.memory_space<vmem>>, vector<112x4xf32>
    %c6_138 = arith.constant 6 : index
    %c0_139 = arith.constant 0 : index
    %c0_140 = arith.constant 0 : index
    %129 = vector.load %arg3[%c6_138, %c0_139, %c0_140] : memref<9x4x32xf32, #tpu.memory_space<vmem>>, vector<1x4x32xf32>
    %130 = vector.shape_cast %129 : vector<1x4x32xf32> to vector<4x32xf32>
    %cst_141 = arith.constant dense<0.000000e+00> : vector<112x32xf32>
    %131 = tpu.matmul %128, %130, %cst_141 {dimension_numbers = #tpu.dot_dimension_numbers<[1], [0], [0], [1], [0, 0, 1, 1], [], []>} : vector<112x4xf32>, vector<4x32xf32>, vector<112x32xf32> -> vector<112x32xf32>
    %132 = arith.addf %127, %131 : vector<112x32xf32>
    %c59_142 = arith.constant 59 : index
    %c0_143 = arith.constant 0 : index
    %133 = vector.load %arg12[%c59_142, %c0_143] : memref<202x4xf32, #tpu.memory_space<vmem>>, vector<112x4xf32>
    %c7_144 = arith.constant 7 : index
    %c0_145 = arith.constant 0 : index
    %c0_146 = arith.constant 0 : index
    %134 = vector.load %arg3[%c7_144, %c0_145, %c0_146] : memref<9x4x32xf32, #tpu.memory_space<vmem>>, vector<1x4x32xf32>
    %135 = vector.shape_cast %134 : vector<1x4x32xf32> to vector<4x32xf32>
    %cst_147 = arith.constant dense<0.000000e+00> : vector<112x32xf32>
    %136 = tpu.matmul %133, %135, %cst_147 {dimension_numbers = #tpu.dot_dimension_numbers<[1], [0], [0], [1], [0, 0, 1, 1], [], []>} : vector<112x4xf32>, vector<4x32xf32>, vector<112x32xf32> -> vector<112x32xf32>
    %137 = arith.addf %132, %136 : vector<112x32xf32>
    %c60 = arith.constant 60 : index
    %c0_148 = arith.constant 0 : index
    %138 = vector.load %arg12[%c60, %c0_148] : memref<202x4xf32, #tpu.memory_space<vmem>>, vector<112x4xf32>
    %c8_149 = arith.constant 8 : index
    %c0_150 = arith.constant 0 : index
    %c0_151 = arith.constant 0 : index
    %139 = vector.load %arg3[%c8_149, %c0_150, %c0_151] : memref<9x4x32xf32, #tpu.memory_space<vmem>>, vector<1x4x32xf32>
    %140 = vector.shape_cast %139 : vector<1x4x32xf32> to vector<4x32xf32>
    %cst_152 = arith.constant dense<0.000000e+00> : vector<112x32xf32>
    %141 = tpu.matmul %138, %140, %cst_152 {dimension_numbers = #tpu.dot_dimension_numbers<[1], [0], [0], [1], [0, 0, 1, 1], [], []>} : vector<112x4xf32>, vector<4x32xf32>, vector<112x32xf32> -> vector<112x32xf32>
    %142 = arith.addf %137, %141 : vector<112x32xf32>
    %c0_153 = arith.constant 0 : index
    %c0_154 = arith.constant 0 : index
    %143 = vector.load %arg4[%c0_153, %c0_154] : memref<1x32xf32, #tpu.memory_space<vmem>>, vector<1x32xf32>
    %144 = vector.broadcast %143 : vector<1x32xf32> to vector<112x32xf32>
    %145 = arith.addf %142, %144 : vector<112x32xf32>
    %cst_155 = arith.constant 0.000000e+00 : f32
    %146 = vector.broadcast %cst_155 : f32 to vector<112x32xf32>
    %147 = arith.maximumf %145, %146 : vector<112x32xf32>
    %cst_156 = arith.constant dense<0.000000e+00> : vector<112xf32>
    %148 = vector.multi_reduction <add>, %147, %cst_156 [1] : vector<112x32xf32> to vector<112xf32>
    %149 = vector.shape_cast %148 : vector<112xf32> to vector<112x1xf32>
    %150 = arith.addf %96, %149 : vector<112x1xf32>
    %cst_157 = arith.constant 0.000000e+00 : f32
    %151 = vector.broadcast %cst_157 : f32 to vector<112x32xf32>
    %c15_158 = arith.constant 15 : index
    %c0_159 = arith.constant 0 : index
    %152 = vector.load %arg12[%c15_158, %c0_159] : memref<202x4xf32, #tpu.memory_space<vmem>>, vector<112x4xf32>
    %c0_160 = arith.constant 0 : index
    %c0_161 = arith.constant 0 : index
    %c0_162 = arith.constant 0 : index
    %153 = vector.load %arg5[%c0_160, %c0_161, %c0_162] : memref<25x4x32xf32, #tpu.memory_space<vmem>>, vector<1x4x32xf32>
    %154 = vector.shape_cast %153 : vector<1x4x32xf32> to vector<4x32xf32>
    %cst_163 = arith.constant dense<0.000000e+00> : vector<112x32xf32>
    %155 = tpu.matmul %152, %154, %cst_163 {dimension_numbers = #tpu.dot_dimension_numbers<[1], [0], [0], [1], [0, 0, 1, 1], [], []>} : vector<112x4xf32>, vector<4x32xf32>, vector<112x32xf32> -> vector<112x32xf32>
    %156 = arith.addf %151, %155 : vector<112x32xf32>
    %c16 = arith.constant 16 : index
    %c0_164 = arith.constant 0 : index
    %157 = vector.load %arg12[%c16, %c0_164] : memref<202x4xf32, #tpu.memory_space<vmem>>, vector<112x4xf32>
    %c1_165 = arith.constant 1 : index
    %c0_166 = arith.constant 0 : index
    %c0_167 = arith.constant 0 : index
    %158 = vector.load %arg5[%c1_165, %c0_166, %c0_167] : memref<25x4x32xf32, #tpu.memory_space<vmem>>, vector<1x4x32xf32>
    %159 = vector.shape_cast %158 : vector<1x4x32xf32> to vector<4x32xf32>
    %cst_168 = arith.constant dense<0.000000e+00> : vector<112x32xf32>
    %160 = tpu.matmul %157, %159, %cst_168 {dimension_numbers = #tpu.dot_dimension_numbers<[1], [0], [0], [1], [0, 0, 1, 1], [], []>} : vector<112x4xf32>, vector<4x32xf32>, vector<112x32xf32> -> vector<112x32xf32>
    %161 = arith.addf %156, %160 : vector<112x32xf32>
    %c17 = arith.constant 17 : index
    %c0_169 = arith.constant 0 : index
    %162 = vector.load %arg12[%c17, %c0_169] : memref<202x4xf32, #tpu.memory_space<vmem>>, vector<112x4xf32>
    %c2_170 = arith.constant 2 : index
    %c0_171 = arith.constant 0 : index
    %c0_172 = arith.constant 0 : index
    %163 = vector.load %arg5[%c2_170, %c0_171, %c0_172] : memref<25x4x32xf32, #tpu.memory_space<vmem>>, vector<1x4x32xf32>
    %164 = vector.shape_cast %163 : vector<1x4x32xf32> to vector<4x32xf32>
    %cst_173 = arith.constant dense<0.000000e+00> : vector<112x32xf32>
    %165 = tpu.matmul %162, %164, %cst_173 {dimension_numbers = #tpu.dot_dimension_numbers<[1], [0], [0], [1], [0, 0, 1, 1], [], []>} : vector<112x4xf32>, vector<4x32xf32>, vector<112x32xf32> -> vector<112x32xf32>
    %166 = arith.addf %161, %165 : vector<112x32xf32>
    %c18 = arith.constant 18 : index
    %c0_174 = arith.constant 0 : index
    %167 = vector.load %arg12[%c18, %c0_174] : memref<202x4xf32, #tpu.memory_space<vmem>>, vector<112x4xf32>
    %c3_175 = arith.constant 3 : index
    %c0_176 = arith.constant 0 : index
    %c0_177 = arith.constant 0 : index
    %168 = vector.load %arg5[%c3_175, %c0_176, %c0_177] : memref<25x4x32xf32, #tpu.memory_space<vmem>>, vector<1x4x32xf32>
    %169 = vector.shape_cast %168 : vector<1x4x32xf32> to vector<4x32xf32>
    %cst_178 = arith.constant dense<0.000000e+00> : vector<112x32xf32>
    %170 = tpu.matmul %167, %169, %cst_178 {dimension_numbers = #tpu.dot_dimension_numbers<[1], [0], [0], [1], [0, 0, 1, 1], [], []>} : vector<112x4xf32>, vector<4x32xf32>, vector<112x32xf32> -> vector<112x32xf32>
    %171 = arith.addf %166, %170 : vector<112x32xf32>
    %c19 = arith.constant 19 : index
    %c0_179 = arith.constant 0 : index
    %172 = vector.load %arg12[%c19, %c0_179] : memref<202x4xf32, #tpu.memory_space<vmem>>, vector<112x4xf32>
    %c4_180 = arith.constant 4 : index
    %c0_181 = arith.constant 0 : index
    %c0_182 = arith.constant 0 : index
    %173 = vector.load %arg5[%c4_180, %c0_181, %c0_182] : memref<25x4x32xf32, #tpu.memory_space<vmem>>, vector<1x4x32xf32>
    %174 = vector.shape_cast %173 : vector<1x4x32xf32> to vector<4x32xf32>
    %cst_183 = arith.constant dense<0.000000e+00> : vector<112x32xf32>
    %175 = tpu.matmul %172, %174, %cst_183 {dimension_numbers = #tpu.dot_dimension_numbers<[1], [0], [0], [1], [0, 0, 1, 1], [], []>} : vector<112x4xf32>, vector<4x32xf32>, vector<112x32xf32> -> vector<112x32xf32>
    %176 = arith.addf %171, %175 : vector<112x32xf32>
    %c29 = arith.constant 29 : index
    %c0_184 = arith.constant 0 : index
    %177 = vector.load %arg12[%c29, %c0_184] : memref<202x4xf32, #tpu.memory_space<vmem>>, vector<112x4xf32>
    %c5_185 = arith.constant 5 : index
    %c0_186 = arith.constant 0 : index
    %c0_187 = arith.constant 0 : index
    %178 = vector.load %arg5[%c5_185, %c0_186, %c0_187] : memref<25x4x32xf32, #tpu.memory_space<vmem>>, vector<1x4x32xf32>
    %179 = vector.shape_cast %178 : vector<1x4x32xf32> to vector<4x32xf32>
    %cst_188 = arith.constant dense<0.000000e+00> : vector<112x32xf32>
    %180 = tpu.matmul %177, %179, %cst_188 {dimension_numbers = #tpu.dot_dimension_numbers<[1], [0], [0], [1], [0, 0, 1, 1], [], []>} : vector<112x4xf32>, vector<4x32xf32>, vector<112x32xf32> -> vector<112x32xf32>
    %181 = arith.addf %176, %180 : vector<112x32xf32>
    %c30_189 = arith.constant 30 : index
    %c0_190 = arith.constant 0 : index
    %182 = vector.load %arg12[%c30_189, %c0_190] : memref<202x4xf32, #tpu.memory_space<vmem>>, vector<112x4xf32>
    %c6_191 = arith.constant 6 : index
    %c0_192 = arith.constant 0 : index
    %c0_193 = arith.constant 0 : index
    %183 = vector.load %arg5[%c6_191, %c0_192, %c0_193] : memref<25x4x32xf32, #tpu.memory_space<vmem>>, vector<1x4x32xf32>
    %184 = vector.shape_cast %183 : vector<1x4x32xf32> to vector<4x32xf32>
    %cst_194 = arith.constant dense<0.000000e+00> : vector<112x32xf32>
    %185 = tpu.matmul %182, %184, %cst_194 {dimension_numbers = #tpu.dot_dimension_numbers<[1], [0], [0], [1], [0, 0, 1, 1], [], []>} : vector<112x4xf32>, vector<4x32xf32>, vector<112x32xf32> -> vector<112x32xf32>
    %186 = arith.addf %181, %185 : vector<112x32xf32>
    %c31_195 = arith.constant 31 : index
    %c0_196 = arith.constant 0 : index
    %187 = vector.load %arg12[%c31_195, %c0_196] : memref<202x4xf32, #tpu.memory_space<vmem>>, vector<112x4xf32>
    %c7_197 = arith.constant 7 : index
    %c0_198 = arith.constant 0 : index
    %c0_199 = arith.constant 0 : index
    %188 = vector.load %arg5[%c7_197, %c0_198, %c0_199] : memref<25x4x32xf32, #tpu.memory_space<vmem>>, vector<1x4x32xf32>
    %189 = vector.shape_cast %188 : vector<1x4x32xf32> to vector<4x32xf32>
    %cst_200 = arith.constant dense<0.000000e+00> : vector<112x32xf32>
    %190 = tpu.matmul %187, %189, %cst_200 {dimension_numbers = #tpu.dot_dimension_numbers<[1], [0], [0], [1], [0, 0, 1, 1], [], []>} : vector<112x4xf32>, vector<4x32xf32>, vector<112x32xf32> -> vector<112x32xf32>
    %191 = arith.addf %186, %190 : vector<112x32xf32>
    %c32_201 = arith.constant 32 : index
    %c0_202 = arith.constant 0 : index
    %192 = vector.load %arg12[%c32_201, %c0_202] : memref<202x4xf32, #tpu.memory_space<vmem>>, vector<112x4xf32>
    %c8_203 = arith.constant 8 : index
    %c0_204 = arith.constant 0 : index
    %c0_205 = arith.constant 0 : index
    %193 = vector.load %arg5[%c8_203, %c0_204, %c0_205] : memref<25x4x32xf32, #tpu.memory_space<vmem>>, vector<1x4x32xf32>
    %194 = vector.shape_cast %193 : vector<1x4x32xf32> to vector<4x32xf32>
    %cst_206 = arith.constant dense<0.000000e+00> : vector<112x32xf32>
    %195 = tpu.matmul %192, %194, %cst_206 {dimension_numbers = #tpu.dot_dimension_numbers<[1], [0], [0], [1], [0, 0, 1, 1], [], []>} : vector<112x4xf32>, vector<4x32xf32>, vector<112x32xf32> -> vector<112x32xf32>
    %196 = arith.addf %191, %195 : vector<112x32xf32>
    %c33 = arith.constant 33 : index
    %c0_207 = arith.constant 0 : index
    %197 = vector.load %arg12[%c33, %c0_207] : memref<202x4xf32, #tpu.memory_space<vmem>>, vector<112x4xf32>
    %c9_208 = arith.constant 9 : index
    %c0_209 = arith.constant 0 : index
    %c0_210 = arith.constant 0 : index
    %198 = vector.load %arg5[%c9_208, %c0_209, %c0_210] : memref<25x4x32xf32, #tpu.memory_space<vmem>>, vector<1x4x32xf32>
    %199 = vector.shape_cast %198 : vector<1x4x32xf32> to vector<4x32xf32>
    %cst_211 = arith.constant dense<0.000000e+00> : vector<112x32xf32>
    %200 = tpu.matmul %197, %199, %cst_211 {dimension_numbers = #tpu.dot_dimension_numbers<[1], [0], [0], [1], [0, 0, 1, 1], [], []>} : vector<112x4xf32>, vector<4x32xf32>, vector<112x32xf32> -> vector<112x32xf32>
    %201 = arith.addf %196, %200 : vector<112x32xf32>
    %c43 = arith.constant 43 : index
    %c0_212 = arith.constant 0 : index
    %202 = vector.load %arg12[%c43, %c0_212] : memref<202x4xf32, #tpu.memory_space<vmem>>, vector<112x4xf32>
    %c10_213 = arith.constant 10 : index
    %c0_214 = arith.constant 0 : index
    %c0_215 = arith.constant 0 : index
    %203 = vector.load %arg5[%c10_213, %c0_214, %c0_215] : memref<25x4x32xf32, #tpu.memory_space<vmem>>, vector<1x4x32xf32>
    %204 = vector.shape_cast %203 : vector<1x4x32xf32> to vector<4x32xf32>
    %cst_216 = arith.constant dense<0.000000e+00> : vector<112x32xf32>
    %205 = tpu.matmul %202, %204, %cst_216 {dimension_numbers = #tpu.dot_dimension_numbers<[1], [0], [0], [1], [0, 0, 1, 1], [], []>} : vector<112x4xf32>, vector<4x32xf32>, vector<112x32xf32> -> vector<112x32xf32>
    %206 = arith.addf %201, %205 : vector<112x32xf32>
    %c44_217 = arith.constant 44 : index
    %c0_218 = arith.constant 0 : index
    %207 = vector.load %arg12[%c44_217, %c0_218] : memref<202x4xf32, #tpu.memory_space<vmem>>, vector<112x4xf32>
    %c11_219 = arith.constant 11 : index
    %c0_220 = arith.constant 0 : index
    %c0_221 = arith.constant 0 : index
    %208 = vector.load %arg5[%c11_219, %c0_220, %c0_221] : memref<25x4x32xf32, #tpu.memory_space<vmem>>, vector<1x4x32xf32>
    %209 = vector.shape_cast %208 : vector<1x4x32xf32> to vector<4x32xf32>
    %cst_222 = arith.constant dense<0.000000e+00> : vector<112x32xf32>
    %210 = tpu.matmul %207, %209, %cst_222 {dimension_numbers = #tpu.dot_dimension_numbers<[1], [0], [0], [1], [0, 0, 1, 1], [], []>} : vector<112x4xf32>, vector<4x32xf32>, vector<112x32xf32> -> vector<112x32xf32>
    %211 = arith.addf %206, %210 : vector<112x32xf32>
    %c45_223 = arith.constant 45 : index
    %c0_224 = arith.constant 0 : index
    %212 = vector.load %arg12[%c45_223, %c0_224] : memref<202x4xf32, #tpu.memory_space<vmem>>, vector<112x4xf32>
    %c12_225 = arith.constant 12 : index
    %c0_226 = arith.constant 0 : index
    %c0_227 = arith.constant 0 : index
    %213 = vector.load %arg5[%c12_225, %c0_226, %c0_227] : memref<25x4x32xf32, #tpu.memory_space<vmem>>, vector<1x4x32xf32>
    %214 = vector.shape_cast %213 : vector<1x4x32xf32> to vector<4x32xf32>
    %cst_228 = arith.constant dense<0.000000e+00> : vector<112x32xf32>
    %215 = tpu.matmul %212, %214, %cst_228 {dimension_numbers = #tpu.dot_dimension_numbers<[1], [0], [0], [1], [0, 0, 1, 1], [], []>} : vector<112x4xf32>, vector<4x32xf32>, vector<112x32xf32> -> vector<112x32xf32>
    %216 = arith.addf %211, %215 : vector<112x32xf32>
    %c46_229 = arith.constant 46 : index
    %c0_230 = arith.constant 0 : index
    %217 = vector.load %arg12[%c46_229, %c0_230] : memref<202x4xf32, #tpu.memory_space<vmem>>, vector<112x4xf32>
    %c13_231 = arith.constant 13 : index
    %c0_232 = arith.constant 0 : index
    %c0_233 = arith.constant 0 : index
    %218 = vector.load %arg5[%c13_231, %c0_232, %c0_233] : memref<25x4x32xf32, #tpu.memory_space<vmem>>, vector<1x4x32xf32>
    %219 = vector.shape_cast %218 : vector<1x4x32xf32> to vector<4x32xf32>
    %cst_234 = arith.constant dense<0.000000e+00> : vector<112x32xf32>
    %220 = tpu.matmul %217, %219, %cst_234 {dimension_numbers = #tpu.dot_dimension_numbers<[1], [0], [0], [1], [0, 0, 1, 1], [], []>} : vector<112x4xf32>, vector<4x32xf32>, vector<112x32xf32> -> vector<112x32xf32>
    %221 = arith.addf %216, %220 : vector<112x32xf32>
    %c47 = arith.constant 47 : index
    %c0_235 = arith.constant 0 : index
    %222 = vector.load %arg12[%c47, %c0_235] : memref<202x4xf32, #tpu.memory_space<vmem>>, vector<112x4xf32>
    %c14_236 = arith.constant 14 : index
    %c0_237 = arith.constant 0 : index
    %c0_238 = arith.constant 0 : index
    %223 = vector.load %arg5[%c14_236, %c0_237, %c0_238] : memref<25x4x32xf32, #tpu.memory_space<vmem>>, vector<1x4x32xf32>
    %224 = vector.shape_cast %223 : vector<1x4x32xf32> to vector<4x32xf32>
    %cst_239 = arith.constant dense<0.000000e+00> : vector<112x32xf32>
    %225 = tpu.matmul %222, %224, %cst_239 {dimension_numbers = #tpu.dot_dimension_numbers<[1], [0], [0], [1], [0, 0, 1, 1], [], []>} : vector<112x4xf32>, vector<4x32xf32>, vector<112x32xf32> -> vector<112x32xf32>
    %226 = arith.addf %221, %225 : vector<112x32xf32>
    %c57 = arith.constant 57 : index
    %c0_240 = arith.constant 0 : index
    %227 = vector.load %arg12[%c57, %c0_240] : memref<202x4xf32, #tpu.memory_space<vmem>>, vector<112x4xf32>
    %c15_241 = arith.constant 15 : index
    %c0_242 = arith.constant 0 : index
    %c0_243 = arith.constant 0 : index
    %228 = vector.load %arg5[%c15_241, %c0_242, %c0_243] : memref<25x4x32xf32, #tpu.memory_space<vmem>>, vector<1x4x32xf32>
    %229 = vector.shape_cast %228 : vector<1x4x32xf32> to vector<4x32xf32>
    %cst_244 = arith.constant dense<0.000000e+00> : vector<112x32xf32>
    %230 = tpu.matmul %227, %229, %cst_244 {dimension_numbers = #tpu.dot_dimension_numbers<[1], [0], [0], [1], [0, 0, 1, 1], [], []>} : vector<112x4xf32>, vector<4x32xf32>, vector<112x32xf32> -> vector<112x32xf32>
    %231 = arith.addf %226, %230 : vector<112x32xf32>
    %c58_245 = arith.constant 58 : index
    %c0_246 = arith.constant 0 : index
    %232 = vector.load %arg12[%c58_245, %c0_246] : memref<202x4xf32, #tpu.memory_space<vmem>>, vector<112x4xf32>
    %c16_247 = arith.constant 16 : index
    %c0_248 = arith.constant 0 : index
    %c0_249 = arith.constant 0 : index
    %233 = vector.load %arg5[%c16_247, %c0_248, %c0_249] : memref<25x4x32xf32, #tpu.memory_space<vmem>>, vector<1x4x32xf32>
    %234 = vector.shape_cast %233 : vector<1x4x32xf32> to vector<4x32xf32>
    %cst_250 = arith.constant dense<0.000000e+00> : vector<112x32xf32>
    %235 = tpu.matmul %232, %234, %cst_250 {dimension_numbers = #tpu.dot_dimension_numbers<[1], [0], [0], [1], [0, 0, 1, 1], [], []>} : vector<112x4xf32>, vector<4x32xf32>, vector<112x32xf32> -> vector<112x32xf32>
    %236 = arith.addf %231, %235 : vector<112x32xf32>
    %c59_251 = arith.constant 59 : index
    %c0_252 = arith.constant 0 : index
    %237 = vector.load %arg12[%c59_251, %c0_252] : memref<202x4xf32, #tpu.memory_space<vmem>>, vector<112x4xf32>
    %c17_253 = arith.constant 17 : index
    %c0_254 = arith.constant 0 : index
    %c0_255 = arith.constant 0 : index
    %238 = vector.load %arg5[%c17_253, %c0_254, %c0_255] : memref<25x4x32xf32, #tpu.memory_space<vmem>>, vector<1x4x32xf32>
    %239 = vector.shape_cast %238 : vector<1x4x32xf32> to vector<4x32xf32>
    %cst_256 = arith.constant dense<0.000000e+00> : vector<112x32xf32>
    %240 = tpu.matmul %237, %239, %cst_256 {dimension_numbers = #tpu.dot_dimension_numbers<[1], [0], [0], [1], [0, 0, 1, 1], [], []>} : vector<112x4xf32>, vector<4x32xf32>, vector<112x32xf32> -> vector<112x32xf32>
    %241 = arith.addf %236, %240 : vector<112x32xf32>
    %c60_257 = arith.constant 60 : index
    %c0_258 = arith.constant 0 : index
    %242 = vector.load %arg12[%c60_257, %c0_258] : memref<202x4xf32, #tpu.memory_space<vmem>>, vector<112x4xf32>
    %c18_259 = arith.constant 18 : index
    %c0_260 = arith.constant 0 : index
    %c0_261 = arith.constant 0 : index
    %243 = vector.load %arg5[%c18_259, %c0_260, %c0_261] : memref<25x4x32xf32, #tpu.memory_space<vmem>>, vector<1x4x32xf32>
    %244 = vector.shape_cast %243 : vector<1x4x32xf32> to vector<4x32xf32>
    %cst_262 = arith.constant dense<0.000000e+00> : vector<112x32xf32>
    %245 = tpu.matmul %242, %244, %cst_262 {dimension_numbers = #tpu.dot_dimension_numbers<[1], [0], [0], [1], [0, 0, 1, 1], [], []>} : vector<112x4xf32>, vector<4x32xf32>, vector<112x32xf32> -> vector<112x32xf32>
    %246 = arith.addf %241, %245 : vector<112x32xf32>
    %c61 = arith.constant 61 : index
    %c0_263 = arith.constant 0 : index
    %247 = vector.load %arg12[%c61, %c0_263] : memref<202x4xf32, #tpu.memory_space<vmem>>, vector<112x4xf32>
    %c19_264 = arith.constant 19 : index
    %c0_265 = arith.constant 0 : index
    %c0_266 = arith.constant 0 : index
    %248 = vector.load %arg5[%c19_264, %c0_265, %c0_266] : memref<25x4x32xf32, #tpu.memory_space<vmem>>, vector<1x4x32xf32>
    %249 = vector.shape_cast %248 : vector<1x4x32xf32> to vector<4x32xf32>
    %cst_267 = arith.constant dense<0.000000e+00> : vector<112x32xf32>
    %250 = tpu.matmul %247, %249, %cst_267 {dimension_numbers = #tpu.dot_dimension_numbers<[1], [0], [0], [1], [0, 0, 1, 1], [], []>} : vector<112x4xf32>, vector<4x32xf32>, vector<112x32xf32> -> vector<112x32xf32>
    %251 = arith.addf %246, %250 : vector<112x32xf32>
    %c71 = arith.constant 71 : index
    %c0_268 = arith.constant 0 : index
    %252 = vector.load %arg12[%c71, %c0_268] : memref<202x4xf32, #tpu.memory_space<vmem>>, vector<112x4xf32>
    %c20 = arith.constant 20 : index
    %c0_269 = arith.constant 0 : index
    %c0_270 = arith.constant 0 : index
    %253 = vector.load %arg5[%c20, %c0_269, %c0_270] : memref<25x4x32xf32, #tpu.memory_space<vmem>>, vector<1x4x32xf32>
    %254 = vector.shape_cast %253 : vector<1x4x32xf32> to vector<4x32xf32>
    %cst_271 = arith.constant dense<0.000000e+00> : vector<112x32xf32>
    %255 = tpu.matmul %252, %254, %cst_271 {dimension_numbers = #tpu.dot_dimension_numbers<[1], [0], [0], [1], [0, 0, 1, 1], [], []>} : vector<112x4xf32>, vector<4x32xf32>, vector<112x32xf32> -> vector<112x32xf32>
    %256 = arith.addf %251, %255 : vector<112x32xf32>
    %c72 = arith.constant 72 : index
    %c0_272 = arith.constant 0 : index
    %257 = vector.load %arg12[%c72, %c0_272] : memref<202x4xf32, #tpu.memory_space<vmem>>, vector<112x4xf32>
    %c21 = arith.constant 21 : index
    %c0_273 = arith.constant 0 : index
    %c0_274 = arith.constant 0 : index
    %258 = vector.load %arg5[%c21, %c0_273, %c0_274] : memref<25x4x32xf32, #tpu.memory_space<vmem>>, vector<1x4x32xf32>
    %259 = vector.shape_cast %258 : vector<1x4x32xf32> to vector<4x32xf32>
    %cst_275 = arith.constant dense<0.000000e+00> : vector<112x32xf32>
    %260 = tpu.matmul %257, %259, %cst_275 {dimension_numbers = #tpu.dot_dimension_numbers<[1], [0], [0], [1], [0, 0, 1, 1], [], []>} : vector<112x4xf32>, vector<4x32xf32>, vector<112x32xf32> -> vector<112x32xf32>
    %261 = arith.addf %256, %260 : vector<112x32xf32>
    %c73_276 = arith.constant 73 : index
    %c0_277 = arith.constant 0 : index
    %262 = vector.load %arg12[%c73_276, %c0_277] : memref<202x4xf32, #tpu.memory_space<vmem>>, vector<112x4xf32>
    %c22 = arith.constant 22 : index
    %c0_278 = arith.constant 0 : index
    %c0_279 = arith.constant 0 : index
    %263 = vector.load %arg5[%c22, %c0_278, %c0_279] : memref<25x4x32xf32, #tpu.memory_space<vmem>>, vector<1x4x32xf32>
    %264 = vector.shape_cast %263 : vector<1x4x32xf32> to vector<4x32xf32>
    %cst_280 = arith.constant dense<0.000000e+00> : vector<112x32xf32>
    %265 = tpu.matmul %262, %264, %cst_280 {dimension_numbers = #tpu.dot_dimension_numbers<[1], [0], [0], [1], [0, 0, 1, 1], [], []>} : vector<112x4xf32>, vector<4x32xf32>, vector<112x32xf32> -> vector<112x32xf32>
    %266 = arith.addf %261, %265 : vector<112x32xf32>
    %c74 = arith.constant 74 : index
    %c0_281 = arith.constant 0 : index
    %267 = vector.load %arg12[%c74, %c0_281] : memref<202x4xf32, #tpu.memory_space<vmem>>, vector<112x4xf32>
    %c23 = arith.constant 23 : index
    %c0_282 = arith.constant 0 : index
    %c0_283 = arith.constant 0 : index
    %268 = vector.load %arg5[%c23, %c0_282, %c0_283] : memref<25x4x32xf32, #tpu.memory_space<vmem>>, vector<1x4x32xf32>
    %269 = vector.shape_cast %268 : vector<1x4x32xf32> to vector<4x32xf32>
    %cst_284 = arith.constant dense<0.000000e+00> : vector<112x32xf32>
    %270 = tpu.matmul %267, %269, %cst_284 {dimension_numbers = #tpu.dot_dimension_numbers<[1], [0], [0], [1], [0, 0, 1, 1], [], []>} : vector<112x4xf32>, vector<4x32xf32>, vector<112x32xf32> -> vector<112x32xf32>
    %271 = arith.addf %266, %270 : vector<112x32xf32>
    %c75 = arith.constant 75 : index
    %c0_285 = arith.constant 0 : index
    %272 = vector.load %arg12[%c75, %c0_285] : memref<202x4xf32, #tpu.memory_space<vmem>>, vector<112x4xf32>
    %c24 = arith.constant 24 : index
    %c0_286 = arith.constant 0 : index
    %c0_287 = arith.constant 0 : index
    %273 = vector.load %arg5[%c24, %c0_286, %c0_287] : memref<25x4x32xf32, #tpu.memory_space<vmem>>, vector<1x4x32xf32>
    %274 = vector.shape_cast %273 : vector<1x4x32xf32> to vector<4x32xf32>
    %cst_288 = arith.constant dense<0.000000e+00> : vector<112x32xf32>
    %275 = tpu.matmul %272, %274, %cst_288 {dimension_numbers = #tpu.dot_dimension_numbers<[1], [0], [0], [1], [0, 0, 1, 1], [], []>} : vector<112x4xf32>, vector<4x32xf32>, vector<112x32xf32> -> vector<112x32xf32>
    %276 = arith.addf %271, %275 : vector<112x32xf32>
    %c0_289 = arith.constant 0 : index
    %c0_290 = arith.constant 0 : index
    %277 = vector.load %arg6[%c0_289, %c0_290] : memref<1x32xf32, #tpu.memory_space<vmem>>, vector<1x32xf32>
    %278 = vector.broadcast %277 : vector<1x32xf32> to vector<112x32xf32>
    %279 = arith.addf %276, %278 : vector<112x32xf32>
    %cst_291 = arith.constant 0.000000e+00 : f32
    %280 = vector.broadcast %cst_291 : f32 to vector<112x32xf32>
    %281 = arith.maximumf %279, %280 : vector<112x32xf32>
    %cst_292 = arith.constant dense<0.000000e+00> : vector<112xf32>
    %282 = vector.multi_reduction <add>, %281, %cst_292 [1] : vector<112x32xf32> to vector<112xf32>
    %283 = vector.shape_cast %282 : vector<112xf32> to vector<112x1xf32>
    %284 = arith.addf %150, %283 : vector<112x1xf32>
    %cst_293 = arith.constant 0.000000e+00 : f32
    %285 = vector.broadcast %cst_293 : f32 to vector<112x20xf32>
    %c0_294 = arith.constant 0 : index
    %c0_295 = arith.constant 0 : index
    %286 = vector.load %arg12[%c0_294, %c0_295] : memref<202x4xf32, #tpu.memory_space<vmem>>, vector<112x4xf32>
    %c0_296 = arith.constant 0 : index
    %c0_297 = arith.constant 0 : index
    %c0_298 = arith.constant 0 : index
    %287 = vector.load %arg7[%c0_296, %c0_297, %c0_298] : memref<49x4x20xf32, #tpu.memory_space<vmem>>, vector<1x4x20xf32>
    %288 = vector.shape_cast %287 : vector<1x4x20xf32> to vector<4x20xf32>
    %cst_299 = arith.constant dense<0.000000e+00> : vector<112x20xf32>
    %289 = tpu.matmul %286, %288, %cst_299 {dimension_numbers = #tpu.dot_dimension_numbers<[1], [0], [0], [1], [0, 0, 1, 1], [], []>} : vector<112x4xf32>, vector<4x20xf32>, vector<112x20xf32> -> vector<112x20xf32>
    %290 = arith.addf %285, %289 : vector<112x20xf32>
    %c1_300 = arith.constant 1 : index
    %c0_301 = arith.constant 0 : index
    %291 = vector.load %arg12[%c1_300, %c0_301] : memref<202x4xf32, #tpu.memory_space<vmem>>, vector<112x4xf32>
    %c1_302 = arith.constant 1 : index
    %c0_303 = arith.constant 0 : index
    %c0_304 = arith.constant 0 : index
    %292 = vector.load %arg7[%c1_302, %c0_303, %c0_304] : memref<49x4x20xf32, #tpu.memory_space<vmem>>, vector<1x4x20xf32>
    %293 = vector.shape_cast %292 : vector<1x4x20xf32> to vector<4x20xf32>
    %cst_305 = arith.constant dense<0.000000e+00> : vector<112x20xf32>
    %294 = tpu.matmul %291, %293, %cst_305 {dimension_numbers = #tpu.dot_dimension_numbers<[1], [0], [0], [1], [0, 0, 1, 1], [], []>} : vector<112x4xf32>, vector<4x20xf32>, vector<112x20xf32> -> vector<112x20xf32>
    %295 = arith.addf %290, %294 : vector<112x20xf32>
    %c2_306 = arith.constant 2 : index
    %c0_307 = arith.constant 0 : index
    %296 = vector.load %arg12[%c2_306, %c0_307] : memref<202x4xf32, #tpu.memory_space<vmem>>, vector<112x4xf32>
    %c2_308 = arith.constant 2 : index
    %c0_309 = arith.constant 0 : index
    %c0_310 = arith.constant 0 : index
    %297 = vector.load %arg7[%c2_308, %c0_309, %c0_310] : memref<49x4x20xf32, #tpu.memory_space<vmem>>, vector<1x4x20xf32>
    %298 = vector.shape_cast %297 : vector<1x4x20xf32> to vector<4x20xf32>
    %cst_311 = arith.constant dense<0.000000e+00> : vector<112x20xf32>
    %299 = tpu.matmul %296, %298, %cst_311 {dimension_numbers = #tpu.dot_dimension_numbers<[1], [0], [0], [1], [0, 0, 1, 1], [], []>} : vector<112x4xf32>, vector<4x20xf32>, vector<112x20xf32> -> vector<112x20xf32>
    %300 = arith.addf %295, %299 : vector<112x20xf32>
    %c3_312 = arith.constant 3 : index
    %c0_313 = arith.constant 0 : index
    %301 = vector.load %arg12[%c3_312, %c0_313] : memref<202x4xf32, #tpu.memory_space<vmem>>, vector<112x4xf32>
    %c3_314 = arith.constant 3 : index
    %c0_315 = arith.constant 0 : index
    %c0_316 = arith.constant 0 : index
    %302 = vector.load %arg7[%c3_314, %c0_315, %c0_316] : memref<49x4x20xf32, #tpu.memory_space<vmem>>, vector<1x4x20xf32>
    %303 = vector.shape_cast %302 : vector<1x4x20xf32> to vector<4x20xf32>
    %cst_317 = arith.constant dense<0.000000e+00> : vector<112x20xf32>
    %304 = tpu.matmul %301, %303, %cst_317 {dimension_numbers = #tpu.dot_dimension_numbers<[1], [0], [0], [1], [0, 0, 1, 1], [], []>} : vector<112x4xf32>, vector<4x20xf32>, vector<112x20xf32> -> vector<112x20xf32>
    %305 = arith.addf %300, %304 : vector<112x20xf32>
    %c4_318 = arith.constant 4 : index
    %c0_319 = arith.constant 0 : index
    %306 = vector.load %arg12[%c4_318, %c0_319] : memref<202x4xf32, #tpu.memory_space<vmem>>, vector<112x4xf32>
    %c4_320 = arith.constant 4 : index
    %c0_321 = arith.constant 0 : index
    %c0_322 = arith.constant 0 : index
    %307 = vector.load %arg7[%c4_320, %c0_321, %c0_322] : memref<49x4x20xf32, #tpu.memory_space<vmem>>, vector<1x4x20xf32>
    %308 = vector.shape_cast %307 : vector<1x4x20xf32> to vector<4x20xf32>
    %cst_323 = arith.constant dense<0.000000e+00> : vector<112x20xf32>
    %309 = tpu.matmul %306, %308, %cst_323 {dimension_numbers = #tpu.dot_dimension_numbers<[1], [0], [0], [1], [0, 0, 1, 1], [], []>} : vector<112x4xf32>, vector<4x20xf32>, vector<112x20xf32> -> vector<112x20xf32>
    %310 = arith.addf %305, %309 : vector<112x20xf32>
    %c5_324 = arith.constant 5 : index
    %c0_325 = arith.constant 0 : index
    %311 = vector.load %arg12[%c5_324, %c0_325] : memref<202x4xf32, #tpu.memory_space<vmem>>, vector<112x4xf32>
    %c5_326 = arith.constant 5 : index
    %c0_327 = arith.constant 0 : index
    %c0_328 = arith.constant 0 : index
    %312 = vector.load %arg7[%c5_326, %c0_327, %c0_328] : memref<49x4x20xf32, #tpu.memory_space<vmem>>, vector<1x4x20xf32>
    %313 = vector.shape_cast %312 : vector<1x4x20xf32> to vector<4x20xf32>
    %cst_329 = arith.constant dense<0.000000e+00> : vector<112x20xf32>
    %314 = tpu.matmul %311, %313, %cst_329 {dimension_numbers = #tpu.dot_dimension_numbers<[1], [0], [0], [1], [0, 0, 1, 1], [], []>} : vector<112x4xf32>, vector<4x20xf32>, vector<112x20xf32> -> vector<112x20xf32>
    %315 = arith.addf %310, %314 : vector<112x20xf32>
    %c6_330 = arith.constant 6 : index
    %c0_331 = arith.constant 0 : index
    %316 = vector.load %arg12[%c6_330, %c0_331] : memref<202x4xf32, #tpu.memory_space<vmem>>, vector<112x4xf32>
    %c6_332 = arith.constant 6 : index
    %c0_333 = arith.constant 0 : index
    %c0_334 = arith.constant 0 : index
    %317 = vector.load %arg7[%c6_332, %c0_333, %c0_334] : memref<49x4x20xf32, #tpu.memory_space<vmem>>, vector<1x4x20xf32>
    %318 = vector.shape_cast %317 : vector<1x4x20xf32> to vector<4x20xf32>
    %cst_335 = arith.constant dense<0.000000e+00> : vector<112x20xf32>
    %319 = tpu.matmul %316, %318, %cst_335 {dimension_numbers = #tpu.dot_dimension_numbers<[1], [0], [0], [1], [0, 0, 1, 1], [], []>} : vector<112x4xf32>, vector<4x20xf32>, vector<112x20xf32> -> vector<112x20xf32>
    %320 = arith.addf %315, %319 : vector<112x20xf32>
    %c14_336 = arith.constant 14 : index
    %c0_337 = arith.constant 0 : index
    %321 = vector.load %arg12[%c14_336, %c0_337] : memref<202x4xf32, #tpu.memory_space<vmem>>, vector<112x4xf32>
    %c7_338 = arith.constant 7 : index
    %c0_339 = arith.constant 0 : index
    %c0_340 = arith.constant 0 : index
    %322 = vector.load %arg7[%c7_338, %c0_339, %c0_340] : memref<49x4x20xf32, #tpu.memory_space<vmem>>, vector<1x4x20xf32>
    %323 = vector.shape_cast %322 : vector<1x4x20xf32> to vector<4x20xf32>
    %cst_341 = arith.constant dense<0.000000e+00> : vector<112x20xf32>
    %324 = tpu.matmul %321, %323, %cst_341 {dimension_numbers = #tpu.dot_dimension_numbers<[1], [0], [0], [1], [0, 0, 1, 1], [], []>} : vector<112x4xf32>, vector<4x20xf32>, vector<112x20xf32> -> vector<112x20xf32>
    %325 = arith.addf %320, %324 : vector<112x20xf32>
    %c15_342 = arith.constant 15 : index
    %c0_343 = arith.constant 0 : index
    %326 = vector.load %arg12[%c15_342, %c0_343] : memref<202x4xf32, #tpu.memory_space<vmem>>, vector<112x4xf32>
    %c8_344 = arith.constant 8 : index
    %c0_345 = arith.constant 0 : index
    %c0_346 = arith.constant 0 : index
    %327 = vector.load %arg7[%c8_344, %c0_345, %c0_346] : memref<49x4x20xf32, #tpu.memory_space<vmem>>, vector<1x4x20xf32>
    %328 = vector.shape_cast %327 : vector<1x4x20xf32> to vector<4x20xf32>
    %cst_347 = arith.constant dense<0.000000e+00> : vector<112x20xf32>
    %329 = tpu.matmul %326, %328, %cst_347 {dimension_numbers = #tpu.dot_dimension_numbers<[1], [0], [0], [1], [0, 0, 1, 1], [], []>} : vector<112x4xf32>, vector<4x20xf32>, vector<112x20xf32> -> vector<112x20xf32>
    %330 = arith.addf %325, %329 : vector<112x20xf32>
    %c16_348 = arith.constant 16 : index
    %c0_349 = arith.constant 0 : index
    %331 = vector.load %arg12[%c16_348, %c0_349] : memref<202x4xf32, #tpu.memory_space<vmem>>, vector<112x4xf32>
    %c9_350 = arith.constant 9 : index
    %c0_351 = arith.constant 0 : index
    %c0_352 = arith.constant 0 : index
    %332 = vector.load %arg7[%c9_350, %c0_351, %c0_352] : memref<49x4x20xf32, #tpu.memory_space<vmem>>, vector<1x4x20xf32>
    %333 = vector.shape_cast %332 : vector<1x4x20xf32> to vector<4x20xf32>
    %cst_353 = arith.constant dense<0.000000e+00> : vector<112x20xf32>
    %334 = tpu.matmul %331, %333, %cst_353 {dimension_numbers = #tpu.dot_dimension_numbers<[1], [0], [0], [1], [0, 0, 1, 1], [], []>} : vector<112x4xf32>, vector<4x20xf32>, vector<112x20xf32> -> vector<112x20xf32>
    %335 = arith.addf %330, %334 : vector<112x20xf32>
    %c17_354 = arith.constant 17 : index
    %c0_355 = arith.constant 0 : index
    %336 = vector.load %arg12[%c17_354, %c0_355] : memref<202x4xf32, #tpu.memory_space<vmem>>, vector<112x4xf32>
    %c10_356 = arith.constant 10 : index
    %c0_357 = arith.constant 0 : index
    %c0_358 = arith.constant 0 : index
    %337 = vector.load %arg7[%c10_356, %c0_357, %c0_358] : memref<49x4x20xf32, #tpu.memory_space<vmem>>, vector<1x4x20xf32>
    %338 = vector.shape_cast %337 : vector<1x4x20xf32> to vector<4x20xf32>
    %cst_359 = arith.constant dense<0.000000e+00> : vector<112x20xf32>
    %339 = tpu.matmul %336, %338, %cst_359 {dimension_numbers = #tpu.dot_dimension_numbers<[1], [0], [0], [1], [0, 0, 1, 1], [], []>} : vector<112x4xf32>, vector<4x20xf32>, vector<112x20xf32> -> vector<112x20xf32>
    %340 = arith.addf %335, %339 : vector<112x20xf32>
    %c18_360 = arith.constant 18 : index
    %c0_361 = arith.constant 0 : index
    %341 = vector.load %arg12[%c18_360, %c0_361] : memref<202x4xf32, #tpu.memory_space<vmem>>, vector<112x4xf32>
    %c11_362 = arith.constant 11 : index
    %c0_363 = arith.constant 0 : index
    %c0_364 = arith.constant 0 : index
    %342 = vector.load %arg7[%c11_362, %c0_363, %c0_364] : memref<49x4x20xf32, #tpu.memory_space<vmem>>, vector<1x4x20xf32>
    %343 = vector.shape_cast %342 : vector<1x4x20xf32> to vector<4x20xf32>
    %cst_365 = arith.constant dense<0.000000e+00> : vector<112x20xf32>
    %344 = tpu.matmul %341, %343, %cst_365 {dimension_numbers = #tpu.dot_dimension_numbers<[1], [0], [0], [1], [0, 0, 1, 1], [], []>} : vector<112x4xf32>, vector<4x20xf32>, vector<112x20xf32> -> vector<112x20xf32>
    %345 = arith.addf %340, %344 : vector<112x20xf32>
    %c19_366 = arith.constant 19 : index
    %c0_367 = arith.constant 0 : index
    %346 = vector.load %arg12[%c19_366, %c0_367] : memref<202x4xf32, #tpu.memory_space<vmem>>, vector<112x4xf32>
    %c12_368 = arith.constant 12 : index
    %c0_369 = arith.constant 0 : index
    %c0_370 = arith.constant 0 : index
    %347 = vector.load %arg7[%c12_368, %c0_369, %c0_370] : memref<49x4x20xf32, #tpu.memory_space<vmem>>, vector<1x4x20xf32>
    %348 = vector.shape_cast %347 : vector<1x4x20xf32> to vector<4x20xf32>
    %cst_371 = arith.constant dense<0.000000e+00> : vector<112x20xf32>
    %349 = tpu.matmul %346, %348, %cst_371 {dimension_numbers = #tpu.dot_dimension_numbers<[1], [0], [0], [1], [0, 0, 1, 1], [], []>} : vector<112x4xf32>, vector<4x20xf32>, vector<112x20xf32> -> vector<112x20xf32>
    %350 = arith.addf %345, %349 : vector<112x20xf32>
    %c20_372 = arith.constant 20 : index
    %c0_373 = arith.constant 0 : index
    %351 = vector.load %arg12[%c20_372, %c0_373] : memref<202x4xf32, #tpu.memory_space<vmem>>, vector<112x4xf32>
    %c13_374 = arith.constant 13 : index
    %c0_375 = arith.constant 0 : index
    %c0_376 = arith.constant 0 : index
    %352 = vector.load %arg7[%c13_374, %c0_375, %c0_376] : memref<49x4x20xf32, #tpu.memory_space<vmem>>, vector<1x4x20xf32>
    %353 = vector.shape_cast %352 : vector<1x4x20xf32> to vector<4x20xf32>
    %cst_377 = arith.constant dense<0.000000e+00> : vector<112x20xf32>
    %354 = tpu.matmul %351, %353, %cst_377 {dimension_numbers = #tpu.dot_dimension_numbers<[1], [0], [0], [1], [0, 0, 1, 1], [], []>} : vector<112x4xf32>, vector<4x20xf32>, vector<112x20xf32> -> vector<112x20xf32>
    %355 = arith.addf %350, %354 : vector<112x20xf32>
    %c28 = arith.constant 28 : index
    %c0_378 = arith.constant 0 : index
    %356 = vector.load %arg12[%c28, %c0_378] : memref<202x4xf32, #tpu.memory_space<vmem>>, vector<112x4xf32>
    %c14_379 = arith.constant 14 : index
    %c0_380 = arith.constant 0 : index
    %c0_381 = arith.constant 0 : index
    %357 = vector.load %arg7[%c14_379, %c0_380, %c0_381] : memref<49x4x20xf32, #tpu.memory_space<vmem>>, vector<1x4x20xf32>
    %358 = vector.shape_cast %357 : vector<1x4x20xf32> to vector<4x20xf32>
    %cst_382 = arith.constant dense<0.000000e+00> : vector<112x20xf32>
    %359 = tpu.matmul %356, %358, %cst_382 {dimension_numbers = #tpu.dot_dimension_numbers<[1], [0], [0], [1], [0, 0, 1, 1], [], []>} : vector<112x4xf32>, vector<4x20xf32>, vector<112x20xf32> -> vector<112x20xf32>
    %360 = arith.addf %355, %359 : vector<112x20xf32>
    %c29_383 = arith.constant 29 : index
    %c0_384 = arith.constant 0 : index
    %361 = vector.load %arg12[%c29_383, %c0_384] : memref<202x4xf32, #tpu.memory_space<vmem>>, vector<112x4xf32>
    %c15_385 = arith.constant 15 : index
    %c0_386 = arith.constant 0 : index
    %c0_387 = arith.constant 0 : index
    %362 = vector.load %arg7[%c15_385, %c0_386, %c0_387] : memref<49x4x20xf32, #tpu.memory_space<vmem>>, vector<1x4x20xf32>
    %363 = vector.shape_cast %362 : vector<1x4x20xf32> to vector<4x20xf32>
    %cst_388 = arith.constant dense<0.000000e+00> : vector<112x20xf32>
    %364 = tpu.matmul %361, %363, %cst_388 {dimension_numbers = #tpu.dot_dimension_numbers<[1], [0], [0], [1], [0, 0, 1, 1], [], []>} : vector<112x4xf32>, vector<4x20xf32>, vector<112x20xf32> -> vector<112x20xf32>
    %365 = arith.addf %360, %364 : vector<112x20xf32>
    %c30_389 = arith.constant 30 : index
    %c0_390 = arith.constant 0 : index
    %366 = vector.load %arg12[%c30_389, %c0_390] : memref<202x4xf32, #tpu.memory_space<vmem>>, vector<112x4xf32>
    %c16_391 = arith.constant 16 : index
    %c0_392 = arith.constant 0 : index
    %c0_393 = arith.constant 0 : index
    %367 = vector.load %arg7[%c16_391, %c0_392, %c0_393] : memref<49x4x20xf32, #tpu.memory_space<vmem>>, vector<1x4x20xf32>
    %368 = vector.shape_cast %367 : vector<1x4x20xf32> to vector<4x20xf32>
    %cst_394 = arith.constant dense<0.000000e+00> : vector<112x20xf32>
    %369 = tpu.matmul %366, %368, %cst_394 {dimension_numbers = #tpu.dot_dimension_numbers<[1], [0], [0], [1], [0, 0, 1, 1], [], []>} : vector<112x4xf32>, vector<4x20xf32>, vector<112x20xf32> -> vector<112x20xf32>
    %370 = arith.addf %365, %369 : vector<112x20xf32>
    %c31_395 = arith.constant 31 : index
    %c0_396 = arith.constant 0 : index
    %371 = vector.load %arg12[%c31_395, %c0_396] : memref<202x4xf32, #tpu.memory_space<vmem>>, vector<112x4xf32>
    %c17_397 = arith.constant 17 : index
    %c0_398 = arith.constant 0 : index
    %c0_399 = arith.constant 0 : index
    %372 = vector.load %arg7[%c17_397, %c0_398, %c0_399] : memref<49x4x20xf32, #tpu.memory_space<vmem>>, vector<1x4x20xf32>
    %373 = vector.shape_cast %372 : vector<1x4x20xf32> to vector<4x20xf32>
    %cst_400 = arith.constant dense<0.000000e+00> : vector<112x20xf32>
    %374 = tpu.matmul %371, %373, %cst_400 {dimension_numbers = #tpu.dot_dimension_numbers<[1], [0], [0], [1], [0, 0, 1, 1], [], []>} : vector<112x4xf32>, vector<4x20xf32>, vector<112x20xf32> -> vector<112x20xf32>
    %375 = arith.addf %370, %374 : vector<112x20xf32>
    %c32_401 = arith.constant 32 : index
    %c0_402 = arith.constant 0 : index
    %376 = vector.load %arg12[%c32_401, %c0_402] : memref<202x4xf32, #tpu.memory_space<vmem>>, vector<112x4xf32>
    %c18_403 = arith.constant 18 : index
    %c0_404 = arith.constant 0 : index
    %c0_405 = arith.constant 0 : index
    %377 = vector.load %arg7[%c18_403, %c0_404, %c0_405] : memref<49x4x20xf32, #tpu.memory_space<vmem>>, vector<1x4x20xf32>
    %378 = vector.shape_cast %377 : vector<1x4x20xf32> to vector<4x20xf32>
    %cst_406 = arith.constant dense<0.000000e+00> : vector<112x20xf32>
    %379 = tpu.matmul %376, %378, %cst_406 {dimension_numbers = #tpu.dot_dimension_numbers<[1], [0], [0], [1], [0, 0, 1, 1], [], []>} : vector<112x4xf32>, vector<4x20xf32>, vector<112x20xf32> -> vector<112x20xf32>
    %380 = arith.addf %375, %379 : vector<112x20xf32>
    %c33_407 = arith.constant 33 : index
    %c0_408 = arith.constant 0 : index
    %381 = vector.load %arg12[%c33_407, %c0_408] : memref<202x4xf32, #tpu.memory_space<vmem>>, vector<112x4xf32>
    %c19_409 = arith.constant 19 : index
    %c0_410 = arith.constant 0 : index
    %c0_411 = arith.constant 0 : index
    %382 = vector.load %arg7[%c19_409, %c0_410, %c0_411] : memref<49x4x20xf32, #tpu.memory_space<vmem>>, vector<1x4x20xf32>
    %383 = vector.shape_cast %382 : vector<1x4x20xf32> to vector<4x20xf32>
    %cst_412 = arith.constant dense<0.000000e+00> : vector<112x20xf32>
    %384 = tpu.matmul %381, %383, %cst_412 {dimension_numbers = #tpu.dot_dimension_numbers<[1], [0], [0], [1], [0, 0, 1, 1], [], []>} : vector<112x4xf32>, vector<4x20xf32>, vector<112x20xf32> -> vector<112x20xf32>
    %385 = arith.addf %380, %384 : vector<112x20xf32>
    %c34 = arith.constant 34 : index
    %c0_413 = arith.constant 0 : index
    %386 = vector.load %arg12[%c34, %c0_413] : memref<202x4xf32, #tpu.memory_space<vmem>>, vector<112x4xf32>
    %c20_414 = arith.constant 20 : index
    %c0_415 = arith.constant 0 : index
    %c0_416 = arith.constant 0 : index
    %387 = vector.load %arg7[%c20_414, %c0_415, %c0_416] : memref<49x4x20xf32, #tpu.memory_space<vmem>>, vector<1x4x20xf32>
    %388 = vector.shape_cast %387 : vector<1x4x20xf32> to vector<4x20xf32>
    %cst_417 = arith.constant dense<0.000000e+00> : vector<112x20xf32>
    %389 = tpu.matmul %386, %388, %cst_417 {dimension_numbers = #tpu.dot_dimension_numbers<[1], [0], [0], [1], [0, 0, 1, 1], [], []>} : vector<112x4xf32>, vector<4x20xf32>, vector<112x20xf32> -> vector<112x20xf32>
    %390 = arith.addf %385, %389 : vector<112x20xf32>
    %c42 = arith.constant 42 : index
    %c0_418 = arith.constant 0 : index
    %391 = vector.load %arg12[%c42, %c0_418] : memref<202x4xf32, #tpu.memory_space<vmem>>, vector<112x4xf32>
    %c21_419 = arith.constant 21 : index
    %c0_420 = arith.constant 0 : index
    %c0_421 = arith.constant 0 : index
    %392 = vector.load %arg7[%c21_419, %c0_420, %c0_421] : memref<49x4x20xf32, #tpu.memory_space<vmem>>, vector<1x4x20xf32>
    %393 = vector.shape_cast %392 : vector<1x4x20xf32> to vector<4x20xf32>
    %cst_422 = arith.constant dense<0.000000e+00> : vector<112x20xf32>
    %394 = tpu.matmul %391, %393, %cst_422 {dimension_numbers = #tpu.dot_dimension_numbers<[1], [0], [0], [1], [0, 0, 1, 1], [], []>} : vector<112x4xf32>, vector<4x20xf32>, vector<112x20xf32> -> vector<112x20xf32>
    %395 = arith.addf %390, %394 : vector<112x20xf32>
    %c43_423 = arith.constant 43 : index
    %c0_424 = arith.constant 0 : index
    %396 = vector.load %arg12[%c43_423, %c0_424] : memref<202x4xf32, #tpu.memory_space<vmem>>, vector<112x4xf32>
    %c22_425 = arith.constant 22 : index
    %c0_426 = arith.constant 0 : index
    %c0_427 = arith.constant 0 : index
    %397 = vector.load %arg7[%c22_425, %c0_426, %c0_427] : memref<49x4x20xf32, #tpu.memory_space<vmem>>, vector<1x4x20xf32>
    %398 = vector.shape_cast %397 : vector<1x4x20xf32> to vector<4x20xf32>
    %cst_428 = arith.constant dense<0.000000e+00> : vector<112x20xf32>
    %399 = tpu.matmul %396, %398, %cst_428 {dimension_numbers = #tpu.dot_dimension_numbers<[1], [0], [0], [1], [0, 0, 1, 1], [], []>} : vector<112x4xf32>, vector<4x20xf32>, vector<112x20xf32> -> vector<112x20xf32>
    %400 = arith.addf %395, %399 : vector<112x20xf32>
    %c44_429 = arith.constant 44 : index
    %c0_430 = arith.constant 0 : index
    %401 = vector.load %arg12[%c44_429, %c0_430] : memref<202x4xf32, #tpu.memory_space<vmem>>, vector<112x4xf32>
    %c23_431 = arith.constant 23 : index
    %c0_432 = arith.constant 0 : index
    %c0_433 = arith.constant 0 : index
    %402 = vector.load %arg7[%c23_431, %c0_432, %c0_433] : memref<49x4x20xf32, #tpu.memory_space<vmem>>, vector<1x4x20xf32>
    %403 = vector.shape_cast %402 : vector<1x4x20xf32> to vector<4x20xf32>
    %cst_434 = arith.constant dense<0.000000e+00> : vector<112x20xf32>
    %404 = tpu.matmul %401, %403, %cst_434 {dimension_numbers = #tpu.dot_dimension_numbers<[1], [0], [0], [1], [0, 0, 1, 1], [], []>} : vector<112x4xf32>, vector<4x20xf32>, vector<112x20xf32> -> vector<112x20xf32>
    %405 = arith.addf %400, %404 : vector<112x20xf32>
    %c45_435 = arith.constant 45 : index
    %c0_436 = arith.constant 0 : index
    %406 = vector.load %arg12[%c45_435, %c0_436] : memref<202x4xf32, #tpu.memory_space<vmem>>, vector<112x4xf32>
    %c24_437 = arith.constant 24 : index
    %c0_438 = arith.constant 0 : index
    %c0_439 = arith.constant 0 : index
    %407 = vector.load %arg7[%c24_437, %c0_438, %c0_439] : memref<49x4x20xf32, #tpu.memory_space<vmem>>, vector<1x4x20xf32>
    %408 = vector.shape_cast %407 : vector<1x4x20xf32> to vector<4x20xf32>
    %cst_440 = arith.constant dense<0.000000e+00> : vector<112x20xf32>
    %409 = tpu.matmul %406, %408, %cst_440 {dimension_numbers = #tpu.dot_dimension_numbers<[1], [0], [0], [1], [0, 0, 1, 1], [], []>} : vector<112x4xf32>, vector<4x20xf32>, vector<112x20xf32> -> vector<112x20xf32>
    %410 = arith.addf %405, %409 : vector<112x20xf32>
    %c46_441 = arith.constant 46 : index
    %c0_442 = arith.constant 0 : index
    %411 = vector.load %arg12[%c46_441, %c0_442] : memref<202x4xf32, #tpu.memory_space<vmem>>, vector<112x4xf32>
    %c25 = arith.constant 25 : index
    %c0_443 = arith.constant 0 : index
    %c0_444 = arith.constant 0 : index
    %412 = vector.load %arg7[%c25, %c0_443, %c0_444] : memref<49x4x20xf32, #tpu.memory_space<vmem>>, vector<1x4x20xf32>
    %413 = vector.shape_cast %412 : vector<1x4x20xf32> to vector<4x20xf32>
    %cst_445 = arith.constant dense<0.000000e+00> : vector<112x20xf32>
    %414 = tpu.matmul %411, %413, %cst_445 {dimension_numbers = #tpu.dot_dimension_numbers<[1], [0], [0], [1], [0, 0, 1, 1], [], []>} : vector<112x4xf32>, vector<4x20xf32>, vector<112x20xf32> -> vector<112x20xf32>
    %415 = arith.addf %410, %414 : vector<112x20xf32>
    %c47_446 = arith.constant 47 : index
    %c0_447 = arith.constant 0 : index
    %416 = vector.load %arg12[%c47_446, %c0_447] : memref<202x4xf32, #tpu.memory_space<vmem>>, vector<112x4xf32>
    %c26 = arith.constant 26 : index
    %c0_448 = arith.constant 0 : index
    %c0_449 = arith.constant 0 : index
    %417 = vector.load %arg7[%c26, %c0_448, %c0_449] : memref<49x4x20xf32, #tpu.memory_space<vmem>>, vector<1x4x20xf32>
    %418 = vector.shape_cast %417 : vector<1x4x20xf32> to vector<4x20xf32>
    %cst_450 = arith.constant dense<0.000000e+00> : vector<112x20xf32>
    %419 = tpu.matmul %416, %418, %cst_450 {dimension_numbers = #tpu.dot_dimension_numbers<[1], [0], [0], [1], [0, 0, 1, 1], [], []>} : vector<112x4xf32>, vector<4x20xf32>, vector<112x20xf32> -> vector<112x20xf32>
    %420 = arith.addf %415, %419 : vector<112x20xf32>
    %c48 = arith.constant 48 : index
    %c0_451 = arith.constant 0 : index
    %421 = vector.load %arg12[%c48, %c0_451] : memref<202x4xf32, #tpu.memory_space<vmem>>, vector<112x4xf32>
    %c27 = arith.constant 27 : index
    %c0_452 = arith.constant 0 : index
    %c0_453 = arith.constant 0 : index
    %422 = vector.load %arg7[%c27, %c0_452, %c0_453] : memref<49x4x20xf32, #tpu.memory_space<vmem>>, vector<1x4x20xf32>
    %423 = vector.shape_cast %422 : vector<1x4x20xf32> to vector<4x20xf32>
    %cst_454 = arith.constant dense<0.000000e+00> : vector<112x20xf32>
    %424 = tpu.matmul %421, %423, %cst_454 {dimension_numbers = #tpu.dot_dimension_numbers<[1], [0], [0], [1], [0, 0, 1, 1], [], []>} : vector<112x4xf32>, vector<4x20xf32>, vector<112x20xf32> -> vector<112x20xf32>
    %425 = arith.addf %420, %424 : vector<112x20xf32>
    %c56 = arith.constant 56 : index
    %c0_455 = arith.constant 0 : index
    %426 = vector.load %arg12[%c56, %c0_455] : memref<202x4xf32, #tpu.memory_space<vmem>>, vector<112x4xf32>
    %c28_456 = arith.constant 28 : index
    %c0_457 = arith.constant 0 : index
    %c0_458 = arith.constant 0 : index
    %427 = vector.load %arg7[%c28_456, %c0_457, %c0_458] : memref<49x4x20xf32, #tpu.memory_space<vmem>>, vector<1x4x20xf32>
    %428 = vector.shape_cast %427 : vector<1x4x20xf32> to vector<4x20xf32>
    %cst_459 = arith.constant dense<0.000000e+00> : vector<112x20xf32>
    %429 = tpu.matmul %426, %428, %cst_459 {dimension_numbers = #tpu.dot_dimension_numbers<[1], [0], [0], [1], [0, 0, 1, 1], [], []>} : vector<112x4xf32>, vector<4x20xf32>, vector<112x20xf32> -> vector<112x20xf32>
    %430 = arith.addf %425, %429 : vector<112x20xf32>
    %c57_460 = arith.constant 57 : index
    %c0_461 = arith.constant 0 : index
    %431 = vector.load %arg12[%c57_460, %c0_461] : memref<202x4xf32, #tpu.memory_space<vmem>>, vector<112x4xf32>
    %c29_462 = arith.constant 29 : index
    %c0_463 = arith.constant 0 : index
    %c0_464 = arith.constant 0 : index
    %432 = vector.load %arg7[%c29_462, %c0_463, %c0_464] : memref<49x4x20xf32, #tpu.memory_space<vmem>>, vector<1x4x20xf32>
    %433 = vector.shape_cast %432 : vector<1x4x20xf32> to vector<4x20xf32>
    %cst_465 = arith.constant dense<0.000000e+00> : vector<112x20xf32>
    %434 = tpu.matmul %431, %433, %cst_465 {dimension_numbers = #tpu.dot_dimension_numbers<[1], [0], [0], [1], [0, 0, 1, 1], [], []>} : vector<112x4xf32>, vector<4x20xf32>, vector<112x20xf32> -> vector<112x20xf32>
    %435 = arith.addf %430, %434 : vector<112x20xf32>
    %c58_466 = arith.constant 58 : index
    %c0_467 = arith.constant 0 : index
    %436 = vector.load %arg12[%c58_466, %c0_467] : memref<202x4xf32, #tpu.memory_space<vmem>>, vector<112x4xf32>
    %c30_468 = arith.constant 30 : index
    %c0_469 = arith.constant 0 : index
    %c0_470 = arith.constant 0 : index
    %437 = vector.load %arg7[%c30_468, %c0_469, %c0_470] : memref<49x4x20xf32, #tpu.memory_space<vmem>>, vector<1x4x20xf32>
    %438 = vector.shape_cast %437 : vector<1x4x20xf32> to vector<4x20xf32>
    %cst_471 = arith.constant dense<0.000000e+00> : vector<112x20xf32>
    %439 = tpu.matmul %436, %438, %cst_471 {dimension_numbers = #tpu.dot_dimension_numbers<[1], [0], [0], [1], [0, 0, 1, 1], [], []>} : vector<112x4xf32>, vector<4x20xf32>, vector<112x20xf32> -> vector<112x20xf32>
    %440 = arith.addf %435, %439 : vector<112x20xf32>
    %c59_472 = arith.constant 59 : index
    %c0_473 = arith.constant 0 : index
    %441 = vector.load %arg12[%c59_472, %c0_473] : memref<202x4xf32, #tpu.memory_space<vmem>>, vector<112x4xf32>
    %c31_474 = arith.constant 31 : index
    %c0_475 = arith.constant 0 : index
    %c0_476 = arith.constant 0 : index
    %442 = vector.load %arg7[%c31_474, %c0_475, %c0_476] : memref<49x4x20xf32, #tpu.memory_space<vmem>>, vector<1x4x20xf32>
    %443 = vector.shape_cast %442 : vector<1x4x20xf32> to vector<4x20xf32>
    %cst_477 = arith.constant dense<0.000000e+00> : vector<112x20xf32>
    %444 = tpu.matmul %441, %443, %cst_477 {dimension_numbers = #tpu.dot_dimension_numbers<[1], [0], [0], [1], [0, 0, 1, 1], [], []>} : vector<112x4xf32>, vector<4x20xf32>, vector<112x20xf32> -> vector<112x20xf32>
    %445 = arith.addf %440, %444 : vector<112x20xf32>
    %c60_478 = arith.constant 60 : index
    %c0_479 = arith.constant 0 : index
    %446 = vector.load %arg12[%c60_478, %c0_479] : memref<202x4xf32, #tpu.memory_space<vmem>>, vector<112x4xf32>
    %c32_480 = arith.constant 32 : index
    %c0_481 = arith.constant 0 : index
    %c0_482 = arith.constant 0 : index
    %447 = vector.load %arg7[%c32_480, %c0_481, %c0_482] : memref<49x4x20xf32, #tpu.memory_space<vmem>>, vector<1x4x20xf32>
    %448 = vector.shape_cast %447 : vector<1x4x20xf32> to vector<4x20xf32>
    %cst_483 = arith.constant dense<0.000000e+00> : vector<112x20xf32>
    %449 = tpu.matmul %446, %448, %cst_483 {dimension_numbers = #tpu.dot_dimension_numbers<[1], [0], [0], [1], [0, 0, 1, 1], [], []>} : vector<112x4xf32>, vector<4x20xf32>, vector<112x20xf32> -> vector<112x20xf32>
    %450 = arith.addf %445, %449 : vector<112x20xf32>
    %c61_484 = arith.constant 61 : index
    %c0_485 = arith.constant 0 : index
    %451 = vector.load %arg12[%c61_484, %c0_485] : memref<202x4xf32, #tpu.memory_space<vmem>>, vector<112x4xf32>
    %c33_486 = arith.constant 33 : index
    %c0_487 = arith.constant 0 : index
    %c0_488 = arith.constant 0 : index
    %452 = vector.load %arg7[%c33_486, %c0_487, %c0_488] : memref<49x4x20xf32, #tpu.memory_space<vmem>>, vector<1x4x20xf32>
    %453 = vector.shape_cast %452 : vector<1x4x20xf32> to vector<4x20xf32>
    %cst_489 = arith.constant dense<0.000000e+00> : vector<112x20xf32>
    %454 = tpu.matmul %451, %453, %cst_489 {dimension_numbers = #tpu.dot_dimension_numbers<[1], [0], [0], [1], [0, 0, 1, 1], [], []>} : vector<112x4xf32>, vector<4x20xf32>, vector<112x20xf32> -> vector<112x20xf32>
    %455 = arith.addf %450, %454 : vector<112x20xf32>
    %c62 = arith.constant 62 : index
    %c0_490 = arith.constant 0 : index
    %456 = vector.load %arg12[%c62, %c0_490] : memref<202x4xf32, #tpu.memory_space<vmem>>, vector<112x4xf32>
    %c34_491 = arith.constant 34 : index
    %c0_492 = arith.constant 0 : index
    %c0_493 = arith.constant 0 : index
    %457 = vector.load %arg7[%c34_491, %c0_492, %c0_493] : memref<49x4x20xf32, #tpu.memory_space<vmem>>, vector<1x4x20xf32>
    %458 = vector.shape_cast %457 : vector<1x4x20xf32> to vector<4x20xf32>
    %cst_494 = arith.constant dense<0.000000e+00> : vector<112x20xf32>
    %459 = tpu.matmul %456, %458, %cst_494 {dimension_numbers = #tpu.dot_dimension_numbers<[1], [0], [0], [1], [0, 0, 1, 1], [], []>} : vector<112x4xf32>, vector<4x20xf32>, vector<112x20xf32> -> vector<112x20xf32>
    %460 = arith.addf %455, %459 : vector<112x20xf32>
    %c70 = arith.constant 70 : index
    %c0_495 = arith.constant 0 : index
    %461 = vector.load %arg12[%c70, %c0_495] : memref<202x4xf32, #tpu.memory_space<vmem>>, vector<112x4xf32>
    %c35 = arith.constant 35 : index
    %c0_496 = arith.constant 0 : index
    %c0_497 = arith.constant 0 : index
    %462 = vector.load %arg7[%c35, %c0_496, %c0_497] : memref<49x4x20xf32, #tpu.memory_space<vmem>>, vector<1x4x20xf32>
    %463 = vector.shape_cast %462 : vector<1x4x20xf32> to vector<4x20xf32>
    %cst_498 = arith.constant dense<0.000000e+00> : vector<112x20xf32>
    %464 = tpu.matmul %461, %463, %cst_498 {dimension_numbers = #tpu.dot_dimension_numbers<[1], [0], [0], [1], [0, 0, 1, 1], [], []>} : vector<112x4xf32>, vector<4x20xf32>, vector<112x20xf32> -> vector<112x20xf32>
    %465 = arith.addf %460, %464 : vector<112x20xf32>
    %c71_499 = arith.constant 71 : index
    %c0_500 = arith.constant 0 : index
    %466 = vector.load %arg12[%c71_499, %c0_500] : memref<202x4xf32, #tpu.memory_space<vmem>>, vector<112x4xf32>
    %c36 = arith.constant 36 : index
    %c0_501 = arith.constant 0 : index
    %c0_502 = arith.constant 0 : index
    %467 = vector.load %arg7[%c36, %c0_501, %c0_502] : memref<49x4x20xf32, #tpu.memory_space<vmem>>, vector<1x4x20xf32>
    %468 = vector.shape_cast %467 : vector<1x4x20xf32> to vector<4x20xf32>
    %cst_503 = arith.constant dense<0.000000e+00> : vector<112x20xf32>
    %469 = tpu.matmul %466, %468, %cst_503 {dimension_numbers = #tpu.dot_dimension_numbers<[1], [0], [0], [1], [0, 0, 1, 1], [], []>} : vector<112x4xf32>, vector<4x20xf32>, vector<112x20xf32> -> vector<112x20xf32>
    %470 = arith.addf %465, %469 : vector<112x20xf32>
    %c72_504 = arith.constant 72 : index
    %c0_505 = arith.constant 0 : index
    %471 = vector.load %arg12[%c72_504, %c0_505] : memref<202x4xf32, #tpu.memory_space<vmem>>, vector<112x4xf32>
    %c37 = arith.constant 37 : index
    %c0_506 = arith.constant 0 : index
    %c0_507 = arith.constant 0 : index
    %472 = vector.load %arg7[%c37, %c0_506, %c0_507] : memref<49x4x20xf32, #tpu.memory_space<vmem>>, vector<1x4x20xf32>
    %473 = vector.shape_cast %472 : vector<1x4x20xf32> to vector<4x20xf32>
    %cst_508 = arith.constant dense<0.000000e+00> : vector<112x20xf32>
    %474 = tpu.matmul %471, %473, %cst_508 {dimension_numbers = #tpu.dot_dimension_numbers<[1], [0], [0], [1], [0, 0, 1, 1], [], []>} : vector<112x4xf32>, vector<4x20xf32>, vector<112x20xf32> -> vector<112x20xf32>
    %475 = arith.addf %470, %474 : vector<112x20xf32>
    %c73_509 = arith.constant 73 : index
    %c0_510 = arith.constant 0 : index
    %476 = vector.load %arg12[%c73_509, %c0_510] : memref<202x4xf32, #tpu.memory_space<vmem>>, vector<112x4xf32>
    %c38 = arith.constant 38 : index
    %c0_511 = arith.constant 0 : index
    %c0_512 = arith.constant 0 : index
    %477 = vector.load %arg7[%c38, %c0_511, %c0_512] : memref<49x4x20xf32, #tpu.memory_space<vmem>>, vector<1x4x20xf32>
    %478 = vector.shape_cast %477 : vector<1x4x20xf32> to vector<4x20xf32>
    %cst_513 = arith.constant dense<0.000000e+00> : vector<112x20xf32>
    %479 = tpu.matmul %476, %478, %cst_513 {dimension_numbers = #tpu.dot_dimension_numbers<[1], [0], [0], [1], [0, 0, 1, 1], [], []>} : vector<112x4xf32>, vector<4x20xf32>, vector<112x20xf32> -> vector<112x20xf32>
    %480 = arith.addf %475, %479 : vector<112x20xf32>
    %c74_514 = arith.constant 74 : index
    %c0_515 = arith.constant 0 : index
    %481 = vector.load %arg12[%c74_514, %c0_515] : memref<202x4xf32, #tpu.memory_space<vmem>>, vector<112x4xf32>
    %c39 = arith.constant 39 : index
    %c0_516 = arith.constant 0 : index
    %c0_517 = arith.constant 0 : index
    %482 = vector.load %arg7[%c39, %c0_516, %c0_517] : memref<49x4x20xf32, #tpu.memory_space<vmem>>, vector<1x4x20xf32>
    %483 = vector.shape_cast %482 : vector<1x4x20xf32> to vector<4x20xf32>
    %cst_518 = arith.constant dense<0.000000e+00> : vector<112x20xf32>
    %484 = tpu.matmul %481, %483, %cst_518 {dimension_numbers = #tpu.dot_dimension_numbers<[1], [0], [0], [1], [0, 0, 1, 1], [], []>} : vector<112x4xf32>, vector<4x20xf32>, vector<112x20xf32> -> vector<112x20xf32>
    %485 = arith.addf %480, %484 : vector<112x20xf32>
    %c75_519 = arith.constant 75 : index
    %c0_520 = arith.constant 0 : index
    %486 = vector.load %arg12[%c75_519, %c0_520] : memref<202x4xf32, #tpu.memory_space<vmem>>, vector<112x4xf32>
    %c40 = arith.constant 40 : index
    %c0_521 = arith.constant 0 : index
    %c0_522 = arith.constant 0 : index
    %487 = vector.load %arg7[%c40, %c0_521, %c0_522] : memref<49x4x20xf32, #tpu.memory_space<vmem>>, vector<1x4x20xf32>
    %488 = vector.shape_cast %487 : vector<1x4x20xf32> to vector<4x20xf32>
    %cst_523 = arith.constant dense<0.000000e+00> : vector<112x20xf32>
    %489 = tpu.matmul %486, %488, %cst_523 {dimension_numbers = #tpu.dot_dimension_numbers<[1], [0], [0], [1], [0, 0, 1, 1], [], []>} : vector<112x4xf32>, vector<4x20xf32>, vector<112x20xf32> -> vector<112x20xf32>
    %490 = arith.addf %485, %489 : vector<112x20xf32>
    %c76 = arith.constant 76 : index
    %c0_524 = arith.constant 0 : index
    %491 = vector.load %arg12[%c76, %c0_524] : memref<202x4xf32, #tpu.memory_space<vmem>>, vector<112x4xf32>
    %c41 = arith.constant 41 : index
    %c0_525 = arith.constant 0 : index
    %c0_526 = arith.constant 0 : index
    %492 = vector.load %arg7[%c41, %c0_525, %c0_526] : memref<49x4x20xf32, #tpu.memory_space<vmem>>, vector<1x4x20xf32>
    %493 = vector.shape_cast %492 : vector<1x4x20xf32> to vector<4x20xf32>
    %cst_527 = arith.constant dense<0.000000e+00> : vector<112x20xf32>
    %494 = tpu.matmul %491, %493, %cst_527 {dimension_numbers = #tpu.dot_dimension_numbers<[1], [0], [0], [1], [0, 0, 1, 1], [], []>} : vector<112x4xf32>, vector<4x20xf32>, vector<112x20xf32> -> vector<112x20xf32>
    %495 = arith.addf %490, %494 : vector<112x20xf32>
    %c84 = arith.constant 84 : index
    %c0_528 = arith.constant 0 : index
    %496 = vector.load %arg12[%c84, %c0_528] : memref<202x4xf32, #tpu.memory_space<vmem>>, vector<112x4xf32>
    %c42_529 = arith.constant 42 : index
    %c0_530 = arith.constant 0 : index
    %c0_531 = arith.constant 0 : index
    %497 = vector.load %arg7[%c42_529, %c0_530, %c0_531] : memref<49x4x20xf32, #tpu.memory_space<vmem>>, vector<1x4x20xf32>
    %498 = vector.shape_cast %497 : vector<1x4x20xf32> to vector<4x20xf32>
    %cst_532 = arith.constant dense<0.000000e+00> : vector<112x20xf32>
    %499 = tpu.matmul %496, %498, %cst_532 {dimension_numbers = #tpu.dot_dimension_numbers<[1], [0], [0], [1], [0, 0, 1, 1], [], []>} : vector<112x4xf32>, vector<4x20xf32>, vector<112x20xf32> -> vector<112x20xf32>
    %500 = arith.addf %495, %499 : vector<112x20xf32>
    %c85 = arith.constant 85 : index
    %c0_533 = arith.constant 0 : index
    %501 = vector.load %arg12[%c85, %c0_533] : memref<202x4xf32, #tpu.memory_space<vmem>>, vector<112x4xf32>
    %c43_534 = arith.constant 43 : index
    %c0_535 = arith.constant 0 : index
    %c0_536 = arith.constant 0 : index
    %502 = vector.load %arg7[%c43_534, %c0_535, %c0_536] : memref<49x4x20xf32, #tpu.memory_space<vmem>>, vector<1x4x20xf32>
    %503 = vector.shape_cast %502 : vector<1x4x20xf32> to vector<4x20xf32>
    %cst_537 = arith.constant dense<0.000000e+00> : vector<112x20xf32>
    %504 = tpu.matmul %501, %503, %cst_537 {dimension_numbers = #tpu.dot_dimension_numbers<[1], [0], [0], [1], [0, 0, 1, 1], [], []>} : vector<112x4xf32>, vector<4x20xf32>, vector<112x20xf32> -> vector<112x20xf32>
    %505 = arith.addf %500, %504 : vector<112x20xf32>
    %c86 = arith.constant 86 : index
    %c0_538 = arith.constant 0 : index
    %506 = vector.load %arg12[%c86, %c0_538] : memref<202x4xf32, #tpu.memory_space<vmem>>, vector<112x4xf32>
    %c44_539 = arith.constant 44 : index
    %c0_540 = arith.constant 0 : index
    %c0_541 = arith.constant 0 : index
    %507 = vector.load %arg7[%c44_539, %c0_540, %c0_541] : memref<49x4x20xf32, #tpu.memory_space<vmem>>, vector<1x4x20xf32>
    %508 = vector.shape_cast %507 : vector<1x4x20xf32> to vector<4x20xf32>
    %cst_542 = arith.constant dense<0.000000e+00> : vector<112x20xf32>
    %509 = tpu.matmul %506, %508, %cst_542 {dimension_numbers = #tpu.dot_dimension_numbers<[1], [0], [0], [1], [0, 0, 1, 1], [], []>} : vector<112x4xf32>, vector<4x20xf32>, vector<112x20xf32> -> vector<112x20xf32>
    %510 = arith.addf %505, %509 : vector<112x20xf32>
    %c87_543 = arith.constant 87 : index
    %c0_544 = arith.constant 0 : index
    %511 = vector.load %arg12[%c87_543, %c0_544] : memref<202x4xf32, #tpu.memory_space<vmem>>, vector<112x4xf32>
    %c45_545 = arith.constant 45 : index
    %c0_546 = arith.constant 0 : index
    %c0_547 = arith.constant 0 : index
    %512 = vector.load %arg7[%c45_545, %c0_546, %c0_547] : memref<49x4x20xf32, #tpu.memory_space<vmem>>, vector<1x4x20xf32>
    %513 = vector.shape_cast %512 : vector<1x4x20xf32> to vector<4x20xf32>
    %cst_548 = arith.constant dense<0.000000e+00> : vector<112x20xf32>
    %514 = tpu.matmul %511, %513, %cst_548 {dimension_numbers = #tpu.dot_dimension_numbers<[1], [0], [0], [1], [0, 0, 1, 1], [], []>} : vector<112x4xf32>, vector<4x20xf32>, vector<112x20xf32> -> vector<112x20xf32>
    %515 = arith.addf %510, %514 : vector<112x20xf32>
    %c88 = arith.constant 88 : index
    %c0_549 = arith.constant 0 : index
    %516 = vector.load %arg12[%c88, %c0_549] : memref<202x4xf32, #tpu.memory_space<vmem>>, vector<112x4xf32>
    %c46_550 = arith.constant 46 : index
    %c0_551 = arith.constant 0 : index
    %c0_552 = arith.constant 0 : index
    %517 = vector.load %arg7[%c46_550, %c0_551, %c0_552] : memref<49x4x20xf32, #tpu.memory_space<vmem>>, vector<1x4x20xf32>
    %518 = vector.shape_cast %517 : vector<1x4x20xf32> to vector<4x20xf32>
    %cst_553 = arith.constant dense<0.000000e+00> : vector<112x20xf32>
    %519 = tpu.matmul %516, %518, %cst_553 {dimension_numbers = #tpu.dot_dimension_numbers<[1], [0], [0], [1], [0, 0, 1, 1], [], []>} : vector<112x4xf32>, vector<4x20xf32>, vector<112x20xf32> -> vector<112x20xf32>
    %520 = arith.addf %515, %519 : vector<112x20xf32>
    %c89 = arith.constant 89 : index
    %c0_554 = arith.constant 0 : index
    %521 = vector.load %arg12[%c89, %c0_554] : memref<202x4xf32, #tpu.memory_space<vmem>>, vector<112x4xf32>
    %c47_555 = arith.constant 47 : index
    %c0_556 = arith.constant 0 : index
    %c0_557 = arith.constant 0 : index
    %522 = vector.load %arg7[%c47_555, %c0_556, %c0_557] : memref<49x4x20xf32, #tpu.memory_space<vmem>>, vector<1x4x20xf32>
    %523 = vector.shape_cast %522 : vector<1x4x20xf32> to vector<4x20xf32>
    %cst_558 = arith.constant dense<0.000000e+00> : vector<112x20xf32>
    %524 = tpu.matmul %521, %523, %cst_558 {dimension_numbers = #tpu.dot_dimension_numbers<[1], [0], [0], [1], [0, 0, 1, 1], [], []>} : vector<112x4xf32>, vector<4x20xf32>, vector<112x20xf32> -> vector<112x20xf32>
    %525 = arith.addf %520, %524 : vector<112x20xf32>
    %c90 = arith.constant 90 : index
    %c0_559 = arith.constant 0 : index
    %526 = vector.load %arg12[%c90, %c0_559] : memref<202x4xf32, #tpu.memory_space<vmem>>, vector<112x4xf32>
    %c48_560 = arith.constant 48 : index
    %c0_561 = arith.constant 0 : index
    %c0_562 = arith.constant 0 : index
    %527 = vector.load %arg7[%c48_560, %c0_561, %c0_562] : memref<49x4x20xf32, #tpu.memory_space<vmem>>, vector<1x4x20xf32>
    %528 = vector.shape_cast %527 : vector<1x4x20xf32> to vector<4x20xf32>
    %cst_563 = arith.constant dense<0.000000e+00> : vector<112x20xf32>
    %529 = tpu.matmul %526, %528, %cst_563 {dimension_numbers = #tpu.dot_dimension_numbers<[1], [0], [0], [1], [0, 0, 1, 1], [], []>} : vector<112x4xf32>, vector<4x20xf32>, vector<112x20xf32> -> vector<112x20xf32>
    %530 = arith.addf %525, %529 : vector<112x20xf32>
    %c0_564 = arith.constant 0 : index
    %c0_565 = arith.constant 0 : index
    %531 = vector.load %arg8[%c0_564, %c0_565] : memref<1x20xf32, #tpu.memory_space<vmem>>, vector<1x20xf32>
    %532 = vector.broadcast %531 : vector<1x20xf32> to vector<112x20xf32>
    %533 = arith.addf %530, %532 : vector<112x20xf32>
    %cst_566 = arith.constant 0.000000e+00 : f32
    %534 = vector.broadcast %cst_566 : f32 to vector<112x20xf32>
    %535 = arith.maximumf %533, %534 : vector<112x20xf32>
    %cst_567 = arith.constant dense<0.000000e+00> : vector<112xf32>
    %536 = vector.multi_reduction <add>, %535, %cst_567 [1] : vector<112x20xf32> to vector<112xf32>
    %537 = vector.shape_cast %536 : vector<112xf32> to vector<112x1xf32>
    %538 = arith.addf %284, %537 : vector<112x1xf32>
    %cst_568 = arith.constant 0.000000e+00 : f32
    %539 = vector.broadcast %cst_568 : f32 to vector<112x1xf32>
    %540 = arith.maximumf %538, %539 : vector<112x1xf32>
    %c0_569 = arith.constant 0 : index
    %c0_570 = arith.constant 0 : index
    %541 = vector.load %arg9[%c0_569, %c0_570] : memref<16x112xf32, #tpu.memory_space<vmem>>, vector<16x112xf32>
    %c0_571 = arith.constant 0 : index
    %c0_572 = arith.constant 0 : index
    %542 = vector.load %arg10[%c0_571, %c0_572] : memref<112x16xf32, #tpu.memory_space<vmem>>, vector<112x16xf32>
    %543 = vector.broadcast %540 : vector<112x1xf32> to vector<112x16xf32>
    %544 = arith.mulf %543, %542 : vector<112x16xf32>
    %cst_573 = arith.constant dense<0.000000e+00> : vector<16x16xf32>
    %545 = tpu.matmul %541, %544, %cst_573 {dimension_numbers = #tpu.dot_dimension_numbers<[1], [0], [0], [1], [0, 0, 1, 1], [], []>} : vector<16x112xf32>, vector<112x16xf32>, vector<16x16xf32> -> vector<16x16xf32>
    %c0_574 = arith.constant 0 : index
    %c0_575 = arith.constant 0 : index
    %c0_576 = arith.constant 0 : index
    %546 = vector.load %arg11[%c0_574, %c0_575, %c0_576] : memref<1x16x16xf32, #tpu.memory_space<vmem>>, vector<1x16x16xf32>
    %547 = vector.shape_cast %546 : vector<1x16x16xf32> to vector<16x16xf32>
    %548 = vector.shape_cast %545 : vector<16x16xf32> to vector<1x16x16xf32>
    tpu.vector_store %arg11[%c0_574, %c0_575, %c0_576], %548 {strides = array<i32>} : memref<1x16x16xf32, #tpu.memory_space<vmem>>, vector<1x16x16xf32>,
    return
  }
  func.func @transform_0(%arg0: i32) -> (i32, i32, i32, i32) {
    %c0_i32 = arith.constant 0 : i32
    %c0_i32_0 = arith.constant 0 : i32
    %c0_i32_1 = arith.constant 0 : i32
    %c0_i32_2 = arith.constant 0 : i32
    return %arg0, %c0_i32, %c0_i32_0, %c0_i32_1 : i32, i32, i32, i32
  }
  func.func @transform_1(%arg0: i32) -> (i32, i32) {
    %c0_i32 = arith.constant 0 : i32
    %c0_i32_0 = arith.constant 0 : i32
    %c0_i32_1 = arith.constant 0 : i32
    return %c0_i32, %c0_i32_0 : i32, i32
  }
  func.func @transform_2(%arg0: i32) -> (i32, i32, i32) {
    %c0_i32 = arith.constant 0 : i32
    %c0_i32_0 = arith.constant 0 : i32
    %c0_i32_1 = arith.constant 0 : i32
    %c0_i32_2 = arith.constant 0 : i32
    return %c0_i32, %c0_i32_0, %c0_i32_1 : i32, i32, i32
  }
  func.func @transform_3(%arg0: i32) -> (i32, i32) {
    %c0_i32 = arith.constant 0 : i32
    %c0_i32_0 = arith.constant 0 : i32
    %c0_i32_1 = arith.constant 0 : i32
    return %c0_i32, %c0_i32_0 : i32, i32
  }
  func.func @transform_4(%arg0: i32) -> (i32, i32, i32) {
    %c0_i32 = arith.constant 0 : i32
    %c0_i32_0 = arith.constant 0 : i32
    %c0_i32_1 = arith.constant 0 : i32
    %c0_i32_2 = arith.constant 0 : i32
    return %c0_i32, %c0_i32_0, %c0_i32_1 : i32, i32, i32
  }
  func.func @transform_5(%arg0: i32) -> (i32, i32) {
    %c0_i32 = arith.constant 0 : i32
    %c0_i32_0 = arith.constant 0 : i32
    %c0_i32_1 = arith.constant 0 : i32
    return %c0_i32, %c0_i32_0 : i32, i32
  }
  func.func @transform_6(%arg0: i32) -> (i32, i32, i32) {
    %c0_i32 = arith.constant 0 : i32
    %c0_i32_0 = arith.constant 0 : i32
    %c0_i32_1 = arith.constant 0 : i32
    %c0_i32_2 = arith.constant 0 : i32
    return %c0_i32, %c0_i32_0, %c0_i32_1 : i32, i32, i32
  }
  func.func @transform_7(%arg0: i32) -> (i32, i32) {
    %c0_i32 = arith.constant 0 : i32
    %c0_i32_0 = arith.constant 0 : i32
    %c0_i32_1 = arith.constant 0 : i32
    return %c0_i32, %c0_i32_0 : i32, i32
  }
  func.func @transform_8(%arg0: i32) -> (i32, i32) {
    %c0_i32 = arith.constant 0 : i32
    %c0_i32_0 = arith.constant 0 : i32
    %c0_i32_1 = arith.constant 0 : i32
    return %c0_i32, %c0_i32_0 : i32, i32
  }
  func.func @transform_9(%arg0: i32) -> (i32, i32) {
    %c0_i32 = arith.constant 0 : i32
    %c0_i32_0 = arith.constant 0 : i32
    %c0_i32_1 = arith.constant 0 : i32
    return %c0_i32, %c0_i32_0 : i32, i32
  }
  func.func @transform_10(%arg0: i32) -> (i32, i32, i32) {
    %c0_i32 = arith.constant 0 : i32
    %c0_i32_0 = arith.constant 0 : i32
    %c0_i32_1 = arith.constant 0 : i32
    return %arg0, %c0_i32, %c0_i32_0 : i32, i32, i32
  }
}

</mosaic_0001>

<bundles_post_ra>
// kernel: tpu_custom_call.1
= control target key start
LH: loop header
LB: loop body
LE: loop exit
PB: predicated region body
PF: predicated region fallthrough
CT: control target
= control target key end

     0   :  { %15 = vsyncpa [#allocation4], 0  ;;  %s26614_s0 = inlined_call_operand.vmem [shape: f32[2,16,16,4], index: 0, kind: input, shape index: {}]   ;;  %s26615_s1 = inlined_call_operand.vmem [shape: f32[8,16], index: 1, kind: input, shape index: {}]   ;;  %s26616_s2 = inlined_call_operand.vmem [shape: f32[9,4,32], index: 2, kind: input, shape index: {}]   ;;  %s26617_s3 = inlined_call_operand.vmem [shape: f32[1,32], index: 3, kind: input, shape index: {}]   ;;  %s26618_s4 = inlined_call_operand.vmem [shape: f32[25,4,32], index: 4, kind: input, shape index: {}]   ;;  %s26619_s5 = inlined_call_operand.vmem [shape: f32[1,32], index: 5, kind: input, shape index: {}]   ;;  %s26620_s6 = inlined_call_operand.vmem [shape: f32[49,4,20], index: 6, kind: input, shape index: {}]   ;;  %s26621_s7 = inlined_call_operand.vmem [shape: f32[1,20], index: 7, kind: input, shape index: {}]   ;;  %s26622_s8 = inlined_call_operand.vmem [shape: f32[16,112], index: 8, kind: input, shape index: {}]   ;;  %s26623_s9 = inlined_call_operand.vmem [shape: f32[112,16], index: 9, kind: input, shape index: {}]   ;;  %s26624_s10 = inlined_call_operand.hbm [shape: f32[2,16,16], index: 10, kind: output, shape index: {}]  }
   0x1   :  { %17 = vsyncpa [#allocation4 + $0x1], 0  ;;  %s23111_s13 = smov 0   ;;  %s23113_s14 = smov 0  }
   0x2   :  { %s23115_s15 = smov 0   ;;  %s23117_s16 = smov 0  }
   0x3 LB: > { %s23132_s17 = sadd.s32 4294967295, %s23048_s16   ;;  %s16977_s18 = sadd.s32 4294967294, %s23048_s16   ;;  %s23048_s16 = sphi %s23117_s16, %s26959_s16   ;;  %s23044_s15 = sphi %s23115_s15, %s26958_s15   ;;  %s23040_s14 = sphi %s23113_s14, %s26957_s14   ;;  %s23036_s13 = sphi %s23111_s13, %s26956_s13  }
   0x4   : > { %s23136_s19 = sadd.s32 1, %s23048_s16   ;;  %s245_s20 = sadd.s32 1, %s23044_s15 }
   0x5   : > { %s242_s21 = ssub.s32 %s23048_s16, %s23136_s19  ;;  %p255_p0 = scmp.ne.s32.totalorder %s23044_s15, %s23040_s14 }
   0x6   : > { %p243_p1 = scmp.eq.s32.totalorder %s242_s21, 0  ;;  %p256_p2 = scmp.eq.s32.totalorder %s23132_s17, 1 }
   0x7   : > { %p261_p3 = scmp.ne.s32.totalorder %s23040_s14, %s23036_s13  ;;  %p262_p4 = scmp.eq.s32.totalorder %s16977_s18, 1 }
   0x8   : > { %s23147_s22 = scalar_select %p243_p1, %s23044_s15, %s245_s20  }
   0x9   : > { %p23149_p5 = por %p256_p2, %p255_p0  ;;  %p23153_p6 = por %p262_p4, %p261_p3 }
   0xa   : > { %p16980_p7 = scmp.ge.s32.totalorder %s23048_s16, 1  ;;  %p315_p8 = scmp.lt.s32.totalorder %s23048_s16, 3 }
   0xc   : > { %p316_p9 = pnand %p16980_p7, %p315_p8 }
   0xe   : > { %319 = sbr.rel (%p316_p9) target bundleno = 2033 (0x7f1), region = 60 }
  0x15   : > { %p353_p10 = scmp.lt.s32.totalorder %s23132_s17, 1  ;;  %v23050_v0 = vmov 0.0|0.0   ;;  %vm23051_vm0 = vmmov 0   ;;  %v26625_v1 = vmov 0.0   ;;  %vm358_vm1 = vcmask 31744   ;;  %v23244_v29 = vld [vmem:[%s26615_s1] sm:$0xff] }
  0x16   : > { %21654 = vmatprep.subr.bf16.mxu1 %v23050_v0  ;;  %19662 = vmatprep.mubr.msk.f32.mxu1 %vm23051_vm0, %v26625_v1  ;;  %364 = vst.msk [vmem:[#allocation2 + $0x28] sm:$0xff] %vm358_vm1, %v26625_v1  ;;  %365 = vst.msk [vmem:[#allocation2 + $0x30] sm:$0xff] %vm358_vm1, %v26625_v1  ;;  %vm399_vm2 = vcmask 130048   ;;  %vm1131_vm3 = vcmask 1043456   ;;  %vm2955_vm4 = vcmask 261120   ;;  %vm384_vm5 = vcmask 25600  }
  0x17   : > { %s23164_s25 = scalar_select %p353_p10, %s23132_s17, 1  ;;  %21672 = vmatprep.subr.bf16.mxu0 %v23050_v0  ;;  %19704 = vmatprep.mubr.msk.f32.mxu0 %vm23051_vm0, %v26625_v1  ;;  %359 = vst.msk [vmem:[#allocation2] sm:$0xff] %vm358_vm1, %v26625_v1  ;;  %360 = vst.msk [vmem:[#allocation2 + $0x8] sm:$0xff] %vm358_vm1, %v26625_v1  ;;  %vm16716_vm6 = vcmask 162816   ;;  %vm16817_vm7 = vcmask 916480  }
  0x18   : > { %361 = vst.msk [vmem:[#allocation2 + $0x10] sm:$0xff] %vm358_vm1, %v26625_v1  ;;  %362 = vst.msk [vmem:[#allocation2 + $0x18] sm:$0xff] %vm358_vm1, %v26625_v1  ;;  %s350_s27 = sand.u32 1, %s23040_s14   ;;  %s18372_s11 = sshll.u32 %s23132_s17, 8 }
  0x19   : > { %363 = vst.msk [vmem:[#allocation2 + $0x20] sm:$0xff] %vm358_vm1, %v26625_v1  ;;  %366 = vst.msk [vmem:[#allocation2 + $0x38] sm:$0xff] %vm358_vm1, %v26625_v1  ;;  %s18371_s26 = sshll.u32 %s23164_s25, 8  ;;  %s16981_s28 = sshll.u32 %s350_s27, 4 }
  0x1a   : > { %367 = vst.msk [vmem:[#allocation2 + $0x40] sm:$0xff] %vm358_vm1, %v26625_v1  ;;  %368 = vst.msk [vmem:[#allocation2 + $0x48] sm:$0xff] %vm358_vm1, %v26625_v1  ;;  %s23223_s29 = scalar_lea.vmem %s26614_s0, %s18371_s26  ;;  %s26569_s20 = scalar_lea.hbm %s26624_s10, %s18372_s11 }
  0x1b   : > { %369 = vst.msk [vmem:[#allocation2 + $0x50] sm:$0xff] %vm358_vm1, %v26625_v1  ;;  %370 = vst.msk [vmem:[#allocation2 + $0x58] sm:$0xff] %vm358_vm1, %v26625_v1  ;;  %v387_v2 = vld [vmem:[%s23223_s29] sm:$0xff]  ;;  %v388_v3 = vld [vmem:[%s23223_s29 + $0x8] sm:$0xff]  ;;  %s26573_s21 = scalar_lea.sflag [#allocation4], %s350_s27  ;;  %s23053_s17 = smov [#allocation3]  }
  0x1c   : > { %371 = vst.msk [vmem:[#allocation2 + $0x60] sm:$0xff] %vm358_vm1, %v26625_v1  ;;  %372 = vst.msk [vmem:[#allocation2 + $0x68] sm:$0xff] %vm358_vm1, %v26625_v1  ;;  %v16984_v4 = vld [vmem:[%s23223_s29 + $0x10] sm:$0xff]  ;;  %v16985_v5 = vld [vmem:[%s23223_s29 + $0x18] sm:$0xff]  ;;  %s22990_s26 = sshll.u32 %s23053_s17, 4  ;;  %s22991_s26 = int_to_ptr.vmem [resolvable:$false] %s22990_s26 }
  0x1d   : > { %373 = vst.msk [vmem:[#allocation2 + $0x70] sm:$0xff] %vm358_vm1, %v26625_v1  ;;  %374 = vst.msk [vmem:[#allocation2 + $0x78] sm:$0xff] %vm358_vm1, %v26625_v1  ;;  %v392_v6 = vadd.f32 %v16984_v4, %v387_v2  ;;  %v16986_v7 = vld [vmem:[%s23223_s29 + $0x20] sm:$0xff]  ;;  %v16987_v8 = vld [vmem:[%s23223_s29 + $0x28] sm:$0xff]  ;;  %v393_v9 = vadd.f32 %v16985_v5, %v388_v3 }
  0x1e   : > { %375 = vst.msk [vmem:[#allocation2 + $0x80] sm:$0xff] %vm358_vm1, %v26625_v1  ;;  %376 = vst.msk [vmem:[#allocation2 + $0x88] sm:$0xff] %vm358_vm1, %v26625_v1  ;;  %v16991_v10 = vld [vmem:[%s23223_s29 + $0x30] sm:$0xff]  ;;  %v16992_v11 = vld [vmem:[%s23223_s29 + $0x38] sm:$0xff] }
  0x1f   : > { %377 = vst.msk [vmem:[#allocation2 + $0x90] sm:$0xff] %vm358_vm1, %v26625_v1  ;;  %378 = vst.msk [vmem:[#allocation2 + $0x98] sm:$0xff] %vm358_vm1, %v26625_v1  ;;  %v16993_v12 = vld [vmem:[%s23223_s29 + $0x40] sm:$0xff]  ;;  %v397_v13 = vadd.f32 %v16986_v7, %v392_v6  ;;  %v480_v14 = vadd.f32 %v16991_v10, %v16986_v7  ;;  %v481_v15 = vadd.f32 %v16992_v11, %v16987_v8  ;;  %v16994_v16 = vld [vmem:[%s23223_s29 + $0x48] sm:$0xff] }
  0x20   : > { %379 = vst.msk [vmem:[#allocation2 + $0xa0] sm:$0xff] %vm358_vm1, %v26625_v1  ;;  %380 = vst.msk [vmem:[#allocation2 + $0xa8] sm:$0xff] %vm358_vm1, %v26625_v1  ;;  %v16998_v17 = vld [vmem:[%s23223_s29 + $0x50] sm:$0xff]  ;;  %v16999_v18 = vld [vmem:[%s23223_s29 + $0x58] sm:$0xff]  ;;  %v398_v19 = vadd.f32 %v16987_v8, %v393_v9 }
  0x21   : > { %381 = vst.msk [vmem:[#allocation2 + $0xb0] sm:$0xff] %vm358_vm1, %v26625_v1  ;;  %382 = vst.msk [vmem:[#allocation2 + $0xb8] sm:$0xff] %vm358_vm1, %v26625_v1  ;;  %v564_v20 = vadd.f32 %v16998_v17, %v16993_v12  ;;  %v565_v21 = vadd.f32 %v16999_v18, %v16994_v16  ;;  %v17005_v22 = vld [vmem:[%s23223_s29 + $0x70] sm:$0xff]  ;;  %v485_v23 = vadd.f32 %v16993_v12, %v480_v14  ;;  %v17000_v25 = vld [vmem:[%s23223_s29 + $0x60] sm:$0xff] }
  0x22   : > { %383 = vst.msk [vmem:[#allocation2 + $0xc0] sm:$0xff] %vm358_vm1, %v26625_v1  ;;  %v486_v24 = vadd.f32 %v16994_v16, %v481_v15  ;;  %v17001_v26 = vld [vmem:[%s23223_s29 + $0x68] sm:$0xff]  ;;  %v17006_v27 = vld [vmem:[%s23223_s29 + $0x78] sm:$0xff]  ;;  %v21655_v28 = vpack.c.bf16 %v398_v19, %v397_v13  ;;  %v17007_v30 = vld [vmem:[%s23223_s29 + $0x80] sm:$0xff]  ;;  %v648_v31 = vadd.f32 %v17005_v22, %v17000_v25 }
  0x23   : > { %v17008_v32 = vld [vmem:[%s23223_s29 + $0x88] sm:$0xff]  ;;  %v17012_v33 = vld [vmem:[%s23223_s29 + $0x90] sm:$0xff]  ;;  %v17013_v34 = vld [vmem:[%s23223_s29 + $0x98] sm:$0xff]  ;;  %v569_v36 = vadd.f32 %v17000_v25, %v564_v20  ;;  %v570_v37 = vadd.f32 %v17001_v26, %v565_v21  ;;  %v649_v38 = vadd.f32 %v17006_v27, %v17001_v26 }
  0x24   : > { %21656 = vmatpush3.bf16.msra.mxu1 %v21655_v28  ;;  %v21658_v35 = vpack.c.bf16 %v486_v24, %v485_v23  ;;  %v17021_v39 = vld [vmem:[%s23223_s29 + $0xc0] sm:$0xff]  ;;  %v17022_v40 = vld [vmem:[%s23223_s29 + $0xc8] sm:$0xff]  ;;  %v17026_v41 = vld [vmem:[%s23223_s29 + $0xd0] sm:$0xff]  ;;  %v653_v47 = vadd.f32 %v17007_v30, %v648_v31  ;;  %v732_v48 = vadd.f32 %v17012_v33, %v17007_v30  ;;  %v733_v49 = vadd.f32 %v17013_v34, %v17008_v32 }
  0x25   : > { %21657 = vmatprep.subr.bf16.mxu1 %v23050_v0  ;;  %v17027_v42 = vld [vmem:[%s23223_s29 + $0xd8] sm:$0xff]  ;;  %v900_v43 = vadd.f32 %v17026_v41, %v17021_v39  ;;  %v17028_v44 = vld [vmem:[%s23223_s29 + $0xe0] sm:$0xff]  ;;  %v17029_v45 = vld [vmem:[%s23223_s29 + $0xe8] sm:$0xff]  ;;  %v21661_v51 = vpack.c.bf16 %v570_v37, %v569_v36  ;;  %v654_v52 = vadd.f32 %v17008_v32, %v649_v38 }
  0x26   : > { %v901_v46 = vadd.f32 %v17027_v42, %v17022_v40  ;;  %v17019_v53 = vld [vmem:[%s23223_s29 + $0xb0] sm:$0xff]  ;;  %v17020_v54 = vld [vmem:[%s23223_s29 + $0xb8] sm:$0xff]  ;;  %v17014_v56 = vld [vmem:[%s23223_s29 + $0xa0] sm:$0xff] }
  0x27   : > { %19663 = vmatmul.mubr.msk.f32.vlgmr.msra.gmra.mrb[0].mxu1 %vm399_vm2, %v23244_v29  ;;  %v905_v50 = vadd.f32 %v17028_v44, %v900_v43  ;;  %v17015_v57 = vld [vmem:[%s23223_s29 + $0xa8] sm:$0xff]  ;;  %v816_v59 = vadd.f32 %v17019_v53, %v17014_v56  ;;  %v21664_v61 = vpack.c.bf16 %v654_v52, %v653_v47  ;;  %v737_v62 = vadd.f32 %v17014_v56, %v732_v48  ;;  %v17033_v5 = vld [vmem:[%s23223_s29 + $0xf0] sm:$0xff]  ;;  %v17034_v6 = vld [vmem:[%s23223_s29 + $0xf8] sm:$0xff]  ;;  %s352_s29 = scalar_lea.vmem [#allocation3], %s16981_s28  ;;  %s22992_s28 = scalar_lea.vmem %s22991_s26, 512 }
  0x28   : > { %21659 = vmatpush3.bf16.msra.mxu1 %v21658_v35  ;;  %19669 = vmatprep.mubr.msk.f32.mxu1 %vm23051_vm0, %v26625_v1  ;;  %v906_v55 = vadd.f32 %v17029_v45, %v901_v46  ;;  %v817_v60 = vadd.f32 %v17020_v54, %v17015_v57  ;;  %v738_v63 = vadd.f32 %v17015_v57, %v733_v49  ;;  %v17691_v11 = vld [vmem:[%s26620_s6 + $0x1c] sm:$0xf]  ;;  %v9261_v12 = vld [vmem:[#allocation2 + $0xe] sm:$0xff]  ;;  %v17036_v13 = vld [vmem:[%s26616_s2 + $0x4] sm:$0xf]  ;;  %s16915_s30 = sshll.u32 %s352_s29, 4  ;;  %s26564_s30 = int_to_ptr.vmem [resolvable:$true] %s16915_s30 }
  0x29   : > { %21660 = vmatprep.subr.bf16.mxu1 %v23050_v0  ;;  %v821_v3 = vadd.f32 %v17021_v39, %v816_v59  ;;  %v984_v8 = vadd.f32 %v17033_v5, %v17028_v44  ;;  %v985_v9 = vadd.f32 %v17034_v6, %v17029_v45  ;;  %v23307_v14 = vld [vmem:[#allocation2 + $0x1f] sm:$0xff]  ;;  %v23350_v35 = vld [vmem:[%s26616_s2 + $0x8] sm:$0xf]  ;;  %s22986_s25 = scalar_lea.vmem %s26564_s30, 256  ;;  %p22993_p0 = scmp.lt.s32.totalorder %s26564_s30, %s22991_s26 }
  0x2a   : > { %v21673_v58 = vpack.c.bf16 %v906_v55, %v905_v50  ;;  %v21667_v2 = vpack.c.bf16 %v738_v63, %v737_v62  ;;  %v822_v4 = vadd.f32 %v17022_v40, %v817_v60  ;;  %26781 = vst [vmem:[#allocation6_spill] sm:$0xff] %v23307_v14  ;;  %v23309_v15 = vld [vmem:[#allocation2 + $0x1e] sm:$0xff]  ;;  %v23422_v63 = vld [vmem:[#allocation2 + $0xf] sm:$0xff]  ;;  %p22987_p11 = scmp.ne.s32.totalorder %s26564_s30, %s22986_s25  ;;  %p22994_p1 = scmp.lt.s32.totalorder %s22992_s28, %s22986_s25 }
  0x2b   : > { %19670 = vmatmul.mubr.msk.f32.vlgmr.msra.gmra.mrb[2].mxu1 %vm399_vm2, %v23244_v29  ;;  %v21676_v10 = vpack.c.bf16 %v985_v9, %v984_v8  ;;  %v17707_v16 = vld [vmem:[%s26620_s6 + $0x20] sm:$0xf]  ;;  %v23327_v18 = vld [vmem:[%s26620_s6 + $0x24] sm:$0xf]  ;;  %26796 = vst [vmem:[#allocation21_spill] sm:$0xff] %v23422_v63 }
  0x2c   : > { %21662 = vmatpush3.bf16.msra.mxu1 %v21661_v51  ;;  %19676 = vmatprep.mubr.msk.f32.mxu1 %vm23051_vm0, %v26625_v1  ;;  %v21670_v7 = vpack.c.bf16 %v822_v4, %v821_v3  ;;  %v1072_v17 = vld [vmem:[%s26616_s2] sm:$0xf]  ;;  %v17739_v8 = vld [vmem:[%s26620_s6 + $0x28] sm:$0xf]  ;;  %v17083_v9 = vld [vmem:[%s26616_s2 + $0xc] sm:$0xf]  ;;  %p22988_p12 = pnand %p22987_p11, %p23149_p5  ;;  %p22995_p2 = por %p22994_p1, %p22993_p0 }
  0x2d   : > { %21663 = vmatprep.subr.bf16.mxu1 %v23050_v0  ;;  %21674 = vmatpush3.bf16.msra.mxu0 %v21673_v58 }
  0x2e   : > { %20657 = vmatprep.subr.msk.mxu0 %vm1131_vm3, %v17691_v11  ;;  %p22989_p13 = pneg %p22988_p12 }
  0x2f   : > { %19677 = vmatmul.mubr.msk.f32.vlgmr.msra.gmra.mrb[4].mxu1 %vm399_vm2, %v23244_v29 }
  0x30   : > { %21665 = vmatpush3.bf16.msra.mxu1 %v21664_v61  ;;  %19683 = vmatprep.mubr.msk.f32.mxu1 %vm23051_vm0, %v26625_v1  ;;  %p22996_p3 = pnand %p22995_p2, %p22989_p13 }
  0x31   : > { %21666 = vmatprep.subr.bf16.mxu1 %v23050_v0  ;;  %19705 = vmatmul.mubr.msk.f32.vlgmr.msra.gmra.mrb[0].mxu0 %vm399_vm2, %v23244_v29 }
  0x32   : > { %20658 = vmatpush3.msk.msra.mxu0 %vm1131_vm3, %v17691_v11  ;;  %20659 = vmatprep.mubr.msk.f32.mxu0 %vm358_vm1, %v9261_v12  ;;  %v23520_v12 = vld [vmem:[#allocation2 + $0x18] sm:$0xff] }
  0x33   : > { %19684 = vmatmul.mubr.msk.f32.vlgmr.msra.gmra.mrb[6].mxu1 %vm399_vm2, %v23244_v29  ;;  %20680 = vmatprep.subr.msk.mxu0 %vm1131_vm3, %v17707_v16 }
  0x34   : > { %21668 = vmatpush3.bf16.msra.mxu1 %v21667_v2  ;;  %19690 = vmatprep.mubr.msk.f32.mxu1 %vm23051_vm0, %v26625_v1 }
  0x35   : > { %21669 = vmatprep.subr.bf16.mxu1 %v23050_v0 }
  0x37   : > { %19691 = vmatmul.mubr.msk.f32.vlgmr.msra.gmra.mrb[8].mxu1 %vm399_vm2, %v23244_v29 }
  0x38   : > { %21671 = vmatpush3.bf16.msra.mxu1 %v21670_v7  ;;  %19697 = vmatprep.mubr.msk.f32.mxu1 %vm23051_vm0, %v26625_v1  ;;  %v23446_v7 = vld [vmem:[#allocation2 + $0x17] sm:$0xff] }
  0x39   : > { %21675 = vmatprep.subr.bf16.mxu1 %v23050_v0  ;;  %v9262_v0 = vld [vmem:[#allocation2 + $0x16] sm:$0xff]  ;;  %26802 = vst [vmem:[#allocation27_spill] sm:$0xff] %v23446_v7 }
  0x3a   : > { %20660 = vmatmul.mubr.msk.f32.vlgmr.msra.gmra.mrb[2].mxu0 %vm358_vm1, %v9262_v0  ;;  %v23522_v0 = vld [vmem:[#allocation2 + $0x20] sm:$0xff] }
  0x3b   : > { %19698 = vmatmul.mubr.msk.f32.vlgmr.msra.gmra.mrb[10].mxu1 %vm399_vm2, %v23244_v29  ;;  %20662 = vmatprep.mubr.msk.f32.mxu0 %vm358_vm1, %v23309_v15 }
  0x3c   : > { %21677 = vmatpush3.bf16.msra.mxu1 %v21676_v10  ;;  %19711 = vmatprep.mubr.msk.f32.mxu1 %vm23051_vm0, %v26625_v1  ;;  %v23508_v10 = vld [vmem:[#allocation2 + $0x10] sm:$0xff] }
  0x3d   : > { %19714 = vmatprep.subr.msk.mxu1 %vm1131_vm3, %v17036_v13  ;;  %20681 = vmatpush3.msk.msra.mxu0 %vm1131_vm3, %v17707_v16  ;;  %v17755_v16 = vld [vmem:[%s26620_s6 + $0x2c] sm:$0xf] }
  0x3e   : > { %20703 = vmatprep.subr.msk.mxu0 %vm1131_vm3, %v23327_v18 }
  0x3f   : > { %19712 = vmatmul.mubr.msk.f32.vlgmr.msra.gmra.mrb[12].mxu1 %vm399_vm2, %v23244_v29 }
  0x40   : > { %19715 = vmatpush3.msk.msra.mxu1 %vm1131_vm3, %v17036_v13  ;;  %19716 = vmatprep.mubr.msk.f32.mxu1 %vm358_vm1, %v23307_v14 }
  0x41   : > { %19737 = vmatprep.subr.msk.mxu1 %vm1131_vm3, %v1072_v17 }
  0xfa   : > { %v469_v19 = vpop.f32.mrb[0].mxu1 }
  0xfb   : > { %v473_v20 = vmul.f32 0.33333334, %v469_v19  ;;  %v19664_v21 = vpop.f32.mrb[1].mxu1  ;;  %v17099_v19 = vld [vmem:[%s26616_s2 + $0x10] sm:$0xf] }
  0xfd   : > { %474 = vst.msk [vmem:[#allocation2 + $0x2d] sm:$0xff] %vm358_vm1, %v473_v20 }
  0xfe   : > { %v553_v22 = vpop.f32.mrb[2].mxu1 }
  0xff   : > { %v557_v23 = vmul.f32 0.33333334, %v553_v22  ;;  %v19671_v24 = vpop.f32.mrb[3].mxu1 }
 0x101   : > { %558 = vst.msk [vmem:[#allocation2 + $0x3b] sm:$0xff] %vm358_vm1, %v557_v23 }
 0x102   : > { %v637_v25 = vpop.f32.mrb[4].mxu1 }
 0x103   : > { %v641_v26 = vmul.f32 0.33333334, %v637_v25  ;;  %v19678_v27 = vpop.f32.mrb[5].mxu1 }
 0x104   : > { %v23334_v28 = vld [vmem:[#allocation2 + $0x27] sm:$0xff]  ;;  %v23338_v30 = vld [vmem:[#allocation2 + $0x2f] sm:$0xff]  ;;  %v973_v31 = vpop.f32.mrb[0].mxu0 }
 0x105   : > { %26782 = vst [vmem:[#allocation7_spill] sm:$0xff] %v23334_v28  ;;  %v23336_v29 = vld [vmem:[#allocation2 + $0x26] sm:$0xff]  ;;  %26783 = vst [vmem:[#allocation8_spill] sm:$0xff] %v23338_v30  ;;  %19717 = vmatmul.mubr.msk.f32.vlgmr.msra.gmra.mrb[14].mxu1 %vm358_vm1, %v23334_v28  ;;  %v23345_v32 = vld [vmem:[#allocation2 + $0x2e] sm:$0xff]  ;;  %v977_v33 = vmul.f32 0.33333334, %v973_v31 }
 0x106   : > { %642 = vst.msk [vmem:[#allocation2 + $0x49] sm:$0xff] %vm358_vm1, %v641_v26  ;;  %20663 = vmatmul.mubr.msk.f32.gmra.mrb[4].mxu0 %vm358_vm1, %v23336_v29  ;;  %v19706_v34 = vpop.f32.mrb[1].mxu0  ;;  %v721_v36 = vpop.f32.mrb[6].mxu1  ;;  %19719 = vmatprep.mubr.msk.f32.mxu1 %vm358_vm1, %v23338_v30  ;;  %v23604_v31 = vld [vmem:[#allocation2 + $0x11] sm:$0xff] }
 0x107   : > { %20665 = vmatprep.mubr.msk.f32.mxu0 %vm358_vm1, %v23345_v32  ;;  %v725_v37 = vmul.f32 0.33333334, %v721_v36  ;;  %v19685_v38 = vpop.f32.mrb[7].mxu1  ;;  %978 = vst.msk [vmem:[#allocation2 + $0x81] sm:$0xff] %vm358_vm1, %v977_v33  ;;  %19738 = vmatpush3.msk.msra.mxu1 %vm1131_vm3, %v1072_v17  ;;  %v23539_v17 = vld [vmem:[#allocation2 + $0x28] sm:$0xff]  ;;  %26812 = vst [vmem:[#allocation37_spill] sm:$0xff] %v23604_v31 }
 0x108   : > { %v23358_v39 = vld [vmem:[#allocation2 + $0x37] sm:$0xff]  ;;  %v23362_v41 = vld [vmem:[#allocation2 + $0x3f] sm:$0xff]  ;;  %19760 = vmatprep.subr.msk.mxu1 %vm1131_vm3, %v23350_v35  ;;  %v23627_v38 = vld [vmem:[%s26620_s6 + $0x30] sm:$0xf] }
 0x109   : > { %26784 = vst [vmem:[#allocation9_spill] sm:$0xff] %v23358_v39  ;;  %v23360_v40 = vld [vmem:[#allocation2 + $0x36] sm:$0xff]  ;;  %26785 = vst [vmem:[#allocation10_spill] sm:$0xff] %v23362_v41  ;;  %19720 = vmatmul.mubr.msk.f32.gmra.mrb[16].mxu1 %vm358_vm1, %v23358_v39  ;;  %v23371_v42 = vld [vmem:[#allocation2 + $0x3e] sm:$0xff] }
 0x10a   : > { %726 = vst.msk [vmem:[#allocation2 + $0x57] sm:$0xff] %vm358_vm1, %v725_v37  ;;  %20666 = vmatmul.mubr.msk.f32.gmra.mrb[6].mxu0 %vm358_vm1, %v23360_v40  ;;  %v805_v43 = vpop.f32.mrb[8].mxu1  ;;  %19722 = vmatprep.mubr.msk.f32.mxu1 %vm358_vm1, %v23362_v41  ;;  %v23555_v20 = vld [vmem:[#allocation2 + $0x38] sm:$0xff]  ;;  %v23562_v21 = vld [vmem:[#allocation2 + $0x40] sm:$0xff] }
 0x10b   : > { %20668 = vmatprep.mubr.msk.f32.mxu0 %vm358_vm1, %v23371_v42  ;;  %v809_v44 = vmul.f32 0.33333334, %v805_v43  ;;  %v19692_v45 = vpop.f32.mrb[9].mxu1  ;;  %26804 = vst [vmem:[#allocation29_spill] sm:$0xff] %v23555_v20  ;;  %26805 = vst [vmem:[#allocation30_spill] sm:$0xff] %v23562_v21  ;;  %v23622_v37 = vld [vmem:[#allocation2 + $0x21] sm:$0xff] }
 0x10c   : > { %26817 = vst [vmem:[#allocation42_spill] sm:$0xff] %v23622_v37  ;;  %v23633_v43 = vld [vmem:[#allocation2 + $0x2c] sm:$0xff] }
 0x10d   : > { %v23377_v46 = vld [vmem:[#allocation2 + $0x47] sm:$0xff]  ;;  %v23381_v48 = vld [vmem:[#allocation2 + $0x4f] sm:$0xff]  ;;  %810 = vst.msk [vmem:[#allocation2 + $0x65] sm:$0xff] %vm358_vm1, %v809_v44 }
 0x10e   : > { %26786 = vst [vmem:[#allocation11_spill] sm:$0xff] %v23377_v46  ;;  %v23379_v47 = vld [vmem:[#allocation2 + $0x46] sm:$0xff]  ;;  %26787 = vst [vmem:[#allocation12_spill] sm:$0xff] %v23381_v48  ;;  %19723 = vmatmul.mubr.msk.f32.gmra.mrb[18].mxu1 %vm358_vm1, %v23377_v46  ;;  %v23388_v49 = vld [vmem:[#allocation2 + $0x4e] sm:$0xff]  ;;  %v889_v50 = vpop.f32.mrb[10].mxu1 }
 0x10f   : > { %20669 = vmatmul.mubr.msk.f32.gmra.mrb[8].mxu0 %vm358_vm1, %v23379_v47  ;;  %26788 = vst [vmem:[#allocation13_spill] sm:$0xff] %v23388_v49  ;;  %19725 = vmatprep.mubr.msk.f32.mxu1 %vm358_vm1, %v23381_v48  ;;  %v893_v51 = vmul.f32 0.33333334, %v889_v50  ;;  %v19699_v52 = vpop.f32.mrb[11].mxu1  ;;  %v23420_v62 = vld [vmem:[#allocation2 + $0x7f] sm:$0xff]  ;;  %v23444_v6 = vld [vmem:[#allocation2 + $0x87] sm:$0xff] }
 0x110   : > { %20671 = vmatprep.mubr.msk.f32.mxu0 %vm358_vm1, %v23388_v49  ;;  %26795 = vst [vmem:[#allocation20_spill] sm:$0xff] %v23420_v62  ;;  %26801 = vst [vmem:[#allocation26_spill] sm:$0xff] %v23444_v6  ;;  %v23514_v11 = vld [vmem:[#allocation2 + $0x7e] sm:$0xff]  ;;  %v23524_v13 = vld [vmem:[#allocation2 + $0x86] sm:$0xff] }
 0x111   : > { %v23394_v53 = vld [vmem:[#allocation2 + $0x57] sm:$0xff]  ;;  %894 = vst.msk [vmem:[#allocation2 + $0x73] sm:$0xff] %vm358_vm1, %v893_v51  ;;  %26803 = vst [vmem:[#allocation28_spill] sm:$0xff] %v23514_v11  ;;  %v23568_v22 = vld [vmem:[#allocation2 + $0x48] sm:$0xff] }
 0x112   : > { %26789 = vst [vmem:[#allocation14_spill] sm:$0xff] %v23394_v53  ;;  %v23396_v54 = vld [vmem:[#allocation2 + $0x56] sm:$0xff]  ;;  %19726 = vmatmul.mubr.msk.f32.gmra.mrb[20].mxu1 %vm358_vm1, %v23394_v53  ;;  %v1052_v55 = vpop.f32.mrb[12].mxu1  ;;  %26806 = vst [vmem:[#allocation31_spill] sm:$0xff] %v23568_v22  ;;  %v23612_v34 = vld [vmem:[#allocation2 + $0x80] sm:$0xff] }
 0x113   : > { %26790 = vst [vmem:[#allocation15_spill] sm:$0xff] %v23396_v54  ;;  %20672 = vmatmul.mubr.msk.f32.gmra.mrb[10].mxu0 %vm358_vm1, %v23396_v54  ;;  %v1056_v56 = vmul.f32 0.5, %v1052_v55  ;;  %v19713_v57 = vpop.f32.mrb[13].mxu1  ;;  %v23574_v23 = vld [vmem:[#allocation2 + $0x50] sm:$0xff]  ;;  %v23580_v24 = vld [vmem:[#allocation2 + $0x58] sm:$0xff]  ;;  %26814 = vst [vmem:[#allocation39_spill] sm:$0xff] %v23612_v34 }
 0x114   : > { %v23403_v58 = vld [vmem:[#allocation2 + $0x5f] sm:$0xff]  ;;  %v23407_v60 = vld [vmem:[#allocation2 + $0x67] sm:$0xff]  ;;  %26807 = vst [vmem:[#allocation32_spill] sm:$0xff] %v23574_v23  ;;  %26808 = vst [vmem:[#allocation33_spill] sm:$0xff] %v23580_v24 }
 0x115   : > { %26791 = vst [vmem:[#allocation16_spill] sm:$0xff] %v23403_v58  ;;  %v23405_v59 = vld [vmem:[#allocation2 + $0x5e] sm:$0xff]  ;;  %26793 = vst [vmem:[#allocation18_spill] sm:$0xff] %v23407_v60  ;;  %19728 = vmatprep.mubr.msk.f32.mxu1 %vm358_vm1, %v23403_v58  ;;  %v23413_v61 = vld [vmem:[#allocation2 + $0x66] sm:$0xff] }
 0x116   : > { %26792 = vst [vmem:[#allocation17_spill] sm:$0xff] %v23405_v59  ;;  %20674 = vmatprep.mubr.msk.f32.mxu0 %vm358_vm1, %v23405_v59  ;;  %26794 = vst [vmem:[#allocation19_spill] sm:$0xff] %v23413_v61  ;;  %19729 = vmatmul.mubr.msk.f32.gmra.mrb[22].mxu1 %vm358_vm1, %v23407_v60  ;;  %v23586_v25 = vld [vmem:[#allocation2 + $0x60] sm:$0xff]  ;;  %v23592_v26 = vld [vmem:[#allocation2 + $0x68] sm:$0xff] }
 0x117   : > { %1057 = vst.msk [vmem:[#allocation2 + $0x8f] sm:$0xff] %vm358_vm1, %v1056_v56  ;;  %20675 = vmatmul.mubr.msk.f32.gmra.mrb[12].mxu0 %vm358_vm1, %v23413_v61  ;;  %26809 = vst [vmem:[#allocation34_spill] sm:$0xff] %v23586_v25  ;;  %v23642_v44 = vld [vmem:[#allocation2 + $0x34] sm:$0xff]  ;;  %v23644_v45 = vld [vmem:[#allocation2 + $0x29] sm:$0xff] }
 0x118   : > { %v23424_v2 = vld [vmem:[#allocation2 + $0x6f] sm:$0xff]  ;;  %v23428_v4 = vld [vmem:[#allocation2 + $0x77] sm:$0xff]  ;;  %26810 = vst [vmem:[#allocation35_spill] sm:$0xff] %v23592_v26  ;;  %26818 = vst [vmem:[#allocation43_spill] sm:$0xff] %v23644_v45 }
 0x119   : > { %26797 = vst [vmem:[#allocation22_spill] sm:$0xff] %v23424_v2  ;;  %v23426_v3 = vld [vmem:[#allocation2 + $0x6e] sm:$0xff]  ;;  %26799 = vst [vmem:[#allocation24_spill] sm:$0xff] %v23428_v4  ;;  %19731 = vmatprep.mubr.msk.f32.mxu1 %vm358_vm1, %v23424_v2  ;;  %v23434_v5 = vld [vmem:[#allocation2 + $0x76] sm:$0xff] }
 0x11a   : > { %26798 = vst [vmem:[#allocation23_spill] sm:$0xff] %v23426_v3  ;;  %20677 = vmatprep.mubr.msk.f32.mxu0 %vm358_vm1, %v23426_v3  ;;  %26800 = vst [vmem:[#allocation25_spill] sm:$0xff] %v23434_v5  ;;  %19732 = vmatmul.mubr.msk.f32.gmra.mrb[24].mxu1 %vm358_vm1, %v23428_v4  ;;  %v23598_v27 = vld [vmem:[#allocation2 + $0x70] sm:$0xff]  ;;  %v23606_v33 = vld [vmem:[#allocation2 + $0x78] sm:$0xff] }
 0x11b   : > { %20678 = vmatmul.mubr.msk.f32.gmra.mrb[14].mxu0 %vm358_vm1, %v23434_v5  ;;  %19734 = vmatprep.mubr.msk.f32.mxu1 %vm358_vm1, %v23420_v62  ;;  %26811 = vst [vmem:[#allocation36_spill] sm:$0xff] %v23598_v27  ;;  %26813 = vst [vmem:[#allocation38_spill] sm:$0xff] %v23606_v33  ;;  %v23650_v50 = vld [vmem:[#allocation2 + $0x3c] sm:$0xff]  ;;  %v23652_v51 = vld [vmem:[#allocation2 + $0x31] sm:$0xff] }
 0x11c   : > { %20682 = vmatprep.mubr.msk.f32.mxu0 %vm358_vm1, %v23422_v63  ;;  %26819 = vst [vmem:[#allocation44_spill] sm:$0xff] %v23652_v51  ;;  %v23657_v52 = vld [vmem:[%s26616_s2 + $0x14] sm:$0xf]  ;;  %v23664_v55 = vld [vmem:[#allocation2 + $0x44] sm:$0xff]  ;;  %v23666_v56 = vld [vmem:[#allocation2 + $0x39] sm:$0xff] }
 0x11d   : > { %26820 = vst [vmem:[#allocation45_spill] sm:$0xff] %v23666_v56  ;;  %v23674_v57 = vld [vmem:[#allocation2 + $0x4c] sm:$0xff] }
 0x11e   : > { %19735 = vmatmul.mubr.msk.f32.gmra.mrb[26].mxu1 %vm358_vm1, %v23444_v6  ;;  %v23620_v36 = vld [vmem:[#allocation2 + $0x88] sm:$0xff]  ;;  %v23692_v1 = vld [vmem:[#allocation2 + $0x51] sm:$0xff] }
 0x11f   : > { %20683 = vmatmul.mubr.msk.f32.vlgmr.msra.gmra.mrb[2].mxu0 %vm358_vm1, %v23446_v7  ;;  %19739 = vmatprep.mubr.msk.f32.mxu1 %vm358_vm1, %v23309_v15  ;;  %26816 = vst [vmem:[#allocation41_spill] sm:$0xff] %v23620_v36  ;;  %26823 = vst [vmem:[#allocation48_spill] sm:$0xff] %v23692_v1  ;;  %v23755_v6 = vld [vmem:[%s26620_s6 + $0x34] sm:$0xf]  ;;  %v23773_v62 = vld [vmem:[#allocation2 + $0x2a] sm:$0xff] }
 0x120   : > { %20704 = vmatpush3.msk.msra.mxu0 %vm1131_vm3, %v23327_v18  ;;  %20685 = vmatprep.mubr.msk.f32.mxu0 %vm358_vm1, %v23307_v14  ;;  %v23545_v18 = vld [vmem:[#allocation2 + $0x30] sm:$0xff]  ;;  %26832 = vst [vmem:[#allocation57_spill] sm:$0xff] %v23773_v62  ;;  %v23859_v14 = vld [vmem:[#allocation2 + $0x85] sm:$0xff] }
 0x121   : > { %20726 = vmatprep.subr.msk.mxu0 %vm1131_vm3, %v17739_v8  ;;  %v23841_v7 = vld [vmem:[#allocation2 + $0x75] sm:$0xff]  ;;  %v23843_v63 = vld [vmem:[#allocation2 + $0x6a] sm:$0xff] }
 0x122   : > { %19740 = vmatmul.mubr.msk.f32.vlgmr.msra.gmra.mrb[14].mxu1 %vm358_vm1, %v23336_v29 }
 0x123   : > { %20686 = vmatmul.mubr.msk.f32.gmra.mrb[4].mxu0 %vm358_vm1, %v23334_v28  ;;  %19742 = vmatprep.mubr.msk.f32.mxu1 %vm358_vm1, %v23345_v32  ;;  %v23851_v28 = vld [vmem:[#allocation2 + $0x72] sm:$0xff] }
 0x124   : > { %20688 = vmatprep.mubr.msk.f32.mxu0 %vm358_vm1, %v23338_v30  ;;  %19761 = vmatpush3.msk.msra.mxu1 %vm1131_vm3, %v23350_v35  ;;  %v23618_v35 = vld [vmem:[#allocation2 + $0x19] sm:$0xff] }
 0x125   : > { %19783 = vmatprep.subr.msk.mxu1 %vm1131_vm3, %v17083_v9  ;;  %26815 = vst [vmem:[#allocation40_spill] sm:$0xff] %v23618_v35  ;;  %v23849_v30 = vld [vmem:[#allocation2 + $0x7d] sm:$0xff] }
 0x126   : > { %19743 = vmatmul.mubr.msk.f32.gmra.mrb[16].mxu1 %vm358_vm1, %v23360_v40 }
 0x127   : > { %20689 = vmatmul.mubr.msk.f32.gmra.mrb[6].mxu0 %vm358_vm1, %v23358_v39  ;;  %19745 = vmatprep.mubr.msk.f32.mxu1 %vm358_vm1, %v23371_v42  ;;  %v23835_v39 = vld [vmem:[#allocation2 + $0x62] sm:$0xff] }
 0x128   : > { %20691 = vmatprep.mubr.msk.f32.mxu0 %vm358_vm1, %v23362_v41  ;;  %v23833_v41 = vld [vmem:[#allocation2 + $0x6d] sm:$0xff] }
 0x12a   : > { %19746 = vmatmul.mubr.msk.f32.gmra.mrb[18].mxu1 %vm358_vm1, %v23379_v47 }
 0x12b   : > { %20692 = vmatmul.mubr.msk.f32.gmra.mrb[8].mxu0 %vm358_vm1, %v23377_v46  ;;  %19748 = vmatprep.mubr.msk.f32.mxu1 %vm358_vm1, %v23388_v49  ;;  %v23827_v46 = vld [vmem:[#allocation2 + $0x5a] sm:$0xff] }
 0x12c   : > { %20694 = vmatprep.mubr.msk.f32.mxu0 %vm358_vm1, %v23381_v48  ;;  %v23825_v48 = vld [vmem:[#allocation2 + $0x65] sm:$0xff] }
 0x12e   : > { %19749 = vmatmul.mubr.msk.f32.gmra.mrb[20].mxu1 %vm358_vm1, %v23396_v54 }
 0x12f   : > { %20695 = vmatmul.mubr.msk.f32.gmra.mrb[10].mxu0 %vm358_vm1, %v23394_v53  ;;  %19751 = vmatprep.mubr.msk.f32.mxu1 %vm358_vm1, %v23405_v59  ;;  %v23819_v53 = vld [vmem:[#allocation2 + $0x52] sm:$0xff] }
 0x130   : > { %20697 = vmatprep.mubr.msk.f32.mxu0 %vm358_vm1, %v23403_v58  ;;  %v23817_v58 = vld [vmem:[#allocation2 + $0x5d] sm:$0xff] }
 0x132   : > { %19752 = vmatmul.mubr.msk.f32.gmra.mrb[22].mxu1 %vm358_vm1, %v23413_v61 }
 0x133   : > { %20698 = vmatmul.mubr.msk.f32.gmra.mrb[12].mxu0 %vm358_vm1, %v23407_v60  ;;  %19754 = vmatprep.mubr.msk.f32.mxu1 %vm358_vm1, %v23426_v3  ;;  %v23803_v60 = vld [vmem:[#allocation2 + $0x42] sm:$0xff] }
 0x134   : > { %20700 = vmatprep.mubr.msk.f32.mxu0 %vm358_vm1, %v23424_v2  ;;  %v23801_v2 = vld [vmem:[#allocation2 + $0x4d] sm:$0xff] }
 0x136   : > { %19755 = vmatmul.mubr.msk.f32.gmra.mrb[24].mxu1 %vm358_vm1, %v23434_v5 }
 0x137   : > { %20701 = vmatmul.mubr.msk.f32.gmra.mrb[14].mxu0 %vm358_vm1, %v23428_v4  ;;  %19757 = vmatprep.mubr.msk.f32.mxu1 %vm358_vm1, %v23514_v11  ;;  %v23781_v4 = vld [vmem:[#allocation2 + $0x32] sm:$0xff] }
 0x138   : > { %20705 = vmatprep.mubr.msk.f32.mxu0 %vm358_vm1, %v23508_v10  ;;  %26833 = vst [vmem:[#allocation58_spill] sm:$0xff] %v23781_v4 }
 0x13a   : > { %19758 = vmatmul.mubr.msk.f32.gmra.mrb[26].mxu1 %vm358_vm1, %v23524_v13 }
 0x13b   : > { %20706 = vmatmul.mubr.msk.f32.vlgmr.msra.gmra.mrb[2].mxu0 %vm358_vm1, %v23520_v12  ;;  %19762 = vmatprep.mubr.msk.f32.mxu1 %vm358_vm1, %v23522_v0 }
 0x13c   : > { %20727 = vmatpush3.msk.msra.mxu0 %vm1131_vm3, %v17739_v8  ;;  %20708 = vmatprep.mubr.msk.f32.mxu0 %vm358_vm1, %v23522_v0  ;;  %v23676_v8 = vld [vmem:[#allocation2 + $0x41] sm:$0xff] }
 0x13d   : > { %20749 = vmatprep.subr.msk.mxu0 %vm1131_vm3, %v17755_v16  ;;  %26821 = vst [vmem:[#allocation46_spill] sm:$0xff] %v23676_v8 }
 0x13e   : > { %19763 = vmatmul.mubr.msk.f32.vlgmr.msra.gmra.mrb[14].mxu1 %vm358_vm1, %v23539_v17 }
 0x13f   : > { %20709 = vmatmul.mubr.msk.f32.gmra.mrb[4].mxu0 %vm358_vm1, %v23539_v17  ;;  %19765 = vmatprep.mubr.msk.f32.mxu1 %vm358_vm1, %v23545_v18 }
 0x140   : > { %20711 = vmatprep.mubr.msk.f32.mxu0 %vm358_vm1, %v23545_v18  ;;  %19784 = vmatpush3.msk.msra.mxu1 %vm1131_vm3, %v17083_v9  ;;  %v23682_v9 = vld [vmem:[#allocation2 + $0x54] sm:$0xff] }
 0x141   : > { %19806 = vmatprep.subr.msk.mxu1 %vm1131_vm3, %v17099_v19 }
 0x142   : > { %19766 = vmatmul.mubr.msk.f32.gmra.mrb[16].mxu1 %vm358_vm1, %v23555_v20 }
 0x143   : > { %20712 = vmatmul.mubr.msk.f32.gmra.mrb[6].mxu0 %vm358_vm1, %v23555_v20  ;;  %19768 = vmatprep.mubr.msk.f32.mxu1 %vm358_vm1, %v23562_v21  ;;  %v2093_v20 = vld [vmem:[#allocation2 + $0x96] sm:$0xff] }
 0x144   : > { %20714 = vmatprep.mubr.msk.f32.mxu0 %vm358_vm1, %v23562_v21  ;;  %v23952_v21 = vld [vmem:[#allocation2 + $0x7b] sm:$0xff] }
 0x146   : > { %19769 = vmatmul.mubr.msk.f32.gmra.mrb[18].mxu1 %vm358_vm1, %v23568_v22 }
 0x147   : > { %20715 = vmatmul.mubr.msk.f32.gmra.mrb[8].mxu0 %vm358_vm1, %v23568_v22  ;;  %19771 = vmatprep.mubr.msk.f32.mxu1 %vm358_vm1, %v23574_v23  ;;  %v17803_v22 = vld [vmem:[%s26620_s6 + $0x38] sm:$0xf] }
 0x148   : > { %20717 = vmatprep.mubr.msk.f32.mxu0 %vm358_vm1, %v23574_v23  ;;  %v23872_v23 = vld [vmem:[#allocation2 + $0x23] sm:$0xff] }
 0x149   : > { %26836 = vst [vmem:[#allocation61_spill] sm:$0xff] %v23872_v23 }
 0x14a   : > { %19772 = vmatmul.mubr.msk.f32.gmra.mrb[20].mxu1 %vm358_vm1, %v23580_v24 }
 0x14b   : > { %20718 = vmatmul.mubr.msk.f32.gmra.mrb[10].mxu0 %vm358_vm1, %v23580_v24  ;;  %19774 = vmatprep.mubr.msk.f32.mxu1 %vm358_vm1, %v23586_v25  ;;  %v1883_v24 = vld [vmem:[#allocation2 + $0x95] sm:$0xff] }
 0x14c   : > { %20720 = vmatprep.mubr.msk.f32.mxu0 %vm358_vm1, %v23586_v25  ;;  %v23870_v25 = vld [vmem:[#allocation2 + $0x1b] sm:$0xff] }
 0x14d   : > { %26835 = vst [vmem:[#allocation60_spill] sm:$0xff] %v23870_v25 }
 0x14e   : > { %19775 = vmatmul.mubr.msk.f32.gmra.mrb[22].mxu1 %vm358_vm1, %v23592_v26 }
 0x14f   : > { %20721 = vmatmul.mubr.msk.f32.gmra.mrb[12].mxu0 %vm358_vm1, %v23592_v26  ;;  %19777 = vmatprep.mubr.msk.f32.mxu1 %vm358_vm1, %v23598_v27  ;;  %v1882_v26 = vld [vmem:[#allocation2 + $0x8d] sm:$0xff] }
 0x150   : > { %20723 = vmatprep.mubr.msk.f32.mxu0 %vm358_vm1, %v23598_v27  ;;  %v23861_v27 = vld [vmem:[#allocation2 + $0x7a] sm:$0xff] }
 0x152   : > { %19778 = vmatmul.mubr.msk.f32.gmra.mrb[24].mxu1 %vm358_vm1, %v23606_v33 }
 0x153   : > { %20724 = vmatmul.mubr.msk.f32.gmra.mrb[14].mxu0 %vm358_vm1, %v23606_v33  ;;  %19780 = vmatprep.mubr.msk.f32.mxu1 %vm358_vm1, %v23612_v34  ;;  %v23700_v34 = vld [vmem:[#allocation2 + $0x59] sm:$0xff] }
 0x154   : > { %20728 = vmatprep.mubr.msk.f32.mxu0 %vm358_vm1, %v23604_v31  ;;  %26824 = vst [vmem:[#allocation49_spill] sm:$0xff] %v23700_v34  ;;  %v23750_v31 = vld [vmem:[#allocation2 + $0x22] sm:$0xff]  ;;  %v23857_v33 = vld [vmem:[#allocation2 + $0x13] sm:$0xff] }
 0x155   : > { %26831 = vst [vmem:[#allocation56_spill] sm:$0xff] %v23750_v31  ;;  %26834 = vst [vmem:[#allocation59_spill] sm:$0xff] %v23857_v33 }
 0x156   : > { %19781 = vmatmul.mubr.msk.f32.gmra.mrb[26].mxu1 %vm358_vm1, %v23620_v36  ;;  %v23698_v36 = vld [vmem:[#allocation2 + $0x64] sm:$0xff] }
 0x157   : > { %20729 = vmatmul.mubr.msk.f32.vlgmr.msra.gmra.mrb[2].mxu0 %vm358_vm1, %v23618_v35  ;;  %19785 = vmatprep.mubr.msk.f32.mxu1 %vm358_vm1, %v23633_v43  ;;  %v23736_v35 = vld [vmem:[#allocation2 + $0x79] sm:$0xff] }
 0x158   : > { %20750 = vmatpush3.msk.msra.mxu0 %vm1131_vm3, %v17755_v16  ;;  %20731 = vmatprep.mubr.msk.f32.mxu0 %vm358_vm1, %v23622_v37  ;;  %v23684_v16 = vld [vmem:[#allocation2 + $0x49] sm:$0xff]  ;;  %26829 = vst [vmem:[#allocation54_spill] sm:$0xff] %v23736_v35 }
 0x159   : > { %20772 = vmatprep.subr.msk.mxu0 %vm1131_vm3, %v23627_v38  ;;  %26822 = vst [vmem:[#allocation47_spill] sm:$0xff] %v23684_v16  ;;  %v23734_v37 = vld [vmem:[#allocation2 + $0x84] sm:$0xff] }
 0x15a   : > { %19786 = vmatmul.mubr.msk.f32.vlgmr.msra.gmra.mrb[14].mxu1 %vm358_vm1, %v23642_v44 }
 0x15b   : > { %20732 = vmatmul.mubr.msk.f32.gmra.mrb[4].mxu0 %vm358_vm1, %v23644_v45  ;;  %19788 = vmatprep.mubr.msk.f32.mxu1 %vm358_vm1, %v23650_v50  ;;  %v23732_v45 = vld [vmem:[#allocation2 + $0x12] sm:$0xff] }
 0x15c   : > { %20734 = vmatprep.mubr.msk.f32.mxu0 %vm358_vm1, %v23652_v51  ;;  %19807 = vmatpush3.msk.msra.mxu1 %vm1131_vm3, %v17099_v19  ;;  %v23690_v19 = vld [vmem:[#allocation2 + $0x5c] sm:$0xff]  ;;  %v23724_v51 = vld [vmem:[#allocation2 + $0x71] sm:$0xff]  ;;  %26828 = vst [vmem:[#allocation53_spill] sm:$0xff] %v23732_v45 }
 0x15d   : > { %19829 = vmatprep.subr.msk.mxu1 %vm1131_vm3, %v23657_v52  ;;  %26827 = vst [vmem:[#allocation52_spill] sm:$0xff] %v23724_v51 }
 0x15e   : > { %19789 = vmatmul.mubr.msk.f32.gmra.mrb[16].mxu1 %vm358_vm1, %v23664_v55 }
 0x15f   : > { %20735 = vmatmul.mubr.msk.f32.gmra.mrb[6].mxu0 %vm358_vm1, %v23666_v56  ;;  %19791 = vmatprep.mubr.msk.f32.mxu1 %vm358_vm1, %v23674_v57  ;;  %v23716_v56 = vld [vmem:[#allocation2 + $0x69] sm:$0xff] }
 0x160   : > { %20737 = vmatprep.mubr.msk.f32.mxu0 %vm358_vm1, %v23676_v8  ;;  %v23708_v8 = vld [vmem:[#allocation2 + $0x61] sm:$0xff]  ;;  %26826 = vst [vmem:[#allocation51_spill] sm:$0xff] %v23716_v56 }
 0x161   : > { %26825 = vst [vmem:[#allocation50_spill] sm:$0xff] %v23708_v8 }
 0x162   : > { %19792 = vmatmul.mubr.msk.f32.gmra.mrb[18].mxu1 %vm358_vm1, %v23682_v9 }
 0x163   : > { %20738 = vmatmul.mubr.msk.f32.gmra.mrb[8].mxu0 %vm358_vm1, %v23684_v16  ;;  %19794 = vmatprep.mubr.msk.f32.mxu1 %vm358_vm1, %v23690_v19  ;;  %v23706_v16 = vld [vmem:[#allocation2 + $0x6c] sm:$0xff] }
 0x164   : > { %20740 = vmatprep.mubr.msk.f32.mxu0 %vm358_vm1, %v23692_v1  ;;  %v23714_v1 = vld [vmem:[#allocation2 + $0x74] sm:$0xff] }
 0x166   : > { %19795 = vmatmul.mubr.msk.f32.gmra.mrb[20].mxu1 %vm358_vm1, %v23698_v36 }
 0x167   : > { %20741 = vmatmul.mubr.msk.f32.gmra.mrb[10].mxu0 %vm358_vm1, %v23700_v34  ;;  %19797 = vmatprep.mubr.msk.f32.mxu1 %vm358_vm1, %v23706_v16  ;;  %v23722_v34 = vld [vmem:[#allocation2 + $0x7c] sm:$0xff] }
 0x168   : > { %20743 = vmatprep.mubr.msk.f32.mxu0 %vm358_vm1, %v23708_v8  ;;  %v23730_v8 = vld [vmem:[#allocation2 + $0x8c] sm:$0xff] }
 0x16a   : > { %19798 = vmatmul.mubr.msk.f32.gmra.mrb[22].mxu1 %vm358_vm1, %v23714_v1 }
 0x16b   : > { %20744 = vmatmul.mubr.msk.f32.gmra.mrb[12].mxu0 %vm358_vm1, %v23716_v56  ;;  %19800 = vmatprep.mubr.msk.f32.mxu1 %vm358_vm1, %v23722_v34  ;;  %v23748_v56 = vld [vmem:[#allocation2 + $0x94] sm:$0xff] }
 0x16c   : > { %20746 = vmatprep.mubr.msk.f32.mxu0 %vm358_vm1, %v23724_v51  ;;  %v23746_v51 = vld [vmem:[#allocation2 + $0x1a] sm:$0xff] }
 0x16d   : > { %26830 = vst [vmem:[#allocation55_spill] sm:$0xff] %v23746_v51 }
 0x16e   : > { %19801 = vmatmul.mubr.msk.f32.gmra.mrb[24].mxu1 %vm358_vm1, %v23734_v37 }
 0x16f   : > { %20747 = vmatmul.mubr.msk.f32.gmra.mrb[14].mxu0 %vm358_vm1, %v23736_v35  ;;  %19803 = vmatprep.mubr.msk.f32.mxu1 %vm358_vm1, %v23730_v8  ;;  %v23761_v35 = vld [vmem:[#allocation2 + $0x2d] sm:$0xff] }
 0x170   : > { %20751 = vmatprep.mubr.msk.f32.mxu0 %vm358_vm1, %v23732_v45  ;;  %v23771_v45 = vld [vmem:[#allocation2 + $0x35] sm:$0xff] }
 0x172   : > { %19804 = vmatmul.mubr.msk.f32.gmra.mrb[26].mxu1 %vm358_vm1, %v23748_v56 }
 0x173   : > { %20752 = vmatmul.mubr.msk.f32.vlgmr.msra.gmra.mrb[2].mxu0 %vm358_vm1, %v23746_v51  ;;  %19808 = vmatprep.mubr.msk.f32.mxu1 %vm358_vm1, %v23761_v35  ;;  %v23779_v51 = vld [vmem:[#allocation2 + $0x3d] sm:$0xff] }
 0x174   : > { %20773 = vmatpush3.msk.msra.mxu0 %vm1131_vm3, %v23627_v38  ;;  %20754 = vmatprep.mubr.msk.f32.mxu0 %vm358_vm1, %v23750_v31  ;;  %v17131_v38 = vld [vmem:[%s26616_s2 + $0x18] sm:$0xf]  ;;  %v23792_v31 = vld [vmem:[#allocation2 + $0x45] sm:$0xff] }
 0x175   : > { %20795 = vmatprep.subr.msk.mxu0 %vm1131_vm3, %v23755_v6 }
 0x176   : > { %19809 = vmatmul.mubr.msk.f32.vlgmr.msra.gmra.mrb[14].mxu1 %vm358_vm1, %v23771_v45 }
 0x177   : > { %20755 = vmatmul.mubr.msk.f32.gmra.mrb[4].mxu0 %vm358_vm1, %v23773_v62  ;;  %19811 = vmatprep.mubr.msk.f32.mxu1 %vm358_vm1, %v23779_v51  ;;  %v23794_v62 = vld [vmem:[#allocation2 + $0x3a] sm:$0xff] }
 0x178   : > { %20757 = vmatprep.mubr.msk.f32.mxu0 %vm358_vm1, %v23781_v4  ;;  %19830 = vmatpush3.msk.msra.mxu1 %vm1131_vm3, %v23657_v52  ;;  %v23809_v52 = vld [vmem:[#allocation2 + $0x55] sm:$0xff]  ;;  %v23811_v4 = vld [vmem:[#allocation2 + $0x4a] sm:$0xff] }
 0x179   : > { %19852 = vmatprep.subr.msk.mxu1 %vm1131_vm3, %v17131_v38 }
 0x17a   : > { %19812 = vmatmul.mubr.msk.f32.gmra.mrb[16].mxu1 %vm358_vm1, %v23792_v31 }
 0x17b   : > { %20758 = vmatmul.mubr.msk.f32.gmra.mrb[6].mxu0 %vm358_vm1, %v23794_v62  ;;  %19814 = vmatprep.mubr.msk.f32.mxu1 %vm358_vm1, %v23801_v2 }
 0x17c   : > { %20760 = vmatprep.mubr.msk.f32.mxu0 %vm358_vm1, %v23803_v60 }
 0x17e   : > { %19815 = vmatmul.mubr.msk.f32.gmra.mrb[18].mxu1 %vm358_vm1, %v23809_v52 }
 0x17f   : > { %20761 = vmatmul.mubr.msk.f32.gmra.mrb[8].mxu0 %vm358_vm1, %v23811_v4  ;;  %19817 = vmatprep.mubr.msk.f32.mxu1 %vm358_vm1, %v23817_v58 }
 0x180   : > { %20763 = vmatprep.mubr.msk.f32.mxu0 %vm358_vm1, %v23819_v53 }
 0x182   : > { %19818 = vmatmul.mubr.msk.f32.gmra.mrb[20].mxu1 %vm358_vm1, %v23825_v48 }
 0x183   : > { %20764 = vmatmul.mubr.msk.f32.gmra.mrb[10].mxu0 %vm358_vm1, %v23827_v46  ;;  %19820 = vmatprep.mubr.msk.f32.mxu1 %vm358_vm1, %v23833_v41 }
 0x184   : > { %20766 = vmatprep.mubr.msk.f32.mxu0 %vm358_vm1, %v23835_v39 }
 0x186   : > { %19821 = vmatmul.mubr.msk.f32.gmra.mrb[22].mxu1 %vm358_vm1, %v23841_v7 }
 0x187   : > { %20767 = vmatmul.mubr.msk.f32.gmra.mrb[12].mxu0 %vm358_vm1, %v23843_v63  ;;  %19823 = vmatprep.mubr.msk.f32.mxu1 %vm358_vm1, %v23849_v30 }
 0x188   : > { %20769 = vmatprep.mubr.msk.f32.mxu0 %vm358_vm1, %v23851_v28 }
 0x18a   : > { %19824 = vmatmul.mubr.msk.f32.gmra.mrb[24].mxu1 %vm358_vm1, %v23859_v14 }
 0x18b   : > { %20770 = vmatmul.mubr.msk.f32.gmra.mrb[14].mxu0 %vm358_vm1, %v23861_v27  ;;  %19826 = vmatprep.mubr.msk.f32.mxu1 %vm358_vm1, %v1882_v26  ;;  %v23887_v26 = vld [vmem:[#allocation2 + $0x2b] sm:$0xff] }
 0x18c   : > { %20774 = vmatprep.mubr.msk.f32.mxu0 %vm358_vm1, %v23857_v33  ;;  %26837 = vst [vmem:[#allocation62_spill] sm:$0xff] %v23887_v26  ;;  %v23934_v33 = vld [vmem:[#allocation2 + $0x63] sm:$0xff] }
 0x18e   : > { %19827 = vmatmul.mubr.msk.f32.gmra.mrb[26].mxu1 %vm358_vm1, %v1883_v24  ;;  %v23893_v24 = vld [vmem:[#allocation2 + $0x33] sm:$0xff] }
 0x18f   : > { %20775 = vmatmul.mubr.msk.f32.vlgmr.msra.gmra.mrb[2].mxu0 %vm358_vm1, %v23870_v25  ;;  %19831 = vmatprep.mubr.msk.f32.mxu1 %vm358_vm1, %v23345_v32  ;;  %26838 = vst [vmem:[#allocation63_spill] sm:$0xff] %v23893_v24  ;;  %v17147_v25 = vld [vmem:[%s26616_s2 + $0x1c] sm:$0xf] }
 0x190   : > { %20796 = vmatpush3.msk.msra.mxu0 %vm1131_vm3, %v23755_v6  ;;  %20777 = vmatprep.mubr.msk.f32.mxu0 %vm358_vm1, %v23872_v23  ;;  %v23903_v6 = vld [vmem:[#allocation2 + $0x3b] sm:$0xff] }
 0x191   : > { %20818 = vmatprep.subr.msk.mxu0 %vm1131_vm3, %v17803_v22  ;;  %v23928_v23 = vld [vmem:[#allocation2 + $0x5b] sm:$0xff] }
 0x192   : > { %19832 = vmatmul.mubr.msk.f32.vlgmr.msra.gmra.mrb[14].mxu1 %vm358_vm1, %v23360_v40 }
 0x193   : > { %20778 = vmatmul.mubr.msk.f32.gmra.mrb[4].mxu0 %vm358_vm1, %v23887_v26  ;;  %19834 = vmatprep.mubr.msk.f32.mxu1 %vm358_vm1, %v23371_v42  ;;  %v23910_v26 = vld [vmem:[#allocation2 + $0x43] sm:$0xff] }
 0x194   : > { %20780 = vmatprep.mubr.msk.f32.mxu0 %vm358_vm1, %v23893_v24  ;;  %19853 = vmatpush3.msk.msra.mxu1 %vm1131_vm3, %v17131_v38  ;;  %v23916_v24 = vld [vmem:[#allocation2 + $0x4b] sm:$0xff]  ;;  %v23922_v38 = vld [vmem:[#allocation2 + $0x53] sm:$0xff] }
 0x195   : > { %19875 = vmatprep.subr.msk.mxu1 %vm1131_vm3, %v17147_v25 }
 0x196   : > { %19835 = vmatmul.mubr.msk.f32.gmra.mrb[16].mxu1 %vm358_vm1, %v23379_v47 }
 0x197   : > { %20781 = vmatmul.mubr.msk.f32.gmra.mrb[6].mxu0 %vm358_vm1, %v23903_v6  ;;  %19837 = vmatprep.mubr.msk.f32.mxu1 %vm358_vm1, %v23388_v49  ;;  %v17819_v49 = vld [vmem:[%s26620_s6 + $0x3c] sm:$0xf] }
 0x198   : > { %20783 = vmatprep.mubr.msk.f32.mxu0 %vm358_vm1, %v23910_v26 }
 0x19a   : > { %19838 = vmatmul.mubr.msk.f32.gmra.mrb[18].mxu1 %vm358_vm1, %v23396_v54  ;;  %v10242_v54 = vld [vmem:[#allocation2 + $0x1c] sm:$0xff] }
 0x19b   : > { %20784 = vmatmul.mubr.msk.f32.gmra.mrb[8].mxu0 %vm358_vm1, %v23916_v24  ;;  %19840 = vmatprep.mubr.msk.f32.mxu1 %vm358_vm1, %v23405_v59  ;;  %v23940_v59 = vld [vmem:[#allocation2 + $0x6b] sm:$0xff] }
 0x19c   : > { %20786 = vmatprep.mubr.msk.f32.mxu0 %vm358_vm1, %v23922_v38 }
 0x19e   : > { %19841 = vmatmul.mubr.msk.f32.gmra.mrb[20].mxu1 %vm358_vm1, %v23413_v61  ;;  %v23946_v61 = vld [vmem:[#allocation2 + $0x73] sm:$0xff] }
 0x19f   : > { %20787 = vmatmul.mubr.msk.f32.gmra.mrb[10].mxu0 %vm358_vm1, %v23928_v23  ;;  %19843 = vmatprep.mubr.msk.f32.mxu1 %vm358_vm1, %v23426_v3  ;;  %v10241_v3 = vld [vmem:[#allocation2 + $0x14] sm:$0xff] }
 0x1a0   : > { %20789 = vmatprep.mubr.msk.f32.mxu0 %vm358_vm1, %v23934_v33 }
 0x1a2   : > { %19844 = vmatmul.mubr.msk.f32.gmra.mrb[22].mxu1 %vm358_vm1, %v23434_v5  ;;  %v2092_v5 = vld [vmem:[#allocation2 + $0x8e] sm:$0xff] }
 0x1a3   : > { %20790 = vmatmul.mubr.msk.f32.gmra.mrb[12].mxu0 %vm358_vm1, %v23940_v59  ;;  %19846 = vmatprep.mubr.msk.f32.mxu1 %vm358_vm1, %v23514_v11  ;;  %v10243_v11 = vld [vmem:[#allocation2 + $0x24] sm:$0xff] }
 0x1a4   : > { %20792 = vmatprep.mubr.msk.f32.mxu0 %vm358_vm1, %v23946_v61 }
 0x1a6   : > { %19847 = vmatmul.mubr.msk.f32.gmra.mrb[24].mxu1 %vm358_vm1, %v23524_v13 }
 0x1a7   : > { %20793 = vmatmul.mubr.msk.f32.gmra.mrb[14].mxu0 %vm358_vm1, %v23952_v21  ;;  %19849 = vmatprep.mubr.msk.f32.mxu1 %vm358_vm1, %v2092_v5  ;;  %v24007_v5 = vld [vmem:[#allocation2 + $0x82] sm:$0xff] }
 0x1a8   : > { %20797 = vmatprep.mubr.msk.f32.mxu0 %vm358_vm1, %v10241_v3  ;;  %v17163_v3 = vld [vmem:[%s26616_s2 + $0x20] sm:$0xf]  ;;  %26839 = vst [vmem:[#allocation64_spill] sm:$0xff] %v24007_v5 }
 0x1aa   : > { %19850 = vmatmul.mubr.msk.f32.gmra.mrb[26].mxu1 %vm358_vm1, %v2093_v20  ;;  %v24013_v20 = vld [vmem:[#allocation2 + $0x8a] sm:$0xff] }
 0x1ab   : > { %20798 = vmatmul.mubr.msk.f32.vlgmr.msra.gmra.mrb[2].mxu0 %vm358_vm1, %v10242_v54  ;;  %19854 = vmatprep.mubr.msk.f32.mxu1 %vm358_vm1, %v23794_v62  ;;  %26840 = vst [vmem:[#allocation65_spill] sm:$0xff] %v24013_v20 }
 0x1ac   : > { %20819 = vmatpush3.msk.msra.mxu0 %vm1131_vm3, %v17803_v22  ;;  %20800 = vmatprep.mubr.msk.f32.mxu0 %vm358_vm1, %v10243_v11  ;;  %v2302_v22 = vld [vmem:[#allocation2 + $0x9a] sm:$0xff] }
 0x1ad   : > { %20841 = vmatprep.subr.msk.mxu0 %vm1131_vm3, %v17819_v49 }
 0x1ae   : > { %19855 = vmatmul.mubr.msk.f32.vlgmr.msra.gmra.mrb[14].mxu1 %vm358_vm1, %v23803_v60 }
 0x1af   : > { %20801 = vmatmul.mubr.msk.f32.gmra.mrb[4].mxu0 %vm358_vm1, %v23633_v43  ;;  %19857 = vmatprep.mubr.msk.f32.mxu1 %vm358_vm1, %v23811_v4 }
 0x1b0   : > { %20803 = vmatprep.mubr.msk.f32.mxu0 %vm358_vm1, %v23642_v44  ;;  %19876 = vmatpush3.msk.msra.mxu1 %vm1131_vm3, %v17147_v25  ;;  %v24019_v25 = vld [vmem:[#allocation2 + $0x92] sm:$0xff] }
 0x1b1   : > { %19898 = vmatprep.subr.msk.mxu1 %vm1131_vm3, %v17163_v3 }
 0x1b2   : > { %19858 = vmatmul.mubr.msk.f32.gmra.mrb[16].mxu1 %vm358_vm1, %v23819_v53 }
 0x1b3   : > { %20804 = vmatmul.mubr.msk.f32.gmra.mrb[6].mxu0 %vm358_vm1, %v23650_v50  ;;  %19860 = vmatprep.mubr.msk.f32.mxu1 %vm358_vm1, %v23827_v46 }
 0x1b4   : > { %20806 = vmatprep.mubr.msk.f32.mxu0 %vm358_vm1, %v23664_v55 }
 0x1b6   : > { %19861 = vmatmul.mubr.msk.f32.gmra.mrb[18].mxu1 %vm358_vm1, %v23835_v39 }
 0x1b7   : > { %20807 = vmatmul.mubr.msk.f32.gmra.mrb[8].mxu0 %vm358_vm1, %v23674_v57  ;;  %19863 = vmatprep.mubr.msk.f32.mxu1 %vm358_vm1, %v23843_v63 }
 0x1b8   : > { %20809 = vmatprep.mubr.msk.f32.mxu0 %vm358_vm1, %v23682_v9 }
 0x1ba   : > { %19864 = vmatmul.mubr.msk.f32.gmra.mrb[20].mxu1 %vm358_vm1, %v23851_v28 }
 0x1bb   : > { %20810 = vmatmul.mubr.msk.f32.gmra.mrb[10].mxu0 %vm358_vm1, %v23690_v19  ;;  %19866 = vmatprep.mubr.msk.f32.mxu1 %vm358_vm1, %v23861_v27 }
 0x1bc   : > { %20812 = vmatprep.mubr.msk.f32.mxu0 %vm358_vm1, %v23698_v36 }
 0x1be   : > { %19867 = vmatmul.mubr.msk.f32.gmra.mrb[22].mxu1 %vm358_vm1, %v24007_v5  ;;  %v2303_v5 = vld [vmem:[#allocation2 + $0xa2] sm:$0xff] }
 0x1bf   : > { %20813 = vmatmul.mubr.msk.f32.gmra.mrb[12].mxu0 %vm358_vm1, %v23706_v16  ;;  %19869 = vmatprep.mubr.msk.f32.mxu1 %vm358_vm1, %v24013_v20  ;;  %v17835_v20 = vld [vmem:[%s26620_s6 + $0x40] sm:$0xf] }
 0x1c0   : > { %20815 = vmatprep.mubr.msk.f32.mxu0 %vm358_vm1, %v23714_v1 }
 0x1c2   : > { %19870 = vmatmul.mubr.msk.f32.gmra.mrb[24].mxu1 %vm358_vm1, %v24019_v25 }
 0x1c3   : > { %20816 = vmatmul.mubr.msk.f32.gmra.mrb[14].mxu0 %vm358_vm1, %v23722_v34  ;;  %19872 = vmatprep.mubr.msk.f32.mxu1 %vm358_vm1, %v2302_v22  ;;  %v24098_v22 = vld [vmem:[#allocation2 + $0x25] sm:$0xff] }
 0x1c4   : > { %20820 = vmatprep.mubr.msk.f32.mxu0 %vm358_vm1, %v10242_v54  ;;  %v17180_v54 = vld [vmem:[%s26618_s4 + $0x4] sm:$0xf] }
 0x1c6   : > { %19873 = vmatmul.mubr.msk.f32.gmra.mrb[26].mxu1 %vm358_vm1, %v2303_v5  ;;  %v2513_v5 = vld [vmem:[#allocation2 + $0xa3] sm:$0xff] }
 0x1c7   : > { %20821 = vmatmul.mubr.msk.f32.vlgmr.msra.gmra.mrb[2].mxu0 %vm358_vm1, %v10243_v11  ;;  %19877 = vmatprep.mubr.msk.f32.mxu1 %vm358_vm1, %v23903_v6  ;;  %v24081_v11 = vld [vmem:[#allocation2 + $0x8b] sm:$0xff] }
 0x1c8   : > { %20823 = vmatprep.mubr.msk.f32.mxu0 %vm358_vm1, %v23633_v43  ;;  %20842 = vmatpush3.msk.msra.mxu0 %vm1131_vm3, %v17819_v49  ;;  %v24075_v49 = vld [vmem:[#allocation2 + $0x83] sm:$0xff]  ;;  %v2512_v43 = vld [vmem:[#allocation2 + $0x9b] sm:$0xff] }
 0x1c9   : > { %20864 = vmatprep.subr.msk.mxu0 %vm1131_vm3, %v17835_v20 }
 0x1ca   : > { %19878 = vmatmul.mubr.msk.f32.vlgmr.msra.gmra.mrb[14].mxu1 %vm358_vm1, %v23910_v26 }
 0x1cb   : > { %20824 = vmatmul.mubr.msk.f32.gmra.mrb[4].mxu0 %vm358_vm1, %v23642_v44  ;;  %19880 = vmatprep.mubr.msk.f32.mxu1 %vm358_vm1, %v23916_v24  ;;  %v24087_v44 = vld [vmem:[#allocation2 + $0x1d] sm:$0xff] }
 0x1cc   : > { %20826 = vmatprep.mubr.msk.f32.mxu0 %vm358_vm1, %v23650_v50  ;;  %19899 = vmatpush3.msk.msra.mxu1 %vm1131_vm3, %v17163_v3  ;;  %v24089_v3 = vld [vmem:[#allocation2 + $0x93] sm:$0xff] }
 0x1cd   : > { %19921 = vmatprep.subr.msk.mxu1 %vm1131_vm3, %v17180_v54  ;;  %26841 = vst [vmem:[#allocation66_spill] sm:$0xff] %v24089_v3 }
 0x1ce   : > { %19881 = vmatmul.mubr.msk.f32.gmra.mrb[16].mxu1 %vm358_vm1, %v23922_v38 }
 0x1cf   : > { %20827 = vmatmul.mubr.msk.f32.gmra.mrb[6].mxu0 %vm358_vm1, %v23664_v55  ;;  %19883 = vmatprep.mubr.msk.f32.mxu1 %vm358_vm1, %v23928_v23 }
 0x1d0   : > { %20829 = vmatprep.mubr.msk.f32.mxu0 %vm358_vm1, %v23674_v57 }
 0x1d2   : > { %19884 = vmatmul.mubr.msk.f32.gmra.mrb[18].mxu1 %vm358_vm1, %v23934_v33 }
 0x1d3   : > { %20830 = vmatmul.mubr.msk.f32.gmra.mrb[8].mxu0 %vm358_vm1, %v23682_v9  ;;  %19886 = vmatprep.mubr.msk.f32.mxu1 %vm358_vm1, %v23940_v59 }
 0x1d4   : > { %20832 = vmatprep.mubr.msk.f32.mxu0 %vm358_vm1, %v23690_v19 }
 0x1d6   : > { %19887 = vmatmul.mubr.msk.f32.gmra.mrb[20].mxu1 %vm358_vm1, %v23946_v61 }
 0x1d7   : > { %20833 = vmatmul.mubr.msk.f32.gmra.mrb[10].mxu0 %vm358_vm1, %v23698_v36  ;;  %19889 = vmatprep.mubr.msk.f32.mxu1 %vm358_vm1, %v23952_v21 }
 0x1d8   : > { %20835 = vmatprep.mubr.msk.f32.mxu0 %vm358_vm1, %v23706_v16 }
 0x1da   : > { %19890 = vmatmul.mubr.msk.f32.gmra.mrb[22].mxu1 %vm358_vm1, %v24075_v49 }
 0x1db   : > { %20836 = vmatmul.mubr.msk.f32.gmra.mrb[12].mxu0 %vm358_vm1, %v23714_v1  ;;  %19892 = vmatprep.mubr.msk.f32.mxu1 %vm358_vm1, %v24081_v11 }
 0x1dc   : > { %20838 = vmatprep.mubr.msk.f32.mxu0 %vm358_vm1, %v23722_v34 }
 0x1de   : > { %19893 = vmatmul.mubr.msk.f32.gmra.mrb[24].mxu1 %vm358_vm1, %v24089_v3  ;;  %v17851_v3 = vld [vmem:[%s26620_s6 + $0x44] sm:$0xf] }
 0x1df   : > { %20839 = vmatmul.mubr.msk.f32.gmra.mrb[14].mxu0 %vm358_vm1, %v23734_v37  ;;  %19895 = vmatprep.mubr.msk.f32.mxu1 %vm358_vm1, %v2512_v43  ;;  %v3026_v43 = vld [vmem:[%s26618_s4] sm:$0xf] }
 0x1e0   : > { %20843 = vmatprep.mubr.msk.f32.mxu0 %vm358_vm1, %v24087_v44 }
 0x1e2   : > { %19896 = vmatmul.mubr.msk.f32.gmra.mrb[26].mxu1 %vm358_vm1, %v2513_v5  ;;  %v26860_v5 = vld [vmem:[#allocation8_spill] sm:$0xff] }
 0x1e3   : > { %20844 = vmatmul.mubr.msk.f32.vlgmr.msra.gmra.mrb[2].mxu0 %vm358_vm1, %v24098_v22  ;;  %19900 = vmatprep.mubr.msk.f32.mxu1 %vm358_vm1, %v23650_v50  ;;  %v26850_v50 = vld [vmem:[#allocation23_spill] sm:$0xff] }
 0x1e4   : > { %20846 = vmatprep.mubr.msk.f32.mxu0 %vm358_vm1, %v23761_v35  ;;  %20865 = vmatpush3.msk.msra.mxu0 %vm1131_vm3, %v17835_v20  ;;  %v17883_v20 = vld [vmem:[%s26620_s6 + $0x4c] sm:$0xf] }
 0x1e5   : > { %20887 = vmatprep.subr.msk.mxu0 %vm1131_vm3, %v17851_v3 }
 0x1e6   : > { %19901 = vmatmul.mubr.msk.f32.vlgmr.msra.gmra.mrb[14].mxu1 %vm358_vm1, %v23664_v55  ;;  %v26851_v55 = vld [vmem:[#allocation33_spill] sm:$0xff] }
 0x1e7   : > { %20847 = vmatmul.mubr.msk.f32.gmra.mrb[4].mxu0 %vm358_vm1, %v23771_v45  ;;  %19903 = vmatprep.mubr.msk.f32.mxu1 %vm358_vm1, %v23674_v57  ;;  %v26853_v57 = vld [vmem:[#allocation34_spill] sm:$0xff] }
 0x1e8   : > { %20849 = vmatprep.mubr.msk.f32.mxu0 %vm358_vm1, %v23779_v51  ;;  %19922 = vmatpush3.msk.msra.mxu1 %vm1131_vm3, %v17180_v54  ;;  %v26858_v54 = vld [vmem:[#allocation38_spill] sm:$0xff] }
 0x1e9   : > { %19944 = vmatprep.subr.msk.mxu1 %vm1131_vm3, %v3026_v43 }
 0x1ea   : > { %19904 = vmatmul.mubr.msk.f32.gmra.mrb[16].mxu1 %vm358_vm1, %v23682_v9  ;;  %v26855_v9 = vld [vmem:[#allocation35_spill] sm:$0xff] }
 0x1eb   : > { %20850 = vmatmul.mubr.msk.f32.gmra.mrb[6].mxu0 %vm358_vm1, %v23792_v31  ;;  %19906 = vmatprep.mubr.msk.f32.mxu1 %vm358_vm1, %v23690_v19  ;;  %v26857_v19 = vld [vmem:[#allocation6_spill] sm:$0xff] }
 0x1ec   : > { %20852 = vmatprep.mubr.msk.f32.mxu0 %vm358_vm1, %v23801_v2 }
 0x1ee   : > { %19907 = vmatmul.mubr.msk.f32.gmra.mrb[18].mxu1 %vm358_vm1, %v23698_v36  ;;  %v17867_v36 = vld [vmem:[%s26620_s6 + $0x48] sm:$0xf] }
 0x1ef   : > { %20853 = vmatmul.mubr.msk.f32.gmra.mrb[8].mxu0 %vm358_vm1, %v23809_v52  ;;  %19909 = vmatprep.mubr.msk.f32.mxu1 %vm358_vm1, %v23706_v16  ;;  %v26856_v16 = vld [vmem:[#allocation36_spill] sm:$0xff] }
 0x1f0   : > { %20855 = vmatprep.mubr.msk.f32.mxu0 %vm358_vm1, %v23817_v58 }
 0x1f2   : > { %19910 = vmatmul.mubr.msk.f32.gmra.mrb[20].mxu1 %vm358_vm1, %v23714_v1  ;;  %v2722_v1 = vld [vmem:[#allocation2 + $0x9c] sm:$0xff] }
 0x1f3   : > { %20856 = vmatmul.mubr.msk.f32.gmra.mrb[10].mxu0 %vm358_vm1, %v23825_v48  ;;  %19912 = vmatprep.mubr.msk.f32.mxu1 %vm358_vm1, %v23722_v34  ;;  %v2723_v34 = vld [vmem:[#allocation2 + $0xa4] sm:$0xff] }
 0x1f4   : > { %20858 = vmatprep.mubr.msk.f32.mxu0 %vm358_vm1, %v23833_v41 }
 0x1f6   : > { %19913 = vmatmul.mubr.msk.f32.gmra.mrb[22].mxu1 %vm358_vm1, %v23734_v37  ;;  %v26849_v37 = vld [vmem:[#allocation32_spill] sm:$0xff] }
 0x1f7   : > { %20859 = vmatmul.mubr.msk.f32.gmra.mrb[12].mxu0 %vm358_vm1, %v23841_v7  ;;  %19915 = vmatprep.mubr.msk.f32.mxu1 %vm358_vm1, %v23730_v8  ;;  %v26854_v8 = vld [vmem:[#allocation28_spill] sm:$0xff] }
 0x1f8   : > { %20861 = vmatprep.mubr.msk.f32.mxu0 %vm358_vm1, %v23849_v30 }
 0x1fa   : > { %19916 = vmatmul.mubr.msk.f32.gmra.mrb[24].mxu1 %vm358_vm1, %v23748_v56  ;;  %v26852_v56 = vld [vmem:[#allocation25_spill] sm:$0xff] }
 0x1fb   : > { %20862 = vmatmul.mubr.msk.f32.gmra.mrb[14].mxu0 %vm358_vm1, %v23859_v14  ;;  %19918 = vmatprep.mubr.msk.f32.mxu1 %vm358_vm1, %v2722_v1  ;;  %v26863_v1 = vld [vmem:[#allocation9_spill] sm:$0xff] }
 0x1fc   : > { %20866 = vmatprep.mubr.msk.f32.mxu0 %vm358_vm1, %v23309_v15  ;;  %v17211_v15 = vld [vmem:[%s26618_s4 + $0x8] sm:$0xf] }
 0x1fe   : > { %19919 = vmatmul.mubr.msk.f32.gmra.mrb[26].mxu1 %vm358_vm1, %v2723_v34  ;;  %v17227_v34 = vld [vmem:[%s26618_s4 + $0xc] sm:$0xf] }
 0x1ff   : > { %20867 = vmatmul.mubr.msk.f32.vlgmr.msra.gmra.mrb[2].mxu0 %vm358_vm1, %v23336_v29  ;;  %19923 = vmatprep.mubr.msk.f32.mxu1 %vm358_vm1, %v23508_v10  ;;  %v26842_v29 = vld [vmem:[#allocation13_spill] sm:$0xff] }
 0x200   : > { %20869 = vmatprep.mubr.msk.f32.mxu0 %vm358_vm1, %v23345_v32  ;;  %20888 = vmatpush3.msk.msra.mxu0 %vm1131_vm3, %v17851_v3  ;;  %v26843_v32 = vld [vmem:[#allocation29_spill] sm:$0xff]  ;;  %v26859_v3 = vld [vmem:[#allocation7_spill] sm:$0xff] }
 0x201   : > { %20910 = vmatprep.subr.msk.mxu0 %vm1131_vm3, %v17867_v36  ;;  %v26846_v10 = vld [vmem:[#allocation17_spill] sm:$0xff] }
 0x202   : > { %19924 = vmatmul.mubr.msk.f32.vlgmr.msra.gmra.mrb[28].mxu1 %vm358_vm1, %v23520_v12  ;;  %v26847_v12 = vld [vmem:[#allocation31_spill] sm:$0xff] }
 0x203   : > { %20870 = vmatmul.mubr.msk.f32.gmra.mrb[4].mxu0 %vm358_vm1, %v23360_v40  ;;  %19926 = vmatprep.mubr.msk.f32.mxu1 %vm358_vm1, %v23522_v0  ;;  %v26844_v40 = vld [vmem:[#allocation15_spill] sm:$0xff] }
 0x204   : > { %20872 = vmatprep.mubr.msk.f32.mxu0 %vm358_vm1, %v23371_v42  ;;  %19945 = vmatpush3.msk.msra.mxu1 %vm1131_vm3, %v3026_v43  ;;  %v26845_v42 = vld [vmem:[#allocation30_spill] sm:$0xff]  ;;  %v26862_v43 = vld [vmem:[#allocation27_spill] sm:$0xff] }
 0x205   : > { %19967 = vmatprep.subr.msk.mxu1 %vm1131_vm3, %v17211_v15 }
 0x206   : > { %19927 = vmatmul.mubr.msk.f32.gmra.mrb[30].mxu1 %vm358_vm1, %v23539_v17 }
 0x207   : > { %20873 = vmatmul.mubr.msk.f32.gmra.mrb[6].mxu0 %vm358_vm1, %v23379_v47  ;;  %19929 = vmatprep.mubr.msk.f32.mxu1 %vm358_vm1, %v23545_v18  ;;  %v26848_v47 = vld [vmem:[#allocation19_spill] sm:$0xff] }
 0x208   : > { %20875 = vmatprep.mubr.msk.f32.mxu0 %vm358_vm1, %v26842_v29  ;;  %v26864_v29 = vld [vmem:[#allocation10_spill] sm:$0xff] }
 0x20a   : > { %19930 = vmatmul.mubr.msk.f32.gmra.mrb[32].mxu1 %vm358_vm1, %v26843_v32 }
 0x20b   : > { %20876 = vmatmul.mubr.msk.f32.gmra.mrb[8].mxu0 %vm358_vm1, %v26844_v40  ;;  %19932 = vmatprep.mubr.msk.f32.mxu1 %vm358_vm1, %v26845_v42  ;;  %v24251_v40 = vld [vmem:[#allocation2 + $0x1f] sm:$0xff] }
 0x20c   : > { %20878 = vmatprep.mubr.msk.f32.mxu0 %vm358_vm1, %v26846_v10  ;;  %v26866_v10 = vld [vmem:[#allocation12_spill] sm:$0xff] }
 0x20e   : > { %19933 = vmatmul.mubr.msk.f32.gmra.mrb[34].mxu1 %vm358_vm1, %v26847_v12 }
 0x20f   : > { %20879 = vmatmul.mubr.msk.f32.gmra.mrb[10].mxu0 %vm358_vm1, %v26848_v47  ;;  %19935 = vmatprep.mubr.msk.f32.mxu1 %vm358_vm1, %v26849_v37  ;;  %v26867_v47 = vld [vmem:[#allocation14_spill] sm:$0xff] }
 0x210   : > { %20881 = vmatprep.mubr.msk.f32.mxu0 %vm358_vm1, %v26850_v50  ;;  %v26869_v50 = vld [vmem:[#allocation18_spill] sm:$0xff] }
 0x212   : > { %19936 = vmatmul.mubr.msk.f32.gmra.mrb[36].mxu1 %vm358_vm1, %v26851_v55 }
 0x213   : > { %20882 = vmatmul.mubr.msk.f32.gmra.mrb[12].mxu0 %vm358_vm1, %v26852_v56  ;;  %19938 = vmatprep.mubr.msk.f32.mxu1 %vm358_vm1, %v26853_v57  ;;  %v26870_v56 = vld [vmem:[#allocation22_spill] sm:$0xff] }
 0x214   : > { %20884 = vmatprep.mubr.msk.f32.mxu0 %vm358_vm1, %v26854_v8  ;;  %v26871_v8 = vld [vmem:[#allocation24_spill] sm:$0xff] }
 0x216   : > { %19939 = vmatmul.mubr.msk.f32.gmra.mrb[38].mxu1 %vm358_vm1, %v26855_v9 }
 0x217   : > { %20885 = vmatmul.mubr.msk.f32.gmra.mrb[14].mxu0 %vm358_vm1, %v23524_v13  ;;  %19941 = vmatprep.mubr.msk.f32.mxu1 %vm358_vm1, %v26856_v16  ;;  %v26861_v13 = vld [vmem:[#allocation21_spill] sm:$0xff] }
 0x218   : > { %20889 = vmatprep.mubr.msk.f32.mxu0 %vm358_vm1, %v26857_v19  ;;  %v26872_v19 = vld [vmem:[#allocation20_spill] sm:$0xff] }
 0x21a   : > { %19942 = vmatmul.mubr.msk.f32.gmra.mrb[40].mxu1 %vm358_vm1, %v26858_v54 }
 0x21b   : > { %20890 = vmatmul.mubr.msk.f32.vlgmr.msra.gmra.mrb[2].mxu0 %vm358_vm1, %v26859_v3  ;;  %19946 = vmatprep.mubr.msk.f32.mxu1 %vm358_vm1, %v26861_v13  ;;  %v26874_v13 = vld [vmem:[#allocation37_spill] sm:$0xff] }
 0x21c   : > { %20892 = vmatprep.mubr.msk.f32.mxu0 %vm358_vm1, %v26860_v5  ;;  %20911 = vmatpush3.msk.msra.mxu0 %vm1131_vm3, %v17867_v36  ;;  %v26865_v36 = vld [vmem:[#allocation11_spill] sm:$0xff] }
 0x21d   : > { %20933 = vmatprep.subr.msk.mxu0 %vm1131_vm3, %v17883_v20 }
 0x21e   : > { %19947 = vmatmul.mubr.msk.f32.vlgmr.msra.gmra.mrb[28].mxu1 %vm358_vm1, %v26862_v43  ;;  %v26880_v43 = vld [vmem:[#allocation46_spill] sm:$0xff] }
 0x21f   : > { %20893 = vmatmul.mubr.msk.f32.gmra.mrb[4].mxu0 %vm358_vm1, %v26863_v1  ;;  %19949 = vmatprep.mubr.msk.f32.mxu1 %vm358_vm1, %v24251_v40 }
 0x220   : > { %20895 = vmatprep.mubr.msk.f32.mxu0 %vm358_vm1, %v26864_v29  ;;  %19968 = vmatpush3.msk.msra.mxu1 %vm1131_vm3, %v17211_v15  ;;  %v26868_v15 = vld [vmem:[#allocation16_spill] sm:$0xff] }
 0x221   : > { %19990 = vmatprep.subr.msk.mxu1 %vm1131_vm3, %v17227_v34 }
 0x222   : > { %19950 = vmatmul.mubr.msk.f32.gmra.mrb[30].mxu1 %vm358_vm1, %v26859_v3  ;;  %v26873_v3 = vld [vmem:[#allocation26_spill] sm:$0xff] }
 0x223   : > { %20896 = vmatmul.mubr.msk.f32.gmra.mrb[6].mxu0 %vm358_vm1, %v26865_v36  ;;  %19952 = vmatprep.mubr.msk.f32.mxu1 %vm358_vm1, %v26860_v5  ;;  %v17899_v5 = vld [vmem:[%s26620_s6 + $0x50] sm:$0xf] }
 0x224   : > { %20898 = vmatprep.mubr.msk.f32.mxu0 %vm358_vm1, %v26866_v10 }
 0x226   : > { %19953 = vmatmul.mubr.msk.f32.gmra.mrb[32].mxu1 %vm358_vm1, %v26863_v1  ;;  %v26881_v1 = vld [vmem:[#allocation47_spill] sm:$0xff] }
 0x227   : > { %20899 = vmatmul.mubr.msk.f32.gmra.mrb[8].mxu0 %vm358_vm1, %v26867_v47  ;;  %19955 = vmatprep.mubr.msk.f32.mxu1 %vm358_vm1, %v26864_v29  ;;  %v26888_v29 = vld [vmem:[#allocation52_spill] sm:$0xff] }
 0x228   : > { %20901 = vmatprep.mubr.msk.f32.mxu0 %vm358_vm1, %v26868_v15 }
 0x22a   : > { %19956 = vmatmul.mubr.msk.f32.gmra.mrb[34].mxu1 %vm358_vm1, %v26865_v36  ;;  %v26890_v36 = vld [vmem:[#allocation53_spill] sm:$0xff] }
 0x22b   : > { %20902 = vmatmul.mubr.msk.f32.gmra.mrb[10].mxu0 %vm358_vm1, %v26869_v50  ;;  %19958 = vmatprep.mubr.msk.f32.mxu1 %vm358_vm1, %v26866_v10  ;;  %v26891_v10 = vld [vmem:[#allocation55_spill] sm:$0xff] }
 0x22c   : > { %20904 = vmatprep.mubr.msk.f32.mxu0 %vm358_vm1, %v26870_v56 }
 0x22e   : > { %19959 = vmatmul.mubr.msk.f32.gmra.mrb[36].mxu1 %vm358_vm1, %v26867_v47  ;;  %v17259_v47 = vld [vmem:[%s26618_s4 + $0x14] sm:$0xf] }
 0x22f   : > { %20905 = vmatmul.mubr.msk.f32.gmra.mrb[12].mxu0 %vm358_vm1, %v26871_v8  ;;  %19961 = vmatprep.mubr.msk.f32.mxu1 %vm358_vm1, %v26868_v15  ;;  %v26892_v15 = vld [vmem:[#allocation56_spill] sm:$0xff] }
 0x230   : > { %20907 = vmatprep.mubr.msk.f32.mxu0 %vm358_vm1, %v26872_v19  ;;  %v24423_v19 = vld [vmem:[#allocation2 + $0x89] sm:$0xff] }
 0x232   : > { %19962 = vmatmul.mubr.msk.f32.gmra.mrb[38].mxu1 %vm358_vm1, %v26869_v50  ;;  %v26893_v50 = vld [vmem:[#allocation57_spill] sm:$0xff] }
 0x233   : > { %20908 = vmatmul.mubr.msk.f32.gmra.mrb[14].mxu0 %vm358_vm1, %v26873_v3  ;;  %19964 = vmatprep.mubr.msk.f32.mxu1 %vm358_vm1, %v26870_v56  ;;  %v26894_v56 = vld [vmem:[#allocation58_spill] sm:$0xff]  ;;  %v17931_v3 = vld [vmem:[%s26620_s6 + $0x58] sm:$0xf] }
 0x234   : > { %20912 = vmatprep.mubr.msk.f32.mxu0 %vm358_vm1, %v23522_v0  ;;  %v26875_v0 = vld [vmem:[#allocation40_spill] sm:$0xff] }
 0x236   : > { %19965 = vmatmul.mubr.msk.f32.gmra.mrb[40].mxu1 %vm358_vm1, %v26871_v8  ;;  %v24417_v8 = vld [vmem:[#allocation2 + $0x81] sm:$0xff] }
 0x237   : > { %20913 = vmatmul.mubr.msk.f32.vlgmr.msra.gmra.mrb[2].mxu0 %vm358_vm1, %v23539_v17  ;;  %19969 = vmatprep.mubr.msk.f32.mxu1 %vm358_vm1, %v26874_v13  ;;  %v17243_v17 = vld [vmem:[%s26618_s4 + $0x10] sm:$0xf]  ;;  %v26896_v13 = vld [vmem:[#allocation60_spill] sm:$0xff] }
 0x238   : > { %20915 = vmatprep.mubr.msk.f32.mxu0 %vm358_vm1, %v23545_v18  ;;  %20934 = vmatpush3.msk.msra.mxu0 %vm1131_vm3, %v17883_v20  ;;  %v26876_v18 = vld [vmem:[#allocation42_spill] sm:$0xff]  ;;  %v26877_v20 = vld [vmem:[#allocation43_spill] sm:$0xff] }
 0x239   : > { %20956 = vmatprep.subr.msk.mxu0 %vm1131_vm3, %v17899_v5 }
 0x23a   : > { %19970 = vmatmul.mubr.msk.f32.vlgmr.msra.gmra.mrb[28].mxu1 %vm358_vm1, %v26875_v0  ;;  %v17275_v0 = vld [vmem:[%s26618_s4 + $0x18] sm:$0xf] }
 0x23b   : > { %20916 = vmatmul.mubr.msk.f32.gmra.mrb[4].mxu0 %vm358_vm1, %v26843_v32  ;;  %19972 = vmatprep.mubr.msk.f32.mxu1 %vm358_vm1, %v26876_v18  ;;  %v26878_v32 = vld [vmem:[#allocation44_spill] sm:$0xff] }
 0x23c   : > { %20918 = vmatprep.mubr.msk.f32.mxu0 %vm358_vm1, %v26845_v42  ;;  %19991 = vmatpush3.msk.msra.mxu1 %vm1131_vm3, %v17227_v34  ;;  %v26879_v42 = vld [vmem:[#allocation45_spill] sm:$0xff]  ;;  %v26886_v34 = vld [vmem:[#allocation51_spill] sm:$0xff] }
 0x23d   : > { %20013 = vmatprep.subr.msk.mxu1 %vm1131_vm3, %v17243_v17 }
 0x23e   : > { %19973 = vmatmul.mubr.msk.f32.gmra.mrb[30].mxu1 %vm358_vm1, %v26877_v20 }
 0x23f   : > { %20919 = vmatmul.mubr.msk.f32.gmra.mrb[6].mxu0 %vm358_vm1, %v26847_v12  ;;  %19975 = vmatprep.mubr.msk.f32.mxu1 %vm358_vm1, %v26878_v32  ;;  %v26882_v12 = vld [vmem:[#allocation48_spill] sm:$0xff] }
 0x240   : > { %20921 = vmatprep.mubr.msk.f32.mxu0 %vm358_vm1, %v26849_v37  ;;  %v26883_v37 = vld [vmem:[#allocation49_spill] sm:$0xff] }
 0x242   : > { %19976 = vmatmul.mubr.msk.f32.gmra.mrb[32].mxu1 %vm358_vm1, %v26879_v42 }
 0x243   : > { %20922 = vmatmul.mubr.msk.f32.gmra.mrb[8].mxu0 %vm358_vm1, %v26851_v55  ;;  %19978 = vmatprep.mubr.msk.f32.mxu1 %vm358_vm1, %v26880_v43  ;;  %v26884_v55 = vld [vmem:[#allocation50_spill] sm:$0xff] }
 0x244   : > { %20924 = vmatprep.mubr.msk.f32.mxu0 %vm358_vm1, %v26853_v57  ;;  %v26885_v57 = vld [vmem:[#allocation39_spill] sm:$0xff] }
 0x246   : > { %19979 = vmatmul.mubr.msk.f32.gmra.mrb[34].mxu1 %vm358_vm1, %v26881_v1 }
 0x247   : > { %20925 = vmatmul.mubr.msk.f32.gmra.mrb[10].mxu0 %vm358_vm1, %v26855_v9  ;;  %19981 = vmatprep.mubr.msk.f32.mxu1 %vm358_vm1, %v26882_v12  ;;  %v26887_v9 = vld [vmem:[#allocation41_spill] sm:$0xff] }
 0x248   : > { %20927 = vmatprep.mubr.msk.f32.mxu0 %vm358_vm1, %v26856_v16  ;;  %v17915_v16 = vld [vmem:[%s26620_s6 + $0x54] sm:$0xf] }
 0x24a   : > { %19982 = vmatmul.mubr.msk.f32.gmra.mrb[36].mxu1 %vm358_vm1, %v26883_v37 }
 0x24b   : > { %20928 = vmatmul.mubr.msk.f32.gmra.mrb[12].mxu0 %vm358_vm1, %v26858_v54  ;;  %19984 = vmatprep.mubr.msk.f32.mxu1 %vm358_vm1, %v26884_v55  ;;  %v26889_v54 = vld [vmem:[#allocation54_spill] sm:$0xff] }
 0x24c   : > { %20930 = vmatprep.mubr.msk.f32.mxu0 %vm358_vm1, %v26885_v57  ;;  %v24682_v57 = vld [vmem:[%s26620_s6 + $0x64] sm:$0xf] }
 0x24e   : > { %19985 = vmatmul.mubr.msk.f32.gmra.mrb[38].mxu1 %vm358_vm1, %v26886_v34 }
 0x24f   : > { %20931 = vmatmul.mubr.msk.f32.gmra.mrb[14].mxu0 %vm358_vm1, %v26887_v9  ;;  %19987 = vmatprep.mubr.msk.f32.mxu1 %vm358_vm1, %v26888_v29 }
 0x250   : > { %20935 = vmatprep.mubr.msk.f32.mxu0 %vm358_vm1, %v26876_v18  ;;  %v26898_v18 = vld [vmem:[#allocation62_spill] sm:$0xff] }
 0x252   : > { %19988 = vmatmul.mubr.msk.f32.gmra.mrb[40].mxu1 %vm358_vm1, %v26889_v54 }
 0x253   : > { %20936 = vmatmul.mubr.msk.f32.vlgmr.msra.gmra.mrb[2].mxu0 %vm358_vm1, %v26877_v20  ;;  %19992 = vmatprep.mubr.msk.f32.mxu1 %vm358_vm1, %v26890_v36  ;;  %v26899_v20 = vld [vmem:[#allocation63_spill] sm:$0xff] }
 0x254   : > { %20938 = vmatprep.mubr.msk.f32.mxu0 %vm358_vm1, %v26878_v32  ;;  %20957 = vmatpush3.msk.msra.mxu0 %vm1131_vm3, %v17899_v5  ;;  %v26895_v5 = vld [vmem:[#allocation59_spill] sm:$0xff]  ;;  %v26900_v32 = vld [vmem:[#allocation64_spill] sm:$0xff] }
 0x255   : > { %20979 = vmatprep.subr.msk.mxu0 %vm1131_vm3, %v17915_v16 }
 0x256   : > { %19993 = vmatmul.mubr.msk.f32.vlgmr.msra.gmra.mrb[28].mxu1 %vm358_vm1, %v26891_v10 }
 0x257   : > { %20939 = vmatmul.mubr.msk.f32.gmra.mrb[4].mxu0 %vm358_vm1, %v26879_v42  ;;  %19995 = vmatprep.mubr.msk.f32.mxu1 %vm358_vm1, %v26892_v15  ;;  %v26901_v42 = vld [vmem:[#allocation65_spill] sm:$0xff] }
 0x258   : > { %20941 = vmatprep.mubr.msk.f32.mxu0 %vm358_vm1, %v26880_v43  ;;  %20014 = vmatpush3.msk.msra.mxu1 %vm1131_vm3, %v17243_v17  ;;  %v26897_v17 = vld [vmem:[#allocation61_spill] sm:$0xff]  ;;  %v17947_v43 = vld [vmem:[%s26620_s6 + $0x5c] sm:$0xf] }
 0x259   : > { %20036 = vmatprep.subr.msk.mxu1 %vm1131_vm3, %v17259_v47 }
 0x25a   : > { %19996 = vmatmul.mubr.msk.f32.gmra.mrb[30].mxu1 %vm358_vm1, %v26893_v50 }
 0x25b   : > { %20942 = vmatmul.mubr.msk.f32.gmra.mrb[6].mxu0 %vm358_vm1, %v26881_v1  ;;  %19998 = vmatprep.mubr.msk.f32.mxu1 %vm358_vm1, %v26894_v56  ;;  %v17291_v1 = vld [vmem:[%s26618_s4 + $0x1c] sm:$0xf] }
 0x25c   : > { %20944 = vmatprep.mubr.msk.f32.mxu0 %vm358_vm1, %v26882_v12  ;;  %v24670_v12 = vld [vmem:[#allocation2 + $0x86] sm:$0xff] }
 0x25e   : > { %19999 = vmatmul.mubr.msk.f32.gmra.mrb[32].mxu1 %vm358_vm1, %v23794_v62 }
 0x25f   : > { %20945 = vmatmul.mubr.msk.f32.gmra.mrb[8].mxu0 %vm358_vm1, %v26883_v37  ;;  %20001 = vmatprep.mubr.msk.f32.mxu1 %vm358_vm1, %v23803_v60  ;;  %v24674_v37 = vld [vmem:[#allocation2 + $0x34] sm:$0xff] }
 0x260   : > { %20947 = vmatprep.mubr.msk.f32.mxu0 %vm358_vm1, %v26884_v55 }
 0x262   : > { %20002 = vmatmul.mubr.msk.f32.gmra.mrb[34].mxu1 %vm358_vm1, %v23811_v4 }
 0x263   : > { %20948 = vmatmul.mubr.msk.f32.gmra.mrb[10].mxu0 %vm358_vm1, %v26886_v34  ;;  %20004 = vmatprep.mubr.msk.f32.mxu1 %vm358_vm1, %v23819_v53 }
 0x264   : > { %20950 = vmatprep.mubr.msk.f32.mxu0 %vm358_vm1, %v26888_v29  ;;  %v24685_v29 = vld [vmem:[#allocation2 + $0x3c] sm:$0xff] }
 0x266   : > { %20005 = vmatmul.mubr.msk.f32.gmra.mrb[36].mxu1 %vm358_vm1, %v23827_v46 }
 0x267   : > { %20951 = vmatmul.mubr.msk.f32.gmra.mrb[12].mxu0 %vm358_vm1, %v26889_v54  ;;  %20007 = vmatprep.mubr.msk.f32.mxu1 %vm358_vm1, %v23835_v39 }
 0x268   : > { %20953 = vmatprep.mubr.msk.f32.mxu0 %vm358_vm1, %v24417_v8 }
 0x26a   : > { %20008 = vmatmul.mubr.msk.f32.gmra.mrb[38].mxu1 %vm358_vm1, %v23843_v63 }
 0x26b   : > { %20954 = vmatmul.mubr.msk.f32.gmra.mrb[14].mxu0 %vm358_vm1, %v24423_v19  ;;  %20010 = vmatprep.mubr.msk.f32.mxu1 %vm358_vm1, %v23851_v28 }
 0x26c   : > { %20958 = vmatprep.mubr.msk.f32.mxu0 %vm358_vm1, %v26892_v15  ;;  %v22888_v15 = vld [vmem:[#allocation2 + $0x27] sm:$0xff] }
 0x26e   : > { %20011 = vmatmul.mubr.msk.f32.gmra.mrb[40].mxu1 %vm358_vm1, %v23861_v27 }
 0x26f   : > { %20959 = vmatmul.mubr.msk.f32.vlgmr.msra.gmra.mrb[2].mxu0 %vm358_vm1, %v26893_v50  ;;  %20015 = vmatprep.mubr.msk.f32.mxu1 %vm358_vm1, %v26895_v5 }
 0x270   : > { %20961 = vmatprep.mubr.msk.f32.mxu0 %vm358_vm1, %v26894_v56  ;;  %20980 = vmatpush3.msk.msra.mxu0 %vm1131_vm3, %v17915_v16 }
 0x271   : > { %21002 = vmatprep.subr.msk.mxu0 %vm1131_vm3, %v17931_v3 }
 0x272   : > { %20016 = vmatmul.mubr.msk.f32.vlgmr.msra.gmra.mrb[28].mxu1 %vm358_vm1, %v26896_v13  ;;  %v24705_v13 = vld [vmem:[#allocation2 + $0x4c] sm:$0xff] }
 0x273   : > { %20962 = vmatmul.mubr.msk.f32.gmra.mrb[4].mxu0 %vm358_vm1, %v23794_v62  ;;  %20018 = vmatprep.mubr.msk.f32.mxu1 %vm358_vm1, %v26897_v17  ;;  %26903 = vst [vmem:[#allocation13_spill] sm:$0xff] %v24705_v13 }
 0x274   : > { %20964 = vmatprep.mubr.msk.f32.mxu0 %vm358_vm1, %v23803_v60  ;;  %20037 = vmatpush3.msk.msra.mxu1 %vm1131_vm3, %v17259_v47 }
 0x275   : > { %20059 = vmatprep.subr.msk.mxu1 %vm1131_vm3, %v17275_v0 }
 0x276   : > { %20019 = vmatmul.mubr.msk.f32.gmra.mrb[30].mxu1 %vm358_vm1, %v26898_v18 }
 0x277   : > { %20965 = vmatmul.mubr.msk.f32.gmra.mrb[6].mxu0 %vm358_vm1, %v23811_v4  ;;  %20021 = vmatprep.mubr.msk.f32.mxu1 %vm358_vm1, %v26899_v20 }
 0x278   : > { %20967 = vmatprep.mubr.msk.f32.mxu0 %vm358_vm1, %v23819_v53 }
 0x27a   : > { %20022 = vmatmul.mubr.msk.f32.gmra.mrb[32].mxu1 %vm358_vm1, %v23903_v6 }
 0x27b   : > { %20968 = vmatmul.mubr.msk.f32.gmra.mrb[8].mxu0 %vm358_vm1, %v23827_v46  ;;  %20024 = vmatprep.mubr.msk.f32.mxu1 %vm358_vm1, %v23910_v26 }
 0x27c   : > { %20970 = vmatprep.mubr.msk.f32.mxu0 %vm358_vm1, %v23835_v39 }
 0x27e   : > { %20025 = vmatmul.mubr.msk.f32.gmra.mrb[34].mxu1 %vm358_vm1, %v23916_v24 }
 0x27f   : > { %20971 = vmatmul.mubr.msk.f32.gmra.mrb[10].mxu0 %vm358_vm1, %v23843_v63  ;;  %20027 = vmatprep.mubr.msk.f32.mxu1 %vm358_vm1, %v23922_v38 }
 0x280   : > { %20973 = vmatprep.mubr.msk.f32.mxu0 %vm358_vm1, %v23851_v28 }
 0x282   : > { %20028 = vmatmul.mubr.msk.f32.gmra.mrb[36].mxu1 %vm358_vm1, %v23928_v23 }
 0x283   : > { %20974 = vmatmul.mubr.msk.f32.gmra.mrb[12].mxu0 %vm358_vm1, %v23861_v27  ;;  %20030 = vmatprep.mubr.msk.f32.mxu1 %vm358_vm1, %v23934_v33 }
 0x284   : > { %20976 = vmatprep.mubr.msk.f32.mxu0 %vm358_vm1, %v26900_v32 }
 0x286   : > { %20031 = vmatmul.mubr.msk.f32.gmra.mrb[38].mxu1 %vm358_vm1, %v23940_v59 }
 0x287   : > { %20977 = vmatmul.mubr.msk.f32.gmra.mrb[14].mxu0 %vm358_vm1, %v26901_v42  ;;  %20033 = vmatprep.mubr.msk.f32.mxu1 %vm358_vm1, %v23946_v61 }
 0x288   : > { %20981 = vmatprep.mubr.msk.f32.mxu0 %vm358_vm1, %v26893_v50  ;;  %v24698_v50 = vld [vmem:[#allocation2 + $0x44] sm:$0xff] }
 0x28a   : > { %20034 = vmatmul.mubr.msk.f32.gmra.mrb[40].mxu1 %vm358_vm1, %v23952_v21 }
 0x28b   : > { %20982 = vmatmul.mubr.msk.f32.vlgmr.msra.gmra.mrb[2].mxu0 %vm358_vm1, %v26894_v56  ;;  %20038 = vmatprep.mubr.msk.f32.mxu1 %vm358_vm1, %v24087_v44 }
 0x28c   : > { %20984 = vmatprep.mubr.msk.f32.mxu0 %vm358_vm1, %v23794_v62  ;;  %21003 = vmatpush3.msk.msra.mxu0 %vm1131_vm3, %v17931_v3  ;;  %v24627_v62 = vld [vmem:[#allocation2 + $0x5e] sm:$0xff] }
 0x28d   : > { %21025 = vmatprep.subr.msk.mxu0 %vm1131_vm3, %v17947_v43 }
 0x28e   : > { %20039 = vmatmul.mubr.msk.f32.vlgmr.msra.gmra.mrb[28].mxu1 %vm358_vm1, %v24098_v22 }
 0x28f   : > { %20985 = vmatmul.mubr.msk.f32.gmra.mrb[4].mxu0 %vm358_vm1, %v23803_v60  ;;  %20041 = vmatprep.mubr.msk.f32.mxu1 %vm358_vm1, %v23761_v35  ;;  %v24621_v60 = vld [vmem:[#allocation2 + $0x56] sm:$0xff] }
 0x290   : > { %20987 = vmatprep.mubr.msk.f32.mxu0 %vm358_vm1, %v23811_v4  ;;  %20060 = vmatpush3.msk.msra.mxu1 %vm1131_vm3, %v17275_v0  ;;  %v24653_v35 = vld [vmem:[#allocation2 + $0x76] sm:$0xff] }
 0x291   : > { %20082 = vmatprep.subr.msk.mxu1 %vm1131_vm3, %v17291_v1 }
 0x292   : > { %20042 = vmatmul.mubr.msk.f32.gmra.mrb[30].mxu1 %vm358_vm1, %v23771_v45  ;;  %v26902_v45 = vld [vmem:[#allocation66_spill] sm:$0xff] }
 0x293   : > { %20988 = vmatmul.mubr.msk.f32.gmra.mrb[6].mxu0 %vm358_vm1, %v23819_v53  ;;  %20044 = vmatprep.mubr.msk.f32.mxu1 %vm358_vm1, %v23779_v51  ;;  %v24609_v53 = vld [vmem:[#allocation2 + $0x46] sm:$0xff] }
 0x294   : > { %20990 = vmatprep.mubr.msk.f32.mxu0 %vm358_vm1, %v23827_v46  ;;  %v24597_v46 = vld [vmem:[#allocation2 + $0x36] sm:$0xff] }
 0x296   : > { %20045 = vmatmul.mubr.msk.f32.gmra.mrb[32].mxu1 %vm358_vm1, %v23792_v31 }
 0x297   : > { %20991 = vmatmul.mubr.msk.f32.gmra.mrb[8].mxu0 %vm358_vm1, %v23835_v39  ;;  %20047 = vmatprep.mubr.msk.f32.mxu1 %vm358_vm1, %v23801_v2  ;;  %v22872_v39 = vld [vmem:[#allocation2 + $0x26] sm:$0xff] }
 0x298   : > { %20993 = vmatprep.mubr.msk.f32.mxu0 %vm358_vm1, %v23843_v63 }
 0x29a   : > { %20048 = vmatmul.mubr.msk.f32.gmra.mrb[34].mxu1 %vm358_vm1, %v23809_v52 }
 0x29b   : > { %20994 = vmatmul.mubr.msk.f32.gmra.mrb[10].mxu0 %vm358_vm1, %v23851_v28  ;;  %20050 = vmatprep.mubr.msk.f32.mxu1 %vm358_vm1, %v23817_v58  ;;  %v24568_v28 = vld [vmem:[%s26620_s6 + $0x60] sm:$0xf]  ;;  %v24615_v58 = vld [vmem:[#allocation2 + $0x4e] sm:$0xff] }
 0x29c   : > { %20996 = vmatprep.mubr.msk.f32.mxu0 %vm358_vm1, %v23861_v27 }
 0x29e   : > { %20051 = vmatmul.mubr.msk.f32.gmra.mrb[36].mxu1 %vm358_vm1, %v23825_v48  ;;  %v24603_v48 = vld [vmem:[#allocation2 + $0x3e] sm:$0xff] }
 0x29f   : > { %20997 = vmatmul.mubr.msk.f32.gmra.mrb[12].mxu0 %vm358_vm1, %v26900_v32  ;;  %20053 = vmatprep.mubr.msk.f32.mxu1 %vm358_vm1, %v23833_v41  ;;  %v24588_v41 = vld [vmem:[#allocation2 + $0x2e] sm:$0xff] }
 0x2a0   : > { %20999 = vmatprep.mubr.msk.f32.mxu0 %vm358_vm1, %v26901_v42  ;;  %v22892_v42 = vld [vmem:[#allocation2 + $0x37] sm:$0xff] }
 0x2a2   : > { %20054 = vmatmul.mubr.msk.f32.gmra.mrb[38].mxu1 %vm358_vm1, %v23841_v7  ;;  %v24639_v7 = vld [vmem:[#allocation2 + $0x66] sm:$0xff] }
 0x2a3   : > { %21000 = vmatmul.mubr.msk.f32.gmra.mrb[14].mxu0 %vm358_vm1, %v24019_v25  ;;  %20056 = vmatprep.mubr.msk.f32.mxu1 %vm358_vm1, %v23849_v30  ;;  %v22871_v30 = vld [vmem:[#allocation2 + $0x1e] sm:$0xff] }
 0x2a4   : > { %21004 = vmatprep.mubr.msk.f32.mxu0 %vm358_vm1, %v26898_v18 }
 0x2a6   : > { %20057 = vmatmul.mubr.msk.f32.gmra.mrb[40].mxu1 %vm358_vm1, %v23859_v14  ;;  %v24586_v14 = vld [vmem:[%s26618_s4 + $0x20] sm:$0xf] }
 0x2a7   : > { %21005 = vmatmul.mubr.msk.f32.vlgmr.msra.gmra.mrb[2].mxu0 %vm358_vm1, %v26899_v20  ;;  %20061 = vmatprep.mubr.msk.f32.mxu1 %vm358_vm1, %v22871_v30 }
 0x2a8   : > { %21007 = vmatprep.mubr.msk.f32.mxu0 %vm358_vm1, %v23903_v6  ;;  %21026 = vmatpush3.msk.msra.mxu0 %vm1131_vm3, %v17947_v43  ;;  %v24665_v6 = vld [vmem:[#allocation2 + $0x2c] sm:$0xff]  ;;  %v24714_v43 = vld [vmem:[#allocation2 + $0x54] sm:$0xff] }
 0x2a9   : > { %21048 = vmatprep.subr.msk.mxu0 %vm1131_vm3, %v24568_v28  ;;  %26904 = vst [vmem:[#allocation29_spill] sm:$0xff] %v24714_v43 }
 0x2aa   : > { %20062 = vmatmul.mubr.msk.f32.vlgmr.msra.gmra.mrb[28].mxu1 %vm358_vm1, %v22872_v39 }
 0x2ab   : > { %21008 = vmatmul.mubr.msk.f32.gmra.mrb[4].mxu0 %vm358_vm1, %v23910_v26  ;;  %20064 = vmatprep.mubr.msk.f32.mxu1 %vm358_vm1, %v24588_v41 }
 0x2ac   : > { %21010 = vmatprep.mubr.msk.f32.mxu0 %vm358_vm1, %v23916_v24  ;;  %20083 = vmatpush3.msk.msra.mxu1 %vm1131_vm3, %v17291_v1  ;;  %v24661_v24 = vld [vmem:[#allocation2 + $0x7e] sm:$0xff] }
 0x2ad   : > { %20105 = vmatprep.subr.msk.mxu1 %vm1131_vm3, %v24586_v14 }
 0x2ae   : > { %20065 = vmatmul.mubr.msk.f32.gmra.mrb[30].mxu1 %vm358_vm1, %v24597_v46 }
 0x2af   : > { %21011 = vmatmul.mubr.msk.f32.gmra.mrb[6].mxu0 %vm358_vm1, %v23922_v38  ;;  %20067 = vmatprep.mubr.msk.f32.mxu1 %vm358_vm1, %v24603_v48 }
 0x2b0   : > { %21013 = vmatprep.mubr.msk.f32.mxu0 %vm358_vm1, %v23928_v23 }
 0x2b2   : > { %20068 = vmatmul.mubr.msk.f32.gmra.mrb[32].mxu1 %vm358_vm1, %v24609_v53 }
 0x2b3   : > { %21014 = vmatmul.mubr.msk.f32.gmra.mrb[8].mxu0 %vm358_vm1, %v23934_v33  ;;  %20070 = vmatprep.mubr.msk.f32.mxu1 %vm358_vm1, %v24615_v58 }
 0x2b4   : > { %21016 = vmatprep.mubr.msk.f32.mxu0 %vm358_vm1, %v23940_v59  ;;  %v24636_v59 = vld [vmem:[%s26617_s3] ss:$0 sm:$0xff] }
 0x2b6   : > { %20071 = vmatmul.mubr.msk.f32.gmra.mrb[34].mxu1 %vm358_vm1, %v24621_v60 }
 0x2b7   : > { %21017 = vmatmul.mubr.msk.f32.gmra.mrb[10].mxu0 %vm358_vm1, %v23946_v61  ;;  %20073 = vmatprep.mubr.msk.f32.mxu1 %vm358_vm1, %v24627_v62 }
 0x2b8   : > { %21019 = vmatprep.mubr.msk.f32.mxu0 %vm358_vm1, %v23952_v21  ;;  %v24646_v21 = vld [vmem:[#allocation2 + $0x6e] sm:$0xff] }
 0x2b9   : > { %v19902_v63 = vpop.f32.mrb[14].mxu1 }
 0x2ba   : > { %v2928_v2 = vadd.f32 %v19902_v63, %v24636_v59  ;;  %v2837_v4 = vpop.f32.mrb[15].mxu1  ;;  %20074 = vmatmul.mubr.msk.f32.gmra.mrb[36].mxu1 %vm358_vm1, %v24639_v7  ;;  %v24726_v63 = vld [vmem:[#allocation2 + $0x5c] sm:$0xff] }
 0x2bb   : > { %21020 = vmatmul.mubr.msk.f32.gmra.mrb[12].mxu0 %vm358_vm1, %v24075_v49  ;;  %v2927_v61 = vadd.f32 %v24636_v59, %v2837_v4  ;;  %20076 = vmatprep.mubr.msk.f32.mxu1 %vm358_vm1, %v24646_v21  ;;  %26905 = vst [vmem:[#allocation15_spill] sm:$0xff] %v24726_v63 }
 0x2bc   : > { %21022 = vmatprep.mubr.msk.f32.mxu0 %vm358_vm1, %v24081_v11  ;;  %v2942_v23 = vmax.f32 %v2928_v2, 0.0 }
 0x2bd   : > { %v19905_v27 = vpop.f32.mrb[16].mxu1  ;;  %v2941_v52 = vmax.f32 %v2927_v61, 0.0 }
 0x2be   : > { %v2930_v31 = vadd.f32 %v19905_v27, %v24636_v59  ;;  %v2847_v33 = vpop.f32.mrb[17].mxu1  ;;  %20077 = vmatmul.mubr.msk.f32.gmra.mrb[38].mxu1 %vm358_vm1, %v24653_v35  ;;  %v2959_v51 = vsel %vm2955_vm4, %v2942_v23, 0.0 }
 0x2bf   : > { %21023 = vmatmul.mubr.msk.f32.gmra.mrb[14].mxu0 %vm358_vm1, %v26902_v45  ;;  %v2929_v26 = vadd.f32 %v24636_v59, %v2847_v33  ;;  %20079 = vmatprep.mubr.msk.f32.mxu1 %vm358_vm1, %v24661_v24  ;;  %v2956_v16 = vsel %vm2955_vm4, %v2941_v52, 0.0  ;;  %v24735_v33 = vld [vmem:[#allocation2 + $0x64] sm:$0xff] }
 0x2c0   : > { %21027 = vmatprep.mubr.msk.f32.mxu0 %vm358_vm1, %v24665_v6  ;;  %v2944_v38 = vmax.f32 %v2930_v31, 0.0  ;;  %2960 = vadd.xlane.f32.xlu0 %v2959_v51  ;;  %v22896_v31 = vld [vmem:[#allocation2 + $0x47] sm:$0xff]  ;;  %26906 = vst [vmem:[#allocation30_spill] sm:$0xff] %v24735_v33 }
 0x2c1   : > { %v19908_v25 = vpop.f32.mrb[18].mxu1  ;;  %v2943_v34 = vmax.f32 %v2929_v26, 0.0 }
 0x2c2   : > { %v2932_v44 = vadd.f32 %v19908_v25, %v24636_v59  ;;  %v2857_v22 = vpop.f32.mrb[19].mxu1  ;;  %20080 = vmatmul.mubr.msk.f32.gmra.mrb[40].mxu1 %vm358_vm1, %v24670_v12  ;;  %v2965_v55 = vsel %vm2955_vm4, %v2944_v38, 0.0  ;;  %v22898_v38 = vld [vmem:[#allocation2 + $0x4f] sm:$0xff] }
 0x2c3   : > { %21028 = vmatmul.mubr.msk.f32.vlgmr.msra.gmra.mrb[2].mxu0 %vm358_vm1, %v24674_v37  ;;  %v2931_v9 = vadd.f32 %v24636_v59, %v2857_v22  ;;  %2966 = vadd.xlane.f32.xlu1 %v2965_v55  ;;  %v2962_v0 = vsel %vm2955_vm4, %v2943_v34, 0.0  ;;  %v24742_v25 = vld [vmem:[#allocation2 + $0x6c] sm:$0xff] }
 0x2c4   : > { %21030 = vmatprep.mubr.msk.f32.mxu0 %vm358_vm1, %v24685_v29  ;;  %21049 = vmatpush3.msk.msra.mxu0 %vm1131_vm3, %v24568_v28  ;;  %v2946_v54 = vmax.f32 %v2932_v44, 0.0  ;;  %v24722_v28 = vld [vmem:[%s26618_s4 + $0x24] sm:$0xf]  ;;  %26907 = vst [vmem:[#allocation17_spill] sm:$0xff] %v24742_v25 }
 0x2c5   : > { %2957 = vadd.xlane.f32.xlu0 %v2956_v16  ;;  %v19911_v36 = vpop.f32.mrb[20].mxu1  ;;  %20084 = vmatprep.mubr.msk.f32.mxu1 %vm358_vm1, %v24251_v40  ;;  %v2945_v3 = vmax.f32 %v2931_v9, 0.0  ;;  %v22890_v40 = vld [vmem:[#allocation2 + $0x2f] sm:$0xff]  ;;  %v22900_v16 = vld [vmem:[#allocation2 + $0x57] sm:$0xff] }
 0x2c6   : > { %21071 = vmatprep.subr.msk.mxu0 %vm1131_vm3, %v24682_v57  ;;  %v2934_v10 = vadd.f32 %v19911_v36, %v24636_v59  ;;  %v2867_v47 = vpop.f32.mrb[21].mxu1  ;;  %20085 = vmatmul.mubr.msk.f32.vlgmr.msra.gmra.mrb[28].mxu1 %vm358_vm1, %v22888_v15  ;;  %v2971_v56 = vsel %vm2955_vm4, %v2946_v54, 0.0  ;;  %v24749_v54 = vld [vmem:[#allocation2 + $0x74] sm:$0xff]  ;;  %v22902_v15 = vld [vmem:[#allocation2 + $0x5f] sm:$0xff] }
 0x2c7   : > { %21031 = vmatmul.mubr.msk.f32.gmra.mrb[4].mxu0 %vm358_vm1, %v24698_v50  ;;  %v2933_v5 = vadd.f32 %v24636_v59, %v2867_v47  ;;  %20087 = vmatprep.mubr.msk.f32.mxu1 %vm358_vm1, %v22890_v40  ;;  %v2968_v2 = vsel %vm2955_vm4, %v2945_v3, 0.0  ;;  %v22904_v40 = vld [vmem:[#allocation2 + $0x67] sm:$0xff] }
 0x2c8   : > { %21033 = vmatprep.mubr.msk.f32.mxu0 %vm358_vm1, %v24705_v13  ;;  %v2948_v17 = vmax.f32 %v2934_v10, 0.0  ;;  %2972 = vadd.xlane.f32.xlu1 %v2971_v56  ;;  %v24756_v56 = vld [vmem:[#allocation2 + $0x7c] sm:$0xff] }
 0x2c9   : > { %2963 = vadd.xlane.f32.xlu0 %v2962_v0  ;;  %v19914_v18 = vpop.f32.mrb[22].mxu1  ;;  %20106 = vmatpush3.msk.msra.mxu1 %vm1131_vm3, %v24586_v14  ;;  %v2947_v30 = vmax.f32 %v2933_v5, 0.0  ;;  %v22894_v14 = vld [vmem:[#allocation2 + $0x3f] sm:$0xff]  ;;  %26908 = vst [vmem:[#allocation31_spill] sm:$0xff] %v24756_v56 }
 0x2ca   : > { %v2936_v20 = vadd.f32 %v19914_v18, %v24636_v59  ;;  %v2877_v32 = vpop.f32.mrb[23].mxu1  ;;  %20088 = vmatmul.mubr.msk.f32.gmra.mrb[30].mxu1 %vm358_vm1, %v22892_v42  ;;  %v2977_v1 = vsel %vm2955_vm4, %v2948_v17, 0.0  ;;  %20128 = vmatprep.subr.msk.mxu1 %vm1131_vm3, %v24722_v28  ;;  %v24762_v0 = vld [vmem:[#allocation2 + $0x84] sm:$0xff]  ;;  %v22906_v18 = vld [vmem:[#allocation2 + $0x6f] sm:$0xff]  ;;  %v22908_v42 = vld [vmem:[#allocation2 + $0x77] sm:$0xff] }
 0x2cb   : > { %21034 = vmatmul.mubr.msk.f32.gmra.mrb[6].mxu0 %vm358_vm1, %v24714_v43  ;;  %v2935_v39 = vadd.f32 %v24636_v59, %v2877_v32  ;;  %20090 = vmatprep.mubr.msk.f32.mxu1 %vm358_vm1, %v22894_v14  ;;  %v2974_v44 = vsel %vm2955_vm4, %v2947_v30, 0.0  ;;  %v22910_v30 = vld [vmem:[#allocation2 + $0x7f] sm:$0xff] }
 0x2cc   : > { %21036 = vmatprep.mubr.msk.f32.mxu0 %vm358_vm1, %v24726_v63  ;;  %v2950_v4 = vmax.f32 %v2936_v20, 0.0  ;;  %2978 = vadd.xlane.f32.xlu1 %v2977_v1  ;;  %v24768_v20 = vld [vmem:[#allocation2 + $0x8c] sm:$0xff]  ;;  %v24774_v1 = vld [vmem:[#allocation2 + $0x94] sm:$0xff] }
 0x2cd   : > { %2969 = vadd.xlane.f32.xlu0 %v2968_v2  ;;  %v19917_v61 = vpop.f32.mrb[24].mxu1  ;;  %v2949_v52 = vmax.f32 %v2935_v39, 0.0  ;;  %v24779_v39 = vld [vmem:[#allocation2 + $0x2d] sm:$0xff]  ;;  %v24787_v2 = vld [vmem:[%s26620_s6 + $0x68] sm:$0xf] }
 0x2ce   : > { %v2938_v23 = vadd.f32 %v19917_v61, %v24636_v59  ;;  %v2887_v27 = vpop.f32.mrb[25].mxu1  ;;  %20091 = vmatmul.mubr.msk.f32.gmra.mrb[32].mxu1 %vm358_vm1, %v22896_v31  ;;  %v2983_v51 = vsel %vm2955_vm4, %v2950_v4, 0.0  ;;  %v22912_v4 = vld [vmem:[#allocation2 + $0x87] sm:$0xff]  ;;  %v24790_v61 = vld [vmem:[#allocation2 + $0x35] sm:$0xff] }
 0x2cf   : > { %21037 = vmatmul.mubr.msk.f32.gmra.mrb[8].mxu0 %vm358_vm1, %v24735_v33  ;;  %v2937_v26 = vadd.f32 %v24636_v59, %v2887_v27  ;;  %20093 = vmatprep.mubr.msk.f32.mxu1 %vm358_vm1, %v22898_v38  ;;  %v2980_v3 = vsel %vm2955_vm4, %v2949_v52, 0.0  ;;  %v22915_v27 = vld [vmem:[#allocation2 + $0x20] sm:$0xff]  ;;  %v22916_v31 = vld [vmem:[#allocation2 + $0x28] sm:$0xff]  ;;  %v22920_v38 = vld [vmem:[#allocation2 + $0x38] sm:$0xff] }
 0x2d0   : > { %21039 = vmatprep.mubr.msk.f32.mxu0 %vm358_vm1, %v24742_v25  ;;  %v2952_v22 = vmax.f32 %v2938_v23, 0.0  ;;  %2984 = vadd.xlane.f32.xlu1 %v2983_v51  ;;  %v24794_v23 = vld [vmem:[#allocation2 + $0x3d] sm:$0xff]  ;;  %v24804_v51 = vld [vmem:[#allocation2 + $0x45] sm:$0xff] }
 0x2d1   : > { %2975 = vadd.xlane.f32.xlu0 %v2974_v44  ;;  %v19920_v55 = vpop.f32.mrb[26].mxu1  ;;  %v2951_v10 = vmax.f32 %v2937_v26, 0.0  ;;  %v17339_v52 = vld [vmem:[%s26618_s4 + $0x28] sm:$0xf]  ;;  %v22918_v26 = vld [vmem:[#allocation2 + $0x30] sm:$0xff] }
 0x2d2   : > { %v2940_v34 = vadd.f32 %v19920_v55, %v24636_v59  ;;  %v2897_v9 = vpop.f32.mrb[27].mxu1  ;;  %20094 = vmatmul.mubr.msk.f32.gmra.mrb[34].mxu1 %vm358_vm1, %v22900_v16  ;;  %v2989_v36 = vsel %vm2955_vm4, %v2952_v22, 0.0  ;;  %v24820_v44 = vld [vmem:[#allocation2 + $0x55] sm:$0xff]  ;;  %v22922_v22 = vld [vmem:[#allocation2 + $0x40] sm:$0xff]  ;;  %v24835_v16 = vld [vmem:[#allocation2 + $0x6d] sm:$0xff] }
 0x2d3   : > { %21040 = vmatmul.mubr.msk.f32.gmra.mrb[10].mxu0 %vm358_vm1, %v24749_v54  ;;  %v2939_v47 = vadd.f32 %v24636_v59, %v2897_v9  ;;  %20096 = vmatprep.mubr.msk.f32.mxu1 %vm358_vm1, %v22902_v15  ;;  %v2986_v32 = vsel %vm2955_vm4, %v2951_v10, 0.0  ;;  %v24825_v55 = vld [vmem:[#allocation2 + $0x5d] sm:$0xff]  ;;  %v22926_v9 = vld [vmem:[#allocation2 + $0x50] sm:$0xff] }
 0x2d4   : > { %21042 = vmatprep.mubr.msk.f32.mxu0 %vm358_vm1, %v24756_v56  ;;  %v2954_v5 = vmax.f32 %v2940_v34, 0.0  ;;  %2990 = vadd.xlane.f32.xlu1 %v2989_v36  ;;  %v22924_v34 = vld [vmem:[#allocation2 + $0x48] sm:$0xff]  ;;  %v22928_v36 = vld [vmem:[#allocation2 + $0x58] sm:$0xff] }
 0x2d5   : > { %2981 = vadd.xlane.f32.xlu0 %v2980_v3  ;;  %v2953_v17 = vmax.f32 %v2939_v47, 0.0  ;;  %v24840_v10 = vld [vmem:[#allocation2 + $0x75] sm:$0xff]  ;;  %v22930_v47 = vld [vmem:[#allocation2 + $0x60] sm:$0xff]  ;;  %v22932_v3 = vld [vmem:[#allocation2 + $0x68] sm:$0xff] }
 0x2d6   : > { %20097 = vmatmul.mubr.msk.f32.gmra.mrb[36].mxu1 %vm358_vm1, %v22904_v40  ;;  %v2995_v59 = vsel %vm2955_vm4, %v2954_v5, 0.0  ;;  %v24845_v15 = vld [vmem:[#allocation2 + $0x7d] sm:$0xff]  ;;  %v24850_v5 = vld [vmem:[#allocation2 + $0x85] sm:$0xff]  ;;  %v22934_v40 = vld [vmem:[#allocation2 + $0x70] sm:$0xff] }
 0x2d7   : > { %21043 = vmatmul.mubr.msk.f32.gmra.mrb[12].mxu0 %vm358_vm1, %v24762_v0  ;;  %20099 = vmatprep.mubr.msk.f32.mxu1 %vm358_vm1, %v22906_v18  ;;  %v2992_v14 = vsel %vm2955_vm4, %v2953_v17, 0.0  ;;  %v22936_v17 = vld [vmem:[#allocation2 + $0x78] sm:$0xff] }
 0x2d8   : > { %21045 = vmatprep.mubr.msk.f32.mxu0 %vm358_vm1, %v24768_v20  ;;  %2996 = vadd.xlane.f32.xlu1 %v2995_v59  ;;  %v24855_v59 = vld [vmem:[#allocation2 + $0x8d] sm:$0xff]  ;;  %v24860_v18 = vld [vmem:[#allocation2 + $0x95] sm:$0xff] }
 0x2d9   : > { %2987 = vadd.xlane.f32.xlu0 %v2986_v32  ;;  %v22938_v32 = vld [vmem:[#allocation2 + $0x80] sm:$0xff] }
 0x2da   : > { %20100 = vmatmul.mubr.msk.f32.gmra.mrb[38].mxu1 %vm358_vm1, %v22908_v42  ;;  %v18011_v42 = vld [vmem:[%s26620_s6 + $0x6c] sm:$0xf] }
 0x2db   : > { %21046 = vmatmul.mubr.msk.f32.gmra.mrb[14].mxu0 %vm358_vm1, %v24774_v1  ;;  %20102 = vmatprep.mubr.msk.f32.mxu1 %vm358_vm1, %v22910_v30  ;;  %v22939_v30 = vld [vmem:[#allocation2 + $0x88] sm:$0xff] }
 0x2dc   : > { %21050 = vmatprep.mubr.msk.f32.mxu0 %vm358_vm1, %v24779_v39 }
 0x2dd   : > { %2993 = vadd.xlane.f32.xlu0 %v2992_v14  ;;  %v22940_v14 = vld [vmem:[#allocation2 + $0x21] sm:$0xff] }
 0x2de   : > { %20103 = vmatmul.mubr.msk.f32.gmra.mrb[40].mxu1 %vm358_vm1, %v22912_v4  ;;  %v22941_v4 = vld [vmem:[#allocation2 + $0x29] sm:$0xff] }
 0x2df   : > { %21051 = vmatmul.mubr.msk.f32.vlgmr.msra.gmra.mrb[2].mxu0 %vm358_vm1, %v24790_v61  ;;  %20107 = vmatprep.mubr.msk.f32.mxu1 %vm358_vm1, %v22915_v27  ;;  %v17355_v27 = vld [vmem:[%s26618_s4 + $0x2c] sm:$0xf] }
 0x2e0   : > { %21053 = vmatprep.mubr.msk.f32.mxu0 %vm358_vm1, %v24794_v23  ;;  %21072 = vmatpush3.msk.msra.mxu0 %vm1131_vm3, %v24682_v57  ;;  %v24812_v57 = vld [vmem:[#allocation2 + $0x4d] sm:$0xff] }
 0x2e1   : > { %21094 = vmatprep.subr.msk.mxu0 %vm1131_vm3, %v24787_v2 }
 0x2e2   : > { %20108 = vmatmul.mubr.msk.f32.vlgmr.msra.gmra.mrb[28].mxu1 %vm358_vm1, %v22916_v31  ;;  %v22942_v31 = vld [vmem:[#allocation2 + $0x31] sm:$0xff] }
 0x2e3   : > { %21054 = vmatmul.mubr.msk.f32.gmra.mrb[4].mxu0 %vm358_vm1, %v24804_v51  ;;  %20110 = vmatprep.mubr.msk.f32.mxu1 %vm358_vm1, %v22918_v26  ;;  %v22944_v26 = vld [vmem:[#allocation2 + $0x41] sm:$0xff] }
 0x2e4   : > { %21056 = vmatprep.mubr.msk.f32.mxu0 %vm358_vm1, %v24812_v57  ;;  %20129 = vmatpush3.msk.msra.mxu1 %vm1131_vm3, %v24722_v28  ;;  %v24830_v28 = vld [vmem:[#allocation2 + $0x65] sm:$0xff] }
 0x2e5   : > { %20151 = vmatprep.subr.msk.mxu1 %vm1131_vm3, %v17339_v52 }
 0x2e6   : > { %20111 = vmatmul.mubr.msk.f32.gmra.mrb[30].mxu1 %vm358_vm1, %v22920_v38  ;;  %v22945_v38 = vld [vmem:[#allocation2 + $0x49] sm:$0xff] }
 0x2e7   : > { %21057 = vmatmul.mubr.msk.f32.gmra.mrb[6].mxu0 %vm358_vm1, %v24820_v44  ;;  %20113 = vmatprep.mubr.msk.f32.mxu1 %vm358_vm1, %v22922_v22  ;;  %v22947_v22 = vld [vmem:[#allocation2 + $0x59] sm:$0xff] }
 0x2e8   : > { %21059 = vmatprep.mubr.msk.f32.mxu0 %vm358_vm1, %v24825_v55 }
 0x2ea   : > { %20114 = vmatmul.mubr.msk.f32.gmra.mrb[32].mxu1 %vm358_vm1, %v22924_v34  ;;  %v22948_v34 = vld [vmem:[#allocation2 + $0x61] sm:$0xff] }
 0x2eb   : > { %21060 = vmatmul.mubr.msk.f32.gmra.mrb[8].mxu0 %vm358_vm1, %v24830_v28  ;;  %20116 = vmatprep.mubr.msk.f32.mxu1 %vm358_vm1, %v22926_v9  ;;  %v22949_v9 = vld [vmem:[#allocation2 + $0x69] sm:$0xff] }
 0x2ec   : > { %21062 = vmatprep.mubr.msk.f32.mxu0 %vm358_vm1, %v24835_v16 }
 0x2ee   : > { %20117 = vmatmul.mubr.msk.f32.gmra.mrb[34].mxu1 %vm358_vm1, %v22928_v36  ;;  %v22950_v36 = vld [vmem:[#allocation2 + $0x71] sm:$0xff] }
 0x2ef   : > { %21063 = vmatmul.mubr.msk.f32.gmra.mrb[10].mxu0 %vm358_vm1, %v24840_v10  ;;  %20119 = vmatprep.mubr.msk.f32.mxu1 %vm358_vm1, %v22930_v47  ;;  %v24912_v47 = vld [vmem:[#allocation2 + $0x8e] sm:$0xff] }
 0x2f0   : > { %21065 = vmatprep.mubr.msk.f32.mxu0 %vm358_vm1, %v24845_v15 }
 0x2f2   : > { %20120 = vmatmul.mubr.msk.f32.gmra.mrb[36].mxu1 %vm358_vm1, %v22932_v3  ;;  %v22952_v3 = vld [vmem:[#allocation2 + $0x79] sm:$0xff] }
 0x2f3   : > { %21066 = vmatmul.mubr.msk.f32.gmra.mrb[12].mxu0 %vm358_vm1, %v24850_v5  ;;  %20122 = vmatprep.mubr.msk.f32.mxu1 %vm358_vm1, %v22934_v40  ;;  %v24917_v40 = vld [vmem:[#allocation2 + $0x96] sm:$0xff] }
 0x2f4   : > { %21068 = vmatprep.mubr.msk.f32.mxu0 %vm358_vm1, %v24855_v59 }
 0x2f6   : > { %20123 = vmatmul.mubr.msk.f32.gmra.mrb[38].mxu1 %vm358_vm1, %v22936_v17  ;;  %v24921_v17 = vld [vmem:[#allocation2 + $0x2f] sm:$0xff] }
 0x2f7   : > { %21069 = vmatmul.mubr.msk.f32.gmra.mrb[14].mxu0 %vm358_vm1, %v24860_v18  ;;  %20125 = vmatprep.mubr.msk.f32.mxu1 %vm358_vm1, %v22938_v32  ;;  %v24927_v32 = vld [vmem:[#allocation2 + $0x37] sm:$0xff] }
 0x2f8   : > { %21073 = vmatprep.mubr.msk.f32.mxu0 %vm358_vm1, %v24588_v41 }
 0x2fa   : > { %20126 = vmatmul.mubr.msk.f32.gmra.mrb[40].mxu1 %vm358_vm1, %v22939_v30  ;;  %v24933_v30 = vld [vmem:[#allocation2 + $0x3f] sm:$0xff] }
 0x2fb   : > { %21074 = vmatmul.mubr.msk.f32.vlgmr.msra.gmra.mrb[2].mxu0 %vm358_vm1, %v24597_v46  ;;  %20130 = vmatprep.mubr.msk.f32.mxu1 %vm358_vm1, %v22940_v14  ;;  %v18027_v14 = vld [vmem:[%s26620_s6 + $0x70] sm:$0xf] }
 0x2fc   : > { %21076 = vmatprep.mubr.msk.f32.mxu0 %vm358_vm1, %v24603_v48  ;;  %21095 = vmatpush3.msk.msra.mxu0 %vm1131_vm3, %v24787_v2  ;;  %v22943_v2 = vld [vmem:[#allocation2 + $0x39] sm:$0xff] }
 0x2fd   : > { %21117 = vmatprep.subr.msk.mxu0 %vm1131_vm3, %v18011_v42 }
 0x2fe   : > { %20131 = vmatmul.mubr.msk.f32.vlgmr.msra.gmra.mrb[28].mxu1 %vm358_vm1, %v22941_v4  ;;  %v22954_v4 = vld [vmem:[#allocation2 + $0x2b] sm:$0xff] }
 0x2ff   : > { %21077 = vmatmul.mubr.msk.f32.gmra.mrb[4].mxu0 %vm358_vm1, %v24609_v53  ;;  %20133 = vmatprep.mubr.msk.f32.mxu1 %vm358_vm1, %v22942_v31  ;;  %v24948_v31 = vld [vmem:[#allocation2 + $0x4f] sm:$0xff] }
 0x300   : > { %21079 = vmatprep.mubr.msk.f32.mxu0 %vm358_vm1, %v24615_v58  ;;  %20152 = vmatpush3.msk.msra.mxu1 %vm1131_vm3, %v17339_v52  ;;  %v22946_v52 = vld [vmem:[#allocation2 + $0x51] sm:$0xff] }
 0x301   : > { %20174 = vmatprep.subr.msk.mxu1 %vm1131_vm3, %v17355_v27 }
 0x302   : > { %20134 = vmatmul.mubr.msk.f32.gmra.mrb[30].mxu1 %vm358_vm1, %v22943_v2  ;;  %v17371_v2 = vld [vmem:[%s26618_s4 + $0x30] sm:$0xf] }
 0x303   : > { %21080 = vmatmul.mubr.msk.f32.gmra.mrb[6].mxu0 %vm358_vm1, %v24621_v60  ;;  %20136 = vmatprep.mubr.msk.f32.mxu1 %vm358_vm1, %v22944_v26  ;;  %v24953_v26 = vld [vmem:[#allocation2 + $0x3b] sm:$0xff] }
 0x304   : > { %21082 = vmatprep.mubr.msk.f32.mxu0 %vm358_vm1, %v24627_v62  ;;  %26909 = vst [vmem:[#allocation19_spill] sm:$0xff] %v24953_v26 }
 0x306   : > { %20137 = vmatmul.mubr.msk.f32.gmra.mrb[32].mxu1 %vm358_vm1, %v22945_v38  ;;  %v24963_v38 = vld [vmem:[#allocation2 + $0x43] sm:$0xff] }
 0x307   : > { %21083 = vmatmul.mubr.msk.f32.gmra.mrb[8].mxu0 %vm358_vm1, %v24639_v7  ;;  %20139 = vmatprep.mubr.msk.f32.mxu1 %vm358_vm1, %v22946_v52  ;;  %26910 = vst [vmem:[#allocation32_spill] sm:$0xff] %v24963_v38  ;;  %v24969_v52 = vld [vmem:[#allocation2 + $0x5f] sm:$0xff] }
 0x308   : > { %21085 = vmatprep.mubr.msk.f32.mxu0 %vm358_vm1, %v24646_v21 }
 0x30a   : > { %20140 = vmatmul.mubr.msk.f32.gmra.mrb[34].mxu1 %vm358_vm1, %v22947_v22  ;;  %v24971_v22 = vld [vmem:[#allocation2 + $0x4b] sm:$0xff] }
 0x30b   : > { %21086 = vmatmul.mubr.msk.f32.gmra.mrb[10].mxu0 %vm358_vm1, %v24653_v35  ;;  %20142 = vmatprep.mubr.msk.f32.mxu1 %vm358_vm1, %v22948_v34  ;;  %26911 = vst [vmem:[#allocation23_spill] sm:$0xff] %v24971_v22  ;;  %v24979_v34 = vld [vmem:[#allocation2 + $0x53] sm:$0xff] }
 0x30c   : > { %21088 = vmatprep.mubr.msk.f32.mxu0 %vm358_vm1, %v24661_v24  ;;  %26912 = vst [vmem:[#allocation33_spill] sm:$0xff] %v24979_v34 }
 0x30e   : > { %20143 = vmatmul.mubr.msk.f32.gmra.mrb[36].mxu1 %vm358_vm1, %v22949_v9  ;;  %v24985_v9 = vld [vmem:[#allocation2 + $0x6f] sm:$0xff] }
 0x30f   : > { %21089 = vmatmul.mubr.msk.f32.gmra.mrb[12].mxu0 %vm358_vm1, %v24670_v12  ;;  %20145 = vmatprep.mubr.msk.f32.mxu1 %vm358_vm1, %v22950_v36  ;;  %v24987_v36 = vld [vmem:[#allocation2 + $0x5b] sm:$0xff] }
 0x310   : > { %21091 = vmatprep.mubr.msk.f32.mxu0 %vm358_vm1, %v24912_v47  ;;  %26913 = vst [vmem:[#allocation25_spill] sm:$0xff] %v24987_v36 }
 0x312   : > { %20146 = vmatmul.mubr.msk.f32.gmra.mrb[38].mxu1 %vm358_vm1, %v22952_v3  ;;  %v24993_v3 = vld [vmem:[#allocation2 + $0x77] sm:$0xff] }
 0x313   : > { %21092 = vmatmul.mubr.msk.f32.gmra.mrb[14].mxu0 %vm358_vm1, %v24917_v40  ;;  %20148 = vmatprep.mubr.msk.f32.mxu1 %vm358_vm1, %v24417_v8  ;;  %v24942_v8 = vld [vmem:[#allocation2 + $0x47] sm:$0xff] }
 0x314   : > { %21096 = vmatprep.mubr.msk.f32.mxu0 %vm358_vm1, %v24921_v17 }
 0x316   : > { %20149 = vmatmul.mubr.msk.f32.gmra.mrb[40].mxu1 %vm358_vm1, %v24423_v19  ;;  %v22955_v19 = vld [vmem:[#allocation2 + $0x33] sm:$0xff] }
 0x317   : > { %21097 = vmatmul.mubr.msk.f32.vlgmr.msra.gmra.mrb[2].mxu0 %vm358_vm1, %v24927_v32  ;;  %20153 = vmatprep.mubr.msk.f32.mxu1 %vm358_vm1, %v22954_v4  ;;  %v24995_v4 = vld [vmem:[#allocation2 + $0x63] sm:$0xff] }
 0x318   : > { %21099 = vmatprep.mubr.msk.f32.mxu0 %vm358_vm1, %v24933_v30  ;;  %21118 = vmatpush3.msk.msra.mxu0 %vm1131_vm3, %v18011_v42  ;;  %v24960_v42 = vld [vmem:[#allocation2 + $0x57] sm:$0xff]  ;;  %26914 = vst [vmem:[#allocation34_spill] sm:$0xff] %v24995_v4 }
 0x319   : > { %21140 = vmatprep.subr.msk.mxu0 %vm1131_vm3, %v18027_v14 }
 0x31a   : > { %20154 = vmatmul.mubr.msk.f32.vlgmr.msra.gmra.mrb[28].mxu1 %vm358_vm1, %v22955_v19  ;;  %v25001_v19 = vld [vmem:[#allocation2 + $0x7f] sm:$0xff] }
 0x31b   : > { %21100 = vmatmul.mubr.msk.f32.gmra.mrb[4].mxu0 %vm358_vm1, %v24942_v8  ;;  %20156 = vmatprep.mubr.msk.f32.mxu1 %vm358_vm1, %v24953_v26  ;;  %v12622_v26 = vld [vmem:[#allocation2 + $0x38] sm:$0xff] }
 0x31c   : > { %21102 = vmatprep.mubr.msk.f32.mxu0 %vm358_vm1, %v24948_v31  ;;  %20175 = vmatpush3.msk.msra.mxu1 %vm1131_vm3, %v17355_v27  ;;  %v24977_v27 = vld [vmem:[#allocation2 + $0x67] sm:$0xff] }
 0x31d   : > { %20197 = vmatprep.subr.msk.mxu1 %vm1131_vm3, %v17371_v2 }
 0x31e   : > { %20157 = vmatmul.mubr.msk.f32.gmra.mrb[30].mxu1 %vm358_vm1, %v24963_v38  ;;  %v25019_v38 = vld [vmem:[#allocation2 + $0x7b] sm:$0xff] }
 0x31f   : > { %21103 = vmatmul.mubr.msk.f32.gmra.mrb[6].mxu0 %vm358_vm1, %v24960_v42  ;;  %20159 = vmatprep.mubr.msk.f32.mxu1 %vm358_vm1, %v24971_v22  ;;  %v25011_v22 = vld [vmem:[#allocation2 + $0x73] sm:$0xff]  ;;  %26917 = vst [vmem:[#allocation36_spill] sm:$0xff] %v25019_v38 }
 0x320   : > { %21105 = vmatprep.mubr.msk.f32.mxu0 %vm358_vm1, %v24969_v52  ;;  %26916 = vst [vmem:[#allocation35_spill] sm:$0xff] %v25011_v22 }
 0x322   : > { %20160 = vmatmul.mubr.msk.f32.gmra.mrb[32].mxu1 %vm358_vm1, %v24979_v34  ;;  %v25003_v34 = vld [vmem:[#allocation2 + $0x6b] sm:$0xff] }
 0x323   : > { %21106 = vmatmul.mubr.msk.f32.gmra.mrb[8].mxu0 %vm358_vm1, %v24977_v27  ;;  %20162 = vmatprep.mubr.msk.f32.mxu1 %vm358_vm1, %v24987_v36  ;;  %26915 = vst [vmem:[#allocation28_spill] sm:$0xff] %v25003_v34  ;;  %v25009_v36 = vld [vmem:[#allocation2 + $0x87] sm:$0xff] }
 0x324   : > { %21108 = vmatprep.mubr.msk.f32.mxu0 %vm358_vm1, %v24985_v9 }
 0x326   : > { %20163 = vmatmul.mubr.msk.f32.gmra.mrb[34].mxu1 %vm358_vm1, %v24995_v4  ;;  %v25017_v4 = vld [vmem:[#allocation2 + $0x8f] sm:$0xff] }
 0x327   : > { %21109 = vmatmul.mubr.msk.f32.gmra.mrb[10].mxu0 %vm358_vm1, %v24993_v3  ;;  %20165 = vmatprep.mubr.msk.f32.mxu1 %vm358_vm1, %v25003_v34  ;;  %v25025_v34 = vld [vmem:[#allocation2 + $0x97] sm:$0xff] }
 0x328   : > { %21111 = vmatprep.mubr.msk.f32.mxu0 %vm358_vm1, %v25001_v19 }
 0x32a   : > { %20166 = vmatmul.mubr.msk.f32.gmra.mrb[36].mxu1 %vm358_vm1, %v25011_v22  ;;  %v12621_v22 = vld [vmem:[#allocation2 + $0x30] sm:$0xff] }
 0x32b   : > { %21112 = vmatmul.mubr.msk.f32.gmra.mrb[12].mxu0 %vm358_vm1, %v25009_v36  ;;  %20168 = vmatprep.mubr.msk.f32.mxu1 %vm358_vm1, %v25019_v38  ;;  %v12623_v38 = vld [vmem:[#allocation2 + $0x40] sm:$0xff] }
 0x32c   : > { %21114 = vmatprep.mubr.msk.f32.mxu0 %vm358_vm1, %v25017_v4 }
 0x32e   : > { %20169 = vmatmul.mubr.msk.f32.gmra.mrb[38].mxu1 %vm358_vm1, %v24075_v49  ;;  %v18043_v49 = vld [vmem:[%s26620_s6 + $0x74] sm:$0xf] }
 0x32f   : > { %21115 = vmatmul.mubr.msk.f32.gmra.mrb[14].mxu0 %vm358_vm1, %v25025_v34  ;;  %20171 = vmatprep.mubr.msk.f32.mxu1 %vm358_vm1, %v24081_v11  ;;  %v25044_v11 = vld [vmem:[#allocation2 + $0x48] sm:$0xff] }
 0x330   : > { %21119 = vmatprep.mubr.msk.f32.mxu0 %vm358_vm1, %v12621_v22  ;;  %v25074_v22 = vld [vmem:[#allocation2 + $0x68] sm:$0xff] }
 0x332   : > { %20172 = vmatmul.mubr.msk.f32.gmra.mrb[40].mxu1 %vm358_vm1, %v26902_v45  ;;  %v25051_v45 = vld [vmem:[#allocation2 + $0x50] sm:$0xff] }
 0x333   : > { %21120 = vmatmul.mubr.msk.f32.vlgmr.msra.gmra.mrb[2].mxu0 %vm358_vm1, %v12622_v26  ;;  %20176 = vmatprep.mubr.msk.f32.mxu1 %vm358_vm1, %v24665_v6  ;;  %v17387_v6 = vld [vmem:[%s26618_s4 + $0x34] sm:$0xf] }
 0x334   : > { %21122 = vmatprep.mubr.msk.f32.mxu0 %vm358_vm1, %v12623_v38  ;;  %21141 = vmatpush3.msk.msra.mxu0 %vm1131_vm3, %v18027_v14  ;;  %v25061_v14 = vld [vmem:[#allocation2 + $0x58] sm:$0xff] }
 0x335   : > { %21163 = vmatprep.subr.msk.mxu0 %vm1131_vm3, %v18043_v49 }
 0x336   : > { %20177 = vmatmul.mubr.msk.f32.vlgmr.msra.gmra.mrb[28].mxu1 %vm358_vm1, %v24674_v37  ;;  %v25068_v37 = vld [vmem:[#allocation2 + $0x60] sm:$0xff] }
 0x337   : > { %21123 = vmatmul.mubr.msk.f32.gmra.mrb[4].mxu0 %vm358_vm1, %v25044_v11  ;;  %20179 = vmatprep.mubr.msk.f32.mxu1 %vm358_vm1, %v24685_v29 }
 0x338   : > { %21125 = vmatprep.mubr.msk.f32.mxu0 %vm358_vm1, %v25051_v45  ;;  %20198 = vmatpush3.msk.msra.mxu1 %vm1131_vm3, %v17371_v2  ;;  %v25080_v2 = vld [vmem:[#allocation2 + $0x70] sm:$0xff] }
 0x339   : > { %20220 = vmatprep.subr.msk.mxu1 %vm1131_vm3, %v17387_v6 }
 0x33a   : > { %20180 = vmatmul.mubr.msk.f32.gmra.mrb[30].mxu1 %vm358_vm1, %v24698_v50 }
 0x33b   : > { %21126 = vmatmul.mubr.msk.f32.gmra.mrb[6].mxu0 %vm358_vm1, %v25061_v14  ;;  %20182 = vmatprep.mubr.msk.f32.mxu1 %vm358_vm1, %v24705_v13  ;;  %v25086_v13 = vld [vmem:[#allocation2 + $0x78] sm:$0xff] }
 0x33c   : > { %21128 = vmatprep.mubr.msk.f32.mxu0 %vm358_vm1, %v25068_v37 }
 0x33e   : > { %20183 = vmatmul.mubr.msk.f32.gmra.mrb[32].mxu1 %vm358_vm1, %v24714_v43  ;;  %v25092_v43 = vld [vmem:[#allocation2 + $0x80] sm:$0xff] }
 0x33f   : > { %21129 = vmatmul.mubr.msk.f32.gmra.mrb[8].mxu0 %vm358_vm1, %v25074_v22  ;;  %20185 = vmatprep.mubr.msk.f32.mxu1 %vm358_vm1, %v24726_v63  ;;  %v25098_v63 = vld [vmem:[#allocation2 + $0x88] sm:$0xff] }
 0x340   : > { %21131 = vmatprep.mubr.msk.f32.mxu0 %vm358_vm1, %v25080_v2 }
 0x342   : > { %20186 = vmatmul.mubr.msk.f32.gmra.mrb[34].mxu1 %vm358_vm1, %v24735_v33  ;;  %v25104_v33 = vld [vmem:[#allocation2 + $0x90] sm:$0xff] }
 0x343   : > { %21132 = vmatmul.mubr.msk.f32.gmra.mrb[10].mxu0 %vm358_vm1, %v25086_v13  ;;  %20188 = vmatprep.mubr.msk.f32.mxu1 %vm358_vm1, %v24742_v25  ;;  %v25110_v25 = vld [vmem:[#allocation2 + $0x98] sm:$0xff] }
 0x344   : > { %21134 = vmatprep.mubr.msk.f32.mxu0 %vm358_vm1, %v25092_v43 }
 0x346   : > { %20189 = vmatmul.mubr.msk.f32.gmra.mrb[36].mxu1 %vm358_vm1, %v24749_v54 }
 0x347   : > { %21135 = vmatmul.mubr.msk.f32.gmra.mrb[12].mxu0 %vm358_vm1, %v25098_v63  ;;  %20191 = vmatprep.mubr.msk.f32.mxu1 %vm358_vm1, %v24756_v56  ;;  %v18059_v56 = vld [vmem:[%s26620_s6 + $0x78] sm:$0xf] }
 0x348   : > { %21137 = vmatprep.mubr.msk.f32.mxu0 %vm358_vm1, %v25104_v33 }
 0x34a   : > { %20192 = vmatmul.mubr.msk.f32.gmra.mrb[38].mxu1 %vm358_vm1, %v24762_v0 }
 0x34b   : > { %21138 = vmatmul.mubr.msk.f32.gmra.mrb[14].mxu0 %vm358_vm1, %v25110_v25  ;;  %20194 = vmatprep.mubr.msk.f32.mxu1 %vm358_vm1, %v24768_v20 }
 0x34c   : > { %21142 = vmatprep.mubr.msk.f32.mxu0 %vm358_vm1, %v12622_v26  ;;  %v17403_v26 = vld [vmem:[%s26618_s4 + $0x38] sm:$0xf] }
 0x34e   : > { %20195 = vmatmul.mubr.msk.f32.gmra.mrb[40].mxu1 %vm358_vm1, %v24774_v1 }
 0x34f   : > { %21143 = vmatmul.mubr.msk.f32.vlgmr.msra.gmra.mrb[2].mxu0 %vm358_vm1, %v12623_v38  ;;  %20199 = vmatprep.mubr.msk.f32.mxu1 %vm358_vm1, %v24779_v39  ;;  %v25176_v39 = vld [vmem:[#allocation2 + $0xa0] sm:$0xff] }
 0x350   : > { %21145 = vmatprep.mubr.msk.f32.mxu0 %vm358_vm1, %v25044_v11  ;;  %21164 = vmatpush3.msk.msra.mxu0 %vm1131_vm3, %v18043_v49  ;;  %26918 = vst [vmem:[#allocation6_spill] sm:$0xff] %v25176_v39  ;;  %v25366_v38 = vld [vmem:[#allocation2 + $0xa2] sm:$0xff]  ;;  %v26929_v49 = vld [vmem:[#allocation19_spill] sm:$0xff] }
 0x351   : > { %21186 = vmatprep.subr.msk.mxu0 %vm1131_vm3, %v18059_v56 }
 0x352   : > { %20200 = vmatmul.mubr.msk.f32.vlgmr.msra.gmra.mrb[28].mxu1 %vm358_vm1, %v24790_v61  ;;  %v25182_v61 = vld [vmem:[#allocation2 + $0x39] sm:$0xff] }
 0x353   : > { %21146 = vmatmul.mubr.msk.f32.gmra.mrb[4].mxu0 %vm358_vm1, %v25051_v45  ;;  %20202 = vmatprep.mubr.msk.f32.mxu1 %vm358_vm1, %v24794_v23  ;;  %v25188_v23 = vld [vmem:[#allocation2 + $0x41] sm:$0xff] }
 0x354   : > { %21148 = vmatprep.mubr.msk.f32.mxu0 %vm358_vm1, %v25061_v14  ;;  %20221 = vmatpush3.msk.msra.mxu1 %vm1131_vm3, %v17387_v6  ;;  %v26930_v6 = vld [vmem:[#allocation32_spill] sm:$0xff] }
 0x355   : > { %20243 = vmatprep.subr.msk.mxu1 %vm1131_vm3, %v17403_v26 }
 0x356   : > { %20203 = vmatmul.mubr.msk.f32.gmra.mrb[30].mxu1 %vm358_vm1, %v24804_v51  ;;  %v25194_v51 = vld [vmem:[#allocation2 + $0x49] sm:$0xff] }
 0x357   : > { %21149 = vmatmul.mubr.msk.f32.gmra.mrb[6].mxu0 %vm358_vm1, %v25068_v37  ;;  %20205 = vmatprep.mubr.msk.f32.mxu1 %vm358_vm1, %v24812_v57  ;;  %26919 = vst [vmem:[#allocation38_spill] sm:$0xff] %v25194_v51  ;;  %v18075_v57 = vld [vmem:[%s26620_s6 + $0x7c] sm:$0xf] }
 0x358   : > { %21151 = vmatprep.mubr.msk.f32.mxu0 %vm358_vm1, %v25074_v22 }
 0x35a   : > { %20206 = vmatmul.mubr.msk.f32.gmra.mrb[32].mxu1 %vm358_vm1, %v24820_v44  ;;  %v25204_v44 = vld [vmem:[#allocation2 + $0x51] sm:$0xff] }
 0x35b   : > { %21152 = vmatmul.mubr.msk.f32.gmra.mrb[8].mxu0 %vm358_vm1, %v25080_v2  ;;  %20208 = vmatprep.mubr.msk.f32.mxu1 %vm358_vm1, %v24825_v55  ;;  %26920 = vst [vmem:[#allocation7_spill] sm:$0xff] %v25204_v44  ;;  %v25211_v55 = vld [vmem:[#allocation2 + $0x59] sm:$0xff] }
 0x35c   : > { %21154 = vmatprep.mubr.msk.f32.mxu0 %vm358_vm1, %v25086_v13 }
 0x35e   : > { %20209 = vmatmul.mubr.msk.f32.gmra.mrb[34].mxu1 %vm358_vm1, %v24830_v28  ;;  %v25260_v28 = vld [vmem:[#allocation2 + $0x91] sm:$0xff] }
 0x35f   : > { %21155 = vmatmul.mubr.msk.f32.gmra.mrb[10].mxu0 %vm358_vm1, %v25092_v43  ;;  %20211 = vmatprep.mubr.msk.f32.mxu1 %vm358_vm1, %v24835_v16  ;;  %26927 = vst [vmem:[#allocation12_spill] sm:$0xff] %v25260_v28  ;;  %v25301_v16 = vld [vmem:[#allocation2 + $0x52] sm:$0xff] }
 0x360   : > { %21157 = vmatprep.mubr.msk.f32.mxu0 %vm358_vm1, %v25098_v63 }
 0x362   : > { %20212 = vmatmul.mubr.msk.f32.gmra.mrb[36].mxu1 %vm358_vm1, %v24840_v10  ;;  %v17435_v10 = vld [vmem:[%s26618_s4 + $0x40] sm:$0xf] }
 0x363   : > { %21158 = vmatmul.mubr.msk.f32.gmra.mrb[12].mxu0 %vm358_vm1, %v25104_v33  ;;  %20214 = vmatprep.mubr.msk.f32.mxu1 %vm358_vm1, %v24845_v15  ;;  %v25310_v15 = vld [vmem:[#allocation2 + $0x5a] sm:$0xff] }
 0x364   : > { %21160 = vmatprep.mubr.msk.f32.mxu0 %vm358_vm1, %v25110_v25 }
 0x366   : > { %20215 = vmatmul.mubr.msk.f32.gmra.mrb[38].mxu1 %vm358_vm1, %v24850_v5  ;;  %v25318_v5 = vld [vmem:[#allocation2 + $0x62] sm:$0xff] }
 0x367   : > { %21161 = vmatmul.mubr.msk.f32.gmra.mrb[14].mxu0 %vm358_vm1, %v25176_v39  ;;  %20217 = vmatprep.mubr.msk.f32.mxu1 %vm358_vm1, %v24855_v59  ;;  %v25324_v59 = vld [vmem:[#allocation2 + $0x6a] sm:$0xff]  ;;  %v17451_v39 = vld [vmem:[%s26618_s4 + $0x44] sm:$0xf] }
 0x368   : > { %21165 = vmatprep.mubr.msk.f32.mxu0 %vm358_vm1, %v25182_v61 }
 0x36a   : > { %20218 = vmatmul.mubr.msk.f32.gmra.mrb[40].mxu1 %vm358_vm1, %v24860_v18  ;;  %v25330_v18 = vld [vmem:[#allocation2 + $0x72] sm:$0xff] }
 0x36b   : > { %21166 = vmatmul.mubr.msk.f32.vlgmr.msra.gmra.mrb[2].mxu0 %vm358_vm1, %v25188_v23  ;;  %20222 = vmatprep.mubr.msk.f32.mxu1 %vm358_vm1, %v24588_v41  ;;  %v17419_v41 = vld [vmem:[%s26618_s4 + $0x3c] sm:$0xf] }
 0x36c   : > { %21168 = vmatprep.mubr.msk.f32.mxu0 %vm358_vm1, %v25194_v51  ;;  %21187 = vmatpush3.msk.msra.mxu0 %vm1131_vm3, %v18059_v56  ;;  %v25221_v56 = vld [vmem:[#allocation2 + $0x61] sm:$0xff] }
 0x36d   : > { %21209 = vmatprep.subr.msk.mxu0 %vm1131_vm3, %v18075_v57  ;;  %26921 = vst [vmem:[#allocation8_spill] sm:$0xff] %v25221_v56 }
 0x36e   : > { %20223 = vmatmul.mubr.msk.f32.vlgmr.msra.gmra.mrb[28].mxu1 %vm358_vm1, %v24597_v46  ;;  %v25228_v46 = vld [vmem:[#allocation2 + $0x69] sm:$0xff] }
 0x36f   : > { %21169 = vmatmul.mubr.msk.f32.gmra.mrb[4].mxu0 %vm358_vm1, %v25204_v44  ;;  %20225 = vmatprep.mubr.msk.f32.mxu1 %vm358_vm1, %v24603_v48  ;;  %26922 = vst [vmem:[#allocation21_spill] sm:$0xff] %v25228_v46  ;;  %v25234_v48 = vld [vmem:[#allocation2 + $0x71] sm:$0xff] }
 0x370   : > { %21171 = vmatprep.mubr.msk.f32.mxu0 %vm358_vm1, %v25211_v55  ;;  %20244 = vmatpush3.msk.msra.mxu1 %vm1131_vm3, %v17403_v26  ;;  %26923 = vst [vmem:[#allocation27_spill] sm:$0xff] %v25234_v48  ;;  %v18107_v26 = vld [vmem:[%s26620_s6 + $0x84] sm:$0xf] }
 0x371   : > { %20266 = vmatprep.subr.msk.mxu1 %vm1131_vm3, %v17419_v41 }
 0x372   : > { %20226 = vmatmul.mubr.msk.f32.gmra.mrb[30].mxu1 %vm358_vm1, %v24609_v53  ;;  %v25240_v53 = vld [vmem:[#allocation2 + $0x79] sm:$0xff] }
 0x373   : > { %21172 = vmatmul.mubr.msk.f32.gmra.mrb[6].mxu0 %vm358_vm1, %v25221_v56  ;;  %20228 = vmatprep.mubr.msk.f32.mxu1 %vm358_vm1, %v24615_v58  ;;  %26924 = vst [vmem:[#allocation9_spill] sm:$0xff] %v25240_v53  ;;  %v25246_v58 = vld [vmem:[#allocation2 + $0x81] sm:$0xff] }
 0x374   : > { %21174 = vmatprep.mubr.msk.f32.mxu0 %vm358_vm1, %v25228_v46 }
 0x376   : > { %20229 = vmatmul.mubr.msk.f32.gmra.mrb[32].mxu1 %vm358_vm1, %v24621_v60  ;;  %v25252_v60 = vld [vmem:[#allocation2 + $0x89] sm:$0xff] }
 0x377   : > { %21175 = vmatmul.mubr.msk.f32.gmra.mrb[8].mxu0 %vm358_vm1, %v25234_v48  ;;  %20231 = vmatprep.mubr.msk.f32.mxu1 %vm358_vm1, %v24627_v62  ;;  %26925 = vst [vmem:[#allocation10_spill] sm:$0xff] %v25252_v60  ;;  %v25258_v62 = vld [vmem:[#allocation2 + $0x99] sm:$0xff] }
 0x378   : > { %21177 = vmatprep.mubr.msk.f32.mxu0 %vm358_vm1, %v25240_v53  ;;  %26926 = vst [vmem:[#allocation11_spill] sm:$0xff] %v25258_v62 }
 0x37a   : > { %20232 = vmatmul.mubr.msk.f32.gmra.mrb[34].mxu1 %vm358_vm1, %v24639_v7  ;;  %v25270_v7 = vld [vmem:[#allocation2 + $0xa1] sm:$0xff] }
 0x37b   : > { %21178 = vmatmul.mubr.msk.f32.gmra.mrb[10].mxu0 %vm358_vm1, %v25246_v58  ;;  %20234 = vmatprep.mubr.msk.f32.mxu1 %vm358_vm1, %v24646_v21  ;;  %26928 = vst [vmem:[#allocation14_spill] sm:$0xff] %v25270_v7  ;;  %v25278_v21 = vld [vmem:[#allocation2 + $0x3a] sm:$0xff] }
 0x37c   : > { %21180 = vmatprep.mubr.msk.f32.mxu0 %vm358_vm1, %v25252_v60 }
 0x37e   : > { %20235 = vmatmul.mubr.msk.f32.gmra.mrb[36].mxu1 %vm358_vm1, %v24653_v35  ;;  %v25284_v35 = vld [vmem:[#allocation2 + $0x42] sm:$0xff] }
 0x37f   : > { %21181 = vmatmul.mubr.msk.f32.gmra.mrb[12].mxu0 %vm358_vm1, %v25260_v28  ;;  %20237 = vmatprep.mubr.msk.f32.mxu1 %vm358_vm1, %v24661_v24  ;;  %v18091_v24 = vld [vmem:[%s26620_s6 + $0x80] sm:$0xf] }
 0x380   : > { %21183 = vmatprep.mubr.msk.f32.mxu0 %vm358_vm1, %v25258_v62 }
 0x382   : > { %20238 = vmatmul.mubr.msk.f32.gmra.mrb[38].mxu1 %vm358_vm1, %v24670_v12  ;;  %v25293_v12 = vld [vmem:[#allocation2 + $0x4a] sm:$0xff] }
 0x383   : > { %21184 = vmatmul.mubr.msk.f32.gmra.mrb[14].mxu0 %vm358_vm1, %v25270_v7  ;;  %20240 = vmatprep.mubr.msk.f32.mxu1 %vm358_vm1, %v24912_v47  ;;  %v25336_v47 = vld [vmem:[#allocation2 + $0x7a] sm:$0xff] }
 0x384   : > { %21188 = vmatprep.mubr.msk.f32.mxu0 %vm358_vm1, %v25278_v21 }
 0x386   : > { %20241 = vmatmul.mubr.msk.f32.gmra.mrb[40].mxu1 %vm358_vm1, %v24917_v40  ;;  %v25342_v40 = vld [vmem:[#allocation2 + $0x82] sm:$0xff] }
 0x387   : > { %21189 = vmatmul.mubr.msk.f32.vlgmr.msra.gmra.mrb[2].mxu0 %vm358_vm1, %v25284_v35  ;;  %20245 = vmatprep.mubr.msk.f32.mxu1 %vm358_vm1, %v24921_v17  ;;  %v25348_v17 = vld [vmem:[#allocation2 + $0x8a] sm:$0xff] }
 0x388   : > { %21191 = vmatprep.mubr.msk.f32.mxu0 %vm358_vm1, %v25293_v12  ;;  %21210 = vmatpush3.msk.msra.mxu0 %vm1131_vm3, %v18075_v57  ;;  %v26931_v57 = vld [vmem:[#allocation23_spill] sm:$0xff] }
 0x389   : > { %21232 = vmatprep.subr.msk.mxu0 %vm1131_vm3, %v18091_v24 }
 0x38a   : > { %20246 = vmatmul.mubr.msk.f32.vlgmr.msra.gmra.mrb[28].mxu1 %vm358_vm1, %v24927_v32  ;;  %v25354_v32 = vld [vmem:[#allocation2 + $0x92] sm:$0xff] }
 0x38b   : > { %21192 = vmatmul.mubr.msk.f32.gmra.mrb[4].mxu0 %vm358_vm1, %v25301_v16  ;;  %20248 = vmatprep.mubr.msk.f32.mxu1 %vm358_vm1, %v24933_v30  ;;  %v25360_v30 = vld [vmem:[#allocation2 + $0x9a] sm:$0xff] }
 0x38c   : > { %21194 = vmatprep.mubr.msk.f32.mxu0 %vm358_vm1, %v25310_v15  ;;  %20267 = vmatpush3.msk.msra.mxu1 %vm1131_vm3, %v17419_v41  ;;  %v26932_v41 = vld [vmem:[#allocation33_spill] sm:$0xff] }
 0x38d   : > { %20289 = vmatprep.subr.msk.mxu1 %vm1131_vm3, %v17435_v10 }
 0x38e   : > { %20249 = vmatmul.mubr.msk.f32.gmra.mrb[30].mxu1 %vm358_vm1, %v24942_v8 }
 0x38f   : > { %21195 = vmatmul.mubr.msk.f32.gmra.mrb[6].mxu0 %vm358_vm1, %v25318_v5  ;;  %20251 = vmatprep.mubr.msk.f32.mxu1 %vm358_vm1, %v24948_v31 }
 0x390   : > { %21197 = vmatprep.mubr.msk.f32.mxu0 %vm358_vm1, %v25324_v59 }
 0x392   : > { %20252 = vmatmul.mubr.msk.f32.gmra.mrb[32].mxu1 %vm358_vm1, %v24960_v42 }
 0x393   : > { %21198 = vmatmul.mubr.msk.f32.gmra.mrb[8].mxu0 %vm358_vm1, %v25330_v18  ;;  %20254 = vmatprep.mubr.msk.f32.mxu1 %vm358_vm1, %v24969_v52 }
 0x394   : > { %21200 = vmatprep.mubr.msk.f32.mxu0 %vm358_vm1, %v25336_v47 }
 0x396   : > { %20255 = vmatmul.mubr.msk.f32.gmra.mrb[34].mxu1 %vm358_vm1, %v24977_v27 }
 0x397   : > { %21201 = vmatmul.mubr.msk.f32.gmra.mrb[10].mxu0 %vm358_vm1, %v25342_v40  ;;  %20257 = vmatprep.mubr.msk.f32.mxu1 %vm358_vm1, %v24985_v9 }
 0x398   : > { %21203 = vmatprep.mubr.msk.f32.mxu0 %vm358_vm1, %v25348_v17 }
 0x39a   : > { %20258 = vmatmul.mubr.msk.f32.gmra.mrb[36].mxu1 %vm358_vm1, %v24993_v3 }
 0x39b   : > { %21204 = vmatmul.mubr.msk.f32.gmra.mrb[12].mxu0 %vm358_vm1, %v25354_v32  ;;  %20260 = vmatprep.mubr.msk.f32.mxu1 %vm358_vm1, %v25001_v19 }
 0x39c   : > { %21206 = vmatprep.mubr.msk.f32.mxu0 %vm358_vm1, %v25360_v30 }
 0x39e   : > { %20261 = vmatmul.mubr.msk.f32.gmra.mrb[38].mxu1 %vm358_vm1, %v25009_v36 }
 0x39f   : > { %21207 = vmatmul.mubr.msk.f32.gmra.mrb[14].mxu0 %vm358_vm1, %v25366_v38  ;;  %20263 = vmatprep.mubr.msk.f32.mxu1 %vm358_vm1, %v25017_v4 }
 0x3a0   : > { %21211 = vmatprep.mubr.msk.f32.mxu0 %vm358_vm1, %v26929_v49 }
 0x3a2   : > { %20264 = vmatmul.mubr.msk.f32.gmra.mrb[40].mxu1 %vm358_vm1, %v25025_v34 }
 0x3a3   : > { %21212 = vmatmul.mubr.msk.f32.vlgmr.msra.gmra.mrb[2].mxu0 %vm358_vm1, %v26930_v6  ;;  %20268 = vmatprep.mubr.msk.f32.mxu1 %vm358_vm1, %v25182_v61  ;;  %v26933_v61 = vld [vmem:[#allocation25_spill] sm:$0xff] }
 0x3a4   : > { %21214 = vmatprep.mubr.msk.f32.mxu0 %vm358_vm1, %v26931_v57  ;;  %21233 = vmatpush3.msk.msra.mxu0 %vm1131_vm3, %v18091_v24  ;;  %v26935_v24 = vld [vmem:[#allocation28_spill] sm:$0xff] }
 0x3a5   : > { %21255 = vmatprep.subr.msk.mxu0 %vm1131_vm3, %v18107_v26 }
 0x3a6   : > { %20269 = vmatmul.mubr.msk.f32.vlgmr.msra.gmra.mrb[28].mxu1 %vm358_vm1, %v25188_v23  ;;  %v26934_v23 = vld [vmem:[#allocation34_spill] sm:$0xff] }
 0x3a7   : > { %21215 = vmatmul.mubr.msk.f32.gmra.mrb[4].mxu0 %vm358_vm1, %v26932_v41  ;;  %20271 = vmatprep.mubr.msk.f32.mxu1 %vm358_vm1, %v25194_v51  ;;  %v26936_v51 = vld [vmem:[#allocation35_spill] sm:$0xff] }
 0x3a8   : > { %21217 = vmatprep.mubr.msk.f32.mxu0 %vm358_vm1, %v26933_v61  ;;  %20290 = vmatpush3.msk.msra.mxu1 %vm1131_vm3, %v17435_v10  ;;  %v26937_v10 = vld [vmem:[#allocation36_spill] sm:$0xff] }
 0x3a9   : > { %20312 = vmatprep.subr.msk.mxu1 %vm1131_vm3, %v17451_v39 }
 0x3aa   : > { %20272 = vmatmul.mubr.msk.f32.gmra.mrb[30].mxu1 %vm358_vm1, %v25204_v44  ;;  %v25418_v44 = vld [vmem:[#allocation2 + $0x83] sm:$0xff] }
 0x3ab   : > { %21218 = vmatmul.mubr.msk.f32.gmra.mrb[6].mxu0 %vm358_vm1, %v26934_v23  ;;  %20274 = vmatprep.mubr.msk.f32.mxu1 %vm358_vm1, %v25211_v55 }
 0x3ac   : > { %21220 = vmatprep.mubr.msk.f32.mxu0 %vm358_vm1, %v26935_v24 }
 0x3ae   : > { %20275 = vmatmul.mubr.msk.f32.gmra.mrb[32].mxu1 %vm358_vm1, %v25221_v56  ;;  %v25424_v56 = vld [vmem:[#allocation2 + $0x8b] sm:$0xff] }
 0x3af   : > { %21221 = vmatmul.mubr.msk.f32.gmra.mrb[8].mxu0 %vm358_vm1, %v26936_v51  ;;  %20277 = vmatprep.mubr.msk.f32.mxu1 %vm358_vm1, %v25228_v46  ;;  %v25430_v46 = vld [vmem:[#allocation2 + $0x93] sm:$0xff] }
 0x3b0   : > { %21223 = vmatprep.mubr.msk.f32.mxu0 %vm358_vm1, %v26937_v10 }
 0x3b2   : > { %20278 = vmatmul.mubr.msk.f32.gmra.mrb[34].mxu1 %vm358_vm1, %v25234_v48  ;;  %v25436_v48 = vld [vmem:[#allocation2 + $0x9b] sm:$0xff] }
 0x3b3   : > { %21224 = vmatmul.mubr.msk.f32.gmra.mrb[10].mxu0 %vm358_vm1, %v25418_v44  ;;  %20280 = vmatprep.mubr.msk.f32.mxu1 %vm358_vm1, %v25240_v53  ;;  %v25442_v53 = vld [vmem:[#allocation2 + $0xa3] sm:$0xff] }
 0x3b4   : > { %21226 = vmatprep.mubr.msk.f32.mxu0 %vm358_vm1, %v25424_v56 }
 0x3b6   : > { %20281 = vmatmul.mubr.msk.f32.gmra.mrb[36].mxu1 %vm358_vm1, %v25246_v58 }
 0x3b7   : > { %21227 = vmatmul.mubr.msk.f32.gmra.mrb[12].mxu0 %vm358_vm1, %v25430_v46  ;;  %20283 = vmatprep.mubr.msk.f32.mxu1 %vm358_vm1, %v25252_v60  ;;  %v26938_v60 = vld [vmem:[#allocation13_spill] sm:$0xff] }
 0x3b8   : > { %21229 = vmatprep.mubr.msk.f32.mxu0 %vm358_vm1, %v25436_v48 }
 0x3ba   : > { %20284 = vmatmul.mubr.msk.f32.gmra.mrb[38].mxu1 %vm358_vm1, %v25260_v28  ;;  %v18123_v28 = vld [vmem:[%s26620_s6 + $0x88] sm:$0xf] }
 0x3bb   : > { %21230 = vmatmul.mubr.msk.f32.gmra.mrb[14].mxu0 %vm358_vm1, %v25442_v53  ;;  %20286 = vmatprep.mubr.msk.f32.mxu1 %vm358_vm1, %v25258_v62  ;;  %v17467_v62 = vld [vmem:[%s26618_s4 + $0x48] sm:$0xf] }
 0x3bc   : > { %21234 = vmatprep.mubr.msk.f32.mxu0 %vm358_vm1, %v24685_v29 }
 0x3be   : > { %20287 = vmatmul.mubr.msk.f32.gmra.mrb[40].mxu1 %vm358_vm1, %v25270_v7  ;;  %v26939_v7 = vld [vmem:[#allocation29_spill] sm:$0xff] }
 0x3bf   : > { %21235 = vmatmul.mubr.msk.f32.vlgmr.msra.gmra.mrb[2].mxu0 %vm358_vm1, %v24698_v50  ;;  %20291 = vmatprep.mubr.msk.f32.mxu1 %vm358_vm1, %v25278_v21  ;;  %v26940_v21 = vld [vmem:[#allocation15_spill] sm:$0xff] }
 0x3c0   : > { %21237 = vmatprep.mubr.msk.f32.mxu0 %vm358_vm1, %v26938_v60  ;;  %21256 = vmatpush3.msk.msra.mxu0 %vm1131_vm3, %v18107_v26  ;;  %v26942_v26 = vld [vmem:[#allocation17_spill] sm:$0xff] }
 0x3c1   : > { %21278 = vmatprep.subr.msk.mxu0 %vm1131_vm3, %v18123_v28 }
 0x3c2   : > { %20292 = vmatmul.mubr.msk.f32.vlgmr.msra.gmra.mrb[28].mxu1 %vm358_vm1, %v25284_v35  ;;  %v26941_v35 = vld [vmem:[#allocation30_spill] sm:$0xff] }
 0x3c3   : > { %21238 = vmatmul.mubr.msk.f32.gmra.mrb[4].mxu0 %vm358_vm1, %v26939_v7  ;;  %20294 = vmatprep.mubr.msk.f32.mxu1 %vm358_vm1, %v25293_v12  ;;  %v25506_v12 = vld [vmem:[#allocation2 + $0x9c] sm:$0xff] }
 0x3c4   : > { %21240 = vmatprep.mubr.msk.f32.mxu0 %vm358_vm1, %v26940_v21  ;;  %20313 = vmatpush3.msk.msra.mxu1 %vm1131_vm3, %v17451_v39  ;;  %v26943_v39 = vld [vmem:[#allocation31_spill] sm:$0xff] }
 0x3c5   : > { %20335 = vmatprep.subr.msk.mxu1 %vm1131_vm3, %v17467_v62 }
 0x3c6   : > { %20295 = vmatmul.mubr.msk.f32.gmra.mrb[30].mxu1 %vm358_vm1, %v25301_v16  ;;  %v25512_v16 = vld [vmem:[#allocation2 + $0xa4] sm:$0xff] }
 0x3c7   : > { %21241 = vmatmul.mubr.msk.f32.gmra.mrb[6].mxu0 %vm358_vm1, %v26941_v35  ;;  %20297 = vmatprep.mubr.msk.f32.mxu1 %vm358_vm1, %v25310_v15  ;;  %v25516_v15 = vld [vmem:[#allocation2 + $0x3d] sm:$0xff] }
 0x3c8   : > { %21243 = vmatprep.mubr.msk.f32.mxu0 %vm358_vm1, %v26942_v26 }
 0x3ca   : > { %20298 = vmatmul.mubr.msk.f32.gmra.mrb[32].mxu1 %vm358_vm1, %v25318_v5  ;;  %v25522_v5 = vld [vmem:[#allocation2 + $0x45] sm:$0xff] }
 0x3cb   : > { %21244 = vmatmul.mubr.msk.f32.gmra.mrb[8].mxu0 %vm358_vm1, %v24749_v54  ;;  %20300 = vmatprep.mubr.msk.f32.mxu1 %vm358_vm1, %v25324_v59  ;;  %v25528_v59 = vld [vmem:[#allocation2 + $0x4d] sm:$0xff] }
 0x3cc   : > { %21246 = vmatprep.mubr.msk.f32.mxu0 %vm358_vm1, %v26943_v39 }
 0x3ce   : > { %20301 = vmatmul.mubr.msk.f32.gmra.mrb[34].mxu1 %vm358_vm1, %v25330_v18  ;;  %v18139_v18 = vld [vmem:[%s26620_s6 + $0x8c] sm:$0xf] }
 0x3cf   : > { %21247 = vmatmul.mubr.msk.f32.gmra.mrb[10].mxu0 %vm358_vm1, %v24762_v0  ;;  %20303 = vmatprep.mubr.msk.f32.mxu1 %vm358_vm1, %v25336_v47  ;;  %v25538_v47 = vld [vmem:[#allocation2 + $0x55] sm:$0xff] }
 0x3d0   : > { %21249 = vmatprep.mubr.msk.f32.mxu0 %vm358_vm1, %v24768_v20 }
 0x3d2   : > { %20304 = vmatmul.mubr.msk.f32.gmra.mrb[36].mxu1 %vm358_vm1, %v25342_v40  ;;  %v25545_v40 = vld [vmem:[#allocation2 + $0x5d] sm:$0xff] }
 0x3d3   : > { %21250 = vmatmul.mubr.msk.f32.gmra.mrb[12].mxu0 %vm358_vm1, %v24774_v1  ;;  %20306 = vmatprep.mubr.msk.f32.mxu1 %vm358_vm1, %v25348_v17  ;;  %v17483_v17 = vld [vmem:[%s26618_s4 + $0x4c] sm:$0xf] }
 0x3d4   : > { %21252 = vmatprep.mubr.msk.f32.mxu0 %vm358_vm1, %v25506_v12 }
 0x3d6   : > { %20307 = vmatmul.mubr.msk.f32.gmra.mrb[38].mxu1 %vm358_vm1, %v25354_v32  ;;  %v25562_v32 = vld [vmem:[#allocation2 + $0x6d] sm:$0xff] }
 0x3d7   : > { %21253 = vmatmul.mubr.msk.f32.gmra.mrb[14].mxu0 %vm358_vm1, %v25512_v16  ;;  %20309 = vmatprep.mubr.msk.f32.mxu1 %vm358_vm1, %v25360_v30  ;;  %v25568_v30 = vld [vmem:[#allocation2 + $0x75] sm:$0xff] }
 0x3d8   : > { %21257 = vmatprep.mubr.msk.f32.mxu0 %vm358_vm1, %v25516_v15 }
 0x3da   : > { %20310 = vmatmul.mubr.msk.f32.gmra.mrb[40].mxu1 %vm358_vm1, %v25366_v38  ;;  %v25580_v38 = vld [vmem:[#allocation2 + $0x85] sm:$0xff] }
 0x3db   : > { %21258 = vmatmul.mubr.msk.f32.vlgmr.msra.gmra.mrb[2].mxu0 %vm358_vm1, %v25522_v5  ;;  %20314 = vmatprep.mubr.msk.f32.mxu1 %vm358_vm1, %v26929_v49  ;;  %v25586_v49 = vld [vmem:[#allocation2 + $0x8d] sm:$0xff] }
 0x3dc   : > { %21260 = vmatprep.mubr.msk.f32.mxu0 %vm358_vm1, %v25528_v59  ;;  %21279 = vmatpush3.msk.msra.mxu0 %vm1131_vm3, %v18123_v28  ;;  %v25555_v28 = vld [vmem:[#allocation2 + $0x65] sm:$0xff] }
 0x3dd   : > { %21301 = vmatprep.subr.msk.mxu0 %vm1131_vm3, %v18139_v18 }
 0x3de   : > { %20315 = vmatmul.mubr.msk.f32.vlgmr.msra.gmra.mrb[28].mxu1 %vm358_vm1, %v26930_v6  ;;  %v25592_v6 = vld [vmem:[#allocation2 + $0x9d] sm:$0xff] }
 0x3df   : > { %21261 = vmatmul.mubr.msk.f32.gmra.mrb[4].mxu0 %vm358_vm1, %v25538_v47  ;;  %20317 = vmatprep.mubr.msk.f32.mxu1 %vm358_vm1, %v26931_v57  ;;  %v25594_v57 = vld [vmem:[#allocation2 + $0x95] sm:$0xff] }
 0x3e0   : > { %21263 = vmatprep.mubr.msk.f32.mxu0 %vm358_vm1, %v25545_v40  ;;  %20336 = vmatpush3.msk.msra.mxu1 %vm1131_vm3, %v17467_v62  ;;  %v25574_v62 = vld [vmem:[#allocation2 + $0x7d] sm:$0xff] }
 0x3e1   : > { %20358 = vmatprep.subr.msk.mxu1 %vm1131_vm3, %v17483_v17 }
 0x3e2   : > { %20318 = vmatmul.mubr.msk.f32.gmra.mrb[30].mxu1 %vm358_vm1, %v26932_v41  ;;  %v13811_v41 = vld [vmem:[#allocation2 + $0x3e] sm:$0xff] }
 0x3e3   : > { %21264 = vmatmul.mubr.msk.f32.gmra.mrb[6].mxu0 %vm358_vm1, %v25555_v28  ;;  %20320 = vmatprep.mubr.msk.f32.mxu1 %vm358_vm1, %v26933_v61  ;;  %v25623_v61 = vld [vmem:[#allocation2 + $0x56] sm:$0xff] }
 0x3e4   : > { %21266 = vmatprep.mubr.msk.f32.mxu0 %vm358_vm1, %v25562_v32 }
 0x3e6   : > { %20321 = vmatmul.mubr.msk.f32.gmra.mrb[32].mxu1 %vm358_vm1, %v26934_v23  ;;  %v13819_v23 = vld [vmem:[#allocation2 + $0x7e] sm:$0xff] }
 0x3e7   : > { %21267 = vmatmul.mubr.msk.f32.gmra.mrb[8].mxu0 %vm358_vm1, %v25568_v30  ;;  %20323 = vmatprep.mubr.msk.f32.mxu1 %vm358_vm1, %v26935_v24  ;;  %v13821_v24 = vld [vmem:[#allocation2 + $0x8e] sm:$0xff] }
 0x3e8   : > { %21269 = vmatprep.mubr.msk.f32.mxu0 %vm358_vm1, %v25574_v62 }
 0x3ea   : > { %20324 = vmatmul.mubr.msk.f32.gmra.mrb[34].mxu1 %vm358_vm1, %v26936_v51  ;;  %v25604_v51 = vld [vmem:[#allocation2 + $0xa5] sm:$0xff] }
 0x3eb   : > { %21270 = vmatmul.mubr.msk.f32.gmra.mrb[10].mxu0 %vm358_vm1, %v25580_v38  ;;  %20326 = vmatprep.mubr.msk.f32.mxu1 %vm358_vm1, %v26937_v10  ;;  %v13823_v10 = vld [vmem:[#allocation2 + $0x9e] sm:$0xff] }
 0x3ec   : > { %21272 = vmatprep.mubr.msk.f32.mxu0 %vm358_vm1, %v25586_v49 }
 0x3ee   : > { %20327 = vmatmul.mubr.msk.f32.gmra.mrb[36].mxu1 %vm358_vm1, %v25418_v44  ;;  %v13812_v44 = vld [vmem:[#allocation2 + $0x46] sm:$0xff] }
 0x3ef   : > { %21273 = vmatmul.mubr.msk.f32.gmra.mrb[12].mxu0 %vm358_vm1, %v25594_v57  ;;  %20329 = vmatprep.mubr.msk.f32.mxu1 %vm358_vm1, %v25424_v56  ;;  %v13813_v56 = vld [vmem:[#allocation2 + $0x4e] sm:$0xff] }
 0x3f0   : > { %21275 = vmatprep.mubr.msk.f32.mxu0 %vm358_vm1, %v25592_v6 }
 0x3f2   : > { %20330 = vmatmul.mubr.msk.f32.gmra.mrb[38].mxu1 %vm358_vm1, %v25430_v46  ;;  %v18155_v46 = vld [vmem:[%s26620_s6 + $0x90] sm:$0xf] }
 0x3f3   : > { %21276 = vmatmul.mubr.msk.f32.gmra.mrb[14].mxu0 %vm358_vm1, %v25604_v51  ;;  %20332 = vmatprep.mubr.msk.f32.mxu1 %vm358_vm1, %v25436_v48  ;;  %v25630_v48 = vld [vmem:[#allocation2 + $0x5e] sm:$0xff] }
 0x3f4   : > { %21280 = vmatprep.mubr.msk.f32.mxu0 %vm358_vm1, %v13811_v41  ;;  %v7317_v41 = vld [vmem:[#allocation2 + $0x8a] sm:$0xff] }
 0x3f6   : > { %20333 = vmatmul.mubr.msk.f32.gmra.mrb[40].mxu1 %vm358_vm1, %v25442_v53  ;;  %v25640_v53 = vld [vmem:[#allocation2 + $0x66] sm:$0xff] }
 0x3f7   : > { %21281 = vmatmul.mubr.msk.f32.vlgmr.msra.gmra.mrb[2].mxu0 %vm358_vm1, %v13812_v44  ;;  %20337 = vmatprep.mubr.msk.f32.mxu1 %vm358_vm1, %v24685_v29  ;;  %v17499_v29 = vld [vmem:[%s26618_s4 + $0x50] sm:$0xf] }
 0x3f8   : > { %21283 = vmatprep.mubr.msk.f32.mxu0 %vm358_vm1, %v13813_v56  ;;  %21302 = vmatpush3.msk.msra.mxu0 %vm1131_vm3, %v18139_v18  ;;  %v7315_v18 = vld [vmem:[#allocation2 + $0x7a] sm:$0xff] }
 0x3f9   : > { %21324 = vmatprep.subr.msk.mxu0 %vm1131_vm3, %v18155_v46 }
 0x3fa   : > { %20338 = vmatmul.mubr.msk.f32.vlgmr.msra.gmra.mrb[28].mxu1 %vm358_vm1, %v24698_v50  ;;  %v13817_v50 = vld [vmem:[#allocation2 + $0x6e] sm:$0xff] }
 0x3fb   : > { %21284 = vmatmul.mubr.msk.f32.gmra.mrb[4].mxu0 %vm358_vm1, %v25623_v61  ;;  %20340 = vmatprep.mubr.msk.f32.mxu1 %vm358_vm1, %v26938_v60  ;;  %v13818_v60 = vld [vmem:[#allocation2 + $0x76] sm:$0xff] }
 0x3fc   : > { %21286 = vmatprep.mubr.msk.f32.mxu0 %vm358_vm1, %v25630_v48  ;;  %20359 = vmatpush3.msk.msra.mxu1 %vm1131_vm3, %v17483_v17  ;;  %v7316_v17 = vld [vmem:[#allocation2 + $0x82] sm:$0xff] }
 0x3fd   : > { %20381 = vmatprep.subr.msk.mxu1 %vm1131_vm3, %v17499_v29 }
 0x3fe   : > { %20341 = vmatmul.mubr.msk.f32.gmra.mrb[30].mxu1 %vm358_vm1, %v26939_v7  ;;  %v13820_v7 = vld [vmem:[#allocation2 + $0x86] sm:$0xff] }
 0x3ff   : > { %21287 = vmatmul.mubr.msk.f32.gmra.mrb[6].mxu0 %vm358_vm1, %v25640_v53  ;;  %20343 = vmatprep.mubr.msk.f32.mxu1 %vm358_vm1, %v26940_v21  ;;  %v13822_v21 = vld [vmem:[#allocation2 + $0x96] sm:$0xff] }
 0x400   : > { %21289 = vmatprep.mubr.msk.f32.mxu0 %vm358_vm1, %v13817_v50 }
 0x402   : > { %20344 = vmatmul.mubr.msk.f32.gmra.mrb[32].mxu1 %vm358_vm1, %v26941_v35  ;;  %v18187_v35 = vld [vmem:[%s26620_s6 + $0x98] sm:$0xf] }
 0x403   : > { %21290 = vmatmul.mubr.msk.f32.gmra.mrb[8].mxu0 %vm358_vm1, %v13818_v60  ;;  %20346 = vmatprep.mubr.msk.f32.mxu1 %vm358_vm1, %v26942_v26  ;;  %v17531_v26 = vld [vmem:[%s26618_s4 + $0x58] sm:$0xf] }
 0x404   : > { %21292 = vmatprep.mubr.msk.f32.mxu0 %vm358_vm1, %v13819_v23 }
 0x406   : > { %20347 = vmatmul.mubr.msk.f32.gmra.mrb[34].mxu1 %vm358_vm1, %v24749_v54  ;;  %v13824_v54 = vld [vmem:[#allocation2 + $0xa6] sm:$0xff] }
 0x407   : > { %21293 = vmatmul.mubr.msk.f32.gmra.mrb[10].mxu0 %vm358_vm1, %v13820_v7  ;;  %20349 = vmatprep.mubr.msk.f32.mxu1 %vm358_vm1, %v26943_v39  ;;  %v25945_v39 = vld [vmem:[#allocation2 + $0x5a] sm:$0xff] }
 0x408   : > { %21295 = vmatprep.mubr.msk.f32.mxu0 %vm358_vm1, %v13821_v24 }
 0x40a   : > { %20350 = vmatmul.mubr.msk.f32.gmra.mrb[36].mxu1 %vm358_vm1, %v24762_v0  ;;  %v18171_v0 = vld [vmem:[%s26620_s6 + $0x94] sm:$0xf] }
 0x40b   : > { %21296 = vmatmul.mubr.msk.f32.gmra.mrb[12].mxu0 %vm358_vm1, %v13822_v21  ;;  %20352 = vmatprep.mubr.msk.f32.mxu1 %vm358_vm1, %v24768_v20  ;;  %v17515_v20 = vld [vmem:[%s26618_s4 + $0x54] sm:$0xf] }
 0x40c   : > { %21298 = vmatprep.mubr.msk.f32.mxu0 %vm358_vm1, %v13823_v10 }
 0x40e   : > { %20353 = vmatmul.mubr.msk.f32.gmra.mrb[38].mxu1 %vm358_vm1, %v24774_v1  ;;  %v25723_v1 = vld [vmem:[#allocation2 + $0xae] sm:$0xff] }
 0x40f   : > { %21299 = vmatmul.mubr.msk.f32.gmra.mrb[14].mxu0 %vm358_vm1, %v13824_v54  ;;  %20355 = vmatprep.mubr.msk.f32.mxu1 %vm358_vm1, %v25506_v12  ;;  %v18235_v12 = vld [vmem:[%s26620_s6 + $0xa4] sm:$0xf] }
 0x410   : > { %21303 = vmatprep.mubr.msk.f32.mxu0 %vm358_vm1, %v13812_v44  ;;  %v7319_v44 = vld [vmem:[#allocation2 + $0x9a] sm:$0xff] }
 0x412   : > { %20356 = vmatmul.mubr.msk.f32.gmra.mrb[40].mxu1 %vm358_vm1, %v25512_v16  ;;  %v25955_v16 = vld [vmem:[#allocation2 + $0x62] sm:$0xff] }
 0x413   : > { %21304 = vmatmul.mubr.msk.f32.vlgmr.msra.gmra.mrb[2].mxu0 %vm358_vm1, %v13813_v56  ;;  %20360 = vmatprep.mubr.msk.f32.mxu1 %vm358_vm1, %v25516_v15  ;;  %v25962_v15 = vld [vmem:[#allocation2 + $0x6a] sm:$0xff]  ;;  %v7318_v56 = vld [vmem:[#allocation2 + $0x92] sm:$0xff] }
 0x414   : > { %21306 = vmatprep.mubr.msk.f32.mxu0 %vm358_vm1, %v25623_v61  ;;  %21325 = vmatpush3.msk.msra.mxu0 %vm1131_vm3, %v18155_v46  ;;  %v7320_v46 = vld [vmem:[#allocation2 + $0xa2] sm:$0xff] }
 0x415   : > { %21347 = vmatprep.subr.msk.mxu0 %vm1131_vm3, %v18171_v0 }
 0x416   : > { %20361 = vmatmul.mubr.msk.f32.vlgmr.msra.gmra.mrb[28].mxu1 %vm358_vm1, %v25522_v5  ;;  %v17580_v5 = vld [vmem:[%s26620_s6 + $0x4] sm:$0xf] }
 0x417   : > { %21307 = vmatmul.mubr.msk.f32.gmra.mrb[4].mxu0 %vm358_vm1, %v25630_v48  ;;  %20363 = vmatprep.mubr.msk.f32.mxu1 %vm358_vm1, %v25528_v59  ;;  %v7314_v59 = vld [vmem:[#allocation2 + $0x72] sm:$0xff] }
 0x418   : > { %21309 = vmatprep.mubr.msk.f32.mxu0 %vm358_vm1, %v25640_v53  ;;  %20382 = vmatpush3.msk.msra.mxu1 %vm1131_vm3, %v17499_v29  ;;  %v7321_v29 = vld [vmem:[#allocation2 + $0xaa] sm:$0xff] }
 0x419   : > { %20404 = vmatprep.subr.msk.mxu1 %vm1131_vm3, %v17515_v20 }
 0x41a   : > { %20364 = vmatmul.mubr.msk.f32.gmra.mrb[30].mxu1 %vm358_vm1, %v25538_v47 }
 0x41b   : > { %21310 = vmatmul.mubr.msk.f32.gmra.mrb[6].mxu0 %vm358_vm1, %v13817_v50  ;;  %20366 = vmatprep.mubr.msk.f32.mxu1 %vm358_vm1, %v25545_v40  ;;  %v7322_v50 = vld [vmem:[#allocation2 + $0xb2] sm:$0xff] }
 0x41c   : > { %21312 = vmatprep.mubr.msk.f32.mxu0 %vm358_vm1, %v13818_v60  ;;  %v25993_v60 = vld [vmem:[#allocation2 + $0x4b] sm:$0xff] }
 0x41e   : > { %20367 = vmatmul.mubr.msk.f32.gmra.mrb[32].mxu1 %vm358_vm1, %v25555_v28 }
 0x41f   : > { %21313 = vmatmul.mubr.msk.f32.gmra.mrb[8].mxu0 %vm358_vm1, %v13819_v23  ;;  %20369 = vmatprep.mubr.msk.f32.mxu1 %vm358_vm1, %v25562_v32  ;;  %v25998_v23 = vld [vmem:[#allocation2 + $0x53] sm:$0xff] }
 0x420   : > { %21315 = vmatprep.mubr.msk.f32.mxu0 %vm358_vm1, %v13820_v7  ;;  %v26003_v7 = vld [vmem:[#allocation2 + $0x5b] sm:$0xff] }
 0x422   : > { %20370 = vmatmul.mubr.msk.f32.gmra.mrb[34].mxu1 %vm358_vm1, %v25568_v30 }
 0x423   : > { %21316 = vmatmul.mubr.msk.f32.gmra.mrb[10].mxu0 %vm358_vm1, %v13821_v24  ;;  %20372 = vmatprep.mubr.msk.f32.mxu1 %vm358_vm1, %v25574_v62  ;;  %v18251_v24 = vld [vmem:[%s26620_s6 + $0xa8] sm:$0xf] }
 0x424   : > { %21318 = vmatprep.mubr.msk.f32.mxu0 %vm358_vm1, %v13822_v21  ;;  %v26020_v21 = vld [vmem:[#allocation2 + $0x6b] sm:$0xff] }
 0x426   : > { %20373 = vmatmul.mubr.msk.f32.gmra.mrb[36].mxu1 %vm358_vm1, %v25580_v38 }
 0x427   : > { %21319 = vmatmul.mubr.msk.f32.gmra.mrb[12].mxu0 %vm358_vm1, %v13823_v10  ;;  %20375 = vmatprep.mubr.msk.f32.mxu1 %vm358_vm1, %v25586_v49  ;;  %v26013_v10 = vld [vmem:[#allocation2 + $0x63] sm:$0xff] }
 0x428   : > { %21321 = vmatprep.mubr.msk.f32.mxu0 %vm358_vm1, %v13824_v54  ;;  %v7834_v54 = vld [vmem:[%s26620_s6] sm:$0xf] }
 0x42a   : > { %20376 = vmatmul.mubr.msk.f32.gmra.mrb[38].mxu1 %vm358_vm1, %v25594_v57 }
 0x42b   : > { %21322 = vmatmul.mubr.msk.f32.gmra.mrb[14].mxu0 %vm358_vm1, %v25723_v1  ;;  %20378 = vmatprep.mubr.msk.f32.mxu1 %vm358_vm1, %v25592_v6 }
 0x42c   : > { %21326 = vmatprep.mubr.msk.f32.mxu0 %vm358_vm1, %v24942_v8 }
 0x42e   : > { %20379 = vmatmul.mubr.msk.f32.gmra.mrb[40].mxu1 %vm358_vm1, %v25604_v51 }
 0x42f   : > { %21327 = vmatmul.mubr.msk.f32.vlgmr.msra.gmra.mrb[2].mxu0 %vm358_vm1, %v24948_v31  ;;  %20383 = vmatprep.mubr.msk.f32.mxu1 %vm358_vm1, %v24942_v8  ;;  %v25783_v8 = vld [vmem:[#allocation2 + $0x9f] sm:$0xff] }
 0x430   : > { %21329 = vmatprep.mubr.msk.f32.mxu0 %vm358_vm1, %v24960_v42  ;;  %21348 = vmatpush3.msk.msra.mxu0 %vm1131_vm3, %v18171_v0  ;;  %v7524_v0 = vld [vmem:[#allocation2 + $0x73] sm:$0xff] }
 0x431   : > { %21370 = vmatprep.subr.msk.mxu0 %vm1131_vm3, %v18187_v35 }
 0x432   : > { %20384 = vmatmul.mubr.msk.f32.vlgmr.msra.gmra.mrb[28].mxu1 %vm358_vm1, %v24948_v31  ;;  %v25785_v31 = vld [vmem:[#allocation2 + $0xa7] sm:$0xff] }
 0x433   : > { %21330 = vmatmul.mubr.msk.f32.gmra.mrb[4].mxu0 %vm358_vm1, %v24969_v52  ;;  %20386 = vmatprep.mubr.msk.f32.mxu1 %vm358_vm1, %v24960_v42  ;;  %v25795_v42 = vld [vmem:[#allocation2 + $0xaf] sm:$0xff] }
 0x434   : > { %21332 = vmatprep.mubr.msk.f32.mxu0 %vm358_vm1, %v24977_v27  ;;  %20405 = vmatpush3.msk.msra.mxu1 %vm1131_vm3, %v17515_v20  ;;  %v7525_v20 = vld [vmem:[#allocation2 + $0x7b] sm:$0xff] }
 0x435   : > { %20427 = vmatprep.subr.msk.mxu1 %vm1131_vm3, %v17531_v26 }
 0x436   : > { %20387 = vmatmul.mubr.msk.f32.gmra.mrb[30].mxu1 %vm358_vm1, %v24969_v52  ;;  %v18203_v52 = vld [vmem:[%s26620_s6 + $0x9c] sm:$0xf] }
 0x437   : > { %21333 = vmatmul.mubr.msk.f32.gmra.mrb[6].mxu0 %vm358_vm1, %v24985_v9  ;;  %20389 = vmatprep.mubr.msk.f32.mxu1 %vm358_vm1, %v24977_v27  ;;  %v17547_v27 = vld [vmem:[%s26618_s4 + $0x5c] sm:$0xf] }
 0x438   : > { %21335 = vmatprep.mubr.msk.f32.mxu0 %vm358_vm1, %v24993_v3 }
 0x43a   : > { %20390 = vmatmul.mubr.msk.f32.gmra.mrb[32].mxu1 %vm358_vm1, %v24985_v9  ;;  %v26947_v9 = vld [vmem:[#allocation8_spill] sm:$0xff] }
 0x43b   : > { %21336 = vmatmul.mubr.msk.f32.gmra.mrb[8].mxu0 %vm358_vm1, %v25001_v19  ;;  %20392 = vmatprep.mubr.msk.f32.mxu1 %vm358_vm1, %v24993_v3  ;;  %v26948_v3 = vld [vmem:[#allocation21_spill] sm:$0xff] }
 0x43c   : > { %21338 = vmatprep.mubr.msk.f32.mxu0 %vm358_vm1, %v25009_v36 }
 0x43e   : > { %20393 = vmatmul.mubr.msk.f32.gmra.mrb[34].mxu1 %vm358_vm1, %v25001_v19  ;;  %v26950_v19 = vld [vmem:[#allocation9_spill] sm:$0xff] }
 0x43f   : > { %21339 = vmatmul.mubr.msk.f32.gmra.mrb[10].mxu0 %vm358_vm1, %v25017_v4  ;;  %20395 = vmatprep.mubr.msk.f32.mxu1 %vm358_vm1, %v25009_v36  ;;  %v17563_v36 = vld [vmem:[%s26618_s4 + $0x60] sm:$0xf] }
 0x440   : > { %21341 = vmatprep.mubr.msk.f32.mxu0 %vm358_vm1, %v25025_v34 }
 0x442   : > { %20396 = vmatmul.mubr.msk.f32.gmra.mrb[36].mxu1 %vm358_vm1, %v25017_v4  ;;  %v26949_v4 = vld [vmem:[#allocation27_spill] sm:$0xff] }
 0x443   : > { %21342 = vmatmul.mubr.msk.f32.gmra.mrb[12].mxu0 %vm358_vm1, %v25783_v8  ;;  %20398 = vmatprep.mubr.msk.f32.mxu1 %vm358_vm1, %v25025_v34  ;;  %v25855_v34 = vld [vmem:[#allocation2 + $0xa8] sm:$0xff] }
 0x444   : > { %21344 = vmatprep.mubr.msk.f32.mxu0 %vm358_vm1, %v25785_v31 }
 0x446   : > { %20399 = vmatmul.mubr.msk.f32.gmra.mrb[38].mxu1 %vm358_vm1, %v25783_v8 }
 0x447   : > { %21345 = vmatmul.mubr.msk.f32.gmra.mrb[14].mxu0 %vm358_vm1, %v25795_v42  ;;  %20401 = vmatprep.mubr.msk.f32.mxu1 %vm358_vm1, %v25785_v31 }
 0x448   : > { %21349 = vmatprep.mubr.msk.f32.mxu0 %vm358_vm1, %v25044_v11 }
 0x44a   : > { %20402 = vmatmul.mubr.msk.f32.gmra.mrb[40].mxu1 %vm358_vm1, %v25795_v42 }
 0x44b   : > { %21350 = vmatmul.mubr.msk.f32.vlgmr.msra.gmra.mrb[2].mxu0 %vm358_vm1, %v25051_v45  ;;  %20406 = vmatprep.mubr.msk.f32.mxu1 %vm358_vm1, %v25044_v11  ;;  %v26951_v11 = vld [vmem:[#allocation10_spill] sm:$0xff] }
 0x44c   : > { %21352 = vmatprep.mubr.msk.f32.mxu0 %vm358_vm1, %v25061_v14  ;;  %21371 = vmatpush3.msk.msra.mxu0 %vm1131_vm3, %v18187_v35  ;;  %v7526_v35 = vld [vmem:[#allocation2 + $0x83] sm:$0xff] }
 0x44d   : > { %21393 = vmatprep.subr.msk.mxu0 %vm1131_vm3, %v18203_v52 }
 0x44e   : > { %20407 = vmatmul.mubr.msk.f32.vlgmr.msra.gmra.mrb[28].mxu1 %vm358_vm1, %v25051_v45  ;;  %v26952_v45 = vld [vmem:[#allocation12_spill] sm:$0xff] }
 0x44f   : > { %21353 = vmatmul.mubr.msk.f32.gmra.mrb[4].mxu0 %vm358_vm1, %v25068_v37  ;;  %20409 = vmatprep.mubr.msk.f32.mxu1 %vm358_vm1, %v25061_v14  ;;  %v26953_v14 = vld [vmem:[#allocation11_spill] sm:$0xff] }
 0x450   : > { %21355 = vmatprep.mubr.msk.f32.mxu0 %vm358_vm1, %v25074_v22  ;;  %20428 = vmatpush3.msk.msra.mxu1 %vm1131_vm3, %v17531_v26  ;;  %v7527_v26 = vld [vmem:[#allocation2 + $0x8b] sm:$0xff] }
 0x451   : > { %20450 = vmatprep.subr.msk.mxu1 %vm1131_vm3, %v17547_v27 }
 0x452   : > { %20410 = vmatmul.mubr.msk.f32.gmra.mrb[30].mxu1 %vm358_vm1, %v25068_v37  ;;  %v7111_v37 = vld [vmem:[#allocation2 + $0xa9] sm:$0xff] }
 0x453   : > { %21356 = vmatmul.mubr.msk.f32.gmra.mrb[6].mxu0 %vm358_vm1, %v25080_v2  ;;  %20412 = vmatprep.mubr.msk.f32.mxu1 %vm358_vm1, %v25074_v22  ;;  %v26954_v22 = vld [vmem:[#allocation14_spill] sm:$0xff] }
 0x454   : > { %21358 = vmatprep.mubr.msk.f32.mxu0 %vm358_vm1, %v25086_v13 }
 0x456   : > { %20413 = vmatmul.mubr.msk.f32.gmra.mrb[32].mxu1 %vm358_vm1, %v25080_v2  ;;  %v7112_v2 = vld [vmem:[#allocation2 + $0xb1] sm:$0xff] }
 0x457   : > { %21359 = vmatmul.mubr.msk.f32.gmra.mrb[8].mxu0 %vm358_vm1, %v25092_v43  ;;  %20415 = vmatprep.mubr.msk.f32.mxu1 %vm358_vm1, %v25086_v13  ;;  %v26944_v13 = vld [vmem:[#allocation6_spill] sm:$0xff] }
 0x458   : > { %21361 = vmatprep.mubr.msk.f32.mxu0 %vm358_vm1, %v25098_v63 }
 0x45a   : > { %20416 = vmatmul.mubr.msk.f32.gmra.mrb[34].mxu1 %vm358_vm1, %v25092_v43  ;;  %v25865_v43 = vld [vmem:[#allocation2 + $0xb0] sm:$0xff] }
 0x45b   : > { %21362 = vmatmul.mubr.msk.f32.gmra.mrb[10].mxu0 %vm358_vm1, %v25104_v33  ;;  %20418 = vmatprep.mubr.msk.f32.mxu1 %vm358_vm1, %v25098_v63  ;;  %v26945_v63 = vld [vmem:[#allocation38_spill] sm:$0xff] }
 0x45c   : > { %21364 = vmatprep.mubr.msk.f32.mxu0 %vm358_vm1, %v25110_v25 }
 0x45e   : > { %20419 = vmatmul.mubr.msk.f32.gmra.mrb[36].mxu1 %vm358_vm1, %v25104_v33  ;;  %v26946_v33 = vld [vmem:[#allocation7_spill] sm:$0xff] }
 0x45f   : > { %21365 = vmatmul.mubr.msk.f32.gmra.mrb[12].mxu0 %vm358_vm1, %v26944_v13  ;;  %20421 = vmatprep.mubr.msk.f32.mxu1 %vm358_vm1, %v25110_v25  ;;  %v18219_v25 = vld [vmem:[%s26620_s6 + $0xa0] sm:$0xf] }
 0x460   : > { %21367 = vmatprep.mubr.msk.f32.mxu0 %vm358_vm1, %v25855_v34 }
 0x462   : > { %20422 = vmatmul.mubr.msk.f32.gmra.mrb[38].mxu1 %vm358_vm1, %v26944_v13  ;;  %v7530_v13 = vld [vmem:[#allocation2 + $0xa3] sm:$0xff] }
 0x463   : > { %21368 = vmatmul.mubr.msk.f32.gmra.mrb[14].mxu0 %vm358_vm1, %v25865_v43  ;;  %20424 = vmatprep.mubr.msk.f32.mxu1 %vm358_vm1, %v25855_v34 }
 0x464   : > { %21372 = vmatprep.mubr.msk.f32.mxu0 %vm358_vm1, %v26945_v63 }
 0x466   : > { %20425 = vmatmul.mubr.msk.f32.gmra.mrb[40].mxu1 %vm358_vm1, %v25865_v43 }
 0x467   : > { %21373 = vmatmul.mubr.msk.f32.vlgmr.msra.gmra.mrb[2].mxu0 %vm358_vm1, %v26946_v33  ;;  %20429 = vmatprep.mubr.msk.f32.mxu1 %vm358_vm1, %v26945_v63  ;;  %v7531_v63 = vld [vmem:[#allocation2 + $0xab] sm:$0xff] }
 0x468   : > { %21375 = vmatprep.mubr.msk.f32.mxu0 %vm358_vm1, %v25211_v55  ;;  %21394 = vmatpush3.msk.msra.mxu0 %vm1131_vm3, %v18203_v52  ;;  %v7529_v52 = vld [vmem:[#allocation2 + $0x9b] sm:$0xff] }
 0x469   : > { %21416 = vmatprep.subr.msk.mxu0 %vm1131_vm3, %v18219_v25 }
 0x46a   : > { %20430 = vmatmul.mubr.msk.f32.vlgmr.msra.gmra.mrb[28].mxu1 %vm358_vm1, %v26946_v33  ;;  %v7532_v33 = vld [vmem:[#allocation2 + $0xb3] sm:$0xff] }
 0x46b   : > { %21376 = vmatmul.mubr.msk.f32.gmra.mrb[4].mxu0 %vm358_vm1, %v26947_v9  ;;  %20432 = vmatprep.mubr.msk.f32.mxu1 %vm358_vm1, %v25211_v55  ;;  %v25935_v55 = vld [vmem:[#allocation2 + $0x4a] sm:$0xff] }
 0x46c   : > { %21378 = vmatprep.mubr.msk.f32.mxu0 %vm358_vm1, %v26948_v3  ;;  %20451 = vmatpush3.msk.msra.mxu1 %vm1131_vm3, %v17547_v27  ;;  %v7528_v27 = vld [vmem:[#allocation2 + $0x93] sm:$0xff] }
 0x46d   : > { %20473 = vmatprep.subr.msk.mxu1 %vm1131_vm3, %v17563_v36 }
 0x46e   : > { %20433 = vmatmul.mubr.msk.f32.gmra.mrb[30].mxu1 %vm358_vm1, %v26947_v9  ;;  %v26056_v9 = vld [vmem:[#allocation2 + $0x54] sm:$0xff] }
 0x46f   : > { %21379 = vmatmul.mubr.msk.f32.gmra.mrb[6].mxu0 %vm358_vm1, %v26949_v4  ;;  %20435 = vmatprep.mubr.msk.f32.mxu1 %vm358_vm1, %v26948_v3  ;;  %v26061_v3 = vld [vmem:[%s26620_s6 + $0xac] sm:$0xf] }
 0x470   : > { %21381 = vmatprep.mubr.msk.f32.mxu0 %vm358_vm1, %v26950_v19 }
 0x472   : > { %20436 = vmatmul.mubr.msk.f32.gmra.mrb[32].mxu1 %vm358_vm1, %v26949_v4  ;;  %v26066_v4 = vld [vmem:[#allocation2 + $0x5c] sm:$0xff] }
 0x473   : > { %21382 = vmatmul.mubr.msk.f32.gmra.mrb[8].mxu0 %vm358_vm1, %v25246_v58  ;;  %20438 = vmatprep.mubr.msk.f32.mxu1 %vm358_vm1, %v26950_v19  ;;  %v7836_v19 = vld [vmem:[#allocation2 + $0x9] sm:$0xff] }
 0x474   : > { %21384 = vmatprep.mubr.msk.f32.mxu0 %vm358_vm1, %v26951_v11 }
 0x476   : > { %20439 = vmatmul.mubr.msk.f32.gmra.mrb[34].mxu1 %vm358_vm1, %v25246_v58  ;;  %v25940_v58 = vld [vmem:[#allocation2 + $0x52] sm:$0xff] }
 0x477   : > { %21385 = vmatmul.mubr.msk.f32.gmra.mrb[10].mxu0 %vm358_vm1, %v26952_v45  ;;  %20441 = vmatprep.mubr.msk.f32.mxu1 %vm358_vm1, %v26951_v11  ;;  %v7837_v11 = vld [vmem:[#allocation2 + $0x11] sm:$0xff] }
 0x478   : > { %21387 = vmatprep.mubr.msk.f32.mxu0 %vm358_vm1, %v26953_v14 }
 0x47a   : > { %20442 = vmatmul.mubr.msk.f32.gmra.mrb[36].mxu1 %vm358_vm1, %v26952_v45  ;;  %v26074_v45 = vld [vmem:[#allocation2 + $0x64] sm:$0xff] }
 0x47b   : > { %21388 = vmatmul.mubr.msk.f32.gmra.mrb[12].mxu0 %vm358_vm1, %v26954_v22  ;;  %20444 = vmatprep.mubr.msk.f32.mxu1 %vm358_vm1, %v26953_v14  ;;  %v26079_v14 = vld [vmem:[#allocation2 + $0x6c] sm:$0xff] }
 0x47c   : > { %21390 = vmatprep.mubr.msk.f32.mxu0 %vm358_vm1, %v7111_v37 }
 0x47e   : > { %20445 = vmatmul.mubr.msk.f32.gmra.mrb[38].mxu1 %vm358_vm1, %v26954_v22  ;;  %v7838_v22 = vld [vmem:[#allocation2 + $0x19] sm:$0xff] }
 0x47f   : > { %21391 = vmatmul.mubr.msk.f32.gmra.mrb[14].mxu0 %vm358_vm1, %v7112_v2  ;;  %20447 = vmatprep.mubr.msk.f32.mxu1 %vm358_vm1, %v7111_v37  ;;  %v17611_v37 = vld [vmem:[%s26620_s6 + $0x8] sm:$0xf] }
 0x480   : > { %21395 = vmatprep.mubr.msk.f32.mxu0 %vm358_vm1, %v25935_v55 }
 0x482   : > { %20448 = vmatmul.mubr.msk.f32.gmra.mrb[40].mxu1 %vm358_vm1, %v7112_v2  ;;  %v7839_v2 = vld [vmem:[#allocation2 + $0x21] sm:$0xff] }
 0x483   : > { %21396 = vmatmul.mubr.msk.f32.vlgmr.msra.gmra.mrb[2].mxu0 %vm358_vm1, %v25940_v58  ;;  %20452 = vmatprep.mubr.msk.f32.mxu1 %vm358_vm1, %v25935_v55 }
 0x484   : > { %21398 = vmatprep.mubr.msk.f32.mxu0 %vm358_vm1, %v25945_v39  ;;  %21417 = vmatpush3.msk.msra.mxu0 %vm1131_vm3, %v18219_v25  ;;  %v26051_v25 = vld [vmem:[#allocation2 + $0x4c] sm:$0xff] }
 0x485   : > { %21439 = vmatprep.subr.msk.mxu0 %vm1131_vm3, %v18235_v12 }
 0x486   : > { %20453 = vmatmul.mubr.msk.f32.vlgmr.msra.gmra.mrb[28].mxu1 %vm358_vm1, %v25940_v58 }
 0x487   : > { %21399 = vmatmul.mubr.msk.f32.gmra.mrb[4].mxu0 %vm358_vm1, %v25955_v16  ;;  %20455 = vmatprep.mubr.msk.f32.mxu1 %vm358_vm1, %v25945_v39 }
 0x488   : > { %21401 = vmatprep.mubr.msk.f32.mxu0 %vm358_vm1, %v25962_v15  ;;  %20474 = vmatpush3.msk.msra.mxu1 %vm1131_vm3, %v17563_v36  ;;  %v7835_v36 = vld [vmem:[#allocation2 + $0x1] sm:$0xff] }
 0x489   : > { %20496 = vmatprep.subr.msk.mxu1 %vm1131_vm3, %v17580_v5 }
 0x48a   : > { %20456 = vmatmul.mubr.msk.f32.gmra.mrb[30].mxu1 %vm358_vm1, %v25955_v16 }
 0x48b   : > { %21402 = vmatmul.mubr.msk.f32.gmra.mrb[6].mxu0 %vm358_vm1, %v7314_v59  ;;  %20458 = vmatprep.mubr.msk.f32.mxu1 %vm358_vm1, %v25962_v15 }
 0x48c   : > { %21404 = vmatprep.mubr.msk.f32.mxu0 %vm358_vm1, %v7315_v18 }
 0x48e   : > { %20459 = vmatmul.mubr.msk.f32.gmra.mrb[32].mxu1 %vm358_vm1, %v7314_v59  ;;  %v7840_v59 = vld [vmem:[#allocation2 + $0x29] sm:$0xff] }
 0x48f   : > { %21405 = vmatmul.mubr.msk.f32.gmra.mrb[8].mxu0 %vm358_vm1, %v7316_v17  ;;  %20461 = vmatprep.mubr.msk.f32.mxu1 %vm358_vm1, %v7315_v18  ;;  %v15008_v18 = vld [vmem:[#allocation2 + $0x84] sm:$0xff] }
 0x490   : > { %21407 = vmatprep.mubr.msk.f32.mxu0 %vm358_vm1, %v7317_v41 }
 0x492   : > { %20462 = vmatmul.mubr.msk.f32.gmra.mrb[34].mxu1 %vm358_vm1, %v7316_v17  ;;  %v7841_v17 = vld [vmem:[#allocation2 + $0x31] sm:$0xff] }
 0x493   : > { %21408 = vmatmul.mubr.msk.f32.gmra.mrb[10].mxu0 %vm358_vm1, %v7318_v56  ;;  %20464 = vmatprep.mubr.msk.f32.mxu1 %vm358_vm1, %v7317_v41  ;;  %v15009_v41 = vld [vmem:[#allocation2 + $0x8c] sm:$0xff] }
 0x494   : > { %21410 = vmatprep.mubr.msk.f32.mxu0 %vm358_vm1, %v7319_v44 }
 0x496   : > { %20465 = vmatmul.mubr.msk.f32.gmra.mrb[36].mxu1 %vm358_vm1, %v7318_v56  ;;  %v7842_v56 = vld [vmem:[#allocation2 + $0x39] sm:$0xff] }
 0x497   : > { %21411 = vmatmul.mubr.msk.f32.gmra.mrb[12].mxu0 %vm358_vm1, %v7320_v46  ;;  %20467 = vmatprep.mubr.msk.f32.mxu1 %vm358_vm1, %v7319_v44  ;;  %v15011_v44 = vld [vmem:[#allocation2 + $0x9c] sm:$0xff] }
 0x498   : > { %21413 = vmatprep.mubr.msk.f32.mxu0 %vm358_vm1, %v7321_v29 }
 0x49a   : > { %20468 = vmatmul.mubr.msk.f32.gmra.mrb[38].mxu1 %vm358_vm1, %v7320_v46  ;;  %v15010_v46 = vld [vmem:[#allocation2 + $0x94] sm:$0xff] }
 0x49b   : > { %21414 = vmatmul.mubr.msk.f32.gmra.mrb[14].mxu0 %vm358_vm1, %v7322_v50  ;;  %20470 = vmatprep.mubr.msk.f32.mxu1 %vm358_vm1, %v7321_v29  ;;  %v7843_v29 = vld [vmem:[#allocation2 + $0x41] sm:$0xff] }
 0x49c   : > { %21418 = vmatprep.mubr.msk.f32.mxu0 %vm358_vm1, %v25993_v60 }
 0x49e   : > { %20471 = vmatmul.mubr.msk.f32.gmra.mrb[40].mxu1 %vm358_vm1, %v7322_v50  ;;  %v15012_v50 = vld [vmem:[#allocation2 + $0xa4] sm:$0xff] }
 0x49f   : > { %21419 = vmatmul.mubr.msk.f32.vlgmr.msra.gmra.mrb[2].mxu0 %vm358_vm1, %v25998_v23  ;;  %20475 = vmatprep.mubr.msk.f32.mxu1 %vm358_vm1, %v25993_v60 }
 0x4a0   : > { %21421 = vmatprep.mubr.msk.f32.mxu0 %vm358_vm1, %v26003_v7  ;;  %21440 = vmatpush3.msk.msra.mxu0 %vm1131_vm3, %v18235_v12  ;;  %v15006_v12 = vld [vmem:[#allocation2 + $0x74] sm:$0xff] }
 0x4a1   : > { %21462 = vmatprep.subr.msk.mxu0 %vm1131_vm3, %v18251_v24 }
 0x4a2   : > { %20476 = vmatmul.mubr.msk.f32.vlgmr.msra.gmra.mrb[28].mxu1 %vm358_vm1, %v25998_v23 }
 0x4a3   : > { %21422 = vmatmul.mubr.msk.f32.gmra.mrb[4].mxu0 %vm358_vm1, %v26013_v10  ;;  %20478 = vmatprep.mubr.msk.f32.mxu1 %vm358_vm1, %v26003_v7 }
 0x4a4   : > { %21424 = vmatprep.mubr.msk.f32.mxu0 %vm358_vm1, %v26020_v21  ;;  %20497 = vmatpush3.msk.msra.mxu1 %vm1131_vm3, %v17580_v5  ;;  %v15007_v5 = vld [vmem:[#allocation2 + $0x7c] sm:$0xff] }
 0x4a5   : > { %20519 = vmatprep.subr.msk.mxu1 %vm1131_vm3, %v7834_v54 }
 0x4a6   : > { %20479 = vmatmul.mubr.msk.f32.gmra.mrb[30].mxu1 %vm358_vm1, %v26013_v10 }
 0x4a7   : > { %21425 = vmatmul.mubr.msk.f32.gmra.mrb[6].mxu0 %vm358_vm1, %v7524_v0  ;;  %20481 = vmatprep.mubr.msk.f32.mxu1 %vm358_vm1, %v26020_v21 }
 0x4a8   : > { %21427 = vmatprep.mubr.msk.f32.mxu0 %vm358_vm1, %v7525_v20 }
 0x4aa   : > { %20482 = vmatmul.mubr.msk.f32.gmra.mrb[32].mxu1 %vm358_vm1, %v7524_v0  ;;  %v7845_v0 = vld [vmem:[#allocation2 + $0x51] sm:$0xff] }
 0x4ab   : > { %21428 = vmatmul.mubr.msk.f32.gmra.mrb[8].mxu0 %vm358_vm1, %v7526_v35  ;;  %20484 = vmatprep.mubr.msk.f32.mxu1 %vm358_vm1, %v7525_v20  ;;  %v15014_v20 = vld [vmem:[#allocation2 + $0xb4] sm:$0xff] }
 0x4ac   : > { %21430 = vmatprep.mubr.msk.f32.mxu0 %vm358_vm1, %v7527_v26 }
 0x4ae   : > { %20485 = vmatmul.mubr.msk.f32.gmra.mrb[34].mxu1 %vm358_vm1, %v7526_v35  ;;  %v26105_v35 = vld [vmem:[#allocation2 + $0x59] sm:$0xff] }
 0x4af   : > { %21431 = vmatmul.mubr.msk.f32.gmra.mrb[10].mxu0 %vm358_vm1, %v7528_v27  ;;  %20487 = vmatprep.mubr.msk.f32.mxu1 %vm358_vm1, %v7527_v26  ;;  %v26110_v26 = vld [vmem:[#allocation2 + $0x61] sm:$0xff] }
 0x4b0   : > { %21433 = vmatprep.mubr.msk.f32.mxu0 %vm358_vm1, %v7529_v52 }
 0x4b2   : > { %20488 = vmatmul.mubr.msk.f32.gmra.mrb[36].mxu1 %vm358_vm1, %v7528_v27  ;;  %v7820_v27 = vld [vmem:[#allocation2] sm:$0xff] }
 0x4b3   : > { %21434 = vmatmul.mubr.msk.f32.gmra.mrb[12].mxu0 %vm358_vm1, %v7530_v13  ;;  %20490 = vmatprep.mubr.msk.f32.mxu1 %vm358_vm1, %v7529_v52  ;;  %v26116_v52 = vld [vmem:[#allocation2 + $0x69] sm:$0xff] }
 0x4b4   : > { %21436 = vmatprep.mubr.msk.f32.mxu0 %vm358_vm1, %v7531_v63 }
 0x4b6   : > { %20491 = vmatmul.mubr.msk.f32.gmra.mrb[38].mxu1 %vm358_vm1, %v7530_v13  ;;  %v18283_v13 = vld [vmem:[%s26620_s6 + $0xb0] sm:$0xf] }
 0x4b7   : > { %21437 = vmatmul.mubr.msk.f32.gmra.mrb[14].mxu0 %vm358_vm1, %v7532_v33  ;;  %20493 = vmatprep.mubr.msk.f32.mxu1 %vm358_vm1, %v7531_v63  ;;  %v7821_v63 = vld [vmem:[#allocation2 + $0x8] sm:$0xff] }
 0x4b8   : > { %21441 = vmatprep.mubr.msk.f32.mxu0 %vm358_vm1, %v26051_v25 }
 0x4ba   : > { %20494 = vmatmul.mubr.msk.f32.gmra.mrb[40].mxu1 %vm358_vm1, %v7532_v33  ;;  %v7822_v33 = vld [vmem:[#allocation2 + $0x10] sm:$0xff] }
 0x4bb   : > { %21442 = vmatmul.mubr.msk.f32.vlgmr.msra.gmra.mrb[2].mxu0 %vm358_vm1, %v26056_v9  ;;  %20498 = vmatprep.mubr.msk.f32.mxu1 %vm358_vm1, %v7835_v36  ;;  %v17627_v36 = vld [vmem:[%s26620_s6 + $0xc] sm:$0xf] }
 0x4bc   : > { %21444 = vmatprep.mubr.msk.f32.mxu0 %vm358_vm1, %v26066_v4  ;;  %21463 = vmatpush3.msk.msra.mxu0 %vm1131_vm3, %v18251_v24  ;;  %v15013_v24 = vld [vmem:[#allocation2 + $0xac] sm:$0xff] }
 0x4bd   : > { %21485 = vmatprep.subr.msk.mxu0 %vm1131_vm3, %v26061_v3 }
 0x4be   : > { %20499 = vmatmul.mubr.msk.f32.vlgmr.msra.gmra.mrb[42].mxu1 %vm358_vm1, %v7836_v19  ;;  %v7824_v19 = vld [vmem:[#allocation2 + $0x20] sm:$0xff] }
 0x4bf   : > { %21445 = vmatmul.mubr.msk.f32.gmra.mrb[4].mxu0 %vm358_vm1, %v26074_v45  ;;  %20501 = vmatprep.mubr.msk.f32.mxu1 %vm358_vm1, %v7837_v11  ;;  %v7825_v11 = vld [vmem:[#allocation2 + $0x28] sm:$0xff] }
 0x4c0   : > { %21447 = vmatprep.mubr.msk.f32.mxu0 %vm358_vm1, %v26079_v14  ;;  %20520 = vmatpush3.msk.msra.mxu1 %vm1131_vm3, %v7834_v54  ;;  %v7844_v54 = vld [vmem:[#allocation2 + $0x49] sm:$0xff] }
 0x4c1   : > { %20542 = vmatprep.subr.msk.mxu1 %vm1131_vm3, %v17611_v37 }
 0x4c2   : > { %20502 = vmatmul.mubr.msk.f32.gmra.mrb[44].mxu1 %vm358_vm1, %v7838_v22  ;;  %v7826_v22 = vld [vmem:[#allocation2 + $0x30] sm:$0xff] }
 0x4c3   : > { %21448 = vmatmul.mubr.msk.f32.gmra.mrb[6].mxu0 %vm358_vm1, %v15006_v12  ;;  %20504 = vmatprep.mubr.msk.f32.mxu1 %vm358_vm1, %v7839_v2  ;;  %v7828_v2 = vld [vmem:[#allocation2 + $0x40] sm:$0xff] }
 0x4c4   : > { %21450 = vmatprep.mubr.msk.f32.mxu0 %vm358_vm1, %v15007_v5 }
 0x4c6   : > { %20505 = vmatmul.mubr.msk.f32.gmra.mrb[46].mxu1 %vm358_vm1, %v7840_v59  ;;  %v15224_v59 = vld [vmem:[#allocation2 + $0xbc] sm:$0xff] }
 0x4c7   : > { %21451 = vmatmul.mubr.msk.f32.gmra.mrb[8].mxu0 %vm358_vm1, %v15008_v18  ;;  %20507 = vmatprep.mubr.msk.f32.mxu1 %vm358_vm1, %v7841_v17  ;;  %v26162_v17 = vld [vmem:[#allocation2 + $0x60] sm:$0xff] }
 0x4c8   : > { %21453 = vmatprep.mubr.msk.f32.mxu0 %vm358_vm1, %v15009_v41 }
 0x4ca   : > { %20508 = vmatmul.mubr.msk.f32.gmra.mrb[48].mxu1 %vm358_vm1, %v7842_v56  ;;  %v18299_v56 = vld [vmem:[%s26620_s6 + $0xb4] sm:$0xf] }
 0x4cb   : > { %21454 = vmatmul.mubr.msk.f32.gmra.mrb[10].mxu0 %vm358_vm1, %v15010_v46  ;;  %20510 = vmatprep.mubr.msk.f32.mxu1 %vm358_vm1, %v7843_v29  ;;  %v8215_v29 = vld [vmem:[#allocation2 + $0x22] sm:$0xff] }
 0x4cc   : > { %21456 = vmatprep.mubr.msk.f32.mxu0 %vm358_vm1, %v15011_v44 }
 0x4ce   : > { %20511 = vmatmul.mubr.msk.f32.gmra.mrb[50].mxu1 %vm358_vm1, %v7844_v54  ;;  %v15637_v54 = vld [vmem:[#allocation2 + $0x86] sm:$0xff] }
 0x4cf   : > { %21457 = vmatmul.mubr.msk.f32.gmra.mrb[12].mxu0 %vm358_vm1, %v15012_v50  ;;  %20513 = vmatprep.mubr.msk.f32.mxu1 %vm358_vm1, %v7845_v0  ;;  %v8426_v0 = vld [vmem:[#allocation2 + $0x2b] sm:$0xff] }
 0x4d0   : > { %21459 = vmatprep.mubr.msk.f32.mxu0 %vm358_vm1, %v15013_v24 }
 0x4d2   : > { %20514 = vmatmul.mubr.msk.f32.gmra.mrb[52].mxu1 %vm358_vm1, %v26105_v35 }
 0x4d3   : > { %21460 = vmatmul.mubr.msk.f32.gmra.mrb[14].mxu0 %vm358_vm1, %v15014_v20  ;;  %20516 = vmatprep.mubr.msk.f32.mxu1 %vm358_vm1, %v26110_v26 }
 0x4d4   : > { %21464 = vmatprep.mubr.msk.f32.mxu0 %vm358_vm1, %v26056_v9 }
 0x4d6   : > { %20517 = vmatmul.mubr.msk.f32.gmra.mrb[54].mxu1 %vm358_vm1, %v26116_v52 }
 0x4d7   : > { %21465 = vmatmul.mubr.msk.f32.vlgmr.msra.gmra.mrb[2].mxu0 %vm358_vm1, %v26066_v4  ;;  %20521 = vmatprep.mubr.msk.f32.mxu1 %vm358_vm1, %v7820_v27  ;;  %v8427_v27 = vld [vmem:[#allocation2 + $0x33] sm:$0xff] }
 0x4d8   : > { %21467 = vmatprep.mubr.msk.f32.mxu0 %vm358_vm1, %v26074_v45  ;;  %21486 = vmatpush3.msk.msra.mxu0 %vm1131_vm3, %v26061_v3  ;;  %v7823_v3 = vld [vmem:[#allocation2 + $0x18] sm:$0xff] }
 0x4d9   : > { %21508 = vmatprep.subr.msk.mxu0 %vm1131_vm3, %v18283_v13 }
 0x4da   : > { %20522 = vmatmul.mubr.msk.f32.vlgmr.msra.gmra.mrb[42].mxu1 %vm358_vm1, %v7821_v63  ;;  %v15640_v63 = vld [vmem:[#allocation2 + $0x9e] sm:$0xff] }
 0x4db   : > { %21468 = vmatmul.mubr.msk.f32.gmra.mrb[4].mxu0 %vm358_vm1, %v26079_v14  ;;  %20524 = vmatprep.mubr.msk.f32.mxu1 %vm358_vm1, %v7822_v33  ;;  %v15641_v33 = vld [vmem:[#allocation2 + $0xa6] sm:$0xff] }
 0x4dc   : > { %21470 = vmatprep.mubr.msk.f32.mxu0 %vm358_vm1, %v15006_v12  ;;  %20543 = vmatpush3.msk.msra.mxu1 %vm1131_vm3, %v17611_v37  ;;  %v7827_v37 = vld [vmem:[#allocation2 + $0x38] sm:$0xff]  ;;  %v7829_v12 = vld [vmem:[#allocation2 + $0x48] sm:$0xff] }
 0x4dd   : > { %20565 = vmatprep.subr.msk.mxu1 %vm1131_vm3, %v17627_v36 }
 0x4de   : > { %20525 = vmatmul.mubr.msk.f32.gmra.mrb[44].mxu1 %vm358_vm1, %v7823_v3  ;;  %v8429_v3 = vld [vmem:[#allocation2 + $0x43] sm:$0xff] }
 0x4df   : > { %21471 = vmatmul.mubr.msk.f32.gmra.mrb[6].mxu0 %vm358_vm1, %v15007_v5  ;;  %20527 = vmatprep.mubr.msk.f32.mxu1 %vm358_vm1, %v7824_v19  ;;  %v7830_v5 = vld [vmem:[#allocation2 + $0x50] sm:$0xff] }
 0x4e0   : > { %21473 = vmatprep.mubr.msk.f32.mxu0 %vm358_vm1, %v15008_v18  ;;  %v26157_v18 = vld [vmem:[#allocation2 + $0x58] sm:$0xff] }
 0x4e1   : > { %v15643_v19 = vld [vmem:[#allocation2 + $0xb6] sm:$0xff] }
 0x4e2   : > { %20528 = vmatmul.mubr.msk.f32.gmra.mrb[46].mxu1 %vm358_vm1, %v7825_v11  ;;  %v15644_v11 = vld [vmem:[#allocation2 + $0xbe] sm:$0xff] }
 0x4e3   : > { %21474 = vmatmul.mubr.msk.f32.gmra.mrb[8].mxu0 %vm358_vm1, %v15009_v41  ;;  %20530 = vmatprep.mubr.msk.f32.mxu1 %vm358_vm1, %v7826_v22  ;;  %v26168_v41 = vld [vmem:[#allocation2 + $0x68] sm:$0xff]  ;;  %v15841_v22 = vld [vmem:[#allocation2 + $0x57] sm:$0xff] }
 0x4e4   : > { %21476 = vmatprep.mubr.msk.f32.mxu0 %vm358_vm1, %v15010_v46  ;;  %v8212_v46 = vld [vmem:[#allocation2 + $0xa] sm:$0xff] }
 0x4e6   : > { %20531 = vmatmul.mubr.msk.f32.gmra.mrb[48].mxu1 %vm358_vm1, %v7827_v37  ;;  %v8631_v37 = vld [vmem:[#allocation2 + $0x4] sm:$0xff] }
 0x4e7   : > { %21477 = vmatmul.mubr.msk.f32.gmra.mrb[10].mxu0 %vm358_vm1, %v15011_v44  ;;  %20533 = vmatprep.mubr.msk.f32.mxu1 %vm358_vm1, %v7828_v2  ;;  %v8211_v44 = vld [vmem:[#allocation2 + $0x2] sm:$0xff]  ;;  %v15844_v2 = vld [vmem:[#allocation2 + $0x6f] sm:$0xff] }
 0x4e8   : > { %21479 = vmatprep.mubr.msk.f32.mxu0 %vm358_vm1, %v15012_v50  ;;  %v26955_v50 = vmov 0.0  }
 0x4e9   : > { %385 = vst.msk [vmem:[#allocation2 + $0xc8] sm:$0x3] %vm384_vm5, %v26955_v50  ;;  %v15854_v50 = vld [vmem:[#allocation2 + $0xbf] sm:$0xff] }
 0x4ea   : > { %20534 = vmatmul.mubr.msk.f32.gmra.mrb[50].mxu1 %vm358_vm1, %v7829_v12  ;;  %v15845_v12 = vld [vmem:[#allocation2 + $0x77] sm:$0xff] }
 0x4eb   : > { %21480 = vmatmul.mubr.msk.f32.gmra.mrb[12].mxu0 %vm358_vm1, %v15013_v24  ;;  %20536 = vmatprep.mubr.msk.f32.mxu1 %vm358_vm1, %v7830_v5  ;;  %v15433_v24 = vld [vmem:[#allocation2 + $0xb5] sm:$0xff] }
 0x4ec   : > { %21482 = vmatprep.mubr.msk.f32.mxu0 %vm358_vm1, %v15014_v20  ;;  %v15638_v20 = vld [vmem:[#allocation2 + $0x8e] sm:$0xff]  ;;  %v8634_v5 = vld [vmem:[#allocation2 + $0x1c] sm:$0xff] }
 0x4ee   : > { %20537 = vmatmul.mubr.msk.f32.gmra.mrb[52].mxu1 %vm358_vm1, %v26157_v18 }
 0x4ef   : > { %21483 = vmatmul.mubr.msk.f32.gmra.mrb[14].mxu0 %vm358_vm1, %v15224_v59  ;;  %20539 = vmatprep.mubr.msk.f32.mxu1 %vm358_vm1, %v26162_v17  ;;  %v8635_v59 = vld [vmem:[#allocation2 + $0x24] sm:$0xff] }
 0x4f0   : > { %21487 = vmatprep.mubr.msk.f32.mxu0 %vm358_vm1, %v25538_v47  ;;  %v8213_v47 = vld [vmem:[#allocation2 + $0x12] sm:$0xff] }
 0x4f2   : > { %20540 = vmatmul.mubr.msk.f32.gmra.mrb[54].mxu1 %vm358_vm1, %v26168_v41 }
 0x4f3   : > { %21488 = vmatmul.mubr.msk.f32.vlgmr.msra.gmra.mrb[2].mxu0 %vm358_vm1, %v25545_v40  ;;  %20544 = vmatprep.mubr.msk.f32.mxu1 %vm358_vm1, %v8211_v44  ;;  %v17643_v40 = vld [vmem:[%s26620_s6 + $0x10] sm:$0xf]  ;;  %v15846_v44 = vld [vmem:[#allocation2 + $0x7f] sm:$0xff] }
 0x4f4   : > { %21490 = vmatprep.mubr.msk.f32.mxu0 %vm358_vm1, %v25555_v28  ;;  %21509 = vmatpush3.msk.msra.mxu0 %vm1131_vm3, %v18283_v13  ;;  %v8214_v28 = vld [vmem:[#allocation2 + $0x1a] sm:$0xff] }
 0x4f5   : > { %21531 = vmatprep.subr.msk.mxu0 %vm1131_vm3, %v18299_v56  ;;  %v15639_v13 = vld [vmem:[#allocation2 + $0x96] sm:$0xff] }
 0x4f6   : > { %20545 = vmatmul.mubr.msk.f32.vlgmr.msra.gmra.mrb[42].mxu1 %vm358_vm1, %v8212_v46  ;;  %v15849_v46 = vld [vmem:[#allocation2 + $0x97] sm:$0xff] }
 0x4f7   : > { %21491 = vmatmul.mubr.msk.f32.gmra.mrb[4].mxu0 %vm358_vm1, %v25562_v32  ;;  %20547 = vmatprep.mubr.msk.f32.mxu1 %vm358_vm1, %v8213_v47  ;;  %v8216_v32 = vld [vmem:[#allocation2 + $0x2a] sm:$0xff] }
 0x4f8   : > { %21493 = vmatprep.mubr.msk.f32.mxu0 %vm358_vm1, %v25568_v30  ;;  %20566 = vmatpush3.msk.msra.mxu1 %vm1131_vm3, %v17627_v36  ;;  %v8217_v30 = vld [vmem:[#allocation2 + $0x32] sm:$0xff]  ;;  %v8428_v36 = vld [vmem:[#allocation2 + $0x3b] sm:$0xff] }
 0x4f9   : > { %20588 = vmatprep.subr.msk.mxu1 %vm1131_vm3, %v17643_v40  ;;  %v8636_v47 = vld [vmem:[#allocation2 + $0x2c] sm:$0xff] }
 0x4fa   : > { %20548 = vmatmul.mubr.msk.f32.gmra.mrb[44].mxu1 %vm358_vm1, %v8214_v28  ;;  %v8637_v28 = vld [vmem:[#allocation2 + $0x34] sm:$0xff] }
 0x4fb   : > { %21494 = vmatmul.mubr.msk.f32.gmra.mrb[6].mxu0 %vm358_vm1, %v25574_v62  ;;  %20550 = vmatprep.mubr.msk.f32.mxu1 %vm358_vm1, %v8215_v29  ;;  %v8218_v62 = vld [vmem:[#allocation2 + $0x3a] sm:$0xff] }
 0x4fc   : > { %21496 = vmatprep.mubr.msk.f32.mxu0 %vm358_vm1, %v25580_v38  ;;  %v8219_v38 = vld [vmem:[#allocation2 + $0x42] sm:$0xff] }
 0x4fd   : > { %v8638_v29 = vld [vmem:[#allocation2 + $0x3c] sm:$0xff] }
 0x4fe   : > { %20551 = vmatmul.mubr.msk.f32.gmra.mrb[46].mxu1 %vm358_vm1, %v8216_v32  ;;  %v8639_v32 = vld [vmem:[#allocation2 + $0x44] sm:$0xff] }
 0x4ff   : > { %21497 = vmatmul.mubr.msk.f32.gmra.mrb[8].mxu0 %vm358_vm1, %v25586_v49  ;;  %20553 = vmatprep.mubr.msk.f32.mxu1 %vm358_vm1, %v8217_v30  ;;  %v15432_v49 = vld [vmem:[#allocation2 + $0xad] sm:$0xff]  ;;  %v15853_v30 = vld [vmem:[#allocation2 + $0xb7] sm:$0xff] }
 0x500   : > { %21499 = vmatprep.mubr.msk.f32.mxu0 %vm358_vm1, %v25594_v57  ;;  %v15434_v57 = vld [vmem:[#allocation2 + $0xbd] sm:$0xff] }
 0x502   : > { %20554 = vmatmul.mubr.msk.f32.gmra.mrb[48].mxu1 %vm358_vm1, %v8218_v62  ;;  %v8846_v62 = vld [vmem:[#allocation2 + $0x2d] sm:$0xff] }
 0x503   : > { %21500 = vmatmul.mubr.msk.f32.gmra.mrb[10].mxu0 %vm358_vm1, %v25592_v6  ;;  %20556 = vmatprep.mubr.msk.f32.mxu1 %vm358_vm1, %v8219_v38  ;;  %v8421_v6 = vld [vmem:[#allocation2 + $0x3] sm:$0xff]  ;;  %v16058_v38 = vld [vmem:[#allocation2 + $0x90] sm:$0xff] }
 0x504   : > { %21502 = vmatprep.mubr.msk.f32.mxu0 %vm358_vm1, %v25604_v51  ;;  %v18315_v51 = vld [vmem:[%s26620_s6 + $0xb8] sm:$0xf] }
 0x506   : > { %20557 = vmatmul.mubr.msk.f32.gmra.mrb[50].mxu1 %vm358_vm1, %v25935_v55  ;;  %v8422_v55 = vld [vmem:[#allocation2 + $0xb] sm:$0xff] }
 0x507   : > { %21503 = vmatmul.mubr.msk.f32.gmra.mrb[12].mxu0 %vm358_vm1, %v15432_v49  ;;  %20559 = vmatprep.mubr.msk.f32.mxu1 %vm358_vm1, %v25940_v58  ;;  %v26237_v58 = vld [vmem:[#allocation2 + $0x6e] sm:$0xff] }
 0x508   : > { %21505 = vmatprep.mubr.msk.f32.mxu0 %vm358_vm1, %v15433_v24  ;;  %v8847_v49 = vld [vmem:[#allocation2 + $0x35] sm:$0xff]  ;;  %v16060_v24 = vld [vmem:[#allocation2 + $0xa0] sm:$0xff] }
 0x50a   : > { %20560 = vmatmul.mubr.msk.f32.gmra.mrb[52].mxu1 %vm358_vm1, %v25945_v39  ;;  %v15635_v39 = vld [vmem:[#allocation2 + $0x76] sm:$0xff] }
 0x50b   : > { %21506 = vmatmul.mubr.msk.f32.gmra.mrb[14].mxu0 %vm358_vm1, %v15434_v57  ;;  %20562 = vmatprep.mubr.msk.f32.mxu1 %vm358_vm1, %v25955_v16  ;;  %v8425_v16 = vld [vmem:[#allocation2 + $0x23] sm:$0xff] }
 0x50c   : > { %21510 = vmatprep.mubr.msk.f32.mxu0 %vm358_vm1, %v25623_v61  ;;  %v8423_v61 = vld [vmem:[#allocation2 + $0x13] sm:$0xff]  ;;  %v8848_v57 = vld [vmem:[#allocation2 + $0x3d] sm:$0xff] }
 0x50e   : > { %20563 = vmatmul.mubr.msk.f32.gmra.mrb[54].mxu1 %vm358_vm1, %v25962_v15  ;;  %v15636_v15 = vld [vmem:[#allocation2 + $0x7e] sm:$0xff] }
 0x50f   : > { %21511 = vmatmul.mubr.msk.f32.vlgmr.msra.gmra.mrb[2].mxu0 %vm358_vm1, %v25630_v48  ;;  %20567 = vmatprep.mubr.msk.f32.mxu1 %vm358_vm1, %v8421_v6  ;;  %v17659_v48 = vld [vmem:[%s26620_s6 + $0x14] sm:$0xf]  ;;  %v8849_v6 = vld [vmem:[#allocation2 + $0x45] sm:$0xff] }
 0x510   : > { %21513 = vmatprep.mubr.msk.f32.mxu0 %vm358_vm1, %v25640_v53  ;;  %21532 = vmatpush3.msk.msra.mxu0 %vm1131_vm3, %v18299_v56  ;;  %v8424_v53 = vld [vmem:[#allocation2 + $0x1b] sm:$0xff]  ;;  %v15847_v56 = vld [vmem:[#allocation2 + $0x87] sm:$0xff] }
 0x511   : > { %21554 = vmatprep.subr.msk.mxu0 %vm1131_vm3, %v18315_v51 }
 0x512   : > { %20568 = vmatmul.mubr.msk.f32.vlgmr.msra.gmra.mrb[42].mxu1 %vm358_vm1, %v8422_v55  ;;  %v8850_v55 = vld [vmem:[#allocation2 + $0x4d] sm:$0xff] }
 0x513   : > { %21514 = vmatmul.mubr.msk.f32.gmra.mrb[4].mxu0 %vm358_vm1, %v26237_v58  ;;  %20570 = vmatprep.mubr.msk.f32.mxu1 %vm358_vm1, %v8423_v61  ;;  %v8851_v61 = vld [vmem:[#allocation2 + $0x55] sm:$0xff] }
 0x514   : > { %21516 = vmatprep.mubr.msk.f32.mxu0 %vm358_vm1, %v15635_v39  ;;  %20589 = vmatpush3.msk.msra.mxu1 %vm1131_vm3, %v17643_v40  ;;  %v15848_v40 = vld [vmem:[#allocation2 + $0x8f] sm:$0xff]  ;;  %v16064_v39 = vld [vmem:[#allocation2 + $0xc0] sm:$0xff] }
 0x515   : > { %20611 = vmatprep.subr.msk.mxu1 %vm1131_vm3, %v17659_v48 }
 0x516   : > { %20571 = vmatmul.mubr.msk.f32.gmra.mrb[44].mxu1 %vm358_vm1, %v8424_v53  ;;  %v8853_v53 = vld [vmem:[#allocation2 + $0x65] sm:$0xff] }
 0x517   : > { %21517 = vmatmul.mubr.msk.f32.gmra.mrb[6].mxu0 %vm358_vm1, %v15636_v15  ;;  %20573 = vmatprep.mubr.msk.f32.mxu1 %vm358_vm1, %v8425_v16  ;;  %v9051_v16 = vld [vmem:[#allocation2 + $0x6] sm:$0xff]  ;;  %v9053_v15 = vld [vmem:[#allocation2 + $0x16] sm:$0xff] }
 0x518   : > { %21519 = vmatprep.mubr.msk.f32.mxu0 %vm358_vm1, %v15637_v54  ;;  %v16264_v54 = vld [vmem:[#allocation2 + $0x71] sm:$0xff] }
 0x51a   : > { %20574 = vmatmul.mubr.msk.f32.gmra.mrb[46].mxu1 %vm358_vm1, %v8426_v0  ;;  %v16266_v0 = vld [vmem:[#allocation2 + $0x81] sm:$0xff] }
 0x51b   : > { %21520 = vmatmul.mubr.msk.f32.gmra.mrb[8].mxu0 %vm358_vm1, %v15638_v20  ;;  %20576 = vmatprep.mubr.msk.f32.mxu1 %vm358_vm1, %v8427_v27  ;;  %v16267_v20 = vld [vmem:[#allocation2 + $0x89] sm:$0xff]  ;;  %v16269_v27 = vld [vmem:[#allocation2 + $0x99] sm:$0xff] }
 0x51c   : > { %21522 = vmatprep.mubr.msk.f32.mxu0 %vm358_vm1, %v15639_v13  ;;  %v9056_v13 = vld [vmem:[#allocation2 + $0x2e] sm:$0xff] }
 0x51e   : > { %20577 = vmatmul.mubr.msk.f32.gmra.mrb[48].mxu1 %vm358_vm1, %v8428_v36  ;;  %v16270_v36 = vld [vmem:[#allocation2 + $0xa1] sm:$0xff] }
 0x51f   : > { %21523 = vmatmul.mubr.msk.f32.gmra.mrb[10].mxu0 %vm358_vm1, %v15640_v63  ;;  %20579 = vmatprep.mubr.msk.f32.mxu1 %vm358_vm1, %v8429_v3  ;;  %v16268_v63 = vld [vmem:[#allocation2 + $0x91] sm:$0xff]  ;;  %v16271_v3 = vld [vmem:[#allocation2 + $0xa9] sm:$0xff] }
 0x520   : > { %21525 = vmatprep.mubr.msk.f32.mxu0 %vm358_vm1, %v15641_v33  ;;  %v9057_v33 = vld [vmem:[#allocation2 + $0x36] sm:$0xff] }
 0x522   : > { %20580 = vmatmul.mubr.msk.f32.gmra.mrb[50].mxu1 %vm358_vm1, %v25993_v60  ;;  %v15842_v60 = vld [vmem:[#allocation2 + $0x5f] sm:$0xff] }
 0x523   : > { %21526 = vmatmul.mubr.msk.f32.gmra.mrb[12].mxu0 %vm358_vm1, %v25723_v1  ;;  %20582 = vmatprep.mubr.msk.f32.mxu1 %vm358_vm1, %v25998_v23  ;;  %v18331_v1 = vld [vmem:[%s26620_s6 + $0xbc] sm:$0xf]  ;;  %v15843_v23 = vld [vmem:[#allocation2 + $0x67] sm:$0xff] }
 0x524   : > { %21528 = vmatprep.mubr.msk.f32.mxu0 %vm358_vm1, %v15643_v19  ;;  %v9058_v19 = vld [vmem:[#allocation2 + $0x3e] sm:$0xff] }
 0x526   : > { %20583 = vmatmul.mubr.msk.f32.gmra.mrb[52].mxu1 %vm358_vm1, %v26003_v7  ;;  %v8632_v7 = vld [vmem:[#allocation2 + $0xc] sm:$0xff] }
 0x527   : > { %21529 = vmatmul.mubr.msk.f32.gmra.mrb[14].mxu0 %vm358_vm1, %v15644_v11  ;;  %20585 = vmatprep.mubr.msk.f32.mxu1 %vm358_vm1, %v26013_v10  ;;  %v8633_v10 = vld [vmem:[#allocation2 + $0x14] sm:$0xff]  ;;  %v9059_v11 = vld [vmem:[#allocation2 + $0x46] sm:$0xff] }
 0x528   : > { %21533 = vmatprep.mubr.msk.f32.mxu0 %vm358_vm1, %v15841_v22  ;;  %v26386_v22 = vld [vmem:[%s26619_s5] ss:$0 sm:$0xff] }
 0x52a   : > { %20586 = vmatmul.mubr.msk.f32.gmra.mrb[54].mxu1 %vm358_vm1, %v26020_v21  ;;  %v17675_v21 = vld [vmem:[%s26620_s6 + $0x18] sm:$0xf] }
 0x52b   : > { %21534 = vmatmul.mubr.msk.f32.vlgmr.msra.gmra.mrb[2].mxu0 %vm358_vm1, %v15842_v60  ;;  %20590 = vmatprep.mubr.msk.f32.mxu1 %vm358_vm1, %v8631_v37  ;;  %v16272_v60 = vld [vmem:[#allocation2 + $0xb1] sm:$0xff]  ;;  %v16273_v37 = vld [vmem:[#allocation2 + $0xb9] sm:$0xff] }
 0x52c   : > { %21536 = vmatprep.mubr.msk.f32.mxu0 %vm358_vm1, %v15843_v23  ;;  %21555 = vmatpush3.msk.msra.mxu0 %vm1131_vm3, %v18315_v51  ;;  %v16063_v51 = vld [vmem:[#allocation2 + $0xb8] sm:$0xff]  ;;  %v9060_v23 = vld [vmem:[#allocation2 + $0x4e] sm:$0xff] }
 0x52d   : > { %21577 = vmatprep.subr.msk.mxu0 %vm1131_vm3, %v18331_v1 }
 0x52e   : > { %20591 = vmatmul.mubr.msk.f32.vlgmr.msra.gmra.mrb[42].mxu1 %vm358_vm1, %v8632_v7 }
 0x52f   : > { %21537 = vmatmul.mubr.msk.f32.gmra.mrb[4].mxu0 %vm358_vm1, %v15844_v2  ;;  %20593 = vmatprep.mubr.msk.f32.mxu1 %vm358_vm1, %v8633_v10  ;;  %v9061_v2 = vld [vmem:[#allocation2 + $0x56] sm:$0xff] }
 0x530   : > { %21539 = vmatprep.mubr.msk.f32.mxu0 %vm358_vm1, %v15845_v12  ;;  %20612 = vmatpush3.msk.msra.mxu1 %vm1131_vm3, %v17659_v48  ;;  %v8852_v48 = vld [vmem:[#allocation2 + $0x5d] sm:$0xff] }
 0x531   : > { %20634 = vmatprep.subr.msk.mxu1 %vm1131_vm3, %v17675_v21 }
 0x532   : > { %20594 = vmatmul.mubr.msk.f32.gmra.mrb[44].mxu1 %vm358_vm1, %v8634_v5 }
 0x533   : > { %21540 = vmatmul.mubr.msk.f32.gmra.mrb[6].mxu0 %vm358_vm1, %v15846_v44  ;;  %20596 = vmatprep.mubr.msk.f32.mxu1 %vm358_vm1, %v8635_v59  ;;  %v9062_v44 = vld [vmem:[#allocation2 + $0x5e] sm:$0xff] }
 0x534   : > { %21542 = vmatprep.mubr.msk.f32.mxu0 %vm358_vm1, %v15847_v56 }
 0x536   : > { %20597 = vmatmul.mubr.msk.f32.gmra.mrb[46].mxu1 %vm358_vm1, %v8636_v47  ;;  %v9063_v47 = vld [vmem:[#allocation2 + $0x66] sm:$0xff] }
 0x537   : > { %21543 = vmatmul.mubr.msk.f32.gmra.mrb[8].mxu0 %vm358_vm1, %v15848_v40  ;;  %20599 = vmatprep.mubr.msk.f32.mxu1 %vm358_vm1, %v8637_v28  ;;  %v16471_v40 = vld [vmem:[#allocation2 + $0x5a] sm:$0xff] }
 0x538   : > { %21545 = vmatprep.mubr.msk.f32.mxu0 %vm358_vm1, %v15849_v46 }
 0x53a   : > { %20600 = vmatmul.mubr.msk.f32.gmra.mrb[48].mxu1 %vm358_vm1, %v8638_v29 }
 0x53b   : > { %21546 = vmatmul.mubr.msk.f32.gmra.mrb[10].mxu0 %vm358_vm1, %v25783_v8  ;;  %20602 = vmatprep.mubr.msk.f32.mxu1 %vm358_vm1, %v8639_v32  ;;  %v8841_v8 = vld [vmem:[#allocation2 + $0x5] sm:$0xff] }
 0x53c   : > { %21548 = vmatprep.mubr.msk.f32.mxu0 %vm358_vm1, %v25785_v31  ;;  %v18347_v31 = vld [vmem:[%s26620_s6 + $0xc0] sm:$0xf] }
 0x53e   : > { %20603 = vmatmul.mubr.msk.f32.gmra.mrb[50].mxu1 %vm358_vm1, %v26051_v25  ;;  %v8843_v25 = vld [vmem:[#allocation2 + $0x15] sm:$0xff] }
 0x53f   : > { %21549 = vmatmul.mubr.msk.f32.gmra.mrb[12].mxu0 %vm358_vm1, %v25795_v42  ;;  %20605 = vmatprep.mubr.msk.f32.mxu1 %vm358_vm1, %v26056_v9  ;;  %v8842_v42 = vld [vmem:[#allocation2 + $0xd] sm:$0xff] }
 0x540   : > { %21551 = vmatprep.mubr.msk.f32.mxu0 %vm358_vm1, %v15853_v30  ;;  %v16054_v9 = vld [vmem:[#allocation2 + $0x70] sm:$0xff] }
 0x542   : > { %20606 = vmatmul.mubr.msk.f32.gmra.mrb[52].mxu1 %vm358_vm1, %v26066_v4  ;;  %v16055_v4 = vld [vmem:[#allocation2 + $0x78] sm:$0xff] }
 0x543   : > { %21552 = vmatmul.mubr.msk.f32.gmra.mrb[14].mxu0 %vm358_vm1, %v15854_v50  ;;  %20608 = vmatprep.mubr.msk.f32.mxu1 %vm358_vm1, %v26074_v45  ;;  %v8844_v45 = vld [vmem:[#allocation2 + $0x1d] sm:$0xff] }
 0x544   : > { %21556 = vmatprep.mubr.msk.f32.mxu0 %vm358_vm1, %v26157_v18  ;;  %v16056_v18 = vld [vmem:[#allocation2 + $0x80] sm:$0xff] }
 0x546   : > { %20609 = vmatmul.mubr.msk.f32.gmra.mrb[54].mxu1 %vm358_vm1, %v26079_v14  ;;  %v8845_v14 = vld [vmem:[#allocation2 + $0x25] sm:$0xff] }
 0x547   : > { %21557 = vmatmul.mubr.msk.f32.vlgmr.msra.gmra.mrb[2].mxu0 %vm358_vm1, %v26162_v17  ;;  %20613 = vmatprep.mubr.msk.f32.mxu1 %vm358_vm1, %v8841_v8  ;;  %v16057_v17 = vld [vmem:[#allocation2 + $0x88] sm:$0xff] }
 0x548   : > { %21559 = vmatprep.mubr.msk.f32.mxu0 %vm358_vm1, %v26168_v41  ;;  %21578 = vmatpush3.msk.msra.mxu0 %vm1131_vm3, %v18331_v1  ;;  %v16059_v41 = vld [vmem:[#allocation2 + $0x98] sm:$0xff]  ;;  %v16472_v8 = vld [vmem:[#allocation2 + $0x62] sm:$0xff] }
 0x549   : > { %21600 = vmatprep.subr.msk.mxu0 %vm1131_vm3, %v18347_v31 }
 0x54a   : > { %20614 = vmatmul.mubr.msk.f32.vlgmr.msra.gmra.mrb[42].mxu1 %vm358_vm1, %v8842_v42 }
 0x54b   : > { %21560 = vmatmul.mubr.msk.f32.gmra.mrb[4].mxu0 %vm358_vm1, %v16054_v9  ;;  %20616 = vmatprep.mubr.msk.f32.mxu1 %vm358_vm1, %v8843_v25  ;;  %v16473_v25 = vld [vmem:[#allocation2 + $0x6a] sm:$0xff] }
 0x54c   : > { %21562 = vmatprep.mubr.msk.f32.mxu0 %vm358_vm1, %v16055_v4  ;;  %20635 = vmatpush3.msk.msra.mxu1 %vm1131_vm3, %v17675_v21  ;;  %v16274_v21 = vld [vmem:[#allocation2 + $0xc1] sm:$0xff] }
 0x54e   : > { %20617 = vmatmul.mubr.msk.f32.gmra.mrb[44].mxu1 %vm358_vm1, %v8844_v45 }
 0x54f   : > { %21563 = vmatmul.mubr.msk.f32.gmra.mrb[6].mxu0 %vm358_vm1, %v16056_v18  ;;  %20619 = vmatprep.mubr.msk.f32.mxu1 %vm358_vm1, %v8845_v14 }
 0x550   : > { %21565 = vmatprep.mubr.msk.f32.mxu0 %vm358_vm1, %v16057_v17 }
 0x552   : > { %20620 = vmatmul.mubr.msk.f32.gmra.mrb[46].mxu1 %vm358_vm1, %v8846_v62 }
 0x553   : > { %21566 = vmatmul.mubr.msk.f32.gmra.mrb[8].mxu0 %vm358_vm1, %v16058_v38  ;;  %20622 = vmatprep.mubr.msk.f32.mxu1 %vm358_vm1, %v8847_v49 }
 0x554   : > { %21568 = vmatprep.mubr.msk.f32.mxu0 %vm358_vm1, %v16059_v41  ;;  %v16474_v41 = vld [vmem:[#allocation2 + $0x72] sm:$0xff] }
 0x556   : > { %20623 = vmatmul.mubr.msk.f32.gmra.mrb[48].mxu1 %vm358_vm1, %v8848_v57 }
 0x557   : > { %21569 = vmatmul.mubr.msk.f32.gmra.mrb[10].mxu0 %vm358_vm1, %v16060_v24  ;;  %20625 = vmatprep.mubr.msk.f32.mxu1 %vm358_vm1, %v8849_v6 }
 0x558   : > { %21571 = vmatprep.mubr.msk.f32.mxu0 %vm358_vm1, %v25855_v34  ;;  %v8854_v34 = vld [vmem:[#allocation2 + $0x6d] sm:$0xff] }
 0x55a   : > { %20626 = vmatmul.mubr.msk.f32.gmra.mrb[50].mxu1 %vm358_vm1, %v8850_v55 }
 0x55b   : > { %21572 = vmatmul.mubr.msk.f32.gmra.mrb[12].mxu0 %vm358_vm1, %v25865_v43  ;;  %20628 = vmatprep.mubr.msk.f32.mxu1 %vm358_vm1, %v8851_v61  ;;  %v9052_v43 = vld [vmem:[#allocation2 + $0xe] sm:$0xff]  ;;  %v16476_v61 = vld [vmem:[#allocation2 + $0x82] sm:$0xff] }
 0x55c   : > { %21574 = vmatprep.mubr.msk.f32.mxu0 %vm358_vm1, %v16063_v51 }
 0x55e   : > { %20629 = vmatmul.mubr.msk.f32.gmra.mrb[52].mxu1 %vm358_vm1, %v8852_v48 }
 0x55f   : > { %21575 = vmatmul.mubr.msk.f32.gmra.mrb[14].mxu0 %vm358_vm1, %v16064_v39  ;;  %20631 = vmatprep.mubr.msk.f32.mxu1 %vm358_vm1, %v8853_v53  ;;  %v16477_v53 = vld [vmem:[#allocation2 + $0x8a] sm:$0xff] }
 0x560   : > { %21579 = vmatprep.mubr.msk.f32.mxu0 %vm358_vm1, %v26105_v35  ;;  %v16265_v35 = vld [vmem:[#allocation2 + $0x79] sm:$0xff] }
 0x562   : > { %20632 = vmatmul.mubr.msk.f32.gmra.mrb[54].mxu1 %vm358_vm1, %v8854_v34 }
 0x563   : > { %21580 = vmatmul.mubr.msk.f32.vlgmr.msra.gmra.mrb[2].mxu0 %vm358_vm1, %v26110_v26  ;;  %20636 = vmatprep.mubr.msk.f32.mxu1 %vm358_vm1, %v9051_v16  ;;  %v9054_v26 = vld [vmem:[#allocation2 + $0x1e] sm:$0xff] }
 0x564   : > { %21582 = vmatprep.mubr.msk.f32.mxu0 %vm358_vm1, %v26116_v52  ;;  %21601 = vmatpush3.msk.msra.mxu0 %vm1131_vm3, %v18347_v31  ;;  %v9055_v52 = vld [vmem:[#allocation2 + $0x26] sm:$0xff] }
 0x566   : > { %20637 = vmatmul.mubr.msk.f32.vlgmr.msra.gmra.mrb[42].mxu1 %vm358_vm1, %v9052_v43 }
 0x567   : > { %21583 = vmatmul.mubr.msk.f32.gmra.mrb[4].mxu0 %vm358_vm1, %v16264_v54  ;;  %20639 = vmatprep.mubr.msk.f32.mxu1 %vm358_vm1, %v9053_v15  ;;  %v16479_v54 = vld [vmem:[#allocation2 + $0x9a] sm:$0xff] }
 0x568   : > { %21585 = vmatprep.mubr.msk.f32.mxu0 %vm358_vm1, %v16265_v35 }
 0x56a   : > { %20640 = vmatmul.mubr.msk.f32.gmra.mrb[44].mxu1 %vm358_vm1, %v9054_v26 }
 0x56b   : > { %21586 = vmatmul.mubr.msk.f32.gmra.mrb[6].mxu0 %vm358_vm1, %v16266_v0  ;;  %20642 = vmatprep.mubr.msk.f32.mxu1 %vm358_vm1, %v9055_v52  ;;  %v16478_v0 = vld [vmem:[#allocation2 + $0x92] sm:$0xff] }
 0x56c   : > { %21588 = vmatprep.mubr.msk.f32.mxu0 %vm358_vm1, %v16267_v20 }
 0x56e   : > { %20643 = vmatmul.mubr.msk.f32.gmra.mrb[46].mxu1 %vm358_vm1, %v9056_v13 }
 0x56f   : > { %21589 = vmatmul.mubr.msk.f32.gmra.mrb[8].mxu0 %vm358_vm1, %v16268_v63  ;;  %20645 = vmatprep.mubr.msk.f32.mxu1 %vm358_vm1, %v9057_v33 }
 0x570   : > { %21591 = vmatprep.mubr.msk.f32.mxu0 %vm358_vm1, %v16269_v27 }
 0x572   : > { %20646 = vmatmul.mubr.msk.f32.gmra.mrb[48].mxu1 %vm358_vm1, %v9058_v19 }
 0x573   : > { %21592 = vmatmul.mubr.msk.f32.gmra.mrb[10].mxu0 %vm358_vm1, %v16270_v36  ;;  %20648 = vmatprep.mubr.msk.f32.mxu1 %vm358_vm1, %v9059_v11  ;;  %v16480_v36 = vld [vmem:[#allocation2 + $0xa2] sm:$0xff] }
 0x574   : > { %21594 = vmatprep.mubr.msk.f32.mxu0 %vm358_vm1, %v16271_v3  ;;  %v16481_v3 = vld [vmem:[#allocation2 + $0xaa] sm:$0xff] }
 0x575   : > { %v20477_v1 = vpop.f32.mrb[28].mxu1 }
 0x576   : > { %v7737_v7 = vadd.f32 %v20477_v1, %v26386_v22  ;;  %v7646_v10 = vpop.f32.mrb[29].mxu1  ;;  %20649 = vmatmul.mubr.msk.f32.gmra.mrb[50].mxu1 %vm358_vm1, %v9060_v23 }
 0x577   : > { %21595 = vmatmul.mubr.msk.f32.gmra.mrb[12].mxu0 %vm358_vm1, %v16272_v60  ;;  %v7736_v12 = vadd.f32 %v26386_v22, %v7646_v10  ;;  %20651 = vmatprep.mubr.msk.f32.mxu1 %vm358_vm1, %v9061_v2  ;;  %v16482_v2 = vld [vmem:[#allocation2 + $0xb2] sm:$0xff] }
 0x578   : > { %21597 = vmatprep.mubr.msk.f32.mxu0 %vm358_vm1, %v16273_v37  ;;  %v7751_v5 = vmax.f32 %v7737_v7, 0.0 }
 0x579   : > { %v20480_v59 = vpop.f32.mrb[30].mxu1  ;;  %v7750_v29 = vmax.f32 %v7736_v12, 0.0  ;;  %v16483_v12 = vld [vmem:[#allocation2 + $0xba] sm:$0xff] }
 0x57a   : > { %v7739_v56 = vadd.f32 %v20480_v59, %v26386_v22  ;;  %v7656_v46 = vpop.f32.mrb[31].mxu1  ;;  %20652 = vmatmul.mubr.msk.f32.gmra.mrb[52].mxu1 %vm358_vm1, %v9062_v44  ;;  %v7767_v28 = vsel %vm2955_vm4, %v7751_v5, 0.0 }
 0x57b   : > { %21598 = vmatmul.mubr.msk.f32.gmra.mrb[14].mxu0 %vm358_vm1, %v16274_v21  ;;  %v7738_v32 = vadd.f32 %v26386_v22, %v7656_v46  ;;  %20654 = vmatprep.mubr.msk.f32.mxu1 %vm358_vm1, %v9063_v47  ;;  %v7764_v45 = vsel %vm2955_vm4, %v7750_v29, 0.0 }
 0x57c   : > { %21602 = vmatprep.mubr.msk.f32.mxu0 %vm358_vm1, %v16471_v40  ;;  %7768 = vadd.xlane.f32.xlu1 %v7767_v28  ;;  %v7753_v31 = vmax.f32 %v7739_v56, 0.0  ;;  %v16484_v56 = vld [vmem:[#allocation2 + $0xc2] sm:$0xff] }
 0x57d   : > { %v7752_v30 = vmax.f32 %v7738_v32, 0.0  ;;  %v20483_v50 = vpop.f32.mrb[32].mxu1 }
 0x57e   : > { %v7666_v42 = vpop.f32.mrb[33].mxu1  ;;  %20655 = vmatmul.mubr.msk.f32.gmra.mrb[54].mxu1 %vm358_vm1, %v26237_v58  ;;  %v7741_v9 = vadd.f32 %v20483_v50, %v26386_v22  ;;  %v16475_v58 = vld [vmem:[#allocation2 + $0x7a] sm:$0xff]  ;;  %v7773_v38 = vsel %vm2955_vm4, %v7753_v31, 0.0 }
 0x57f   : > { %21603 = vmatmul.mubr.msk.f32.vlgmr.msra.gmra.mrb[2].mxu0 %vm358_vm1, %v16472_v8  ;;  %v7740_v4 = vadd.f32 %v26386_v22, %v7666_v42  ;;  %v7770_v14 = vsel %vm2955_vm4, %v7752_v30, 0.0 }
 0x580   : > { %21605 = vmatprep.mubr.msk.f32.mxu0 %vm358_vm1, %v16473_v25  ;;  %7765 = vadd.xlane.f32.xlu1 %v7764_v45  ;;  %v7755_v49 = vmax.f32 %v7741_v9, 0.0  ;;  %v26447_v45 = vld [vmem:[%s26621_s7] ss:$0 sm:$0xff] }
 0x581   : > { %7771 = vadd.xlane.f32.xlu0 %v7770_v14  ;;  %v7754_v18 = vmax.f32 %v7740_v4, 0.0  ;;  %v20486_v17 = vpop.f32.mrb[34].mxu1 }
 0x582   : > { %v7676_v62 = vpop.f32.mrb[35].mxu1  ;;  %v7743_v24 = vadd.f32 %v20486_v17, %v26386_v22  ;;  %v7779_v43 = vsel %vm2955_vm4, %v7755_v49, 0.0 }
 0x583   : > { %21606 = vmatmul.mubr.msk.f32.gmra.mrb[4].mxu0 %vm358_vm1, %v16474_v41  ;;  %v7742_v57 = vadd.f32 %v26386_v22, %v7676_v62  ;;  %v7776_v6 = vsel %vm2955_vm4, %v7754_v18, 0.0 }
 0x584   : > { %21608 = vmatprep.mubr.msk.f32.mxu0 %vm358_vm1, %v16475_v58  ;;  %7774 = vadd.xlane.f32.xlu1 %v7773_v38  ;;  %v7757_v34 = vmax.f32 %v7743_v24, 0.0 }
 0x585   : > { %7777 = vadd.xlane.f32.xlu0 %v7776_v6  ;;  %v7756_v51 = vmax.f32 %v7742_v57, 0.0  ;;  %v20489_v55 = vpop.f32.mrb[36].mxu1 }
 0x586   : > { %v7745_v39 = vadd.f32 %v20489_v55, %v26386_v22  ;;  %v7686_v48 = vpop.f32.mrb[37].mxu1  ;;  %v7785_v63 = vsel %vm2955_vm4, %v7757_v34, 0.0 }
 0x587   : > { %21609 = vmatmul.mubr.msk.f32.gmra.mrb[6].mxu0 %vm358_vm1, %v16476_v61  ;;  %v7744_v16 = vadd.f32 %v26386_v22, %v7686_v48  ;;  %v7782_v15 = vsel %vm2955_vm4, %v7756_v51, 0.0 }
 0x588   : > { %21611 = vmatprep.mubr.msk.f32.mxu0 %vm358_vm1, %v16477_v53  ;;  %7780 = vadd.xlane.f32.xlu1 %v7779_v43  ;;  %v7759_v52 = vmax.f32 %v7745_v39, 0.0 }
 0x589   : > { %7783 = vadd.xlane.f32.xlu0 %v7782_v15  ;;  %v7758_v35 = vmax.f32 %v7744_v16, 0.0  ;;  %v20492_v26 = vpop.f32.mrb[38].mxu1 }
 0x58a   : > { %v7696_v20 = vpop.f32.mrb[39].mxu1  ;;  %v7747_v27 = vadd.f32 %v20492_v26, %v26386_v22  ;;  %v7791_v37 = vsel %vm2955_vm4, %v7759_v52, 0.0 }
 0x58b   : > { %21612 = vmatmul.mubr.msk.f32.gmra.mrb[8].mxu0 %vm358_vm1, %v16478_v0  ;;  %v7746_v13 = vadd.f32 %v26386_v22, %v7696_v20  ;;  %v7788_v33 = vsel %vm2955_vm4, %v7758_v35, 0.0 }
 0x58c   : > { %21614 = vmatprep.mubr.msk.f32.mxu0 %vm358_vm1, %v16479_v54  ;;  %7786 = vadd.xlane.f32.xlu1 %v7785_v63  ;;  %v7761_v1 = vmax.f32 %v7747_v27, 0.0 }
 0x58d   : > { %7789 = vadd.xlane.f32.xlu0 %v7788_v33  ;;  %v7760_v19 = vmax.f32 %v7746_v13, 0.0  ;;  %v20495_v11 = vpop.f32.mrb[40].mxu1 }
 0x58e   : > { %v7706_v60 = vpop.f32.mrb[41].mxu1  ;;  %v7749_v23 = vadd.f32 %v20495_v11, %v26386_v22  ;;  %v7797_v59 = vsel %vm2955_vm4, %v7761_v1, 0.0 }
 0x58f   : > { %21615 = vmatmul.mubr.msk.f32.gmra.mrb[10].mxu0 %vm358_vm1, %v16480_v36  ;;  %v7748_v7 = vadd.f32 %v26386_v22, %v7706_v60  ;;  %v7794_v10 = vsel %vm2955_vm4, %v7760_v19, 0.0 }
 0x590   : > { %21617 = vmatprep.mubr.msk.f32.mxu0 %vm358_vm1, %v16481_v3  ;;  %7792 = vadd.xlane.f32.xlu1 %v7791_v37  ;;  %v7763_v5 = vmax.f32 %v7749_v23, 0.0 }
 0x591   : > { %7795 = vadd.xlane.f32.xlu0 %v7794_v10  ;;  %v7762_v21 = vmax.f32 %v7748_v7, 0.0 }
 0x592   : > { %v7803_v22 = vsel %vm2955_vm4, %v7763_v5, 0.0 }
 0x593   : > { %21618 = vmatmul.mubr.msk.f32.gmra.mrb[12].mxu0 %vm358_vm1, %v16482_v2  ;;  %v7800_v44 = vsel %vm2955_vm4, %v7762_v21, 0.0 }
 0x594   : > { %21620 = vmatprep.mubr.msk.f32.mxu0 %vm358_vm1, %v16483_v12  ;;  %7798 = vadd.xlane.f32.xlu1 %v7797_v59 }
 0x595   : > { %7801 = vadd.xlane.f32.xlu0 %v7800_v44 }
 0x597   : > { %21621 = vmatmul.mubr.msk.f32.gmra.mrb[14].mxu0 %vm358_vm1, %v16484_v56 }
 0x598   : > { %7804 = vadd.xlane.f32.xlu1 %v7803_v22 }
 0x639   : > { %v20638_v46 = vpop.f32.mrb[42].mxu1 }
 0x63a   : > { %v9178_v47 = vpop.f32.mrb[43].mxu1 }
 0x63d   : > { %v20641_v40 = vpop.f32.mrb[44].mxu1 }
 0x63e   : > { %v9188_v28 = vpop.f32.mrb[45].mxu1 }
 0x641   : > { %v20644_v29 = vpop.f32.mrb[46].mxu1 }
 0x642   : > { %v9198_v32 = vpop.f32.mrb[47].mxu1 }
 0x645   : > { %v20647_v30 = vpop.f32.mrb[48].mxu1 }
 0x646   : > { %v9208_v50 = vpop.f32.mrb[49].mxu1 }
 0x649   : > { %v20650_v8 = vpop.f32.mrb[50].mxu1 }
 0x64a   : > { %v9218_v31 = vpop.f32.mrb[51].mxu1 }
 0x64d   : > { %v20653_v42 = vpop.f32.mrb[52].mxu1 }
 0x64e   : > { %v26440_v25 = vpop.f32.mrb[53].mxu1 }
 0x651   : > { %v26442_v9 = vpop.f32.mrb[54].mxu1 }
 0x652   : > { %v21604_v4 = vpop.f32.mrb[2].mxu0  ;;  %v26449_v18 = vpop.f32.mrb[55].mxu1 }
 0x653   : > { %v21706_v14 = vadd.f32 %v21604_v4, %v20638_v46  ;;  %v16598_v17 = vpop.f32.mrb[3].mxu0 }
 0x654   : > { %v21707_v41 = vadd.f32 %v16598_v17, %v9178_v47 }
 0x655   : > { %v16689_v62 = vadd.f32 %v21706_v14, %v26447_v45 }
 0x656   : > { %v16688_v58 = vadd.f32 %v21707_v41, %v26447_v45  ;;  %v21607_v38 = vpop.f32.mrb[4].mxu0 }
 0x657   : > { %v21708_v49 = vadd.f32 %v21607_v38, %v20641_v40  ;;  %v16608_v24 = vpop.f32.mrb[5].mxu0  ;;  %v16703_v57 = vmax.f32 %v16689_v62, 0.0 }
 0x658   : > { %v21709_v6 = vadd.f32 %v16608_v24, %v9188_v28  ;;  %v16702_v51 = vmax.f32 %v16688_v58, 0.0  ;;  %v2961_v24 = vpop.xlane.xlu0 %2960 }
 0x659   : > { %v16691_v55 = vadd.f32 %v21708_v49, %v26447_v45  ;;  %v16720_v61 = vsel %vm16716_vm6, %v16703_v57, 0.0 }
 0x65a   : > { %v16690_v39 = vadd.f32 %v21709_v6, %v26447_v45  ;;  %v21610_v48 = vpop.f32.mrb[6].mxu0  ;;  %16721 = vadd.xlane.f32.xlu1 %v16720_v61  ;;  %v16717_v53 = vsel %vm16716_vm6, %v16702_v51, 0.0 }
 0x65b   : > { %v21710_v34 = vadd.f32 %v21610_v48, %v20644_v29  ;;  %v16618_v16 = vpop.f32.mrb[7].mxu0  ;;  %16718 = vadd.xlane.f32.xlu0 %v16717_v53  ;;  %v16705_v43 = vmax.f32 %v16691_v55, 0.0 }
 0x65c   : > { %v21711_v15 = vadd.f32 %v16618_v16, %v9198_v32  ;;  %v16704_v54 = vmax.f32 %v16690_v39, 0.0  ;;  %v2958_v6 = vpop.xlane.xlu0 %2957 }
 0x65d   : > { %v16693_v35 = vadd.f32 %v21710_v34, %v26447_v45  ;;  %v16726_v26 = vsel %vm16716_vm6, %v16705_v43, 0.0 }
 0x65e   : > { %v16692_v0 = vadd.f32 %v21711_v15, %v26447_v45  ;;  %v21613_v52 = vpop.f32.mrb[8].mxu0  ;;  %16727 = vadd.xlane.f32.xlu1 %v16726_v26  ;;  %v16723_v20 = vsel %vm16716_vm6, %v16704_v54, 0.0 }
 0x65f   : > { %v21712_v27 = vadd.f32 %v21613_v52, %v20647_v30  ;;  %v16628_v13 = vpop.f32.mrb[9].mxu0  ;;  %16724 = vadd.xlane.f32.xlu0 %v16723_v20  ;;  %v16707_v63 = vmax.f32 %v16693_v35, 0.0 }
 0x660   : > { %v21713_v33 = vadd.f32 %v16628_v13, %v9208_v50  ;;  %v16706_v36 = vmax.f32 %v16692_v0, 0.0  ;;  %v2964_v55 = vpop.xlane.xlu0 %2963 }
 0x661   : > { %v16695_v3 = vadd.f32 %v21712_v27, %v26447_v45  ;;  %v16732_v19 = vsel %vm16716_vm6, %v16707_v63, 0.0 }
 0x662   : > { %v16694_v11 = vadd.f32 %v21713_v33, %v26447_v45  ;;  %v21616_v60 = vpop.f32.mrb[10].mxu0  ;;  %16733 = vadd.xlane.f32.xlu1 %v16732_v19  ;;  %v16729_v37 = vsel %vm16716_vm6, %v16706_v36, 0.0 }
 0x663   : > { %v21714_v1 = vadd.f32 %v21616_v60, %v20650_v8  ;;  %v16638_v23 = vpop.f32.mrb[11].mxu0  ;;  %16730 = vadd.xlane.f32.xlu0 %v16729_v37  ;;  %v16709_v7 = vmax.f32 %v16695_v3, 0.0 }
 0x664   : > { %v21715_v10 = vadd.f32 %v16638_v23, %v9218_v31  ;;  %v16708_v2 = vmax.f32 %v16694_v11, 0.0  ;;  %v2970_v39 = vpop.xlane.xlu0 %2969 }
 0x665   : > { %v16697_v12 = vadd.f32 %v21714_v1, %v26447_v45  ;;  %v16738_v21 = vsel %vm16716_vm6, %v16709_v7, 0.0 }
 0x666   : > { %v16696_v5 = vadd.f32 %v21715_v10, %v26447_v45  ;;  %v21619_v59 = vpop.f32.mrb[12].mxu0  ;;  %16739 = vadd.xlane.f32.xlu1 %v16738_v21  ;;  %v16735_v44 = vsel %vm16716_vm6, %v16708_v2, 0.0  ;;  %v16790_v10 = vld [vmem:[%s26623_s9 + $0x8] sm:$0xff] }
 0x667   : > { %v21716_v56 = vadd.f32 %v21619_v59, %v20653_v42  ;;  %v16648_v22 = vpop.f32.mrb[13].mxu0  ;;  %16736 = vadd.xlane.f32.xlu0 %v16735_v44  ;;  %v16711_v46 = vmax.f32 %v16697_v12, 0.0 }
 0x668   : > { %v21717_v47 = vadd.f32 %v16648_v22, %v26440_v25  ;;  %v16710_v40 = vmax.f32 %v16696_v5, 0.0  ;;  %v2976_v53 = vpop.xlane.xlu0 %2975  ;;  %v16789_v5 = vld [vmem:[%s26623_s9] sm:$0xff] }
 0x669   : > { %v16699_v28 = vadd.f32 %v21716_v56, %v26447_v45  ;;  %v16744_v29 = vsel %vm16716_vm6, %v16711_v46, 0.0 }
 0x66a   : > { %v16698_v32 = vadd.f32 %v21717_v47, %v26447_v45  ;;  %v21622_v30 = vpop.f32.mrb[14].mxu0  ;;  %16745 = vadd.xlane.f32.xlu1 %v16744_v29  ;;  %v16741_v50 = vsel %vm16716_vm6, %v16710_v40, 0.0 }
 0x66b   : > { %v21718_v8 = vadd.f32 %v21622_v30, %v26442_v9  ;;  %v16658_v31 = vpop.f32.mrb[15].mxu0  ;;  %16742 = vadd.xlane.f32.xlu0 %v16741_v50  ;;  %v16713_v42 = vmax.f32 %v16699_v28, 0.0  ;;  %v16792_v28 = vld [vmem:[%s26623_s9 + $0x18] sm:$0xff]  ;;  %v16791_v50 = vld [vmem:[%s26623_s9 + $0x10] sm:$0xff] }
 0x66c   : > { %v21719_v4 = vadd.f32 %v16658_v31, %v26449_v18  ;;  %v16712_v14 = vmax.f32 %v16698_v32, 0.0  ;;  %v16787_v18 = vld [vmem:[%s26622_s8] sm:$0xff]  ;;  %v26492_v16 = vpop.xlane.xlu0 %2981 }
 0x66d   : > { %v16701_v25 = vadd.f32 %v21718_v8, %v26447_v45  ;;  %v16750_v17 = vsel %vm16716_vm6, %v16713_v42, 0.0  ;;  %21651 = vmatprep.mubr.msk.f32.mxu1 %vm16817_vm7, %v16787_v18 }
 0x66e   : > { %v16700_v41 = vadd.f32 %v21719_v4, %v26447_v45  ;;  %16751 = vadd.xlane.f32.xlu1 %v16750_v17  ;;  %v16747_v62 = vsel %vm16716_vm6, %v16712_v14, 0.0  ;;  %v2967_v45 = vpop.xlane.xlu1 %2966 }
 0x66f   : > { %16748 = vadd.xlane.f32.xlu0 %v16747_v62  ;;  %v16715_v58 = vmax.f32 %v16701_v25, 0.0  ;;  %v16794_v62 = vld [vmem:[%s26623_s9 + $0x28] sm:$0xff] }
 0x670   : > { %v16714_v38 = vmax.f32 %v16700_v41, 0.0  ;;  %v26494_v15 = vpop.xlane.xlu0 %2987 }
 0x671   : > { %v16756_v9 = vsel %vm16716_vm6, %v16715_v58, 0.0 }
 0x672   : > { %16757 = vadd.xlane.f32.xlu1 %v16756_v9  ;;  %v16753_v49 = vsel %vm16716_vm6, %v16714_v38, 0.0  ;;  %v2973_v57 = vpop.xlane.xlu1 %2972 }
 0x673   : > { %16754 = vadd.xlane.f32.xlu0 %v16753_v49  ;;  %v16793_v49 = vld [vmem:[%s26623_s9 + $0x20] sm:$0xff] }
 0x674   : > { %v26496_v35 = vpop.xlane.xlu0 %2993 }
 0x676   : > { %v2979_v51 = vpop.xlane.xlu1 %2978 }
 0x678   : > { %v7772_v0 = vpop.xlane.xlu0 %7771 }
 0x679   : > { %v7808_v59 = vadd.f32 %v7772_v0, %v2964_v55 }
 0x67a   : > { %v26486_v61 = vpop.xlane.xlu1 %2984 }
 0x67c   : > { %v7778_v20 = vpop.xlane.xlu0 %7777 }
 0x67d   : > { %v7810_v8 = vadd.f32 %v7778_v20, %v2970_v39 }
 0x67e   : > { %v26488_v48 = vpop.xlane.xlu1 %2990 }
 0x680   : > { %v7784_v13 = vpop.xlane.xlu0 %7783 }
 0x681   : > { %v7812_v18 = vadd.f32 %v7784_v13, %v2976_v53  ;;  %v16795_v53 = vld [vmem:[%s26623_s9 + $0x30] sm:$0xff] }
 0x682   : > { %v26490_v34 = vpop.xlane.xlu1 %2996 }
 0x684   : > { %v7790_v33 = vpop.xlane.xlu0 %7789 }
 0x686   : > { %v7769_v43 = vpop.xlane.xlu1 %7768 }
 0x687   : > { %v7807_v60 = vadd.f32 %v7769_v43, %v2961_v24 }
 0x688   : > { %v26500_v3 = vpop.xlane.xlu0 %7795 }
 0x68a   : > { %v7766_v54 = vpop.xlane.xlu1 %7765 }
 0x68b   : > { %v7806_v37 = vadd.f32 %v7766_v54, %v2958_v6  ;;  %v16796_v54 = vld [vmem:[%s26623_s9 + $0x38] sm:$0xff] }
 0x68c   : > { %v26504_v11 = vpop.xlane.xlu0 %7801 }
 0x68e   : > { %v7775_v26 = vpop.xlane.xlu1 %7774 }
 0x68f   : > { %v7809_v12 = vadd.f32 %v7775_v26, %v2967_v45 }
 0x692   : > { %v7781_v52 = vpop.xlane.xlu1 %7780 }
 0x693   : > { %v7811_v32 = vadd.f32 %v7781_v52, %v2973_v57  ;;  %v7814_v52 = vadd.f32 %v7790_v33, %v26492_v16  ;;  %v16797_v16 = vld [vmem:[%s26623_s9 + $0x40] sm:$0xff]  ;;  %v7816_v33 = vadd.f32 %v26500_v3, %v26494_v15  ;;  %v16799_v15 = vld [vmem:[%s26623_s9 + $0x50] sm:$0xff]  ;;  %v7818_v3 = vadd.f32 %v26504_v11, %v26496_v35 }
 0x696   : > { %v7787_v27 = vpop.xlane.xlu1 %7786 }
 0x697   : > { %v7813_v38 = vadd.f32 %v7787_v27, %v2979_v51 }
 0x69a   : > { %v7793_v63 = vpop.xlane.xlu1 %7792 }
 0x69b   : > { %v7815_v51 = vadd.f32 %v7793_v63, %v26486_v61 }
 0x69e   : > { %v26498_v36 = vpop.xlane.xlu1 %7798 }
 0x69f   : > { %v7817_v63 = vadd.f32 %v26498_v36, %v26488_v48  ;;  %v16800_v48 = vld [vmem:[%s26623_s9 + $0x58] sm:$0xff] }
 0x6a2   : > { %v26502_v19 = vpop.xlane.xlu1 %7804 }
 0x6e7   : > { %v16722_v1 = vpop.xlane.xlu1 %16721 }
 0x6e8   : > { %v16760_v23 = vadd.f32 %v16722_v1, %v7807_v60  ;;  %v16719_v7 = vpop.xlane.xlu0 %16718 }
 0x6e9   : > { %v16759_v2 = vadd.f32 %v16719_v7, %v7806_v37  ;;  %v16798_v7 = vld [vmem:[%s26623_s9 + $0x48] sm:$0xff] }
 0x6ea   : > { %v16774_v21 = vmax.f32 %v16760_v23, 0.0 }
 0x6eb   : > { %v16773_v44 = vmax.f32 %v16759_v2, 0.0  ;;  %v16728_v56 = vpop.xlane.xlu1 %16727 }
 0x6ec   : > { %v16804_v22 = vmul.f32 %v16790_v10, %v16774_v21  ;;  %v16762_v46 = vadd.f32 %v16728_v56, %v7809_v12  ;;  %v16725_v47 = vpop.xlane.xlu0 %16724 }
 0x6ed   : > { %v16803_v40 = vmul.f32 %v16789_v5, %v16773_v44  ;;  %v16761_v29 = vadd.f32 %v16725_v47, %v7808_v59 }
 0x6ee   : > { %v16776_v30 = vmax.f32 %v16762_v46, 0.0 }
 0x6ef   : > { %v16775_v31 = vmax.f32 %v16761_v29, 0.0  ;;  %v16734_v42 = vpop.xlane.xlu1 %16733  ;;  %v21678_v4 = vpack.c.bf16 %v16804_v22, %v16803_v40  ;;  %v7819_v22 = vadd.f32 %v26502_v19, %v26490_v34  ;;  %v16802_v34 = vld [vmem:[%s26623_s9 + $0x68] sm:$0xff] }
 0x6f0   : > { %v16806_v14 = vmul.f32 %v16792_v28, %v16776_v30  ;;  %v16764_v25 = vadd.f32 %v16734_v42, %v7811_v32  ;;  %v16731_v17 = vpop.xlane.xlu0 %16730 }
 0x6f1   : > { %v16805_v41 = vmul.f32 %v16791_v50, %v16775_v31  ;;  %v16763_v58 = vadd.f32 %v16731_v17, %v7810_v8  ;;  %21679 = vmatprep.subr.bf16.mxu1 %v21678_v4  ;;  %v16801_v31 = vld [vmem:[%s26623_s9 + $0x60] sm:$0xff] }
 0x6f2   : > { %v16778_v9 = vmax.f32 %v16764_v25, 0.0  ;;  %21681 = vmatpush3.bf16.msra.mxu1 %v21678_v4  ;;  %v16788_v25 = vld [vmem:[%s26622_s8 + $0x8] sm:$0xff] }
 0x6f3   : > { %v16777_v45 = vmax.f32 %v16763_v58, 0.0  ;;  %v16740_v24 = vpop.xlane.xlu1 %16739  ;;  %v21682_v57 = vpack.c.bf16 %v16806_v14, %v16805_v41 }
 0x6f4   : > { %v16808_v6 = vmul.f32 %v16794_v62, %v16778_v9  ;;  %v16766_v55 = vadd.f32 %v16740_v24, %v7813_v38  ;;  %v16737_v39 = vpop.xlane.xlu0 %16736 }
 0x6f5   : > { %v16807_v43 = vmul.f32 %v16793_v49, %v16777_v45  ;;  %v16765_v26 = vadd.f32 %v16737_v39, %v7812_v18  ;;  %21683 = vmatprep.subr.bf16.mxu1 %v21682_v57 }
 0x6f6   : > { %v16780_v0 = vmax.f32 %v16766_v55, 0.0  ;;  %21685 = vmatpush3.bf16.msra.mxu1 %v21682_v57 }
 0x6f7   : > { %v16779_v20 = vmax.f32 %v16765_v26, 0.0  ;;  %v16746_v27 = vpop.xlane.xlu1 %16745  ;;  %v21686_v13 = vpack.c.bf16 %v16808_v6, %v16807_v43 }
 0x6f8   : > { %v16810_v60 = vmul.f32 %v16796_v54, %v16780_v0  ;;  %v16768_v37 = vadd.f32 %v16746_v27, %v7815_v51  ;;  %v16743_v1 = vpop.xlane.xlu0 %16742 }
 0x6f9   : > { %v16809_v23 = vmul.f32 %v16795_v53, %v16779_v20  ;;  %v16767_v61 = vadd.f32 %v16743_v1, %v7814_v52  ;;  %21687 = vmatprep.subr.bf16.mxu1 %v21686_v13 }
 0x6fa   : > { %v16782_v10 = vmax.f32 %v16768_v37, 0.0  ;;  %21689 = vmatpush3.bf16.msra.mxu1 %v21686_v13 }
 0x6fb   : > { %v16781_v2 = vmax.f32 %v16767_v61, 0.0  ;;  %v16752_v12 = vpop.xlane.xlu1 %16751  ;;  %v21690_v21 = vpack.c.bf16 %v16810_v60, %v16809_v23 }
 0x6fc   : > { %v16812_v5 = vmul.f32 %v16798_v7, %v16782_v10  ;;  %v16770_v59 = vadd.f32 %v16752_v12, %v7817_v63  ;;  %v16749_v44 = vpop.xlane.xlu0 %16748 }
 0x6fd   : > { %v16811_v56 = vmul.f32 %v16797_v16, %v16781_v2  ;;  %v16769_v36 = vadd.f32 %v16749_v44, %v7816_v33  ;;  %21691 = vmatprep.subr.bf16.mxu1 %v21690_v21 }
 0x6fe   : > { %v16784_v46 = vmax.f32 %v16770_v59, 0.0  ;;  %21693 = vmatpush3.bf16.msra.mxu1 %v21690_v21 }
 0x6ff   : > { %v16783_v47 = vmax.f32 %v16769_v36, 0.0  ;;  %v16758_v40 = vpop.xlane.xlu1 %16757  ;;  %v21694_v28 = vpack.c.bf16 %v16812_v5, %v16811_v56 }
 0x700   : > { %v16814_v29 = vmul.f32 %v16800_v48, %v16784_v46  ;;  %v16772_v32 = vadd.f32 %v16758_v40, %v7819_v22  ;;  %v16755_v30 = vpop.xlane.xlu0 %16754 }
 0x701   : > { %v16813_v50 = vmul.f32 %v16799_v15, %v16783_v47  ;;  %v16771_v19 = vadd.f32 %v16755_v30, %v7818_v3  ;;  %21695 = vmatprep.subr.bf16.mxu1 %v21694_v28 }
 0x702   : > { %v16786_v8 = vmax.f32 %v16772_v32, 0.0  ;;  %21697 = vmatpush3.bf16.msra.mxu1 %v21694_v28 }
 0x703   : > { %v16785_v35 = vmax.f32 %v16771_v19, 0.0  ;;  %v21698_v11 = vpack.c.bf16 %v16814_v29, %v16813_v50 }
 0x704   : > { %v16816_v42 = vmul.f32 %v16802_v34, %v16786_v8 }
 0x705   : > { %v16815_v4 = vmul.f32 %v16801_v31, %v16785_v35  ;;  %21699 = vmatprep.subr.bf16.mxu1 %v21698_v11 }
 0x706   : > { %21701 = vmatpush3.bf16.msra.mxu1 %v21698_v11 }
 0x707   : > { %v21702_v14 = vpack.c.bf16 %v16816_v42, %v16815_v4 }
 0x709   : > { %21703 = vmatprep.subr.bf16.mxu1 %v21702_v14 }
 0x70a   : > { %21705 = vmatpush3.bf16.msra.mxu1 %v21702_v14 }
 0x70d   : > { %21652 = vmatmul.mubr.msk.f32.vlgmr.msra.gmra.mrb[56].mxu1 %vm16817_vm7, %v16788_v25 }
 0x7e0   : > { %v21653_v17 = vpop.f32.mrb[56].mxu1 }
 0x7e1   : > { %16900 = vst.msk [vmem:[%s352_s29 + $0x8] sm:$0xff] %vm399_vm2, %v21653_v17  ;;  %v16890_v41 = vpop.f32.mrb[57].mxu1 }
 0x7e2   : > { %16899 = vst.msk [vmem:[%s352_s29] sm:$0xff] %vm399_vm2, %v16890_v41 }
 0x7e3   : > { %22999 = shalt.err (!%p22996_p3)
}
 0x7e4   : > { %s23000_s27 = scalar_lea.hbm %s26569_s20, 256  ;;  %s23004_s12 = scalar_lea.hbm %s26624_s10, 512 }
 0x7e5   : > { %p23001_p4 = scmp.ne.s32.totalorder %s26569_s20, %s23000_s27  ;;  %p23005_p9 = scmp.lt.u32.totalorder %s26569_s20, %s26624_s10 }
 0x7e6   : > { %p23006_p10 = scmp.lt.u32.totalorder %s23004_s12, %s23000_s27  ;;  %p23008_p12 = scmp.lt.u32.totalorder %s23000_s27, %s26569_s20 }
 0x7e7   : > { %p23002_p7 = pnand %p23001_p4, %p23149_p5 }
 0x7e8   : > { %p23007_p11 = por %p23006_p10, %p23005_p9 }
 0x7e9   : > { %p23003_p8 = pneg %p23002_p7 }
 0x7ea   : > { %p23009_p13 = por %p23008_p12, %p23007_p11 }
 0x7ec   : > { %p23010_p0 = pnand %p23009_p13, %p23003_p8 }
 0x7ee   : > { %23013 = shalt.err (!%p23010_p0)
}
 0x7ef   : > { %s23054_s25 = smov 128   ;;  %s23055_s26 = smov 8  }
 0x7f0   : > { %22826 = dma.vmem_to_hbm [thread:$0]  (%p23149_p5), %s26564_s30, 256, %s26569_s20, %s26573_s21, %s23054_s25, %s23054_s25, %s23055_s26  }
 0x7f1 PF: > { %p22832_p1 = scmp.ge.s32.totalorder %s23048_s16, 2  ;;  %s16930_s28 = sand.u32 1, %s23036_s13  }
 0x7f2   : > { %s16931_s27 = scalar_lea.sflag [#allocation4], %s16930_s28 }
 0x7f3   : > { %p22829_p2 = pnand %p22832_p1, %p23153_p6 }
 0x7f5   : > { %23031 = dma.done.wait (!%p22829_p2), %s16931_s27, 256  }
 0x7f6   : > { %23033 = vsyncadd (!%p22829_p2), %s16931_s27, 4294967040  ;;  %p20_p3 = scmp.ge.s32.totalorder %s23136_s19, 4   ;;  %s26956_s13 = smov %s23040_s14 }
 0x7f7   : > { %s26957_s14 = smov %s23044_s15  ;;  %s26958_s15 = smov %s23147_s22 }
 0x7f8   : > { %s26959_s16 = smov %s23136_s19  ;;  %22 = sbr.rel (!%p20_p3) target bundleno = 3 (0x3), region = 190 }
 0x7ff   :  { %16936 = vsyncpa [#allocation4], 1 }
 0x800   :  { %16938 = vsyncpa [#allocation4 + $0x1], 1 }

</bundles_post_ra>
